<compile_context>
chip_gen: v7x
topology: tpu7x:2x2x1
jax: 0.10.0
libtpu: 0.0.40
codegen_flags: <defaults>
</compile_context>

<pallas_src>
import math
import functools

import jax
import jax.numpy as jnp
from jax import lax
from jax.experimental import pallas as pl
from jax.experimental.pallas import tpu as pltpu


def _attn_kernel(q_ref, k_ref, v_ref, mask_ref, o_ref, *, scale):
    # Blocks:
    #   q_ref   : (BH, TQ, D)
    #   k_ref   : (BH, S,  D)   full KV -> no reduction axis / no online softmax
    #   v_ref   : (BH, S,  D)
    #   mask_ref: (TQ, S)       broadcast over BH
    #   o_ref   : (BH, D, TQ)   lane-dense last dim (TQ % 128 == 0)
    q = q_ref[...] * scale                        # (BH, TQ, D)
    k = k_ref[...]                                # (BH, S,  D)
    v = v_ref[...]                                # (BH, S,  D)

    # Scores: contract the D axes directly (no explicit k.T relayout).
    s = lax.dot_general(
        q, k,
        dimension_numbers=(((2,), (2,)), ((0,), (0,))),
        preferred_element_type=jnp.float32)       # (BH, TQ, S)
    s = s + mask_ref[...][None, :, :]

    # Full-row softmax (KV tile covers the whole sequence).
    m = jnp.max(s, axis=-1, keepdims=True)
    p = jnp.exp(s - m)                            # (BH, TQ, S)
    l = jnp.sum(p, axis=-1, keepdims=True)        # (BH, TQ, 1)

    out = lax.dot_general(
        p, v,
        dimension_numbers=(((2,), (1,)), ((0,), (0,))),
        preferred_element_type=jnp.float32)       # (BH, TQ, D)
    # Normalize the (small) output instead of the (large) p matrix.
    out = out * pl.reciprocal(l, approx=True)

    # Lane-dense writeback: (BH, D, TQ) -> full-width vector stores.
    o_ref[...] = jnp.swapaxes(out, 1, 2).astype(o_ref.dtype)


def sdpa_pallas(query, key, value, attn_mask, *, tq=128):
    """query/key/value: [B, H, S, D] float32; attn_mask: [1, 1, S, S] float32."""
    B, H, S, D = query.shape
    assert key.shape == (B, H, S, D) and value.shape == (B, H, S, D)
    assert attn_mask.shape == (1, 1, S, S)
    assert S % tq == 0 and tq % 128 == 0

    BH = B * H
    q = query.reshape(BH, S, D)
    k = key.reshape(BH, S, D)
    v = value.reshape(BH, S, D)
    mask = attn_mask.reshape(S, S)                # broadcast over batch*heads
    scale = 1.0 / math.sqrt(D)

    out_t = pl.pallas_call(
        functools.partial(_attn_kernel, scale=scale),
        out_shape=jax.ShapeDtypeStruct((BH, D, S), jnp.float32),
        grid_spec=pltpu.PrefetchScalarGridSpec(
            num_scalar_prefetch=0,
            grid=(S // tq,),                      # query tiles only; >=2 steps
            in_specs=[
                pl.BlockSpec((BH, tq, D), lambda i: (0, i, 0)),   # q
                pl.BlockSpec((BH, S, D), lambda i: (0, 0, 0)),    # k (loaded once)
                pl.BlockSpec((BH, S, D), lambda i: (0, 0, 0)),    # v (loaded once)
                pl.BlockSpec((tq, S), lambda i: (i, 0)),          # mask
            ],
            out_specs=pl.BlockSpec((BH, D, tq), lambda i: (0, 0, i)),
        ),
        compiler_params=pltpu.CompilerParams(
            dimension_semantics=("parallel",)),
    )(q, k, v, mask)

    # (BH, D, S) -> (B, H, S, D)
    return jnp.swapaxes(out_t, 1, 2).reshape(B, H, S, D)


def sdpa_reference(query, key, value, attn_mask):
    d = query.shape[-1]
    qk = jnp.einsum("bhqd,bhkd->bhqk", query, key) / math.sqrt(d)
    qk = qk + attn_mask
    w = jax.nn.softmax(qk, axis=-1)
    return jnp.einsum("bhqk,bhkd->bhqd", w, value)


if __name__ == "__main__":
    # Small shapes consistent with the module: B=1, H=8, S=256, D=16.
    B, H, S, D = 1, 8, 256, 16
    key0 = jax.random.PRNGKey(0)
    k1, k2, k3, k4 = jax.random.split(key0, 4)

    query = jax.random.normal(k1, (B, H, S, D), dtype=jnp.float32)
    key_t = jax.random.normal(k2, (B, H, S, D), dtype=jnp.float32)
    value = jax.random.normal(k3, (B, H, S, D), dtype=jnp.float32)
    attn_mask = jax.random.normal(k4, (1, 1, S, S), dtype=jnp.float32)

    out = sdpa_pallas(query, key_t, value, attn_mask)
    out = jax.block_until_ready(out)

    ref = jax.block_until_ready(sdpa_reference(query, key_t, value, attn_mask))
    assert out.shape == (B, H, S, D)
    # tolerance leaves room for the approximate (EUP) reciprocal in the
    # softmax normalization; real math errors would be orders larger.
    assert jnp.allclose(out, ref, atol=2e-3, rtol=2e-3), "mismatch vs reference"

    print("KERNEL_OK")
</pallas_src>

<mosaic_0001>
module attributes {stable_mosaic.version = 11 : i64} {
  func.func @_attn_kernel(%arg0: i32, %arg1: memref<8x128x16xf32, #tpu.memory_space<vmem>>, %arg2: memref<8x256x16xf32, #tpu.memory_space<vmem>>, %arg3: memref<8x256x16xf32, #tpu.memory_space<vmem>>, %arg4: memref<128x256xf32, #tpu.memory_space<vmem>>, %arg5: memref<8x16x128xf32, #tpu.memory_space<vmem>>) attributes {dimension_semantics = [#tpu.dimension_semantics<parallel>], iteration_bounds = array<i64: 2>, scalar_prefetch = 0 : i64, scratch_operands = 0 : i64, tpu.core_type = #tpu.core_type<tc>, window_params = [{transform_indices = @transform_0, window_bounds = array<i64: 8, 128, 16>}, {pipeline_mode = #tpu.pipeline_mode<synchronous>, transform_indices = @transform_1, window_bounds = array<i64: 8, 256, 16>}, {pipeline_mode = #tpu.pipeline_mode<synchronous>, transform_indices = @transform_2, window_bounds = array<i64: 8, 256, 16>}, {transform_indices = @transform_3, window_bounds = array<i64: 128, 256>}, {transform_indices = @transform_4, window_bounds = array<i64: 8, 16, 128>}]} {
    %c0 = arith.constant 0 : index
    %c0_0 = arith.constant 0 : index
    %c0_1 = arith.constant 0 : index
    %0 = vector.load %arg1[%c0, %c0_0, %c0_1] : memref<8x128x16xf32, #tpu.memory_space<vmem>>, vector<8x128x16xf32>
    %cst = arith.constant 2.500000e-01 : f32
    %1 = vector.broadcast %cst : f32 to vector<8x128x16xf32>
    %2 = arith.mulf %0, %1 : vector<8x128x16xf32>
    %c0_2 = arith.constant 0 : index
    %c0_3 = arith.constant 0 : index
    %c0_4 = arith.constant 0 : index
    %3 = vector.load %arg2[%c0_2, %c0_3, %c0_4] : memref<8x256x16xf32, #tpu.memory_space<vmem>>, vector<8x256x16xf32>
    %c0_5 = arith.constant 0 : index
    %c0_6 = arith.constant 0 : index
    %c0_7 = arith.constant 0 : index
    %4 = vector.load %arg3[%c0_5, %c0_6, %c0_7] : memref<8x256x16xf32, #tpu.memory_space<vmem>>, vector<8x256x16xf32>
    %cst_8 = arith.constant dense<0.000000e+00> : vector<8x128x256xf32>
    %5 = tpu.matmul %2, %3, %cst_8 {dimension_numbers = #tpu.dot_dimension_numbers<[2], [2], [1], [1], [0, 0, 0, 1, 1, 1], [0], [0]>} : vector<8x128x16xf32>, vector<8x256x16xf32>, vector<8x128x256xf32> -> vector<8x128x256xf32>
    %c0_9 = arith.constant 0 : index
    %c0_10 = arith.constant 0 : index
    %6 = vector.load %arg4[%c0_9, %c0_10] : memref<128x256xf32, #tpu.memory_space<vmem>>, vector<128x256xf32>
    %7 = vector.shape_cast %6 : vector<128x256xf32> to vector<1x128x256xf32>
    %8 = vector.broadcast %7 : vector<1x128x256xf32> to vector<8x128x256xf32>
    %9 = arith.addf %5, %8 : vector<8x128x256xf32>
    %cst_11 = arith.constant dense<0xFF800000> : vector<8x128xf32>
    %10 = vector.multi_reduction <maximumf>, %9, %cst_11 [2] : vector<8x128x256xf32> to vector<8x128xf32>
    %11 = vector.shape_cast %10 : vector<8x128xf32> to vector<8x128x1xf32>
    %12 = vector.broadcast %11 : vector<8x128x1xf32> to vector<8x128x256xf32>
    %13 = arith.subf %9, %12 : vector<8x128x256xf32>
    %14 = math.exp %13 : vector<8x128x256xf32>
    %cst_12 = arith.constant dense<0.000000e+00> : vector<8x128xf32>
    %15 = vector.multi_reduction <add>, %14, %cst_12 [2] : vector<8x128x256xf32> to vector<8x128xf32>
    %16 = vector.shape_cast %15 : vector<8x128xf32> to vector<8x128x1xf32>
    %cst_13 = arith.constant dense<0.000000e+00> : vector<8x128x16xf32>
    %17 = tpu.matmul %14, %4, %cst_13 {dimension_numbers = #tpu.dot_dimension_numbers<[2], [1], [1], [2], [0, 0, 0, 1, 1, 2], [0], [0]>} : vector<8x128x256xf32>, vector<8x256x16xf32>, vector<8x128x16xf32> -> vector<8x128x16xf32>
    %18 = tpu.reciprocal %16 {approx = true} : vector<8x128x1xf32> -> vector<8x128x1xf32>
    %19 = vector.broadcast %18 : vector<8x128x1xf32> to vector<8x128x16xf32>
    %20 = arith.mulf %17, %19 : vector<8x128x16xf32>
    %21 = tpu.transpose %20, [0, 2, 1] : vector<8x128x16xf32> -> vector<8x16x128xf32>
    %c0_14 = arith.constant 0 : index
    %c0_15 = arith.constant 0 : index
    %c0_16 = arith.constant 0 : index
    %22 = vector.load %arg5[%c0_14, %c0_15, %c0_16] : memref<8x16x128xf32, #tpu.memory_space<vmem>>, vector<8x16x128xf32>
    tpu.vector_store %arg5[%c0_14, %c0_15, %c0_16], %21 {strides = array<i32>} : memref<8x16x128xf32, #tpu.memory_space<vmem>>, vector<8x16x128xf32>,
    return
  }
  func.func @transform_0(%arg0: i32) -> (i32, i32, i32) {
    %c0_i32 = arith.constant 0 : i32
    %c0_i32_0 = arith.constant 0 : i32
    %c0_i32_1 = arith.constant 0 : i32
    return %c0_i32, %arg0, %c0_i32_0 : i32, i32, i32
  }
  func.func @transform_1(%arg0: i32) -> (i32, i32, i32) {
    %c0_i32 = arith.constant 0 : i32
    %c0_i32_0 = arith.constant 0 : i32
    %c0_i32_1 = arith.constant 0 : i32
    %c0_i32_2 = arith.constant 0 : i32
    return %c0_i32, %c0_i32_0, %c0_i32_1 : i32, i32, i32
  }
  func.func @transform_2(%arg0: i32) -> (i32, i32, i32) {
    %c0_i32 = arith.constant 0 : i32
    %c0_i32_0 = arith.constant 0 : i32
    %c0_i32_1 = arith.constant 0 : i32
    %c0_i32_2 = arith.constant 0 : i32
    return %c0_i32, %c0_i32_0, %c0_i32_1 : i32, i32, i32
  }
  func.func @transform_3(%arg0: i32) -> (i32, i32) {
    %c0_i32 = arith.constant 0 : i32
    %c0_i32_0 = arith.constant 0 : i32
    return %arg0, %c0_i32 : i32, i32
  }
  func.func @transform_4(%arg0: i32) -> (i32, i32, i32) {
    %c0_i32 = arith.constant 0 : i32
    %c0_i32_0 = arith.constant 0 : i32
    %c0_i32_1 = arith.constant 0 : i32
    return %c0_i32, %c0_i32_0, %arg0 : i32, i32, i32
  }
}

</mosaic_0001>

<bundles_post_ra>
// kernel: tpu_custom_call.1
= control target key start
LH: loop header
LB: loop body
LE: loop exit
PB: predicated region body
PF: predicated region fallthrough
CT: control target
= control target key end

     0   :  { %9 = vsyncpa [#allocation4], 0  ;;  %s16894_s0 = inlined_call_operand.vmem [shape: f32[8,256,16], index: 0, kind: input, shape index: {}]   ;;  %s16895_s1 = inlined_call_operand.vmem [shape: f32[8,256,16], index: 1, kind: input, shape index: {}]   ;;  %s16896_s2 = inlined_call_operand.vmem [shape: f32[8,256,16], index: 2, kind: input, shape index: {}]   ;;  %s16897_s3 = inlined_call_operand.vmem [shape: f32[256,256], index: 3, kind: input, shape index: {}]   ;;  %s16898_s4 = inlined_call_operand.hbm [shape: f32[8,16,256], index: 4, kind: output, shape index: {}]  }
   0x1   :  { %11 = vsyncpa [#allocation4 + $0x1], 0  ;;  %s10484_s15 = smov 0   ;;  %s10486_s16 = smov 0  }
   0x2   :  { %s10488_s17 = smov 0   ;;  %s10490_s18 = smov 0  }
   0x3 LB: > { %s10505_s19 = sadd.s32 4294967295, %s10453_s18   ;;  %s7323_s20 = sadd.s32 4294967294, %s10453_s18   ;;  %s10453_s18 = sphi %s10490_s18, %s18320_s18   ;;  %s10449_s17 = sphi %s10488_s17, %s18319_s17   ;;  %s10445_s16 = sphi %s10486_s16, %s18318_s16   ;;  %s10441_s15 = sphi %s10484_s15, %s18317_s15  }
   0x4   : > { %s10509_s21 = sadd.s32 1, %s10453_s18   ;;  %s24_s22 = sadd.s32 1, %s10449_s17 }
   0x5   : > { %s21_s23 = ssub.s32 %s10453_s18, %s10509_s21  ;;  %p31_p0 = scmp.ne.s32.totalorder %s10449_s17, %s10445_s16 }
   0x6   : > { %p22_p1 = scmp.eq.s32.totalorder %s21_s23, 0  ;;  %p32_p2 = scmp.eq.s32.totalorder %s10453_s18, 0 }
   0x7   : > { %p129_p3 = scmp.eq.s32.totalorder %s10505_s19, 1  ;;  %p134_p4 = scmp.ne.s32.totalorder %s10445_s16, %s10441_s15 }
   0x8   : > { %s10521_s24 = scalar_select %p22_p1, %s10449_s17, %s24_s22  }
   0x9   : > { %p33_p5 = por %p32_p2, %p31_p0  ;;  %p10523_p6 = por %p129_p3, %p31_p0 }
   0xa   : > { %p135_p7 = scmp.eq.s32.totalorder %s7323_s20, 1  ;;  %p7325_p9 = scmp.ge.s32.totalorder %s10453_s18, 2 }
   0xc   : > { %p10527_p8 = por %p135_p7, %p134_p4  ;;  %157 = sbr.rel (%p7325_p9) target bundleno = 87 (0x57), region = 24 }
  0x13   : > { %160 = sbr.rel (!%p33_p5) target bundleno = 87 (0x57), region = 28  ;;  %s162_s27 = sand.u32 (%p33_p5), 1, %s10449_s17  }
  0x14   : > { %s7723_s28 = sshll.u32 (%p33_p5), %s10453_s18, 7  ;;  %s7326_s29 = sshll.u32 (%p33_p5), %s162_s27, 10 }
  0x15   : > { %s10539_s6 = scalar_lea.vmem (%p33_p5), %s16894_s0, %s7723_s28  ;;  %s10544_s7 = scalar_lea.vmem (%p33_p5), [#allocation2], %s7326_s29 }
  0x16   : > { %v449_v0 = vld [vmem:[%s10539_s6] sm:$0xff] (%p33_p5)  ;;  %v451_v1 = vld [vmem:[%s10539_s6 + $0x8] sm:$0xff] (%p33_p5)  ;;  %v453_v2 = vld [vmem:[%s10539_s6 + $0x10] sm:$0xff] (%p33_p5) }
  0x17   : > { %450 = vst [vmem:[%s10544_s7] sm:$0xff] (%p33_p5), %v449_v0  ;;  %452 = vst [vmem:[%s10544_s7 + $0x8] sm:$0xff] (%p33_p5), %v451_v1  ;;  %v455_v3 = vld [vmem:[%s10539_s6 + $0x18] sm:$0xff] (%p33_p5)  ;;  %v457_v4 = vld [vmem:[%s10539_s6 + $0x20] sm:$0xff] (%p33_p5) }
  0x18   : > { %454 = vst [vmem:[%s10544_s7 + $0x10] sm:$0xff] (%p33_p5), %v453_v2  ;;  %v459_v5 = vld [vmem:[%s10539_s6 + $0x28] sm:$0xff] (%p33_p5)  ;;  %456 = vst [vmem:[%s10544_s7 + $0x18] sm:$0xff] (%p33_p5), %v455_v3  ;;  %v461_v6 = vld [vmem:[%s10539_s6 + $0x30] sm:$0xff] (%p33_p5) }
  0x19   : > { %458 = vst [vmem:[%s10544_s7 + $0x20] sm:$0xff] (%p33_p5), %v457_v4  ;;  %460 = vst [vmem:[%s10544_s7 + $0x28] sm:$0xff] (%p33_p5), %v459_v5  ;;  %v463_v7 = vld [vmem:[%s10539_s6 + $0x38] sm:$0xff] (%p33_p5)  ;;  %v465_v8 = vld [vmem:[%s10539_s6 + $0x40] sm:$0xff] (%p33_p5) }
  0x1a   : > { %462 = vst [vmem:[%s10544_s7 + $0x30] sm:$0xff] %v461_v6  ;;  %464 = vst [vmem:[%s10544_s7 + $0x38] sm:$0xff] %v463_v7  ;;  %v467_v9 = vld [vmem:[%s10539_s6 + $0x48] sm:$0xff]  ;;  %v469_v10 = vld [vmem:[%s10539_s6 + $0x50] sm:$0xff] }
  0x1b   : > { %466 = vst [vmem:[%s10544_s7 + $0x40] sm:$0xff] %v465_v8  ;;  %v471_v11 = vld [vmem:[%s10539_s6 + $0x58] sm:$0xff]  ;;  %468 = vst [vmem:[%s10544_s7 + $0x48] sm:$0xff] %v467_v9  ;;  %v473_v12 = vld [vmem:[%s10539_s6 + $0x60] sm:$0xff] }
  0x1c   : > { %470 = vst [vmem:[%s10544_s7 + $0x50] sm:$0xff] %v469_v10  ;;  %472 = vst [vmem:[%s10544_s7 + $0x58] sm:$0xff] %v471_v11  ;;  %v475_v13 = vld [vmem:[%s10539_s6 + $0x68] sm:$0xff]  ;;  %v477_v14 = vld [vmem:[%s10539_s6 + $0x70] sm:$0xff] }
  0x1d   : > { %474 = vst [vmem:[%s10544_s7 + $0x60] sm:$0xff] %v473_v12  ;;  %476 = vst [vmem:[%s10544_s7 + $0x68] sm:$0xff] %v475_v13  ;;  %v479_v15 = vld [vmem:[%s10539_s6 + $0x78] sm:$0xff]  ;;  %v481_v16 = vld [vmem:[%s10539_s6 + $0x100] sm:$0xff] }
  0x1e   : > { %478 = vst [vmem:[%s10544_s7 + $0x70] sm:$0xff] %v477_v14  ;;  %v483_v17 = vld [vmem:[%s10539_s6 + $0x108] sm:$0xff]  ;;  %480 = vst [vmem:[%s10544_s7 + $0x78] sm:$0xff] %v479_v15  ;;  %v485_v18 = vld [vmem:[%s10539_s6 + $0x110] sm:$0xff] }
  0x1f   : > { %482 = vst [vmem:[%s10544_s7 + $0x80] sm:$0xff] %v481_v16  ;;  %484 = vst [vmem:[%s10544_s7 + $0x88] sm:$0xff] %v483_v17  ;;  %v487_v19 = vld [vmem:[%s10539_s6 + $0x118] sm:$0xff]  ;;  %v489_v20 = vld [vmem:[%s10539_s6 + $0x120] sm:$0xff] }
  0x20   : > { %486 = vst [vmem:[%s10544_s7 + $0x90] sm:$0xff] %v485_v18  ;;  %488 = vst [vmem:[%s10544_s7 + $0x98] sm:$0xff] %v487_v19  ;;  %v491_v21 = vld [vmem:[%s10539_s6 + $0x128] sm:$0xff]  ;;  %v493_v22 = vld [vmem:[%s10539_s6 + $0x130] sm:$0xff] }
  0x21   : > { %490 = vst [vmem:[%s10544_s7 + $0xa0] sm:$0xff] %v489_v20  ;;  %v495_v23 = vld [vmem:[%s10539_s6 + $0x138] sm:$0xff]  ;;  %492 = vst [vmem:[%s10544_s7 + $0xa8] sm:$0xff] %v491_v21  ;;  %v497_v24 = vld [vmem:[%s10539_s6 + $0x140] sm:$0xff] }
  0x22   : > { %494 = vst [vmem:[%s10544_s7 + $0xb0] sm:$0xff] %v493_v22  ;;  %496 = vst [vmem:[%s10544_s7 + $0xb8] sm:$0xff] %v495_v23  ;;  %v499_v25 = vld [vmem:[%s10539_s6 + $0x148] sm:$0xff]  ;;  %v501_v26 = vld [vmem:[%s10539_s6 + $0x150] sm:$0xff] }
  0x23   : > { %498 = vst [vmem:[%s10544_s7 + $0xc0] sm:$0xff] %v497_v24  ;;  %500 = vst [vmem:[%s10544_s7 + $0xc8] sm:$0xff] %v499_v25  ;;  %v503_v27 = vld [vmem:[%s10539_s6 + $0x158] sm:$0xff]  ;;  %v505_v28 = vld [vmem:[%s10539_s6 + $0x160] sm:$0xff] }
  0x24   : > { %502 = vst [vmem:[%s10544_s7 + $0xd0] sm:$0xff] %v501_v26  ;;  %v507_v29 = vld [vmem:[%s10539_s6 + $0x168] sm:$0xff]  ;;  %504 = vst [vmem:[%s10544_s7 + $0xd8] sm:$0xff] %v503_v27  ;;  %v509_v30 = vld [vmem:[%s10539_s6 + $0x170] sm:$0xff] }
  0x25   : > { %506 = vst [vmem:[%s10544_s7 + $0xe0] sm:$0xff] %v505_v28  ;;  %508 = vst [vmem:[%s10544_s7 + $0xe8] sm:$0xff] %v507_v29  ;;  %v511_v31 = vld [vmem:[%s10539_s6 + $0x178] sm:$0xff]  ;;  %v513_v32 = vld [vmem:[%s10539_s6 + $0x200] sm:$0xff] }
  0x26   : > { %510 = vst [vmem:[%s10544_s7 + $0xf0] sm:$0xff] %v509_v30  ;;  %512 = vst [vmem:[%s10544_s7 + $0xf8] sm:$0xff] %v511_v31  ;;  %v515_v33 = vld [vmem:[%s10539_s6 + $0x208] sm:$0xff]  ;;  %v517_v34 = vld [vmem:[%s10539_s6 + $0x210] sm:$0xff] }
  0x27   : > { %514 = vst [vmem:[%s10544_s7 + $0x100] sm:$0xff] %v513_v32  ;;  %v519_v35 = vld [vmem:[%s10539_s6 + $0x218] sm:$0xff]  ;;  %516 = vst [vmem:[%s10544_s7 + $0x108] sm:$0xff] %v515_v33  ;;  %v521_v36 = vld [vmem:[%s10539_s6 + $0x220] sm:$0xff] }
  0x28   : > { %518 = vst [vmem:[%s10544_s7 + $0x110] sm:$0xff] %v517_v34  ;;  %520 = vst [vmem:[%s10544_s7 + $0x118] sm:$0xff] %v519_v35  ;;  %v523_v37 = vld [vmem:[%s10539_s6 + $0x228] sm:$0xff]  ;;  %v525_v38 = vld [vmem:[%s10539_s6 + $0x230] sm:$0xff] }
  0x29   : > { %522 = vst [vmem:[%s10544_s7 + $0x120] sm:$0xff] %v521_v36  ;;  %524 = vst [vmem:[%s10544_s7 + $0x128] sm:$0xff] %v523_v37  ;;  %v527_v39 = vld [vmem:[%s10539_s6 + $0x238] sm:$0xff]  ;;  %v529_v40 = vld [vmem:[%s10539_s6 + $0x240] sm:$0xff] }
  0x2a   : > { %526 = vst [vmem:[%s10544_s7 + $0x130] sm:$0xff] %v525_v38  ;;  %v531_v41 = vld [vmem:[%s10539_s6 + $0x248] sm:$0xff]  ;;  %528 = vst [vmem:[%s10544_s7 + $0x138] sm:$0xff] %v527_v39  ;;  %v533_v42 = vld [vmem:[%s10539_s6 + $0x250] sm:$0xff] }
  0x2b   : > { %530 = vst [vmem:[%s10544_s7 + $0x140] sm:$0xff] %v529_v40  ;;  %532 = vst [vmem:[%s10544_s7 + $0x148] sm:$0xff] %v531_v41  ;;  %v535_v43 = vld [vmem:[%s10539_s6 + $0x258] sm:$0xff]  ;;  %v537_v44 = vld [vmem:[%s10539_s6 + $0x260] sm:$0xff] }
  0x2c   : > { %534 = vst [vmem:[%s10544_s7 + $0x150] sm:$0xff] %v533_v42  ;;  %536 = vst [vmem:[%s10544_s7 + $0x158] sm:$0xff] %v535_v43  ;;  %v539_v45 = vld [vmem:[%s10539_s6 + $0x268] sm:$0xff]  ;;  %v541_v46 = vld [vmem:[%s10539_s6 + $0x270] sm:$0xff] }
  0x2d   : > { %538 = vst [vmem:[%s10544_s7 + $0x160] sm:$0xff] %v537_v44  ;;  %v543_v47 = vld [vmem:[%s10539_s6 + $0x278] sm:$0xff]  ;;  %540 = vst [vmem:[%s10544_s7 + $0x168] sm:$0xff] %v539_v45  ;;  %v545_v48 = vld [vmem:[%s10539_s6 + $0x300] sm:$0xff] }
  0x2e   : > { %542 = vst [vmem:[%s10544_s7 + $0x170] sm:$0xff] %v541_v46  ;;  %544 = vst [vmem:[%s10544_s7 + $0x178] sm:$0xff] %v543_v47  ;;  %v547_v49 = vld [vmem:[%s10539_s6 + $0x308] sm:$0xff]  ;;  %v549_v50 = vld [vmem:[%s10539_s6 + $0x310] sm:$0xff] }
  0x2f   : > { %546 = vst [vmem:[%s10544_s7 + $0x180] sm:$0xff] %v545_v48  ;;  %548 = vst [vmem:[%s10544_s7 + $0x188] sm:$0xff] %v547_v49  ;;  %v551_v51 = vld [vmem:[%s10539_s6 + $0x318] sm:$0xff]  ;;  %v553_v52 = vld [vmem:[%s10539_s6 + $0x320] sm:$0xff] }
  0x30   : > { %550 = vst [vmem:[%s10544_s7 + $0x190] sm:$0xff] %v549_v50  ;;  %v555_v53 = vld [vmem:[%s10539_s6 + $0x328] sm:$0xff]  ;;  %552 = vst [vmem:[%s10544_s7 + $0x198] sm:$0xff] %v551_v51  ;;  %v557_v54 = vld [vmem:[%s10539_s6 + $0x330] sm:$0xff] }
  0x31   : > { %554 = vst [vmem:[%s10544_s7 + $0x1a0] sm:$0xff] %v553_v52  ;;  %556 = vst [vmem:[%s10544_s7 + $0x1a8] sm:$0xff] %v555_v53  ;;  %v559_v55 = vld [vmem:[%s10539_s6 + $0x338] sm:$0xff]  ;;  %v561_v56 = vld [vmem:[%s10539_s6 + $0x340] sm:$0xff] }
  0x32   : > { %558 = vst [vmem:[%s10544_s7 + $0x1b0] sm:$0xff] %v557_v54  ;;  %560 = vst [vmem:[%s10544_s7 + $0x1b8] sm:$0xff] %v559_v55  ;;  %v563_v57 = vld [vmem:[%s10539_s6 + $0x348] sm:$0xff]  ;;  %v565_v58 = vld [vmem:[%s10539_s6 + $0x350] sm:$0xff] }
  0x33   : > { %562 = vst [vmem:[%s10544_s7 + $0x1c0] sm:$0xff] %v561_v56  ;;  %v567_v59 = vld [vmem:[%s10539_s6 + $0x358] sm:$0xff]  ;;  %564 = vst [vmem:[%s10544_s7 + $0x1c8] sm:$0xff] %v563_v57  ;;  %v569_v60 = vld [vmem:[%s10539_s6 + $0x360] sm:$0xff] }
  0x34   : > { %566 = vst [vmem:[%s10544_s7 + $0x1d0] sm:$0xff] %v565_v58  ;;  %568 = vst [vmem:[%s10544_s7 + $0x1d8] sm:$0xff] %v567_v59  ;;  %v571_v61 = vld [vmem:[%s10539_s6 + $0x368] sm:$0xff]  ;;  %v573_v62 = vld [vmem:[%s10539_s6 + $0x370] sm:$0xff] }
  0x35   : > { %570 = vst [vmem:[%s10544_s7 + $0x1e0] sm:$0xff] %v569_v60  ;;  %572 = vst [vmem:[%s10544_s7 + $0x1e8] sm:$0xff] %v571_v61  ;;  %v575_v63 = vld [vmem:[%s10539_s6 + $0x378] sm:$0xff]  ;;  %v577_v0 = vld [vmem:[%s10539_s6 + $0x400] sm:$0xff] }
  0x36   : > { %574 = vst [vmem:[%s10544_s7 + $0x1f0] sm:$0xff] %v573_v62  ;;  %v579_v1 = vld [vmem:[%s10539_s6 + $0x408] sm:$0xff]  ;;  %576 = vst [vmem:[%s10544_s7 + $0x1f8] sm:$0xff] %v575_v63  ;;  %v581_v2 = vld [vmem:[%s10539_s6 + $0x410] sm:$0xff] }
  0x37   : > { %578 = vst [vmem:[%s10544_s7 + $0x200] sm:$0xff] %v577_v0  ;;  %580 = vst [vmem:[%s10544_s7 + $0x208] sm:$0xff] %v579_v1  ;;  %v583_v3 = vld [vmem:[%s10539_s6 + $0x418] sm:$0xff]  ;;  %v585_v4 = vld [vmem:[%s10539_s6 + $0x420] sm:$0xff] }
  0x38   : > { %582 = vst [vmem:[%s10544_s7 + $0x210] sm:$0xff] %v581_v2  ;;  %584 = vst [vmem:[%s10544_s7 + $0x218] sm:$0xff] %v583_v3  ;;  %v587_v5 = vld [vmem:[%s10539_s6 + $0x428] sm:$0xff]  ;;  %v589_v6 = vld [vmem:[%s10539_s6 + $0x430] sm:$0xff] }
  0x39   : > { %586 = vst [vmem:[%s10544_s7 + $0x220] sm:$0xff] %v585_v4  ;;  %v591_v7 = vld [vmem:[%s10539_s6 + $0x438] sm:$0xff]  ;;  %588 = vst [vmem:[%s10544_s7 + $0x228] sm:$0xff] %v587_v5  ;;  %v593_v8 = vld [vmem:[%s10539_s6 + $0x440] sm:$0xff] }
  0x3a   : > { %590 = vst [vmem:[%s10544_s7 + $0x230] sm:$0xff] %v589_v6  ;;  %592 = vst [vmem:[%s10544_s7 + $0x238] sm:$0xff] %v591_v7  ;;  %v595_v9 = vld [vmem:[%s10539_s6 + $0x448] sm:$0xff]  ;;  %v597_v10 = vld [vmem:[%s10539_s6 + $0x450] sm:$0xff] }
  0x3b   : > { %594 = vst [vmem:[%s10544_s7 + $0x240] sm:$0xff] %v593_v8  ;;  %596 = vst [vmem:[%s10544_s7 + $0x248] sm:$0xff] %v595_v9  ;;  %v599_v11 = vld [vmem:[%s10539_s6 + $0x458] sm:$0xff]  ;;  %v601_v12 = vld [vmem:[%s10539_s6 + $0x460] sm:$0xff] }
  0x3c   : > { %598 = vst [vmem:[%s10544_s7 + $0x250] sm:$0xff] %v597_v10  ;;  %v603_v13 = vld [vmem:[%s10539_s6 + $0x468] sm:$0xff]  ;;  %600 = vst [vmem:[%s10544_s7 + $0x258] sm:$0xff] %v599_v11  ;;  %v605_v14 = vld [vmem:[%s10539_s6 + $0x470] sm:$0xff] }
  0x3d   : > { %602 = vst [vmem:[%s10544_s7 + $0x260] sm:$0xff] %v601_v12  ;;  %604 = vst [vmem:[%s10544_s7 + $0x268] sm:$0xff] %v603_v13  ;;  %v607_v15 = vld [vmem:[%s10539_s6 + $0x478] sm:$0xff]  ;;  %v609_v16 = vld [vmem:[%s10539_s6 + $0x500] sm:$0xff] }
  0x3e   : > { %606 = vst [vmem:[%s10544_s7 + $0x270] sm:$0xff] %v605_v14  ;;  %608 = vst [vmem:[%s10544_s7 + $0x278] sm:$0xff] %v607_v15  ;;  %v611_v17 = vld [vmem:[%s10539_s6 + $0x508] sm:$0xff]  ;;  %v613_v18 = vld [vmem:[%s10539_s6 + $0x510] sm:$0xff] }
  0x3f   : > { %610 = vst [vmem:[%s10544_s7 + $0x280] sm:$0xff] %v609_v16  ;;  %v615_v19 = vld [vmem:[%s10539_s6 + $0x518] sm:$0xff]  ;;  %612 = vst [vmem:[%s10544_s7 + $0x288] sm:$0xff] %v611_v17  ;;  %v617_v20 = vld [vmem:[%s10539_s6 + $0x520] sm:$0xff] }
  0x40   : > { %614 = vst [vmem:[%s10544_s7 + $0x290] sm:$0xff] %v613_v18  ;;  %616 = vst [vmem:[%s10544_s7 + $0x298] sm:$0xff] %v615_v19  ;;  %v619_v21 = vld [vmem:[%s10539_s6 + $0x528] sm:$0xff]  ;;  %v621_v22 = vld [vmem:[%s10539_s6 + $0x530] sm:$0xff] }
  0x41   : > { %618 = vst [vmem:[%s10544_s7 + $0x2a0] sm:$0xff] %v617_v20  ;;  %620 = vst [vmem:[%s10544_s7 + $0x2a8] sm:$0xff] %v619_v21  ;;  %v623_v23 = vld [vmem:[%s10539_s6 + $0x538] sm:$0xff]  ;;  %v625_v24 = vld [vmem:[%s10539_s6 + $0x540] sm:$0xff] }
  0x42   : > { %622 = vst [vmem:[%s10544_s7 + $0x2b0] sm:$0xff] %v621_v22  ;;  %v627_v25 = vld [vmem:[%s10539_s6 + $0x548] sm:$0xff]  ;;  %624 = vst [vmem:[%s10544_s7 + $0x2b8] sm:$0xff] %v623_v23  ;;  %v629_v26 = vld [vmem:[%s10539_s6 + $0x550] sm:$0xff] }
  0x43   : > { %626 = vst [vmem:[%s10544_s7 + $0x2c0] sm:$0xff] %v625_v24  ;;  %628 = vst [vmem:[%s10544_s7 + $0x2c8] sm:$0xff] %v627_v25  ;;  %v631_v27 = vld [vmem:[%s10539_s6 + $0x558] sm:$0xff]  ;;  %v633_v28 = vld [vmem:[%s10539_s6 + $0x560] sm:$0xff] }
  0x44   : > { %630 = vst [vmem:[%s10544_s7 + $0x2d0] sm:$0xff] %v629_v26  ;;  %632 = vst [vmem:[%s10544_s7 + $0x2d8] sm:$0xff] %v631_v27  ;;  %v635_v29 = vld [vmem:[%s10539_s6 + $0x568] sm:$0xff]  ;;  %v637_v30 = vld [vmem:[%s10539_s6 + $0x570] sm:$0xff] }
  0x45   : > { %634 = vst [vmem:[%s10544_s7 + $0x2e0] sm:$0xff] %v633_v28  ;;  %v639_v31 = vld [vmem:[%s10539_s6 + $0x578] sm:$0xff]  ;;  %636 = vst [vmem:[%s10544_s7 + $0x2e8] sm:$0xff] %v635_v29  ;;  %v641_v32 = vld [vmem:[%s10539_s6 + $0x600] sm:$0xff] }
  0x46   : > { %638 = vst [vmem:[%s10544_s7 + $0x2f0] sm:$0xff] %v637_v30  ;;  %640 = vst [vmem:[%s10544_s7 + $0x2f8] sm:$0xff] %v639_v31  ;;  %v643_v33 = vld [vmem:[%s10539_s6 + $0x608] sm:$0xff]  ;;  %v645_v34 = vld [vmem:[%s10539_s6 + $0x610] sm:$0xff] }
  0x47   : > { %642 = vst [vmem:[%s10544_s7 + $0x300] sm:$0xff] %v641_v32  ;;  %644 = vst [vmem:[%s10544_s7 + $0x308] sm:$0xff] %v643_v33  ;;  %v647_v35 = vld [vmem:[%s10539_s6 + $0x618] sm:$0xff]  ;;  %v649_v36 = vld [vmem:[%s10539_s6 + $0x620] sm:$0xff] }
  0x48   : > { %646 = vst [vmem:[%s10544_s7 + $0x310] sm:$0xff] %v645_v34  ;;  %v651_v37 = vld [vmem:[%s10539_s6 + $0x628] sm:$0xff]  ;;  %648 = vst [vmem:[%s10544_s7 + $0x318] sm:$0xff] %v647_v35  ;;  %v653_v38 = vld [vmem:[%s10539_s6 + $0x630] sm:$0xff] }
  0x49   : > { %650 = vst [vmem:[%s10544_s7 + $0x320] sm:$0xff] %v649_v36  ;;  %652 = vst [vmem:[%s10544_s7 + $0x328] sm:$0xff] %v651_v37  ;;  %v655_v39 = vld [vmem:[%s10539_s6 + $0x638] sm:$0xff]  ;;  %v657_v40 = vld [vmem:[%s10539_s6 + $0x640] sm:$0xff] }
  0x4a   : > { %654 = vst [vmem:[%s10544_s7 + $0x330] sm:$0xff] %v653_v38  ;;  %656 = vst [vmem:[%s10544_s7 + $0x338] sm:$0xff] %v655_v39  ;;  %v659_v41 = vld [vmem:[%s10539_s6 + $0x648] sm:$0xff]  ;;  %v661_v42 = vld [vmem:[%s10539_s6 + $0x650] sm:$0xff] }
  0x4b   : > { %658 = vst [vmem:[%s10544_s7 + $0x340] sm:$0xff] %v657_v40  ;;  %v663_v43 = vld [vmem:[%s10539_s6 + $0x658] sm:$0xff]  ;;  %660 = vst [vmem:[%s10544_s7 + $0x348] sm:$0xff] %v659_v41  ;;  %v665_v44 = vld [vmem:[%s10539_s6 + $0x660] sm:$0xff] }
  0x4c   : > { %662 = vst [vmem:[%s10544_s7 + $0x350] sm:$0xff] %v661_v42  ;;  %664 = vst [vmem:[%s10544_s7 + $0x358] sm:$0xff] %v663_v43  ;;  %v667_v45 = vld [vmem:[%s10539_s6 + $0x668] sm:$0xff]  ;;  %v669_v46 = vld [vmem:[%s10539_s6 + $0x670] sm:$0xff] }
  0x4d   : > { %666 = vst [vmem:[%s10544_s7 + $0x360] sm:$0xff] %v665_v44  ;;  %668 = vst [vmem:[%s10544_s7 + $0x368] sm:$0xff] %v667_v45  ;;  %v671_v47 = vld [vmem:[%s10539_s6 + $0x678] sm:$0xff]  ;;  %v673_v48 = vld [vmem:[%s10539_s6 + $0x700] sm:$0xff] }
  0x4e   : > { %670 = vst [vmem:[%s10544_s7 + $0x370] sm:$0xff] %v669_v46  ;;  %v675_v49 = vld [vmem:[%s10539_s6 + $0x708] sm:$0xff]  ;;  %672 = vst [vmem:[%s10544_s7 + $0x378] sm:$0xff] %v671_v47  ;;  %v677_v50 = vld [vmem:[%s10539_s6 + $0x710] sm:$0xff] }
  0x4f   : > { %674 = vst [vmem:[%s10544_s7 + $0x380] sm:$0xff] %v673_v48  ;;  %676 = vst [vmem:[%s10544_s7 + $0x388] sm:$0xff] %v675_v49  ;;  %v679_v51 = vld [vmem:[%s10539_s6 + $0x718] sm:$0xff]  ;;  %v681_v52 = vld [vmem:[%s10539_s6 + $0x720] sm:$0xff] }
  0x50   : > { %678 = vst [vmem:[%s10544_s7 + $0x390] sm:$0xff] %v677_v50  ;;  %680 = vst [vmem:[%s10544_s7 + $0x398] sm:$0xff] %v679_v51  ;;  %v683_v53 = vld [vmem:[%s10539_s6 + $0x728] sm:$0xff]  ;;  %v685_v54 = vld [vmem:[%s10539_s6 + $0x730] sm:$0xff] }
  0x51   : > { %682 = vst [vmem:[%s10544_s7 + $0x3a0] sm:$0xff] %v681_v52  ;;  %v687_v55 = vld [vmem:[%s10539_s6 + $0x738] sm:$0xff]  ;;  %684 = vst [vmem:[%s10544_s7 + $0x3a8] sm:$0xff] %v683_v53  ;;  %v689_v56 = vld [vmem:[%s10539_s6 + $0x740] sm:$0xff] }
  0x52   : > { %686 = vst [vmem:[%s10544_s7 + $0x3b0] sm:$0xff] %v685_v54  ;;  %688 = vst [vmem:[%s10544_s7 + $0x3b8] sm:$0xff] %v687_v55  ;;  %v691_v57 = vld [vmem:[%s10539_s6 + $0x748] sm:$0xff]  ;;  %v693_v58 = vld [vmem:[%s10539_s6 + $0x750] sm:$0xff] }
  0x53   : > { %690 = vst [vmem:[%s10544_s7 + $0x3c0] sm:$0xff] %v689_v56  ;;  %692 = vst [vmem:[%s10544_s7 + $0x3c8] sm:$0xff] %v691_v57  ;;  %v695_v59 = vld [vmem:[%s10539_s6 + $0x758] sm:$0xff]  ;;  %v697_v60 = vld [vmem:[%s10539_s6 + $0x760] sm:$0xff] }
  0x54   : > { %694 = vst [vmem:[%s10544_s7 + $0x3d0] sm:$0xff] %v693_v58  ;;  %v699_v61 = vld [vmem:[%s10539_s6 + $0x768] sm:$0xff]  ;;  %696 = vst [vmem:[%s10544_s7 + $0x3d8] sm:$0xff] %v695_v59  ;;  %v701_v62 = vld [vmem:[%s10539_s6 + $0x770] sm:$0xff] }
  0x55   : > { %698 = vst [vmem:[%s10544_s7 + $0x3e0] sm:$0xff] %v697_v60  ;;  %700 = vst [vmem:[%s10544_s7 + $0x3e8] sm:$0xff] %v699_v61  ;;  %v703_v63 = vld [vmem:[%s10539_s6 + $0x778] sm:$0xff] }
  0x56   : > { %702 = vst [vmem:[%s10544_s7 + $0x3f0] sm:$0xff] %v701_v62  ;;  %704 = vst [vmem:[%s10544_s7 + $0x3f8] sm:$0xff] %v703_v63 }
  0x57 PF: > { %p7329_p10 = scmp.ge.s32.totalorder %s10453_s18, 1  ;;  %p719_p11 = scmp.lt.s32.totalorder %s10453_s18, 3 }
  0x59   : > { %p720_p12 = pnand %p7329_p10, %p719_p11 }
  0x5b   : > { %723 = sbr.rel (%p720_p12) target bundleno = 1364 (0x554), region = 70 }
  0x62   : > { %v1037_v0 = vld [vmem:[%s16895_s1 + $0x80] sm:$0xff]  ;;  %v1038_v1 = vld [vmem:[%s16895_s1 + $0x88] sm:$0xff]  ;;  %vm1565_vm0 = vcmask 130048   ;;  %v1039_v13 = vld [vmem:[%s16895_s1 + $0x90] sm:$0xff]  ;;  %s10880_s14 = sand.u32 1, %s10445_s16   ;;  %s7332_s6 = sshll.u32 %s10505_s19, 4 }
  0x63   : > { %v1069_v2 = vld [vmem:[%s16895_s1 + $0x180] sm:$0xff]  ;;  %v8877_v3 = vpack.c.bf16 %v1038_v1, %v1037_v0  ;;  %vm10812_vm1 = vmpackc.low %vm1565_vm0, %vm1565_vm0  ;;  %v1070_v5 = vld [vmem:[%s16895_s1 + $0x188] sm:$0xff]  ;;  %s7330_s20 = sshll.u32 %s10880_s14, 10  ;;  %p759_p13 = scmp.lt.s32.totalorder %s7332_s6, 31 }
  0x64   : > { %v1021_v6 = vld [vmem:[%s16895_s1] sm:$0xff]  ;;  %v8925_v7 = vpack.c.bf16 %v1070_v5, %v1069_v2  ;;  %v1022_v8 = vld [vmem:[%s16895_s1 + $0x8] sm:$0xff]  ;;  %v1040_v14 = vld [vmem:[%s16895_s1 + $0x98] sm:$0xff]  ;;  %s10928_s5 = scalar_lea.vmem [#allocation2], %s7330_s20  ;;  %s7331_s11 = sshll.u32 %s10880_s14, 7 }
  0x65   : > { %v1053_v9 = vld [vmem:[%s16895_s1 + $0x100] sm:$0xff]  ;;  %v1054_v10 = vld [vmem:[%s16895_s1 + $0x108] sm:$0xff]  ;;  %8879 = vmatprep.subr.msk.bf16.mxu0 %vm10812_vm1, %v8877_v3  ;;  %v8880_v11 = vpack.c.bf16 %v1022_v8, %v1021_v6  ;;  %v1071_v15 = vld [vmem:[%s16895_s1 + $0x190] sm:$0xff]  ;;  %v8883_v16 = vpack.c.bf16 %v1040_v14, %v1039_v13  ;;  %s18322_s6 = smov (!%p759_p13, %s7332_s6), 31  ;;  %s16746_s12 = scalar_lea.vmem [#allocation3], %s7331_s11 }
  0x66   : > { %v8928_v12 = vpack.c.bf16 %v1054_v10, %v1053_v9  ;;  %8927 = vmatprep.subr.msk.bf16.mxu1 %vm10812_vm1, %v8925_v7  ;;  %v1072_v17 = vld [vmem:[%s16895_s1 + $0x198] sm:$0xff]  ;;  %v1023_v19 = vld [vmem:[%s16895_s1 + $0x10] sm:$0xff]  ;;  %v1041_v23 = vld [vmem:[%s16895_s1 + $0xa0] sm:$0xff]  ;;  %s7724_s7 = sshll.u32 %s18322_s6, 4  ;;  %s7720_s13 = sshll.u32 %s10505_s19, 7 }
  0x67   : > { %8882 = vmatpush3.bf16.xpose.msk.msra.mxu0 %vm10812_vm1, %v8880_v11  ;;  %v8931_v18 = vpack.c.bf16 %v1072_v17, %v1071_v15  ;;  %v1024_v20 = vld [vmem:[%s16895_s1 + $0x18] sm:$0xff]  ;;  %v1055_v21 = vld [vmem:[%s16895_s1 + $0x110] sm:$0xff]  ;;  %v1042_v24 = vld [vmem:[%s16895_s1 + $0xa8] sm:$0xff]  ;;  %s12165_s10 = scalar_lea.vmem %s16897_s3, %s7724_s7  ;;  %s7243_s20 = sshll.u32 %s16746_s12, 4  ;;  %s16849_s20 = int_to_ptr.vmem [resolvable:$true] %s7243_s20 }
  0x68   : > { %8930 = vmatpush3.bf16.xpose.msk.msra.mxu1 %vm10812_vm1, %v8928_v12  ;;  %8885 = vmatprep.subr.msk.bf16.mxu0 %vm10812_vm1, %v8883_v16  ;;  %v1056_v22 = vld [vmem:[%s16895_s1 + $0x118] sm:$0xff]  ;;  %v1073_v25 = vld [vmem:[%s16895_s1 + $0x1a0] sm:$0xff]  ;;  %v1074_v26 = vld [vmem:[%s16895_s1 + $0x1a8] sm:$0xff]  ;;  %v8886_v27 = vpack.c.bf16 %v1024_v20, %v1023_v19  ;;  %v8889_v29 = vpack.c.bf16 %v1042_v24, %v1041_v23  ;;  %s7231_s27 = scalar_lea.sflag [#allocation4], %s10880_s14  ;;  %s10391_s28 = scalar_lea.vmem %s16849_s20, 2048 }
  0x69   : > { %8933 = vmatprep.subr.msk.bf16.mxu1 %vm10812_vm1, %v8931_v18  ;;  %v8934_v28 = vpack.c.bf16 %v1056_v22, %v1055_v21  ;;  %v8937_v30 = vpack.c.bf16 %v1074_v26, %v1073_v25  ;;  %v1025_v31 = vld [vmem:[%s16895_s1 + $0x20] sm:$0xff]  ;;  %v1026_v32 = vld [vmem:[%s16895_s1 + $0x28] sm:$0xff]  ;;  %v1043_v35 = vld [vmem:[%s16895_s1 + $0xb0] sm:$0xff]  ;;  %p10392_p0 = scmp.ne.s32.totalorder %s16849_s20, %s10391_s28  ;;  %s10455_s19 = smov [#allocation3]  }
  0x6a   : > { %v1057_v33 = vld [vmem:[%s16895_s1 + $0x120] sm:$0xff]  ;;  %v1058_v34 = vld [vmem:[%s16895_s1 + $0x128] sm:$0xff]  ;;  %v1044_v36 = vld [vmem:[%s16895_s1 + $0xb8] sm:$0xff]  ;;  %v8892_v39 = vpack.c.bf16 %v1026_v32, %v1025_v31  ;;  %s10395_s29 = sshll.u32 %s10455_s19, 4  ;;  %s10396_s29 = int_to_ptr.vmem [resolvable:$false] %s10395_s29 }
  0x6b   : > { %v1075_v37 = vld [vmem:[%s16895_s1 + $0x1b0] sm:$0xff]  ;;  %v1076_v38 = vld [vmem:[%s16895_s1 + $0x1b8] sm:$0xff]  ;;  %v8940_v40 = vpack.c.bf16 %v1058_v34, %v1057_v33  ;;  %v8895_v41 = vpack.c.bf16 %v1044_v36, %v1043_v35  ;;  %v765_v46 = vld [vmem:[%s10928_s5] sm:$0xff]  ;;  %p10393_p1 = pnand %p10392_p0, %p10523_p6  ;;  %s10397_s30 = scalar_lea.vmem %s10396_s29, 4096 }
  0x6c   : > { %v8943_v42 = vpack.c.bf16 %v1076_v38, %v1075_v37  ;;  %v1027_v43 = vld [vmem:[%s16895_s1 + $0x30] sm:$0xff]  ;;  %v1028_v44 = vld [vmem:[%s16895_s1 + $0x38] sm:$0xff]  ;;  %v1045_v48 = vld [vmem:[%s16895_s1 + $0xc0] sm:$0xff]  ;;  %v10941_v49 = vmul.f32 0.25, %v765_v46  ;;  %p10398_p3 = scmp.lt.s32.totalorder %s16849_s20, %s10396_s29  ;;  %p10399_p4 = scmp.lt.s32.totalorder %s10397_s30, %s10391_s28 }
  0x6d   : > { %v1059_v45 = vld [vmem:[%s16895_s1 + $0x130] sm:$0xff]  ;;  %v1060_v47 = vld [vmem:[%s16895_s1 + $0x138] sm:$0xff]  ;;  %v781_v50 = vld [vmem:[%s10928_s5 + $0x80] sm:$0xff]  ;;  %v8898_v55 = vpack.c.bf16 %v1028_v44, %v1027_v43  ;;  %p10394_p2 = pneg %p10393_p1 }
  0x6e   : > { %v1046_v51 = vld [vmem:[%s16895_s1 + $0xc8] sm:$0xff]  ;;  %v1077_v52 = vld [vmem:[%s16895_s1 + $0x1c0] sm:$0xff]  ;;  %v10953_v54 = vmul.f32 0.25, %v781_v50  ;;  %7757 = vmatprep.mubr.msk.f32.mxu0 %vm1565_vm0, %v10941_v49  ;;  %v8946_v56 = vpack.c.bf16 %v1060_v47, %v1059_v45  ;;  %v1047_v63 = vld [vmem:[%s16895_s1 + $0xd0] sm:$0xff]  ;;  %p10400_p5 = por %p10399_p4, %p10398_p3 }
  0x6f   : > { %8888 = vmatpush3.bf16.xpose.msk.msra.mxu0 %vm10812_vm1, %v8886_v27  ;;  %v1078_v53 = vld [vmem:[%s16895_s1 + $0x1c8] sm:$0xff]  ;;  %v8901_v57 = vpack.c.bf16 %v1046_v51, %v1045_v48  ;;  %v1029_v59 = vld [vmem:[%s16895_s1 + $0x40] sm:$0xff]  ;;  %v1048_v0 = vld [vmem:[%s16895_s1 + $0xd8] sm:$0xff] }
  0x70   : > { %8936 = vmatpush3.bf16.xpose.msk.msra.mxu1 %vm10812_vm1, %v8934_v28  ;;  %8891 = vmatprep.subr.msk.bf16.mxu0 %vm10812_vm1, %v8889_v29  ;;  %v8949_v58 = vpack.c.bf16 %v1078_v53, %v1077_v52  ;;  %v1030_v60 = vld [vmem:[%s16895_s1 + $0x48] sm:$0xff]  ;;  %v1061_v61 = vld [vmem:[%s16895_s1 + $0x140] sm:$0xff]  ;;  %v1079_v1 = vld [vmem:[%s16895_s1 + $0x1d0] sm:$0xff]  ;;  %v8907_v6 = vpack.c.bf16 %v1048_v0, %v1047_v63  ;;  %p10401_p7 = pnand %p10400_p5, %p10394_p2 }
  0x71   : > { %8939 = vmatprep.subr.msk.bf16.mxu1 %vm10812_vm1, %v8937_v30  ;;  %7821 = vmatprep.mubr.msk.f32.mxu1 %vm1565_vm0, %v10953_v54  ;;  %v1062_v62 = vld [vmem:[%s16895_s1 + $0x148] sm:$0xff]  ;;  %v1080_v2 = vld [vmem:[%s16895_s1 + $0x1d8] sm:$0xff]  ;;  %v8904_v3 = vpack.c.bf16 %v1030_v60, %v1029_v59  ;;  %v1031_v8 = vld [vmem:[%s16895_s1 + $0x50] sm:$0xff] }
  0x72   : > { %v8952_v5 = vpack.c.bf16 %v1062_v62, %v1061_v61  ;;  %v8955_v7 = vpack.c.bf16 %v1080_v2, %v1079_v1  ;;  %v1032_v9 = vld [vmem:[%s16895_s1 + $0x58] sm:$0xff]  ;;  %v1063_v10 = vld [vmem:[%s16895_s1 + $0x150] sm:$0xff]  ;;  %v1049_v12 = vld [vmem:[%s16895_s1 + $0xe0] sm:$0xff] }
  0x73   : > { %v1064_v11 = vld [vmem:[%s16895_s1 + $0x158] sm:$0xff]  ;;  %v1050_v13 = vld [vmem:[%s16895_s1 + $0xe8] sm:$0xff]  ;;  %v1081_v14 = vld [vmem:[%s16895_s1 + $0x1e0] sm:$0xff]  ;;  %v8910_v16 = vpack.c.bf16 %v1032_v9, %v1031_v8 }
  0x74   : > { %v1082_v15 = vld [vmem:[%s16895_s1 + $0x1e8] sm:$0xff]  ;;  %v8958_v17 = vpack.c.bf16 %v1064_v11, %v1063_v10  ;;  %v8913_v18 = vpack.c.bf16 %v1050_v13, %v1049_v12  ;;  %v1033_v20 = vld [vmem:[%s16895_s1 + $0x60] sm:$0xff]  ;;  %v1051_v24 = vld [vmem:[%s16895_s1 + $0xf0] sm:$0xff] }
  0x75   : > { %v8961_v19 = vpack.c.bf16 %v1082_v15, %v1081_v14  ;;  %v1034_v21 = vld [vmem:[%s16895_s1 + $0x68] sm:$0xff]  ;;  %v1065_v22 = vld [vmem:[%s16895_s1 + $0x160] sm:$0xff]  ;;  %v1052_v25 = vld [vmem:[%s16895_s1 + $0xf8] sm:$0xff] }
  0x76   : > { %v1066_v23 = vld [vmem:[%s16895_s1 + $0x168] sm:$0xff]  ;;  %v1083_v26 = vld [vmem:[%s16895_s1 + $0x1f0] sm:$0xff]  ;;  %v1084_v27 = vld [vmem:[%s16895_s1 + $0x1f8] sm:$0xff]  ;;  %v8916_v28 = vpack.c.bf16 %v1034_v21, %v1033_v20  ;;  %v8919_v30 = vpack.c.bf16 %v1052_v25, %v1051_v24 }
  0x77   : > { %8894 = vmatpush3.bf16.xpose.msk.msra.mxu0 %vm10812_vm1, %v8892_v39  ;;  %v8964_v29 = vpack.c.bf16 %v1066_v23, %v1065_v22  ;;  %v8967_v31 = vpack.c.bf16 %v1084_v27, %v1083_v26  ;;  %v1035_v32 = vld [vmem:[%s16895_s1 + $0x70] sm:$0xff]  ;;  %v1036_v33 = vld [vmem:[%s16895_s1 + $0x78] sm:$0xff]  ;;  %v1101_v36 = vld [vmem:[%s16895_s1 + $0x280] sm:$0xff] }
  0x78   : > { %8942 = vmatpush3.bf16.xpose.msk.msra.mxu1 %vm10812_vm1, %v8940_v40  ;;  %8897 = vmatprep.subr.msk.bf16.mxu0 %vm10812_vm1, %v8895_v41  ;;  %v1067_v34 = vld [vmem:[%s16895_s1 + $0x170] sm:$0xff]  ;;  %v1068_v35 = vld [vmem:[%s16895_s1 + $0x178] sm:$0xff]  ;;  %v1102_v37 = vld [vmem:[%s16895_s1 + $0x288] sm:$0xff]  ;;  %v8922_v40 = vpack.c.bf16 %v1036_v33, %v1035_v32 }
  0x79   : > { %8945 = vmatprep.subr.msk.bf16.mxu1 %vm10812_vm1, %v8943_v42  ;;  %v1133_v38 = vld [vmem:[%s16895_s1 + $0x380] sm:$0xff]  ;;  %v1134_v39 = vld [vmem:[%s16895_s1 + $0x388] sm:$0xff]  ;;  %v8970_v41 = vpack.c.bf16 %v1068_v35, %v1067_v34  ;;  %v8973_v42 = vpack.c.bf16 %v1102_v37, %v1101_v36  ;;  %v1103_v51 = vld [vmem:[%s16895_s1 + $0x290] sm:$0xff] }
  0x7a   : > { %v9021_v43 = vpack.c.bf16 %v1134_v39, %v1133_v38  ;;  %v1085_v44 = vld [vmem:[%s16895_s1 + $0x200] sm:$0xff]  ;;  %v1086_v45 = vld [vmem:[%s16895_s1 + $0x208] sm:$0xff]  ;;  %v1104_v52 = vld [vmem:[%s16895_s1 + $0x298] sm:$0xff] }
  0x7b   : > { %v766_v46 = vld [vmem:[%s10928_s5 + $0x8] sm:$0xff]  ;;  %v1117_v48 = vld [vmem:[%s16895_s1 + $0x300] sm:$0xff]  ;;  %v1135_v53 = vld [vmem:[%s16895_s1 + $0x390] sm:$0xff]  ;;  %v8979_v62 = vpack.c.bf16 %v1104_v52, %v1103_v51 }
  0x7c   : > { %v782_v47 = vld [vmem:[%s10928_s5 + $0x88] sm:$0xff]  ;;  %v767_v60 = vld [vmem:[%s10928_s5 + $0x10] sm:$0xff]  ;;  %v1137_v9 = vld [vmem:[%s16895_s1 + $0x3a0] sm:$0xff] }
  0x7d   : > { %v1118_v50 = vld [vmem:[%s16895_s1 + $0x308] sm:$0xff]  ;;  %v783_v61 = vld [vmem:[%s10928_s5 + $0x90] sm:$0xff]  ;;  %v895_v0 = vmul.f32 0.25, %v767_v60  ;;  %v769_v14 = vld [vmem:[%s10928_s5 + $0x20] sm:$0xff] }
  0x7e   : > { %v9024_v59 = vpack.c.bf16 %v1118_v50, %v1117_v48  ;;  %v1087_v1 = vld [vmem:[%s16895_s1 + $0x210] sm:$0xff]  ;;  %v911_v2 = vmul.f32 0.25, %v783_v61  ;;  %v1106_v8 = vld [vmem:[%s16895_s1 + $0x2a8] sm:$0xff]  ;;  %v1089_v20 = vld [vmem:[%s16895_s1 + $0x220] sm:$0xff] }
  0x7f   : > { %8900 = vmatpush3.bf16.xpose.msk.msra.mxu0 %vm10812_vm1, %v8898_v55  ;;  %v1136_v55 = vld [vmem:[%s16895_s1 + $0x398] sm:$0xff]  ;;  %v1138_v10 = vld [vmem:[%s16895_s1 + $0x3a8] sm:$0xff]  ;;  %v1121_v24 = vld [vmem:[%s16895_s1 + $0x320] sm:$0xff] }
  0x80   : > { %8948 = vmatpush3.bf16.xpose.msk.msra.mxu1 %vm10812_vm1, %v8946_v56  ;;  %8903 = vmatprep.subr.msk.bf16.mxu0 %vm10812_vm1, %v8901_v57  ;;  %v8976_v56 = vpack.c.bf16 %v1086_v45, %v1085_v44  ;;  %v894_v57 = vmul.f32 0.25, %v766_v46  ;;  %v9027_v63 = vpack.c.bf16 %v1136_v55, %v1135_v53  ;;  %v1090_v22 = vld [vmem:[%s16895_s1 + $0x228] sm:$0xff]  ;;  %v1107_v27 = vld [vmem:[%s16895_s1 + $0x2b0] sm:$0xff]  ;;  %v1124_v45 = vld [vmem:[%s16895_s1 + $0x338] sm:$0xff] }
  0x81   : > { %8951 = vmatprep.subr.msk.bf16.mxu1 %vm10812_vm1, %v8949_v58  ;;  %v910_v58 = vmul.f32 0.25, %v782_v47  ;;  %v770_v23 = vld [vmem:[%s10928_s5 + $0x28] sm:$0xff]  ;;  %v771_v34 = vld [vmem:[%s10928_s5 + $0x30] sm:$0xff]  ;;  %v788_v46 = vld [vmem:[%s10928_s5 + $0xb8] sm:$0xff] }
  0x82   : > { %v1122_v25 = vld [vmem:[%s16895_s1 + $0x328] sm:$0xff]  ;;  %v898_v32 = vmul.f32 0.25, %v770_v23  ;;  %v787_v36 = vld [vmem:[%s10928_s5 + $0xb0] sm:$0xff]  ;;  %v899_v39 = vmul.f32 0.25, %v771_v34  ;;  %v1109_v47 = vld [vmem:[%s16895_s1 + $0x2c0] sm:$0xff] }
  0x83   : > { %v786_v26 = vld [vmem:[%s10928_s5 + $0xa8] sm:$0xff]  ;;  %v9036_v33 = vpack.c.bf16 %v1122_v25, %v1121_v24  ;;  %v1123_v44 = vld [vmem:[%s16895_s1 + $0x330] sm:$0xff]  ;;  %v1141_v50 = vld [vmem:[%s16895_s1 + $0x3c0] sm:$0xff] }
  0x84   : > { %v914_v35 = vmul.f32 0.25, %v786_v26  ;;  %v1110_v48 = vld [vmem:[%s16895_s1 + $0x2c8] sm:$0xff]  ;;  %v9042_v55 = vpack.c.bf16 %v1124_v45, %v1123_v44  ;;  %v792_v23 = vld [vmem:[%s10928_s5 + $0xd8] sm:$0xff]  ;;  %v1113_v24 = vld [vmem:[%s16895_s1 + $0x2e0] sm:$0xff] }
  0x85   : > { %v1142_v51 = vld [vmem:[%s16895_s1 + $0x3c8] sm:$0xff]  ;;  %v1145_v26 = vld [vmem:[%s16895_s1 + $0x3e0] sm:$0xff]  ;;  %v1115_v44 = vld [vmem:[%s16895_s1 + $0x2f0] sm:$0xff] }
  0x86   : > { %v9045_v60 = vpack.c.bf16 %v1142_v51, %v1141_v50  ;;  %v1114_v25 = vld [vmem:[%s16895_s1 + $0x2e8] sm:$0xff]  ;;  %v1116_v45 = vld [vmem:[%s16895_s1 + $0x2f8] sm:$0xff]  ;;  %v879_v4 = vld [vmem:[%s10928_s5 + $0x390] sm:$0xff] }
  0x87   : > { %8906 = vmatpush3.bf16.xpose.msk.msra.mxu0 %vm10812_vm1, %v8904_v3  ;;  %v1119_v3 = vld [vmem:[%s16895_s1 + $0x310] sm:$0xff]  ;;  %v9009_v34 = vpack.c.bf16 %v1114_v25, %v1113_v24 }
  0x88   : > { %8954 = vmatpush3.bf16.xpose.msk.msra.mxu1 %vm10812_vm1, %v8952_v5  ;;  %8909 = vmatprep.subr.msk.bf16.mxu0 %vm10812_vm1, %v8907_v6  ;;  %v1120_v5 = vld [vmem:[%s16895_s1 + $0x318] sm:$0xff]  ;;  %v1199_v25 = vld [vmem:[%s16895_s1 + $0x590] sm:$0xff] }
  0x89   : > { %8957 = vmatprep.subr.msk.bf16.mxu1 %vm10812_vm1, %v8955_v7  ;;  %v784_v6 = vld [vmem:[%s10928_s5 + $0x98] sm:$0xff]  ;;  %v1105_v7 = vld [vmem:[%s16895_s1 + $0x2a0] sm:$0xff]  ;;  %v9030_v13 = vpack.c.bf16 %v1120_v5, %v1119_v3  ;;  %v1111_v3 = vld [vmem:[%s16895_s1 + $0x2d0] sm:$0xff] }
  0x8a   : > { %v912_v15 = vmul.f32 0.25, %v784_v6  ;;  %v1112_v5 = vld [vmem:[%s16895_s1 + $0x2d8] sm:$0xff]  ;;  %v1143_v6 = vld [vmem:[%s16895_s1 + $0x3d0] sm:$0xff] }
  0x8f   : > { %8912 = vmatpush3.bf16.xpose.msk.msra.mxu0 %vm10812_vm1, %v8910_v16  ;;  %v785_v16 = vld [vmem:[%s10928_s5 + $0xa0] sm:$0xff] }
  0x90   : > { %8960 = vmatpush3.bf16.xpose.msk.msra.mxu1 %vm10812_vm1, %v8958_v17  ;;  %8915 = vmatprep.subr.msk.bf16.mxu0 %vm10812_vm1, %v8913_v18  ;;  %v8985_v17 = vpack.c.bf16 %v1106_v8, %v1105_v7  ;;  %v9033_v18 = vpack.c.bf16 %v1138_v10, %v1137_v9  ;;  %v913_v21 = vmul.f32 0.25, %v785_v16  ;;  %v1144_v7 = vld [vmem:[%s16895_s1 + $0x3d8] sm:$0xff] }
  0x91   : > { %8963 = vmatprep.subr.msk.bf16.mxu1 %vm10812_vm1, %v8961_v19  ;;  %v897_v19 = vmul.f32 0.25, %v769_v14  ;;  %v9003_v14 = vpack.c.bf16 %v1112_v5, %v1111_v3  ;;  %v1198_v3 = vld [vmem:[%s16895_s1 + $0x588] sm:$0xff] }
  0x97   : > { %8918 = vmatpush3.bf16.xpose.msk.msra.mxu0 %vm10812_vm1, %v8916_v28  ;;  %v1108_v28 = vld [vmem:[%s16895_s1 + $0x2b8] sm:$0xff] }
  0x98   : > { %8966 = vmatpush3.bf16.xpose.msk.msra.mxu1 %vm10812_vm1, %v8964_v29  ;;  %8921 = vmatprep.subr.msk.bf16.mxu0 %vm10812_vm1, %v8919_v30  ;;  %v1139_v29 = vld [vmem:[%s16895_s1 + $0x3b0] sm:$0xff]  ;;  %v1140_v30 = vld [vmem:[%s16895_s1 + $0x3b8] sm:$0xff]  ;;  %v8991_v37 = vpack.c.bf16 %v1108_v28, %v1107_v27  ;;  %v1146_v27 = vld [vmem:[%s16895_s1 + $0x3e8] sm:$0xff] }
  0x99   : > { %8969 = vmatprep.subr.msk.bf16.mxu1 %vm10812_vm1, %v8967_v31  ;;  %v8988_v31 = vpack.c.bf16 %v1090_v22, %v1089_v20  ;;  %v9039_v38 = vpack.c.bf16 %v1140_v30, %v1139_v29  ;;  %v776_v20 = vld [vmem:[%s10928_s5 + $0x58] sm:$0xff] }
  0x9a   : > { %v1128_v22 = vld [vmem:[%s16895_s1 + $0x358] sm:$0xff]  ;;  %v904_v29 = vmul.f32 0.25, %v776_v20  ;;  %v1181_v20 = vld [vmem:[%s16895_s1 + $0x500] sm:$0xff] }
  0x9f   : > { %8924 = vmatpush3.bf16.xpose.msk.msra.mxu0 %vm10812_vm1, %v8922_v40  ;;  %v1091_v40 = vld [vmem:[%s16895_s1 + $0x230] sm:$0xff] }
  0xa0   : > { %8972 = vmatpush3.bf16.xpose.msk.msra.mxu1 %vm10812_vm1, %v8970_v41  ;;  %8975 = vmatprep.subr.msk.bf16.mxu0 %vm10812_vm1, %v8973_v42  ;;  %v915_v41 = vmul.f32 0.25, %v787_v36  ;;  %v1092_v42 = vld [vmem:[%s16895_s1 + $0x238] sm:$0xff] }
  0xa1   : > { %9023 = vmatprep.subr.msk.bf16.mxu1 %vm10812_vm1, %v9021_v43  ;;  %v772_v43 = vld [vmem:[%s10928_s5 + $0x38] sm:$0xff]  ;;  %v8994_v52 = vpack.c.bf16 %v1092_v42, %v1091_v40  ;;  %v778_v40 = vld [vmem:[%s10928_s5 + $0x68] sm:$0xff] }
  0xa2   : > { %v900_v53 = vmul.f32 0.25, %v772_v43  ;;  %v1130_v42 = vld [vmem:[%s16895_s1 + $0x368] sm:$0xff]  ;;  %v906_v50 = vmul.f32 0.25, %v778_v40  ;;  %v1183_v40 = vld [vmem:[%s16895_s1 + $0x510] sm:$0xff] }
  0xa3   : > { %v794_v43 = vld [vmem:[%s10928_s5 + $0xe8] sm:$0xff] }
  0xa6   : > { %7758 = vmatmul.mubr.msk.f32.vlgmr.msra.gmra.mrb[0].mxu0 %vm1565_vm0, %v10941_v49  ;;  %v1088_v49 = vld [vmem:[%s16895_s1 + $0x218] sm:$0xff] }
  0xa7   : > { %7822 = vmatmul.mubr.msk.f32.vlgmr.msra.gmra.mrb[0].mxu1 %vm1565_vm0, %v10953_v54  ;;  %8978 = vmatpush3.bf16.xpose.msk.msra.mxu0 %vm10812_vm1, %v8976_v56  ;;  %v768_v54 = vld [vmem:[%s10928_s5 + $0x18] sm:$0xff]  ;;  %v8982_v11 = vpack.c.bf16 %v1088_v49, %v1087_v1  ;;  %v773_v56 = vld [vmem:[%s10928_s5 + $0x40] sm:$0xff]  ;;  %v774_v1 = vld [vmem:[%s10928_s5 + $0x48] sm:$0xff] }
  0xa8   : > { %7759 = vmatprep.mubr.msk.f32.mxu0 %vm1565_vm0, %v894_v57  ;;  %7823 = vmatprep.mubr.msk.f32.mxu1 %vm1565_vm0, %v910_v58  ;;  %v896_v12 = vmul.f32 0.25, %v768_v54  ;;  %v901_v61 = vmul.f32 0.25, %v773_v56  ;;  %v1126_v49 = vld [vmem:[%s16895_s1 + $0x348] sm:$0xff]  ;;  %v902_v9 = vmul.f32 0.25, %v774_v1  ;;  %v9015_v56 = vpack.c.bf16 %v1116_v45, %v1115_v44  ;;  %v796_v1 = vld [vmem:[%s10928_s5 + $0xf8] sm:$0xff]  ;;  %v1201_v45 = vld [vmem:[%s16895_s1 + $0x5a0] sm:$0xff] }
  0xa9   : > { %9026 = vmatpush3.bf16.xpose.msk.msra.mxu1 %vm10812_vm1, %v9024_v59  ;;  %8981 = vmatprep.subr.msk.bf16.mxu0 %vm10812_vm1, %v8979_v62  ;;  %v8997_v59 = vpack.c.bf16 %v1110_v48, %v1109_v47  ;;  %v1093_v62 = vld [vmem:[%s16895_s1 + $0x240] sm:$0xff]  ;;  %v790_v54 = vld [vmem:[%s10928_s5 + $0xc8] sm:$0xff]  ;;  %v1148_v47 = vld [vmem:[%s16895_s1 + $0x3f8] sm:$0xff] }
  0xaa   : > { %9029 = vmatprep.subr.msk.bf16.mxu1 %vm10812_vm1, %v9027_v63  ;;  %7760 = vmatmul.mubr.msk.f32.gmra.mrb[2].mxu0 %vm1565_vm0, %v894_v57  ;;  %v916_v57 = vmul.f32 0.25, %v788_v46  ;;  %v1147_v46 = vld [vmem:[%s16895_s1 + $0x3f0] sm:$0xff] }
  0xab   : > { %7824 = vmatmul.mubr.msk.f32.gmra.mrb[2].mxu1 %vm1565_vm0, %v910_v58  ;;  %7761 = vmatprep.mubr.msk.f32.mxu0 %vm1565_vm0, %v895_v0  ;;  %v789_v58 = vld [vmem:[%s10928_s5 + $0xc0] sm:$0xff] }
  0xac   : > { %7825 = vmatprep.mubr.msk.f32.mxu1 %vm1565_vm0, %v911_v2  ;;  %v917_v63 = vmul.f32 0.25, %v789_v58 }
  0xae   : > { %7762 = vmatmul.mubr.msk.f32.gmra.mrb[4].mxu0 %vm1565_vm0, %v895_v0  ;;  %v1094_v0 = vld [vmem:[%s16895_s1 + $0x248] sm:$0xff] }
  0xaf   : > { %7826 = vmatmul.mubr.msk.f32.gmra.mrb[4].mxu1 %vm1565_vm0, %v911_v2  ;;  %8984 = vmatpush3.bf16.xpose.msk.msra.mxu0 %vm10812_vm1, %v8982_v11  ;;  %v1125_v2 = vld [vmem:[%s16895_s1 + $0x340] sm:$0xff]  ;;  %v9000_v8 = vpack.c.bf16 %v1094_v0, %v1093_v62  ;;  %v775_v11 = vld [vmem:[%s10928_s5 + $0x50] sm:$0xff]  ;;  %v780_v62 = vld [vmem:[%s10928_s5 + $0x78] sm:$0xff] }
  0xb0   : > { %7763 = vmatprep.mubr.msk.f32.mxu0 %vm1565_vm0, %v896_v12  ;;  %7827 = vmatprep.mubr.msk.f32.mxu1 %vm1565_vm0, %v912_v15  ;;  %v9048_v10 = vpack.c.bf16 %v1126_v49, %v1125_v2  ;;  %v903_v16 = vmul.f32 0.25, %v775_v11  ;;  %v1132_v0 = vld [vmem:[%s16895_s1 + $0x378] sm:$0xff]  ;;  %v1165_v2 = vld [vmem:[%s16895_s1 + $0x480] sm:$0xff]  ;;  %v1166_v49 = vld [vmem:[%s16895_s1 + $0x488] sm:$0xff] }
  0xb1   : > { %9032 = vmatpush3.bf16.xpose.msk.msra.mxu1 %vm10812_vm1, %v9030_v13  ;;  %8987 = vmatprep.subr.msk.bf16.mxu0 %vm10812_vm1, %v8985_v17  ;;  %v791_v13 = vld [vmem:[%s10928_s5 + $0xd0] sm:$0xff]  ;;  %v9069_v11 = vpack.c.bf16 %v1166_v49, %v1165_v2 }
  0xb2   : > { %9035 = vmatprep.subr.msk.bf16.mxu1 %vm10812_vm1, %v9033_v18  ;;  %7764 = vmatmul.mubr.msk.f32.gmra.mrb[6].mxu0 %vm1565_vm0, %v896_v12  ;;  %v918_v12 = vmul.f32 0.25, %v790_v54  ;;  %v1095_v17 = vld [vmem:[%s16895_s1 + $0x250] sm:$0xff]  ;;  %v919_v18 = vmul.f32 0.25, %v791_v13  ;;  %v1197_v54 = vld [vmem:[%s16895_s1 + $0x580] sm:$0xff] }
  0xb3   : > { %7828 = vmatmul.mubr.msk.f32.gmra.mrb[6].mxu1 %vm1565_vm0, %v912_v15  ;;  %7765 = vmatprep.mubr.msk.f32.mxu0 %vm1565_vm0, %v897_v19  ;;  %v9051_v15 = vpack.c.bf16 %v1144_v7, %v1143_v6  ;;  %v908_v6 = vmul.f32 0.25, %v780_v62  ;;  %v1185_v62 = vld [vmem:[%s16895_s1 + $0x520] sm:$0xff]  ;;  %v1203_v49 = vld [vmem:[%s16895_s1 + $0x5b0] sm:$0xff] }
  0xb4   : > { %7829 = vmatprep.mubr.msk.f32.mxu1 %vm1565_vm0, %v913_v21 }
  0xb6   : > { %7766 = vmatmul.mubr.msk.f32.gmra.mrb[8].mxu0 %vm1565_vm0, %v897_v19  ;;  %v1096_v19 = vld [vmem:[%s16895_s1 + $0x258] sm:$0xff] }
  0xb7   : > { %7830 = vmatmul.mubr.msk.f32.gmra.mrb[8].mxu1 %vm1565_vm0, %v913_v21  ;;  %8990 = vmatpush3.bf16.xpose.msk.msra.mxu0 %vm10812_vm1, %v8988_v31  ;;  %v1127_v21 = vld [vmem:[%s16895_s1 + $0x350] sm:$0xff]  ;;  %v9006_v28 = vpack.c.bf16 %v1096_v19, %v1095_v17  ;;  %v777_v31 = vld [vmem:[%s10928_s5 + $0x60] sm:$0xff]  ;;  %v798_v17 = vld [vmem:[%s10928_s5 + $0x108] sm:$0xff] }
  0xb8   : > { %7767 = vmatprep.mubr.msk.f32.mxu0 %vm1565_vm0, %v898_v32  ;;  %7831 = vmatprep.mubr.msk.f32.mxu1 %vm1565_vm0, %v914_v35  ;;  %v9054_v30 = vpack.c.bf16 %v1128_v22, %v1127_v21  ;;  %v905_v36 = vmul.f32 0.25, %v777_v31  ;;  %v1168_v19 = vld [vmem:[%s16895_s1 + $0x498] sm:$0xff]  ;;  %v1182_v21 = vld [vmem:[%s16895_s1 + $0x508] sm:$0xff]  ;;  %v926_v24 = vmul.f32 0.25, %v798_v17  ;;  %v815_v31 = vld [vmem:[%s10928_s5 + $0x190] sm:$0xff] }
  0xb9   : > { %9038 = vmatpush3.bf16.xpose.msk.msra.mxu1 %vm10812_vm1, %v9036_v33  ;;  %8993 = vmatprep.subr.msk.bf16.mxu0 %vm10812_vm1, %v8991_v37  ;;  %v793_v33 = vld [vmem:[%s10928_s5 + $0xe0] sm:$0xff]  ;;  %v814_v22 = vld [vmem:[%s10928_s5 + $0x188] sm:$0xff]  ;;  %v1187_v17 = vld [vmem:[%s16895_s1 + $0x530] sm:$0xff] }
  0xba   : > { %9041 = vmatprep.subr.msk.bf16.mxu1 %vm10812_vm1, %v9039_v38  ;;  %7768 = vmatmul.mubr.msk.f32.gmra.mrb[10].mxu0 %vm1565_vm0, %v898_v32  ;;  %v920_v32 = vmul.f32 0.25, %v792_v23  ;;  %v1097_v37 = vld [vmem:[%s16895_s1 + $0x260] sm:$0xff]  ;;  %v921_v38 = vmul.f32 0.25, %v793_v33 }
  0xbb   : > { %7832 = vmatmul.mubr.msk.f32.gmra.mrb[10].mxu1 %vm1565_vm0, %v914_v35  ;;  %7769 = vmatprep.mubr.msk.f32.mxu0 %vm1565_vm0, %v899_v39  ;;  %v9057_v35 = vpack.c.bf16 %v1146_v27, %v1145_v26  ;;  %v1200_v26 = vld [vmem:[%s16895_s1 + $0x598] sm:$0xff]  ;;  %v799_v27 = vld [vmem:[%s10928_s5 + $0x110] sm:$0xff] }
  0xbc   : > { %7833 = vmatprep.mubr.msk.f32.mxu1 %vm1565_vm0, %v915_v41  ;;  %v927_v33 = vmul.f32 0.25, %v799_v27 }
  0xbe   : > { %7770 = vmatmul.mubr.msk.f32.gmra.mrb[12].mxu0 %vm1565_vm0, %v899_v39  ;;  %v1098_v39 = vld [vmem:[%s16895_s1 + $0x268] sm:$0xff] }
  0xbf   : > { %7834 = vmatmul.mubr.msk.f32.gmra.mrb[12].mxu1 %vm1565_vm0, %v915_v41  ;;  %8996 = vmatpush3.bf16.xpose.msk.msra.mxu0 %vm10812_vm1, %v8994_v52  ;;  %v1129_v41 = vld [vmem:[%s16895_s1 + $0x360] sm:$0xff]  ;;  %v9012_v48 = vpack.c.bf16 %v1098_v39, %v1097_v37  ;;  %v779_v52 = vld [vmem:[%s10928_s5 + $0x70] sm:$0xff]  ;;  %v943_v37 = vmul.f32 0.25, %v815_v31  ;;  %v1170_v39 = vld [vmem:[%s16895_s1 + $0x4a8] sm:$0xff] }
  0xc0   : > { %7771 = vmatprep.mubr.msk.f32.mxu0 %vm1565_vm0, %v900_v53  ;;  %7835 = vmatprep.mubr.msk.f32.mxu1 %vm1565_vm0, %v916_v57  ;;  %v9060_v51 = vpack.c.bf16 %v1130_v42, %v1129_v41  ;;  %v907_v58 = vmul.f32 0.25, %v779_v52  ;;  %v1184_v41 = vld [vmem:[%s16895_s1 + $0x518] sm:$0xff]  ;;  %v817_v52 = vld [vmem:[%s10928_s5 + $0x1a0] sm:$0xff] }
  0xc1   : > { %9044 = vmatpush3.bf16.xpose.msk.msra.mxu1 %vm10812_vm1, %v9042_v55  ;;  %8999 = vmatprep.subr.msk.bf16.mxu0 %vm10812_vm1, %v8997_v59  ;;  %v795_v55 = vld [vmem:[%s10928_s5 + $0xf0] sm:$0xff]  ;;  %v816_v42 = vld [vmem:[%s10928_s5 + $0x198] sm:$0xff]  ;;  %v1157_v31 = vld [vmem:[%s16895_s1 + $0x440] sm:$0xff] }
  0xc2   : > { %9047 = vmatprep.subr.msk.bf16.mxu1 %vm10812_vm1, %v9045_v60  ;;  %7772 = vmatmul.mubr.msk.f32.gmra.mrb[14].mxu0 %vm1565_vm0, %v900_v53  ;;  %v922_v53 = vmul.f32 0.25, %v794_v43  ;;  %v1099_v59 = vld [vmem:[%s16895_s1 + $0x270] sm:$0xff]  ;;  %v923_v60 = vmul.f32 0.25, %v795_v55 }
  0xc3   : > { %7836 = vmatmul.mubr.msk.f32.gmra.mrb[14].mxu1 %vm1565_vm0, %v916_v57  ;;  %7773 = vmatprep.mubr.msk.f32.mxu0 %vm1565_vm0, %v901_v61  ;;  %v9063_v57 = vpack.c.bf16 %v1148_v47, %v1147_v46  ;;  %v1202_v46 = vld [vmem:[%s16895_s1 + $0x5a8] sm:$0xff]  ;;  %v801_v47 = vld [vmem:[%s10928_s5 + $0x120] sm:$0xff] }
  0xc4   : > { %7837 = vmatprep.mubr.msk.f32.mxu1 %vm1565_vm0, %v917_v63  ;;  %v929_v55 = vmul.f32 0.25, %v801_v47 }
  0xc6   : > { %7774 = vmatmul.mubr.msk.f32.gmra.mrb[16].mxu0 %vm1565_vm0, %v901_v61  ;;  %v1100_v61 = vld [vmem:[%s16895_s1 + $0x278] sm:$0xff] }
  0xc7   : > { %7838 = vmatmul.mubr.msk.f32.gmra.mrb[16].mxu1 %vm1565_vm0, %v917_v63  ;;  %9002 = vmatpush3.bf16.xpose.msk.msra.mxu0 %vm10812_vm1, %v9000_v8  ;;  %v1131_v63 = vld [vmem:[%s16895_s1 + $0x370] sm:$0xff]  ;;  %v9018_v5 = vpack.c.bf16 %v1100_v61, %v1099_v59  ;;  %v924_v8 = vmul.f32 0.25, %v796_v1  ;;  %v945_v59 = vmul.f32 0.25, %v817_v52  ;;  %v1172_v61 = vld [vmem:[%s16895_s1 + $0x4b8] sm:$0xff] }
  0xc8   : > { %7775 = vmatprep.mubr.msk.f32.mxu0 %vm1565_vm0, %v902_v9  ;;  %7839 = vmatprep.mubr.msk.f32.mxu1 %vm1565_vm0, %v918_v12  ;;  %v9066_v7 = vpack.c.bf16 %v1132_v0, %v1131_v63  ;;  %v1186_v63 = vld [vmem:[%s16895_s1 + $0x528] sm:$0xff]  ;;  %v1159_v52 = vld [vmem:[%s16895_s1 + $0x450] sm:$0xff] }
  0xc9   : > { %9050 = vmatpush3.bf16.xpose.msk.msra.mxu1 %vm10812_vm1, %v9048_v10  ;;  %9005 = vmatprep.subr.msk.bf16.mxu0 %vm10812_vm1, %v9003_v14  ;;  %v813_v10 = vld [vmem:[%s10928_s5 + $0x180] sm:$0xff]  ;;  %v818_v0 = vld [vmem:[%s10928_s5 + $0x1a8] sm:$0xff] }
  0xca   : > { %9053 = vmatprep.subr.msk.bf16.mxu1 %vm10812_vm1, %v9051_v15  ;;  %7776 = vmatmul.mubr.msk.f32.gmra.mrb[18].mxu0 %vm1565_vm0, %v902_v9  ;;  %v797_v9 = vld [vmem:[%s10928_s5 + $0x100] sm:$0xff]  ;;  %v941_v14 = vmul.f32 0.25, %v813_v10 }
  0xcb   : > { %7840 = vmatmul.mubr.msk.f32.gmra.mrb[18].mxu1 %vm1565_vm0, %v918_v12  ;;  %7777 = vmatprep.mubr.msk.f32.mxu0 %vm1565_vm0, %v903_v16  ;;  %v9117_v12 = vpack.c.bf16 %v1198_v3, %v1197_v54  ;;  %v925_v13 = vmul.f32 0.25, %v797_v9  ;;  %v1149_v15 = vld [vmem:[%s16895_s1 + $0x400] sm:$0xff]  ;;  %v1204_v54 = vld [vmem:[%s16895_s1 + $0x5b8] sm:$0xff]  ;;  %v803_v3 = vld [vmem:[%s10928_s5 + $0x130] sm:$0xff] }
  0xcc   : > { %7841 = vmatprep.mubr.msk.f32.mxu1 %vm1565_vm0, %v919_v18  ;;  %v9135_v9 = vpack.c.bf16 %v1204_v54, %v1203_v49  ;;  %v931_v10 = vmul.f32 0.25, %v803_v3 }
  0xce   : > { %7778 = vmatmul.mubr.msk.f32.gmra.mrb[20].mxu0 %vm1565_vm0, %v903_v16  ;;  %v1150_v16 = vld [vmem:[%s16895_s1 + $0x408] sm:$0xff] }
  0xcf   : > { %7842 = vmatmul.mubr.msk.f32.gmra.mrb[20].mxu1 %vm1565_vm0, %v919_v18  ;;  %9008 = vmatpush3.bf16.xpose.msk.msra.mxu0 %vm10812_vm1, %v9006_v28  ;;  %v1167_v18 = vld [vmem:[%s16895_s1 + $0x490] sm:$0xff]  ;;  %v9072_v23 = vpack.c.bf16 %v1150_v16, %v1149_v15  ;;  %v1173_v15 = vld [vmem:[%s16895_s1 + $0x4c0] sm:$0xff]  ;;  %v1174_v16 = vld [vmem:[%s16895_s1 + $0x4c8] sm:$0xff] }
  0xd0   : > { %7779 = vmatprep.mubr.msk.f32.mxu0 %vm1565_vm0, %v904_v29  ;;  %7843 = vmatprep.mubr.msk.f32.mxu1 %vm1565_vm0, %v920_v32  ;;  %v9075_v28 = vpack.c.bf16 %v1168_v19, %v1167_v18  ;;  %v1188_v18 = vld [vmem:[%s16895_s1 + $0x538] sm:$0xff] }
  0xd1   : > { %9056 = vmatpush3.bf16.xpose.msk.msra.mxu1 %vm10812_vm1, %v9054_v30  ;;  %9011 = vmatprep.subr.msk.bf16.mxu0 %vm10812_vm1, %v9009_v34  ;;  %v942_v30 = vmul.f32 0.25, %v814_v22  ;;  %v1151_v34 = vld [vmem:[%s16895_s1 + $0x410] sm:$0xff]  ;;  %v820_v19 = vld [vmem:[%s10928_s5 + $0x1b8] sm:$0xff]  ;;  %v1205_v22 = vld [vmem:[%s16895_s1 + $0x5c0] sm:$0xff] }
  0xd2   : > { %9059 = vmatprep.subr.msk.bf16.mxu1 %vm10812_vm1, %v9057_v35  ;;  %7780 = vmatmul.mubr.msk.f32.gmra.mrb[22].mxu0 %vm1565_vm0, %v904_v29  ;;  %v9120_v29 = vpack.c.bf16 %v1182_v21, %v1181_v20  ;;  %v1152_v35 = vld [vmem:[%s16895_s1 + $0x418] sm:$0xff]  ;;  %v948_v27 = vmul.f32 0.25, %v820_v19  ;;  %v1211_v19 = vld [vmem:[%s16895_s1 + $0x5f0] sm:$0xff] }
  0xd3   : > { %7844 = vmatmul.mubr.msk.f32.gmra.mrb[22].mxu1 %vm1565_vm0, %v920_v32  ;;  %7781 = vmatprep.mubr.msk.f32.mxu0 %vm1565_vm0, %v905_v36  ;;  %v9123_v32 = vpack.c.bf16 %v1200_v26, %v1199_v25  ;;  %v9078_v43 = vpack.c.bf16 %v1152_v35, %v1151_v34  ;;  %v9093_v25 = vpack.c.bf16 %v1174_v16, %v1173_v15  ;;  %v1175_v35 = vld [vmem:[%s16895_s1 + $0x4d0] sm:$0xff]  ;;  %v1194_v15 = vld [vmem:[%s16895_s1 + $0x568] sm:$0xff] }
  0xd4   : > { %7845 = vmatprep.mubr.msk.f32.mxu1 %vm1565_vm0, %v921_v38  ;;  %v9138_v26 = vpack.c.bf16 %v1188_v18, %v1187_v17  ;;  %v826_v16 = vld [vmem:[%s10928_s5 + $0x1e8] sm:$0xff] }
  0xd6   : > { %7782 = vmatmul.mubr.msk.f32.gmra.mrb[24].mxu0 %vm1565_vm0, %v905_v36  ;;  %v800_v36 = vld [vmem:[%s10928_s5 + $0x118] sm:$0xff] }
  0xd7   : > { %7846 = vmatmul.mubr.msk.f32.gmra.mrb[24].mxu1 %vm1565_vm0, %v921_v38  ;;  %9014 = vmatpush3.bf16.xpose.msk.msra.mxu0 %vm10812_vm1, %v9012_v48  ;;  %v1169_v38 = vld [vmem:[%s16895_s1 + $0x4a0] sm:$0xff]  ;;  %v928_v44 = vmul.f32 0.25, %v800_v36  ;;  %v1176_v36 = vld [vmem:[%s16895_s1 + $0x4d8] sm:$0xff] }
  0xd8   : > { %7783 = vmatprep.mubr.msk.f32.mxu0 %vm1565_vm0, %v906_v50  ;;  %7847 = vmatprep.mubr.msk.f32.mxu1 %vm1565_vm0, %v922_v53  ;;  %v9081_v48 = vpack.c.bf16 %v1170_v39, %v1169_v38  ;;  %v1190_v38 = vld [vmem:[%s16895_s1 + $0x548] sm:$0xff] }
  0xd9   : > { %9062 = vmatpush3.bf16.xpose.msk.msra.mxu1 %vm10812_vm1, %v9060_v51  ;;  %9017 = vmatprep.subr.msk.bf16.mxu0 %vm10812_vm1, %v9015_v56  ;;  %v944_v51 = vmul.f32 0.25, %v816_v42  ;;  %v1153_v56 = vld [vmem:[%s16895_s1 + $0x420] sm:$0xff]  ;;  %v822_v39 = vld [vmem:[%s10928_s5 + $0x1c8] sm:$0xff]  ;;  %v1207_v42 = vld [vmem:[%s16895_s1 + $0x5d0] sm:$0xff] }
  0xda   : > { %9065 = vmatprep.subr.msk.bf16.mxu1 %vm10812_vm1, %v9063_v57  ;;  %7784 = vmatmul.mubr.msk.f32.gmra.mrb[26].mxu0 %vm1565_vm0, %v906_v50  ;;  %v9126_v50 = vpack.c.bf16 %v1184_v41, %v1183_v40  ;;  %v1154_v57 = vld [vmem:[%s16895_s1 + $0x428] sm:$0xff]  ;;  %v950_v47 = vmul.f32 0.25, %v822_v39  ;;  %v1261_v39 = vld [vmem:[%s16895_s1 + $0x780] sm:$0xff] }
  0xdb   : > { %7848 = vmatmul.mubr.msk.f32.gmra.mrb[26].mxu1 %vm1565_vm0, %v922_v53  ;;  %7785 = vmatprep.mubr.msk.f32.mxu0 %vm1565_vm0, %v907_v58  ;;  %v9129_v53 = vpack.c.bf16 %v1202_v46, %v1201_v45  ;;  %v9084_v1 = vpack.c.bf16 %v1154_v57, %v1153_v56  ;;  %v9099_v45 = vpack.c.bf16 %v1176_v36, %v1175_v35  ;;  %v1177_v57 = vld [vmem:[%s16895_s1 + $0x4e0] sm:$0xff]  ;;  %v1196_v35 = vld [vmem:[%s16895_s1 + $0x578] sm:$0xff] }
  0xdc   : > { %7849 = vmatprep.mubr.msk.f32.mxu1 %vm1565_vm0, %v923_v60  ;;  %v828_v36 = vld [vmem:[%s10928_s5 + $0x1f8] sm:$0xff] }
  0xde   : > { %7786 = vmatmul.mubr.msk.f32.gmra.mrb[28].mxu0 %vm1565_vm0, %v907_v58  ;;  %v802_v58 = vld [vmem:[%s10928_s5 + $0x128] sm:$0xff] }
  0xdf   : > { %7850 = vmatmul.mubr.msk.f32.gmra.mrb[28].mxu1 %vm1565_vm0, %v923_v60  ;;  %9020 = vmatpush3.bf16.xpose.msk.msra.mxu0 %vm10812_vm1, %v9018_v5  ;;  %v1171_v60 = vld [vmem:[%s16895_s1 + $0x4b0] sm:$0xff]  ;;  %v930_v2 = vmul.f32 0.25, %v802_v58  ;;  %v1178_v58 = vld [vmem:[%s16895_s1 + $0x4e8] sm:$0xff] }
  0xe0   : > { %7787 = vmatprep.mubr.msk.f32.mxu0 %vm1565_vm0, %v908_v6  ;;  %7851 = vmatprep.mubr.msk.f32.mxu1 %vm1565_vm0, %v924_v8  ;;  %v9087_v5 = vpack.c.bf16 %v1172_v61, %v1171_v60  ;;  %v1192_v60 = vld [vmem:[%s16895_s1 + $0x558] sm:$0xff]  ;;  %v9105_v49 = vpack.c.bf16 %v1178_v58, %v1177_v57  ;;  %v1245_v57 = vld [vmem:[%s16895_s1 + $0x700] sm:$0xff]  ;;  %v1246_v58 = vld [vmem:[%s16895_s1 + $0x708] sm:$0xff] }
  0xe1   : > { %9068 = vmatpush3.bf16.xpose.msk.msra.mxu1 %vm10812_vm1, %v9066_v7  ;;  %9071 = vmatprep.subr.msk.bf16.mxu0 %vm10812_vm1, %v9069_v11  ;;  %v946_v7 = vmul.f32 0.25, %v818_v0  ;;  %v1155_v11 = vld [vmem:[%s16895_s1 + $0x430] sm:$0xff]  ;;  %v824_v61 = vld [vmem:[%s10928_s5 + $0x1d8] sm:$0xff]  ;;  %v1209_v0 = vld [vmem:[%s16895_s1 + $0x5e0] sm:$0xff] }
  0xe2   : > { %9119 = vmatprep.subr.msk.bf16.mxu1 %vm10812_vm1, %v9117_v12  ;;  %7788 = vmatmul.mubr.msk.f32.gmra.mrb[30].mxu0 %vm1565_vm0, %v908_v6  ;;  %v9132_v6 = vpack.c.bf16 %v1186_v63, %v1185_v62  ;;  %v1156_v12 = vld [vmem:[%s16895_s1 + $0x438] sm:$0xff]  ;;  %v952_v3 = vmul.f32 0.25, %v824_v61  ;;  %v1263_v61 = vld [vmem:[%s16895_s1 + $0x790] sm:$0xff] }
  0xe3   : > { %7852 = vmatmul.mubr.msk.f32.gmra.mrb[30].mxu1 %vm1565_vm0, %v924_v8  ;;  %7885 = vmatprep.mubr.msk.f32.mxu0 %vm1565_vm0, %v925_v13  ;;  %v819_v8 = vld [vmem:[%s10928_s5 + $0x1b0] sm:$0xff]  ;;  %v9090_v20 = vpack.c.bf16 %v1156_v12, %v1155_v11 }
  0xe4   : > { %7949 = vmatprep.mubr.msk.f32.mxu1 %vm1565_vm0, %v941_v14  ;;  %v1179_v12 = vld [vmem:[%s16895_s1 + $0x4f0] sm:$0xff] }
  0xe6   : > { %7886 = vmatmul.mubr.msk.f32.vlgmr.msra.gmra.mrb[32].mxu0 %vm1565_vm0, %v925_v13  ;;  %v804_v13 = vld [vmem:[%s10928_s5 + $0x138] sm:$0xff] }
  0xe7   : > { %9074 = vmatpush3.bf16.xpose.msk.msra.mxu0 %vm10812_vm1, %v9072_v23  ;;  %7887 = vmatprep.mubr.msk.f32.mxu0 %vm1565_vm0, %v926_v24  ;;  %v932_v21 = vmul.f32 0.25, %v804_v13  ;;  %v1206_v23 = vld [vmem:[%s16895_s1 + $0x5c8] sm:$0xff]  ;;  %v1180_v13 = vld [vmem:[%s16895_s1 + $0x4f8] sm:$0xff] }
  0xe8   : > { %7950 = vmatmul.mubr.msk.f32.vlgmr.msra.gmra.mrb[32].mxu1 %vm1565_vm0, %v941_v14  ;;  %9077 = vmatprep.subr.msk.bf16.mxu0 %vm10812_vm1, %v9075_v28  ;;  %v947_v14 = vmul.f32 0.25, %v819_v8  ;;  %v821_v28 = vld [vmem:[%s10928_s5 + $0x1c0] sm:$0xff] }
  0xe9   : > { %9122 = vmatpush3.bf16.xpose.msk.msra.mxu1 %vm10812_vm1, %v9120_v29  ;;  %7951 = vmatprep.mubr.msk.f32.mxu1 %vm1565_vm0, %v942_v30  ;;  %v9141_v29 = vpack.c.bf16 %v1206_v23, %v1205_v22  ;;  %v949_v34 = vmul.f32 0.25, %v821_v28  ;;  %v1161_v8 = vld [vmem:[%s16895_s1 + $0x460] sm:$0xff]  ;;  %v9111_v22 = vpack.c.bf16 %v1180_v13, %v1179_v12  ;;  %v1163_v28 = vld [vmem:[%s16895_s1 + $0x470] sm:$0xff]  ;;  %v1248_v13 = vld [vmem:[%s16895_s1 + $0x718] sm:$0xff] }
  0xea   : > { %7888 = vmatmul.mubr.msk.f32.gmra.mrb[34].mxu0 %vm1565_vm0, %v926_v24  ;;  %9125 = vmatprep.subr.msk.bf16.mxu1 %vm10812_vm1, %v9123_v32  ;;  %v805_v24 = vld [vmem:[%s10928_s5 + $0x140] sm:$0xff]  ;;  %v1158_v32 = vld [vmem:[%s16895_s1 + $0x448] sm:$0xff]  ;;  %v1247_v12 = vld [vmem:[%s16895_s1 + $0x710] sm:$0xff] }
  0xeb   : > { %7889 = vmatprep.mubr.msk.f32.mxu0 %vm1565_vm0, %v927_v33  ;;  %v9096_v40 = vpack.c.bf16 %v1158_v32, %v1157_v31  ;;  %v1229_v32 = vld [vmem:[%s16895_s1 + $0x680] sm:$0xff] }
  0xec   : > { %7952 = vmatmul.mubr.msk.f32.gmra.mrb[34].mxu1 %vm1565_vm0, %v942_v30  ;;  %v933_v30 = vmul.f32 0.25, %v805_v24  ;;  %v954_v24 = vmul.f32 0.25, %v826_v16  ;;  %v1265_v16 = vld [vmem:[%s16895_s1 + $0x7a0] sm:$0xff] }
  0xed   : > { %7953 = vmatprep.mubr.msk.f32.mxu1 %vm1565_vm0, %v943_v37 }
  0xee   : > { %7890 = vmatmul.mubr.msk.f32.gmra.mrb[36].mxu0 %vm1565_vm0, %v927_v33  ;;  %v806_v33 = vld [vmem:[%s10928_s5 + $0x148] sm:$0xff] }
  0xef   : > { %9080 = vmatpush3.bf16.xpose.msk.msra.mxu0 %vm10812_vm1, %v9078_v43  ;;  %7891 = vmatprep.mubr.msk.f32.mxu0 %vm1565_vm0, %v928_v44  ;;  %v934_v41 = vmul.f32 0.25, %v806_v33  ;;  %v1208_v43 = vld [vmem:[%s16895_s1 + $0x5d8] sm:$0xff]  ;;  %v1230_v33 = vld [vmem:[%s16895_s1 + $0x688] sm:$0xff] }
  0xf0   : > { %7954 = vmatmul.mubr.msk.f32.gmra.mrb[36].mxu1 %vm1565_vm0, %v943_v37  ;;  %9083 = vmatprep.subr.msk.bf16.mxu0 %vm10812_vm1, %v9081_v48  ;;  %v1189_v37 = vld [vmem:[%s16895_s1 + $0x540] sm:$0xff]  ;;  %v823_v48 = vld [vmem:[%s10928_s5 + $0x1d0] sm:$0xff] }
  0xf1   : > { %9128 = vmatpush3.bf16.xpose.msk.msra.mxu1 %vm10812_vm1, %v9126_v50  ;;  %7955 = vmatprep.mubr.msk.f32.mxu1 %vm1565_vm0, %v944_v51  ;;  %v9144_v46 = vpack.c.bf16 %v1190_v38, %v1189_v37  ;;  %v9147_v50 = vpack.c.bf16 %v1208_v43, %v1207_v42  ;;  %v951_v56 = vmul.f32 0.25, %v823_v48  ;;  %v9165_v42 = vpack.c.bf16 %v1230_v33, %v1229_v32  ;;  %v830_v48 = vld [vmem:[%s10928_s5 + $0x208] sm:$0xff]  ;;  %v1249_v32 = vld [vmem:[%s16895_s1 + $0x720] sm:$0xff] }
  0xf2   : > { %7892 = vmatmul.mubr.msk.f32.gmra.mrb[38].mxu0 %vm1565_vm0, %v928_v44  ;;  %9131 = vmatprep.subr.msk.bf16.mxu1 %vm10812_vm1, %v9129_v53  ;;  %v807_v44 = vld [vmem:[%s10928_s5 + $0x150] sm:$0xff]  ;;  %v1160_v53 = vld [vmem:[%s16895_s1 + $0x458] sm:$0xff]  ;;  %v1250_v33 = vld [vmem:[%s16895_s1 + $0x728] sm:$0xff] }
  0xf3   : > { %7893 = vmatprep.mubr.msk.f32.mxu0 %vm1565_vm0, %v929_v55  ;;  %v9102_v62 = vpack.c.bf16 %v1160_v53, %v1159_v52  ;;  %v1231_v53 = vld [vmem:[%s16895_s1 + $0x690] sm:$0xff] }
  0xf4   : > { %7956 = vmatmul.mubr.msk.f32.gmra.mrb[38].mxu1 %vm1565_vm0, %v944_v51  ;;  %v935_v51 = vmul.f32 0.25, %v807_v44  ;;  %v956_v44 = vmul.f32 0.25, %v828_v36  ;;  %v1267_v36 = vld [vmem:[%s16895_s1 + $0x7b0] sm:$0xff] }
  0xf5   : > { %7957 = vmatprep.mubr.msk.f32.mxu1 %vm1565_vm0, %v945_v59 }
  0xf6   : > { %7894 = vmatmul.mubr.msk.f32.gmra.mrb[40].mxu0 %vm1565_vm0, %v929_v55  ;;  %v808_v55 = vld [vmem:[%s10928_s5 + $0x158] sm:$0xff] }
  0xf7   : > { %9086 = vmatpush3.bf16.xpose.msk.msra.mxu0 %vm10812_vm1, %v9084_v1  ;;  %7895 = vmatprep.mubr.msk.f32.mxu0 %vm1565_vm0, %v930_v2  ;;  %v936_v63 = vmul.f32 0.25, %v808_v55  ;;  %v1210_v1 = vld [vmem:[%s16895_s1 + $0x5e8] sm:$0xff]  ;;  %v1232_v55 = vld [vmem:[%s16895_s1 + $0x698] sm:$0xff] }
  0xf8   : > { %7958 = vmatmul.mubr.msk.f32.gmra.mrb[40].mxu1 %vm1565_vm0, %v945_v59  ;;  %9089 = vmatprep.subr.msk.bf16.mxu0 %vm10812_vm1, %v9087_v5  ;;  %v1191_v59 = vld [vmem:[%s16895_s1 + $0x550] sm:$0xff]  ;;  %v825_v5 = vld [vmem:[%s10928_s5 + $0x1e0] sm:$0xff] }
  0xf9   : > { %9134 = vmatpush3.bf16.xpose.msk.msra.mxu1 %vm10812_vm1, %v9132_v6  ;;  %7959 = vmatprep.mubr.msk.f32.mxu1 %vm1565_vm0, %v946_v7  ;;  %v9150_v54 = vpack.c.bf16 %v1192_v60, %v1191_v59  ;;  %v9153_v6 = vpack.c.bf16 %v1210_v1, %v1209_v0  ;;  %v953_v11 = vmul.f32 0.25, %v825_v5  ;;  %v958_v59 = vmul.f32 0.25, %v830_v48  ;;  %v832_v5 = vld [vmem:[%s10928_s5 + $0x218] sm:$0xff] }
  0xfa   : > { %7896 = vmatmul.mubr.msk.f32.gmra.mrb[42].mxu0 %vm1565_vm0, %v930_v2  ;;  %9137 = vmatprep.subr.msk.bf16.mxu1 %vm10812_vm1, %v9135_v9  ;;  %v809_v2 = vld [vmem:[%s10928_s5 + $0x160] sm:$0xff]  ;;  %v1162_v9 = vld [vmem:[%s16895_s1 + $0x468] sm:$0xff]  ;;  %v9171_v0 = vpack.c.bf16 %v1232_v55, %v1231_v53  ;;  %v1251_v53 = vld [vmem:[%s16895_s1 + $0x730] sm:$0xff] }
  0xfb   : > { %7897 = vmatprep.mubr.msk.f32.mxu0 %vm1565_vm0, %v931_v10  ;;  %v9108_v17 = vpack.c.bf16 %v1162_v9, %v1161_v8  ;;  %v1233_v9 = vld [vmem:[%s16895_s1 + $0x6a0] sm:$0xff]  ;;  %v1252_v55 = vld [vmem:[%s16895_s1 + $0x738] sm:$0xff] }
  0xfc   : > { %7960 = vmatmul.mubr.msk.f32.gmra.mrb[42].mxu1 %vm1565_vm0, %v946_v7  ;;  %v937_v7 = vmul.f32 0.25, %v809_v2  ;;  %v9216_v2 = vpack.c.bf16 %v1246_v58, %v1245_v57  ;;  %v1269_v58 = vld [vmem:[%s16895_s1 + $0x7c0] sm:$0xff] }
  0xfd   : > { %7961 = vmatprep.mubr.msk.f32.mxu1 %vm1565_vm0, %v947_v14 }
  0xfe   : > { %7898 = vmatmul.mubr.msk.f32.gmra.mrb[44].mxu0 %vm1565_vm0, %v931_v10  ;;  %v810_v10 = vld [vmem:[%s10928_s5 + $0x168] sm:$0xff] }
  0xff   : > { %9092 = vmatpush3.bf16.xpose.msk.msra.mxu0 %vm10812_vm1, %v9090_v20  ;;  %7899 = vmatprep.mubr.msk.f32.mxu0 %vm1565_vm0, %v932_v21  ;;  %v938_v18 = vmul.f32 0.25, %v810_v10  ;;  %v1212_v20 = vld [vmem:[%s16895_s1 + $0x5f8] sm:$0xff]  ;;  %v1234_v10 = vld [vmem:[%s16895_s1 + $0x6a8] sm:$0xff] }
 0x100   : > { %7962 = vmatmul.mubr.msk.f32.gmra.mrb[44].mxu1 %vm1565_vm0, %v947_v14  ;;  %9095 = vmatprep.subr.msk.bf16.mxu0 %vm10812_vm1, %v9093_v25  ;;  %v1193_v14 = vld [vmem:[%s16895_s1 + $0x560] sm:$0xff]  ;;  %v827_v25 = vld [vmem:[%s10928_s5 + $0x1f0] sm:$0xff] }
 0x101   : > { %9140 = vmatpush3.bf16.xpose.msk.msra.mxu1 %vm10812_vm1, %v9138_v26  ;;  %7963 = vmatprep.mubr.msk.f32.mxu1 %vm1565_vm0, %v948_v27  ;;  %v9156_v23 = vpack.c.bf16 %v1194_v15, %v1193_v14  ;;  %v9159_v26 = vpack.c.bf16 %v1212_v20, %v1211_v19  ;;  %v955_v31 = vmul.f32 0.25, %v827_v25  ;;  %v960_v14 = vmul.f32 0.25, %v832_v5  ;;  %v834_v25 = vld [vmem:[%s10928_s5 + $0x228] sm:$0xff] }
 0x102   : > { %7900 = vmatmul.mubr.msk.f32.gmra.mrb[46].mxu0 %vm1565_vm0, %v932_v21  ;;  %9143 = vmatprep.subr.msk.bf16.mxu1 %vm10812_vm1, %v9141_v29  ;;  %v811_v21 = vld [vmem:[%s10928_s5 + $0x170] sm:$0xff]  ;;  %v1164_v29 = vld [vmem:[%s16895_s1 + $0x478] sm:$0xff]  ;;  %v9177_v19 = vpack.c.bf16 %v1234_v10, %v1233_v9  ;;  %v1253_v9 = vld [vmem:[%s16895_s1 + $0x740] sm:$0xff] }
 0x103   : > { %7901 = vmatprep.mubr.msk.f32.mxu0 %vm1565_vm0, %v933_v30  ;;  %v9114_v37 = vpack.c.bf16 %v1164_v29, %v1163_v28  ;;  %v1235_v29 = vld [vmem:[%s16895_s1 + $0x6b0] sm:$0xff]  ;;  %v1254_v10 = vld [vmem:[%s16895_s1 + $0x748] sm:$0xff] }
 0x104   : > { %7964 = vmatmul.mubr.msk.f32.gmra.mrb[46].mxu1 %vm1565_vm0, %v948_v27  ;;  %v939_v27 = vmul.f32 0.25, %v811_v21  ;;  %v9222_v21 = vpack.c.bf16 %v1248_v13, %v1247_v12  ;;  %v1271_v13 = vld [vmem:[%s16895_s1 + $0x7d0] sm:$0xff] }
 0x105   : > { %7965 = vmatprep.mubr.msk.f32.mxu1 %vm1565_vm0, %v949_v34 }
 0x106   : > { %7902 = vmatmul.mubr.msk.f32.gmra.mrb[48].mxu0 %vm1565_vm0, %v933_v30  ;;  %v812_v30 = vld [vmem:[%s10928_s5 + $0x178] sm:$0xff] }
 0x107   : > { %9098 = vmatpush3.bf16.xpose.msk.msra.mxu0 %vm10812_vm1, %v9096_v40  ;;  %7903 = vmatprep.mubr.msk.f32.mxu0 %vm1565_vm0, %v934_v41  ;;  %v940_v38 = vmul.f32 0.25, %v812_v30  ;;  %v1262_v40 = vld [vmem:[%s16895_s1 + $0x788] sm:$0xff]  ;;  %v1236_v30 = vld [vmem:[%s16895_s1 + $0x6b8] sm:$0xff] }
 0x108   : > { %7966 = vmatmul.mubr.msk.f32.gmra.mrb[48].mxu1 %vm1565_vm0, %v949_v34  ;;  %9101 = vmatprep.subr.msk.bf16.mxu0 %vm10812_vm1, %v9099_v45  ;;  %v1195_v34 = vld [vmem:[%s16895_s1 + $0x570] sm:$0xff]  ;;  %v845_v45 = vld [vmem:[%s10928_s5 + $0x280] sm:$0xff] }
 0x109   : > { %9146 = vmatpush3.bf16.xpose.msk.msra.mxu1 %vm10812_vm1, %v9144_v46  ;;  %7967 = vmatprep.mubr.msk.f32.mxu1 %vm1565_vm0, %v950_v47  ;;  %v9162_v43 = vpack.c.bf16 %v1196_v35, %v1195_v34  ;;  %v9213_v46 = vpack.c.bf16 %v1262_v40, %v1261_v39  ;;  %v973_v52 = vmul.f32 0.25, %v845_v45  ;;  %v962_v34 = vmul.f32 0.25, %v834_v25  ;;  %v836_v45 = vld [vmem:[%s10928_s5 + $0x238] sm:$0xff] }
 0x10a   : > { %7904 = vmatmul.mubr.msk.f32.gmra.mrb[50].mxu0 %vm1565_vm0, %v934_v41  ;;  %9149 = vmatprep.subr.msk.bf16.mxu1 %vm10812_vm1, %v9147_v50  ;;  %v829_v41 = vld [vmem:[%s10928_s5 + $0x200] sm:$0xff]  ;;  %v9183_v39 = vpack.c.bf16 %v1236_v30, %v1235_v29  ;;  %v1255_v29 = vld [vmem:[%s16895_s1 + $0x750] sm:$0xff]  ;;  %v1256_v30 = vld [vmem:[%s16895_s1 + $0x758] sm:$0xff] }
 0x10b   : > { %7905 = vmatprep.mubr.msk.f32.mxu0 %vm1565_vm0, %v935_v51  ;;  %v1213_v50 = vld [vmem:[%s16895_s1 + $0x600] sm:$0xff] }
 0x10c   : > { %7968 = vmatmul.mubr.msk.f32.gmra.mrb[50].mxu1 %vm1565_vm0, %v950_v47  ;;  %v957_v47 = vmul.f32 0.25, %v829_v41  ;;  %v9228_v41 = vpack.c.bf16 %v1250_v33, %v1249_v32  ;;  %v1273_v33 = vld [vmem:[%s16895_s1 + $0x7e0] sm:$0xff] }
 0x10d   : > { %7969 = vmatprep.mubr.msk.f32.mxu1 %vm1565_vm0, %v951_v56 }
 0x10e   : > { %7906 = vmatmul.mubr.msk.f32.gmra.mrb[52].mxu0 %vm1565_vm0, %v935_v51  ;;  %v1214_v51 = vld [vmem:[%s16895_s1 + $0x608] sm:$0xff] }
 0x10f   : > { %9104 = vmatpush3.bf16.xpose.msk.msra.mxu0 %vm10812_vm1, %v9102_v62  ;;  %7907 = vmatprep.mubr.msk.f32.mxu0 %vm1565_vm0, %v936_v63  ;;  %v9168_v60 = vpack.c.bf16 %v1214_v51, %v1213_v50  ;;  %v1264_v62 = vld [vmem:[%s16895_s1 + $0x798] sm:$0xff]  ;;  %v1237_v50 = vld [vmem:[%s16895_s1 + $0x6c0] sm:$0xff]  ;;  %v1238_v51 = vld [vmem:[%s16895_s1 + $0x6c8] sm:$0xff] }
 0x110   : > { %7970 = vmatmul.mubr.msk.f32.gmra.mrb[52].mxu1 %vm1565_vm0, %v951_v56  ;;  %9107 = vmatprep.subr.msk.bf16.mxu0 %vm10812_vm1, %v9105_v49  ;;  %v846_v56 = vld [vmem:[%s10928_s5 + $0x288] sm:$0xff]  ;;  %v847_v49 = vld [vmem:[%s10928_s5 + $0x290] sm:$0xff] }
 0x111   : > { %9152 = vmatpush3.bf16.xpose.msk.msra.mxu1 %vm10812_vm1, %v9150_v54  ;;  %7971 = vmatprep.mubr.msk.f32.mxu1 %vm1565_vm0, %v952_v3  ;;  %v974_v1 = vmul.f32 0.25, %v846_v56  ;;  %v9219_v54 = vpack.c.bf16 %v1264_v62, %v1263_v61  ;;  %v975_v8 = vmul.f32 0.25, %v847_v49  ;;  %v964_v56 = vmul.f32 0.25, %v836_v45  ;;  %v838_v49 = vld [vmem:[%s10928_s5 + $0x248] sm:$0xff] }
 0x112   : > { %7908 = vmatmul.mubr.msk.f32.gmra.mrb[54].mxu0 %vm1565_vm0, %v936_v63  ;;  %9155 = vmatprep.subr.msk.bf16.mxu1 %vm10812_vm1, %v9153_v6  ;;  %v831_v63 = vld [vmem:[%s10928_s5 + $0x210] sm:$0xff]  ;;  %v9189_v61 = vpack.c.bf16 %v1238_v51, %v1237_v50  ;;  %v1257_v50 = vld [vmem:[%s16895_s1 + $0x760] sm:$0xff]  ;;  %v1258_v51 = vld [vmem:[%s16895_s1 + $0x768] sm:$0xff] }
 0x113   : > { %7909 = vmatprep.mubr.msk.f32.mxu0 %vm1565_vm0, %v937_v7  ;;  %v1215_v6 = vld [vmem:[%s16895_s1 + $0x610] sm:$0xff] }
 0x114   : > { %7972 = vmatmul.mubr.msk.f32.gmra.mrb[54].mxu1 %vm1565_vm0, %v952_v3  ;;  %v959_v3 = vmul.f32 0.25, %v831_v63  ;;  %v9234_v63 = vpack.c.bf16 %v1252_v55, %v1251_v53  ;;  %v1275_v55 = vld [vmem:[%s16895_s1 + $0x7f0] sm:$0xff] }
 0x115   : > { %7973 = vmatprep.mubr.msk.f32.mxu1 %vm1565_vm0, %v953_v11 }
 0x116   : > { %7910 = vmatmul.mubr.msk.f32.gmra.mrb[56].mxu0 %vm1565_vm0, %v937_v7  ;;  %v1216_v7 = vld [vmem:[%s16895_s1 + $0x618] sm:$0xff] }
 0x117   : > { %9110 = vmatpush3.bf16.xpose.msk.msra.mxu0 %vm10812_vm1, %v9108_v17  ;;  %7911 = vmatprep.mubr.msk.f32.mxu0 %vm1565_vm0, %v938_v18  ;;  %v9174_v15 = vpack.c.bf16 %v1216_v7, %v1215_v6  ;;  %v1266_v17 = vld [vmem:[%s16895_s1 + $0x7a8] sm:$0xff]  ;;  %v1239_v6 = vld [vmem:[%s16895_s1 + $0x6d0] sm:$0xff]  ;;  %v1240_v7 = vld [vmem:[%s16895_s1 + $0x6d8] sm:$0xff] }
 0x118   : > { %7974 = vmatmul.mubr.msk.f32.gmra.mrb[56].mxu1 %vm1565_vm0, %v953_v11  ;;  %9113 = vmatprep.subr.msk.bf16.mxu0 %vm10812_vm1, %v9111_v22  ;;  %v848_v11 = vld [vmem:[%s10928_s5 + $0x298] sm:$0xff]  ;;  %v849_v22 = vld [vmem:[%s10928_s5 + $0x2a0] sm:$0xff] }
 0x119   : > { %9158 = vmatpush3.bf16.xpose.msk.msra.mxu1 %vm10812_vm1, %v9156_v23  ;;  %7975 = vmatprep.mubr.msk.f32.mxu1 %vm1565_vm0, %v954_v24  ;;  %v976_v20 = vmul.f32 0.25, %v848_v11  ;;  %v9225_v23 = vpack.c.bf16 %v1266_v17, %v1265_v16  ;;  %v977_v28 = vmul.f32 0.25, %v849_v22  ;;  %v966_v11 = vmul.f32 0.25, %v838_v49  ;;  %v840_v22 = vld [vmem:[%s10928_s5 + $0x258] sm:$0xff] }
 0x11a   : > { %7912 = vmatmul.mubr.msk.f32.gmra.mrb[58].mxu0 %vm1565_vm0, %v938_v18  ;;  %9161 = vmatprep.subr.msk.bf16.mxu1 %vm10812_vm1, %v9159_v26  ;;  %v833_v18 = vld [vmem:[%s10928_s5 + $0x220] sm:$0xff]  ;;  %v9195_v16 = vpack.c.bf16 %v1240_v7, %v1239_v6 }
 0x11b   : > { %7913 = vmatprep.mubr.msk.f32.mxu0 %vm1565_vm0, %v939_v27  ;;  %v1217_v26 = vld [vmem:[%s16895_s1 + $0x620] sm:$0xff] }
 0x11c   : > { %7976 = vmatmul.mubr.msk.f32.gmra.mrb[58].mxu1 %vm1565_vm0, %v954_v24  ;;  %v961_v24 = vmul.f32 0.25, %v833_v18  ;;  %v9240_v18 = vpack.c.bf16 %v1254_v10, %v1253_v9 }
 0x11d   : > { %7977 = vmatprep.mubr.msk.f32.mxu1 %vm1565_vm0, %v955_v31 }
 0x11e   : > { %7914 = vmatmul.mubr.msk.f32.gmra.mrb[60].mxu0 %vm1565_vm0, %v939_v27  ;;  %v1218_v27 = vld [vmem:[%s16895_s1 + $0x628] sm:$0xff] }
 0x11f   : > { %9116 = vmatpush3.bf16.xpose.msk.msra.mxu0 %vm10812_vm1, %v9114_v37  ;;  %7915 = vmatprep.mubr.msk.f32.mxu0 %vm1565_vm0, %v940_v38  ;;  %v9180_v35 = vpack.c.bf16 %v1218_v27, %v1217_v26  ;;  %v1268_v37 = vld [vmem:[%s16895_s1 + $0x7b8] sm:$0xff]  ;;  %v1241_v26 = vld [vmem:[%s16895_s1 + $0x6e0] sm:$0xff]  ;;  %v1242_v27 = vld [vmem:[%s16895_s1 + $0x6e8] sm:$0xff] }
 0x120   : > { %7978 = vmatmul.mubr.msk.f32.gmra.mrb[60].mxu1 %vm1565_vm0, %v955_v31  ;;  %9167 = vmatprep.subr.msk.bf16.mxu0 %vm10812_vm1, %v9165_v42  ;;  %v850_v31 = vld [vmem:[%s10928_s5 + $0x2a8] sm:$0xff]  ;;  %v851_v42 = vld [vmem:[%s10928_s5 + $0x2b0] sm:$0xff] }
 0x121   : > { %9164 = vmatpush3.bf16.xpose.msk.msra.mxu1 %vm10812_vm1, %v9162_v43  ;;  %7979 = vmatprep.mubr.msk.f32.mxu1 %vm1565_vm0, %v956_v44  ;;  %v978_v40 = vmul.f32 0.25, %v850_v31  ;;  %v9231_v43 = vpack.c.bf16 %v1268_v37, %v1267_v36  ;;  %v979_v48 = vmul.f32 0.25, %v851_v42  ;;  %v968_v31 = vmul.f32 0.25, %v840_v22  ;;  %v842_v42 = vld [vmem:[%s10928_s5 + $0x268] sm:$0xff]  ;;  %v880_v22 = vld [vmem:[%s10928_s5 + $0x398] sm:$0xff] }
 0x122   : > { %7916 = vmatmul.mubr.msk.f32.gmra.mrb[62].mxu0 %vm1565_vm0, %v940_v38  ;;  %9215 = vmatprep.subr.msk.bf16.mxu1 %vm10812_vm1, %v9213_v46  ;;  %v835_v38 = vld [vmem:[%s10928_s5 + $0x230] sm:$0xff]  ;;  %v9201_v36 = vpack.c.bf16 %v1242_v27, %v1241_v26  ;;  %v881_v26 = vld [vmem:[%s10928_s5 + $0x3a0] sm:$0xff] }
 0x123   : > { %8013 = vmatprep.mubr.msk.f32.mxu0 %vm1565_vm0, %v957_v47  ;;  %v1219_v46 = vld [vmem:[%s16895_s1 + $0x630] sm:$0xff] }
 0x124   : > { %7980 = vmatmul.mubr.msk.f32.gmra.mrb[62].mxu1 %vm1565_vm0, %v956_v44  ;;  %v963_v44 = vmul.f32 0.25, %v835_v38  ;;  %v9246_v38 = vpack.c.bf16 %v1256_v30, %v1255_v29  ;;  %v1009_v29 = vmul.f32 0.25, %v881_v26  ;;  %v882_v30 = vld [vmem:[%s10928_s5 + $0x3a8] sm:$0xff] }
 0x125   : > { %8077 = vmatprep.mubr.msk.f32.mxu1 %vm1565_vm0, %v973_v52 }
 0x126   : > { %8014 = vmatmul.mubr.msk.f32.vlgmr.msra.gmra.mrb[64].mxu0 %vm1565_vm0, %v957_v47  ;;  %v1220_v47 = vld [vmem:[%s16895_s1 + $0x638] sm:$0xff] }
 0x127   : > { %8015 = vmatprep.mubr.msk.f32.mxu0 %vm1565_vm0, %v958_v59  ;;  %9170 = vmatpush3.bf16.xpose.msk.msra.mxu0 %vm10812_vm1, %v9168_v60  ;;  %v9186_v57 = vpack.c.bf16 %v1220_v47, %v1219_v46  ;;  %v837_v60 = vld [vmem:[%s10928_s5 + $0x240] sm:$0xff]  ;;  %v1243_v46 = vld [vmem:[%s16895_s1 + $0x6f0] sm:$0xff]  ;;  %v1244_v47 = vld [vmem:[%s16895_s1 + $0x6f8] sm:$0xff] }
 0x128   : > { %8078 = vmatmul.mubr.msk.f32.vlgmr.msra.gmra.mrb[64].mxu1 %vm1565_vm0, %v973_v52  ;;  %9173 = vmatprep.subr.msk.bf16.mxu0 %vm10812_vm1, %v9171_v0  ;;  %v852_v52 = vld [vmem:[%s10928_s5 + $0x2b8] sm:$0xff]  ;;  %v853_v0 = vld [vmem:[%s10928_s5 + $0x2c0] sm:$0xff] }
 0x129   : > { %8079 = vmatprep.mubr.msk.f32.mxu1 %vm1565_vm0, %v974_v1  ;;  %9218 = vmatpush3.bf16.xpose.msk.msra.mxu1 %vm10812_vm1, %v9216_v2  ;;  %v980_v62 = vmul.f32 0.25, %v852_v52  ;;  %v965_v2 = vmul.f32 0.25, %v837_v60  ;;  %v981_v5 = vmul.f32 0.25, %v853_v0  ;;  %v970_v52 = vmul.f32 0.25, %v842_v42  ;;  %v844_v0 = vld [vmem:[%s10928_s5 + $0x278] sm:$0xff] }
 0x12a   : > { %8016 = vmatmul.mubr.msk.f32.gmra.mrb[66].mxu0 %vm1565_vm0, %v958_v59  ;;  %9221 = vmatprep.subr.msk.bf16.mxu1 %vm10812_vm1, %v9219_v54  ;;  %v1270_v59 = vld [vmem:[%s16895_s1 + $0x7c8] sm:$0xff]  ;;  %v1221_v54 = vld [vmem:[%s16895_s1 + $0x640] sm:$0xff]  ;;  %v9252_v60 = vpack.c.bf16 %v1258_v51, %v1257_v50  ;;  %v972_v6 = vmul.f32 0.25, %v844_v0  ;;  %v12197_v50 = vld [vmem:[%s12165_s10 + $0x10] sm:$0xff] }
 0x12b   : > { %8017 = vmatprep.mubr.msk.f32.mxu0 %vm1565_vm0, %v959_v3 }
 0x12c   : > { %8080 = vmatmul.mubr.msk.f32.gmra.mrb[66].mxu1 %vm1565_vm0, %v974_v1  ;;  %v9237_v1 = vpack.c.bf16 %v1270_v59, %v1269_v58  ;;  %v9207_v58 = vpack.c.bf16 %v1244_v47, %v1243_v46  ;;  %v1293_v46 = vld [vmem:[%s16896_s2 + $0x80] sm:$0xff]  ;;  %v1294_v47 = vld [vmem:[%s16896_s2 + $0x88] sm:$0xff] }
 0x12d   : > { %8081 = vmatprep.mubr.msk.f32.mxu1 %vm1565_vm0, %v975_v8 }
 0x12e   : > { %8018 = vmatmul.mubr.msk.f32.gmra.mrb[68].mxu0 %vm1565_vm0, %v959_v3  ;;  %v1222_v3 = vld [vmem:[%s16895_s1 + $0x648] sm:$0xff] }
 0x12f   : > { %8019 = vmatprep.mubr.msk.f32.mxu0 %vm1565_vm0, %v960_v14  ;;  %9176 = vmatpush3.bf16.xpose.msk.msra.mxu0 %vm10812_vm1, %v9174_v15  ;;  %v9192_v12 = vpack.c.bf16 %v1222_v3, %v1221_v54  ;;  %v839_v15 = vld [vmem:[%s10928_s5 + $0x250] sm:$0xff]  ;;  %v860_v54 = vld [vmem:[%s10928_s5 + $0x2f8] sm:$0xff] }
 0x130   : > { %8082 = vmatmul.mubr.msk.f32.gmra.mrb[68].mxu1 %vm1565_vm0, %v975_v8  ;;  %9179 = vmatprep.subr.msk.bf16.mxu0 %vm10812_vm1, %v9177_v19  ;;  %v854_v8 = vld [vmem:[%s10928_s5 + $0x2c8] sm:$0xff]  ;;  %v855_v19 = vld [vmem:[%s10928_s5 + $0x2d0] sm:$0xff]  ;;  %v988_v9 = vmul.f32 0.25, %v860_v54 }
 0x131   : > { %8083 = vmatprep.mubr.msk.f32.mxu1 %vm1565_vm0, %v976_v20  ;;  %9224 = vmatpush3.bf16.xpose.msk.msra.mxu1 %vm10812_vm1, %v9222_v21  ;;  %v982_v17 = vmul.f32 0.25, %v854_v8  ;;  %v967_v21 = vmul.f32 0.25, %v839_v15  ;;  %v983_v25 = vmul.f32 0.25, %v855_v19  ;;  %v1259_v3 = vld [vmem:[%s16895_s1 + $0x770] sm:$0xff]  ;;  %v861_v8 = vld [vmem:[%s10928_s5 + $0x300] sm:$0xff]  ;;  %v878_v15 = vld [vmem:[%s10928_s5 + $0x388] sm:$0xff] }
 0x132   : > { %8020 = vmatmul.mubr.msk.f32.gmra.mrb[70].mxu0 %vm1565_vm0, %v960_v14  ;;  %9227 = vmatprep.subr.msk.bf16.mxu1 %vm10812_vm1, %v9225_v23  ;;  %v1272_v14 = vld [vmem:[%s16895_s1 + $0x7d8] sm:$0xff]  ;;  %v1223_v23 = vld [vmem:[%s16895_s1 + $0x650] sm:$0xff] }
 0x133   : > { %8021 = vmatprep.mubr.msk.f32.mxu0 %vm1565_vm0, %v961_v24 }
 0x134   : > { %8084 = vmatmul.mubr.msk.f32.gmra.mrb[70].mxu1 %vm1565_vm0, %v976_v20  ;;  %v9243_v20 = vpack.c.bf16 %v1272_v14, %v1271_v13  ;;  %v862_v13 = vld [vmem:[%s10928_s5 + $0x308] sm:$0xff] }
 0x135   : > { %8085 = vmatprep.mubr.msk.f32.mxu1 %vm1565_vm0, %v977_v28 }
 0x136   : > { %8022 = vmatmul.mubr.msk.f32.gmra.mrb[72].mxu0 %vm1565_vm0, %v961_v24  ;;  %v1224_v24 = vld [vmem:[%s16895_s1 + $0x658] sm:$0xff] }
 0x137   : > { %8023 = vmatprep.mubr.msk.f32.mxu0 %vm1565_vm0, %v962_v34  ;;  %9182 = vmatpush3.bf16.xpose.msk.msra.mxu0 %vm10812_vm1, %v9180_v35  ;;  %v9198_v32 = vpack.c.bf16 %v1224_v24, %v1223_v23  ;;  %v841_v35 = vld [vmem:[%s10928_s5 + $0x260] sm:$0xff] }
 0x138   : > { %8086 = vmatmul.mubr.msk.f32.gmra.mrb[72].mxu1 %vm1565_vm0, %v977_v28  ;;  %9185 = vmatprep.subr.msk.bf16.mxu0 %vm10812_vm1, %v9183_v39  ;;  %v856_v28 = vld [vmem:[%s10928_s5 + $0x2d8] sm:$0xff]  ;;  %v857_v39 = vld [vmem:[%s10928_s5 + $0x2e0] sm:$0xff] }
 0x139   : > { %8087 = vmatprep.mubr.msk.f32.mxu1 %vm1565_vm0, %v978_v40  ;;  %9230 = vmatpush3.bf16.xpose.msk.msra.mxu1 %vm10812_vm1, %v9228_v41  ;;  %v984_v37 = vmul.f32 0.25, %v856_v28  ;;  %v969_v41 = vmul.f32 0.25, %v841_v35  ;;  %v985_v45 = vmul.f32 0.25, %v857_v39  ;;  %v865_v24 = vld [vmem:[%s10928_s5 + $0x320] sm:$0xff]  ;;  %v866_v28 = vld [vmem:[%s10928_s5 + $0x328] sm:$0xff] }
 0x13a   : > { %8024 = vmatmul.mubr.msk.f32.gmra.mrb[74].mxu0 %vm1565_vm0, %v962_v34  ;;  %9233 = vmatprep.subr.msk.bf16.mxu1 %vm10812_vm1, %v9231_v43  ;;  %v1274_v34 = vld [vmem:[%s16895_s1 + $0x7e8] sm:$0xff]  ;;  %v1225_v43 = vld [vmem:[%s16895_s1 + $0x660] sm:$0xff]  ;;  %v993_v27 = vmul.f32 0.25, %v865_v24 }
 0x13b   : > { %8025 = vmatprep.mubr.msk.f32.mxu0 %vm1565_vm0, %v963_v44  ;;  %v12173_v35 = vld [vmem:[%s12165_s10] sm:$0xff]  ;;  %v870_v24 = vld [vmem:[%s10928_s5 + $0x348] sm:$0xff] }
 0x13c   : > { %8088 = vmatmul.mubr.msk.f32.gmra.mrb[74].mxu1 %vm1565_vm0, %v978_v40  ;;  %v9249_v40 = vpack.c.bf16 %v1274_v34, %v1273_v33  ;;  %v1010_v33 = vmul.f32 0.25, %v882_v30  ;;  %v883_v34 = vld [vmem:[%s10928_s5 + $0x3b0] sm:$0xff]  ;;  %v886_v30 = vld [vmem:[%s10928_s5 + $0x3c8] sm:$0xff] }
 0x13d   : > { %8089 = vmatprep.mubr.msk.f32.mxu1 %vm1565_vm0, %v979_v48 }
 0x13e   : > { %8026 = vmatmul.mubr.msk.f32.gmra.mrb[76].mxu0 %vm1565_vm0, %v963_v44  ;;  %v1226_v44 = vld [vmem:[%s16895_s1 + $0x668] sm:$0xff] }
 0x13f   : > { %8027 = vmatprep.mubr.msk.f32.mxu0 %vm1565_vm0, %v964_v56  ;;  %9188 = vmatpush3.bf16.xpose.msk.msra.mxu0 %vm10812_vm1, %v9186_v57  ;;  %v9204_v53 = vpack.c.bf16 %v1226_v44, %v1225_v43  ;;  %v843_v57 = vld [vmem:[%s10928_s5 + $0x270] sm:$0xff] }
 0x140   : > { %8090 = vmatmul.mubr.msk.f32.gmra.mrb[76].mxu1 %vm1565_vm0, %v979_v48  ;;  %9191 = vmatprep.subr.msk.bf16.mxu0 %vm10812_vm1, %v9189_v61  ;;  %v858_v48 = vld [vmem:[%s10928_s5 + $0x2e8] sm:$0xff]  ;;  %v859_v61 = vld [vmem:[%s10928_s5 + $0x2f0] sm:$0xff] }
 0x141   : > { %8091 = vmatprep.mubr.msk.f32.mxu1 %vm1565_vm0, %v980_v62  ;;  %9236 = vmatpush3.bf16.xpose.msk.msra.mxu1 %vm10812_vm1, %v9234_v63  ;;  %v986_v59 = vmul.f32 0.25, %v858_v48  ;;  %v971_v63 = vmul.f32 0.25, %v843_v57  ;;  %v987_v49 = vmul.f32 0.25, %v859_v61 }
 0x142   : > { %8028 = vmatmul.mubr.msk.f32.gmra.mrb[78].mxu0 %vm1565_vm0, %v964_v56  ;;  %9239 = vmatprep.subr.msk.bf16.mxu1 %vm10812_vm1, %v9237_v1  ;;  %v1276_v56 = vld [vmem:[%s16895_s1 + $0x7f8] sm:$0xff]  ;;  %v1227_v1 = vld [vmem:[%s16895_s1 + $0x670] sm:$0xff] }
 0x143   : > { %8029 = vmatprep.mubr.msk.f32.mxu0 %vm1565_vm0, %v965_v2 }
 0x144   : > { %8092 = vmatmul.mubr.msk.f32.gmra.mrb[78].mxu1 %vm1565_vm0, %v980_v62  ;;  %v9255_v62 = vpack.c.bf16 %v1276_v56, %v1275_v55  ;;  %v1278_v55 = vld [vmem:[%s16896_s2 + $0x8] sm:$0xff] }
 0x145   : > { %8093 = vmatprep.mubr.msk.f32.mxu1 %vm1565_vm0, %v981_v5 }
 0x146   : > { %8030 = vmatmul.mubr.msk.f32.gmra.mrb[80].mxu0 %vm1565_vm0, %v965_v2  ;;  %v1228_v2 = vld [vmem:[%s16895_s1 + $0x678] sm:$0xff] }
 0x147   : > { %8031 = vmatprep.mubr.msk.f32.mxu0 %vm1565_vm0, %v966_v11  ;;  %9194 = vmatpush3.bf16.xpose.msk.msra.mxu0 %vm10812_vm1, %v9192_v12  ;;  %v9210_v7 = vpack.c.bf16 %v1228_v2, %v1227_v1  ;;  %v989_v12 = vmul.f32 0.25, %v861_v8  ;;  %v869_v1 = vld [vmem:[%s10928_s5 + $0x340] sm:$0xff] }
 0x148   : > { %8094 = vmatmul.mubr.msk.f32.gmra.mrb[80].mxu1 %vm1565_vm0, %v981_v5  ;;  %9197 = vmatprep.subr.msk.bf16.mxu0 %vm10812_vm1, %v9195_v16  ;;  %v1260_v5 = vld [vmem:[%s16895_s1 + $0x778] sm:$0xff]  ;;  %v990_v16 = vmul.f32 0.25, %v862_v13 }
 0x149   : > { %8095 = vmatprep.mubr.msk.f32.mxu1 %vm1565_vm0, %v982_v17  ;;  %9242 = vmatpush3.bf16.xpose.msk.msra.mxu1 %vm10812_vm1, %v9240_v18  ;;  %v9258_v10 = vpack.c.bf16 %v1260_v5, %v1259_v3  ;;  %v1006_v18 = vmul.f32 0.25, %v878_v15  ;;  %v12227_v3 = vld [vmem:[%s12165_s10 + $0x28] sm:$0xff]  ;;  %v885_v5 = vld [vmem:[%s10928_s5 + $0x3c0] sm:$0xff]  ;;  %v997_v15 = vmul.f32 0.25, %v869_v1 }
 0x14a   : > { %8032 = vmatmul.mubr.msk.f32.gmra.mrb[82].mxu0 %vm1565_vm0, %v966_v11  ;;  %9245 = vmatprep.subr.msk.bf16.mxu1 %vm10812_vm1, %v9243_v20  ;;  %v877_v11 = vld [vmem:[%s10928_s5 + $0x380] sm:$0xff]  ;;  %v864_v20 = vld [vmem:[%s10928_s5 + $0x318] sm:$0xff] }
 0x14b   : > { %8033 = vmatprep.mubr.msk.f32.mxu0 %vm1565_vm0, %v967_v21  ;;  %v1005_v14 = vmul.f32 0.25, %v877_v11  ;;  %v992_v23 = vmul.f32 0.25, %v864_v20  ;;  %v1326_v11 = vld [vmem:[%s16896_s2 + $0x188] sm:$0xff]  ;;  %v1281_v1 = vld [vmem:[%s16896_s2 + $0x20] sm:$0xff] }
 0x14c   : > { %8096 = vmatmul.mubr.msk.f32.gmra.mrb[82].mxu1 %vm1565_vm0, %v982_v17  ;;  %v863_v17 = vld [vmem:[%s10928_s5 + $0x310] sm:$0xff] }
 0x14d   : > { %8097 = vmatprep.mubr.msk.f32.mxu1 %vm1565_vm0, %v983_v25  ;;  %v991_v19 = vmul.f32 0.25, %v863_v17  ;;  %v1280_v17 = vld [vmem:[%s16896_s2 + $0x18] sm:$0xff] }
 0x14e   : > { %8034 = vmatmul.mubr.msk.f32.gmra.mrb[84].mxu0 %vm1565_vm0, %v967_v21  ;;  %v1007_v21 = vmul.f32 0.25, %v879_v4  ;;  %v1310_v4 = vld [vmem:[%s16896_s2 + $0x108] sm:$0xff] }
 0x14f   : > { %8035 = vmatprep.mubr.msk.f32.mxu0 %vm1565_vm0, %v968_v31  ;;  %9200 = vmatpush3.bf16.xpose.msk.msra.mxu0 %vm10812_vm1, %v9198_v32  ;;  %v867_v32 = vld [vmem:[%s10928_s5 + $0x330] sm:$0xff] }
 0x150   : > { %8098 = vmatmul.mubr.msk.f32.gmra.mrb[84].mxu1 %vm1565_vm0, %v983_v25  ;;  %9203 = vmatprep.subr.msk.bf16.mxu0 %vm10812_vm1, %v9201_v36  ;;  %v1008_v25 = vmul.f32 0.25, %v880_v22  ;;  %v995_v36 = vmul.f32 0.25, %v867_v32  ;;  %v1297_v32 = vld [vmem:[%s16896_s2 + $0xa0] sm:$0xff] }
 0x151   : > { %8099 = vmatprep.mubr.msk.f32.mxu1 %vm1565_vm0, %v984_v37  ;;  %9248 = vmatpush3.bf16.xpose.msk.msra.mxu1 %vm10812_vm1, %v9246_v38  ;;  %v868_v38 = vld [vmem:[%s10928_s5 + $0x338] sm:$0xff] }
 0x152   : > { %8036 = vmatmul.mubr.msk.f32.gmra.mrb[86].mxu0 %vm1565_vm0, %v968_v31  ;;  %9251 = vmatprep.subr.msk.bf16.mxu1 %vm10812_vm1, %v9249_v40  ;;  %v994_v31 = vmul.f32 0.25, %v866_v28  ;;  %v996_v51 = vmul.f32 0.25, %v868_v38 }
 0x153   : > { %8037 = vmatprep.mubr.msk.f32.mxu0 %vm1565_vm0, %v969_v41 }
 0x154   : > { %8100 = vmatmul.mubr.msk.f32.gmra.mrb[86].mxu1 %vm1565_vm0, %v984_v37  ;;  %v12177_v37 = vld [vmem:[%s12165_s10 + $0x8] sm:$0xff] }
 0x155   : > { %8101 = vmatprep.mubr.msk.f32.mxu1 %vm1565_vm0, %v985_v45 }
 0x156   : > { %8038 = vmatmul.mubr.msk.f32.gmra.mrb[88].mxu0 %vm1565_vm0, %v969_v41  ;;  %v1011_v41 = vmul.f32 0.25, %v883_v34 }
 0x157   : > { %8039 = vmatprep.mubr.msk.f32.mxu0 %vm1565_vm0, %v970_v52  ;;  %9206 = vmatpush3.bf16.xpose.msk.msra.mxu0 %vm10812_vm1, %v9204_v53  ;;  %v1277_v53 = vld [vmem:[%s16896_s2] sm:$0xff] }
 0x158   : > { %8102 = vmatmul.mubr.msk.f32.gmra.mrb[88].mxu1 %vm1565_vm0, %v985_v45  ;;  %9209 = vmatprep.subr.msk.bf16.mxu0 %vm10812_vm1, %v9207_v58  ;;  %v884_v45 = vld [vmem:[%s10928_s5 + $0x3b8] sm:$0xff] }
 0x159   : > { %8103 = vmatprep.mubr.msk.f32.mxu1 %vm1565_vm0, %v986_v59  ;;  %9254 = vmatpush3.bf16.xpose.msk.msra.mxu1 %vm10812_vm1, %v9252_v60  ;;  %v12213_v58 = vld [vmem:[%s12165_s10 + $0x18] sm:$0xff]  ;;  %v1012_v0 = vmul.f32 0.25, %v884_v45 }
 0x15a   : > { %8040 = vmatmul.mubr.msk.f32.gmra.mrb[90].mxu0 %vm1565_vm0, %v970_v52  ;;  %9257 = vmatprep.subr.msk.bf16.mxu1 %vm10812_vm1, %v9255_v62  ;;  %v9261_v52 = vpack.c.bf16 %v1294_v47, %v1293_v46 }
 0x15b   : > { %8041 = vmatprep.mubr.msk.f32.mxu0 %vm1565_vm0, %v971_v63 }
 0x15c   : > { %8104 = vmatmul.mubr.msk.f32.gmra.mrb[90].mxu1 %vm1565_vm0, %v986_v59  ;;  %v9263_v59 = vpack.c.bf16 %v1278_v55, %v1277_v53 }
 0x15d   : > { %8105 = vmatprep.mubr.msk.f32.mxu1 %vm1565_vm0, %v987_v49 }
 0x15e   : > { %8042 = vmatmul.mubr.msk.f32.gmra.mrb[92].mxu0 %vm1565_vm0, %v971_v63  ;;  %v12219_v63 = vld [vmem:[%s12165_s10 + $0x20] sm:$0xff] }
 0x15f   : > { %8043 = vmatprep.mubr.msk.f32.mxu0 %vm1565_vm0, %v972_v6  ;;  %9212 = vmatpush3.bf16.xpose.msk.msra.mxu0 %vm10812_vm1, %v9210_v7  ;;  %v1296_v7 = vld [vmem:[%s16896_s2 + $0x98] sm:$0xff] }
 0x160   : > { %8106 = vmatmul.mubr.msk.f32.gmra.mrb[92].mxu1 %vm1565_vm0, %v987_v49  ;;  %9262 = vmatprep.subr.bf16.mxu0 %v9261_v52  ;;  %v871_v52 = vld [vmem:[%s10928_s5 + $0x350] sm:$0xff] }
 0x161   : > { %8107 = vmatprep.mubr.msk.f32.mxu1 %vm1565_vm0, %v988_v9  ;;  %9260 = vmatpush3.bf16.xpose.msk.msra.mxu1 %vm10812_vm1, %v9258_v10  ;;  %v1325_v10 = vld [vmem:[%s16896_s2 + $0x180] sm:$0xff] }
 0x162   : > { %8044 = vmatmul.mubr.msk.f32.gmra.mrb[94].mxu0 %vm1565_vm0, %v972_v6  ;;  %v1295_v6 = vld [vmem:[%s16896_s2 + $0x90] sm:$0xff] }
 0x163   : > { %8141 = vmatprep.mubr.msk.f32.mxu0 %vm1565_vm0, %v989_v12 }
 0x164   : > { %8108 = vmatmul.mubr.msk.f32.gmra.mrb[94].mxu1 %vm1565_vm0, %v988_v9  ;;  %v9265_v9 = vpack.c.bf16 %v1296_v7, %v1295_v6 }
 0x165   : > { %8205 = vmatprep.mubr.msk.f32.mxu1 %vm1565_vm0, %v1005_v14 }
 0x166   : > { %8142 = vmatmul.mubr.msk.f32.vlgmr.msra.gmra.mrb[96].mxu0 %vm1565_vm0, %v989_v12  ;;  %v1279_v12 = vld [vmem:[%s16896_s2 + $0x10] sm:$0xff] }
 0x167   : > { %8143 = vmatprep.mubr.msk.f32.mxu0 %vm1565_vm0, %v990_v16  ;;  %9264 = vmatpush3.bf16.msra.mxu0 %v9263_v59 }
 0x168   : > { %8206 = vmatmul.mubr.msk.f32.vlgmr.msra.gmra.mrb[96].mxu1 %vm1565_vm0, %v1005_v14  ;;  %9266 = vmatprep.subr.bf16.mxu0 %v9265_v9  ;;  %v1311_v9 = vld [vmem:[%s16896_s2 + $0x110] sm:$0xff] }
 0x169   : > { %8207 = vmatprep.mubr.msk.f32.mxu1 %vm1565_vm0, %v1006_v18 }
 0x16a   : > { %8144 = vmatmul.mubr.msk.f32.gmra.mrb[98].mxu0 %vm1565_vm0, %v990_v16  ;;  %v9293_v16 = vpack.c.bf16 %v1326_v11, %v1325_v10  ;;  %v1312_v10 = vld [vmem:[%s16896_s2 + $0x118] sm:$0xff]  ;;  %v12344_v11 = vld [vmem:[%s12165_s10 + $0x48] sm:$0xff] }
 0x16b   : > { %8145 = vmatprep.mubr.msk.f32.mxu0 %vm1565_vm0, %v991_v19 }
 0x16c   : > { %8208 = vmatmul.mubr.msk.f32.gmra.mrb[98].mxu1 %vm1565_vm0, %v1006_v18  ;;  %v1309_v18 = vld [vmem:[%s16896_s2 + $0x100] sm:$0xff]  ;;  %9294 = vmatprep.subr.bf16.mxu1 %v9293_v16 }
 0x16d   : > { %8209 = vmatprep.mubr.msk.f32.mxu1 %vm1565_vm0, %v1007_v21 }
 0x16e   : > { %8146 = vmatmul.mubr.msk.f32.gmra.mrb[100].mxu0 %vm1565_vm0, %v991_v19 }
 0x16f   : > { %8147 = vmatprep.mubr.msk.f32.mxu0 %vm1565_vm0, %v992_v23 }
 0x170   : > { %8210 = vmatmul.mubr.msk.f32.gmra.mrb[100].mxu1 %vm1565_vm0, %v1007_v21 }
 0x171   : > { %8211 = vmatprep.mubr.msk.f32.mxu1 %vm1565_vm0, %v1008_v25 }
 0x172   : > { %8148 = vmatmul.mubr.msk.f32.gmra.mrb[102].mxu0 %vm1565_vm0, %v992_v23  ;;  %v1013_v23 = vmul.f32 0.25, %v885_v5  ;;  %v12329_v5 = vld [vmem:[%s12165_s10 + $0x40] sm:$0xff] }
 0x173   : > { %8149 = vmatprep.mubr.msk.f32.mxu0 %vm1565_vm0, %v993_v27 }
 0x174   : > { %8212 = vmatmul.mubr.msk.f32.gmra.mrb[102].mxu1 %vm1565_vm0, %v1008_v25  ;;  %v9267_v25 = vpack.c.bf16 %v1280_v17, %v1279_v12  ;;  %v999_v12 = vmul.f32 0.25, %v871_v52 }
 0x175   : > { %8213 = vmatprep.mubr.msk.f32.mxu1 %vm1565_vm0, %v1009_v29 }
 0x176   : > { %8150 = vmatmul.mubr.msk.f32.gmra.mrb[104].mxu0 %vm1565_vm0, %v993_v27 }
 0x177   : > { %8151 = vmatprep.mubr.msk.f32.mxu0 %vm1565_vm0, %v994_v31  ;;  %9268 = vmatpush3.bf16.msra.mxu0 %v9267_v25  ;;  %v9299_v25 = vpack.c.bf16 %v1312_v10, %v1311_v9  ;;  %v1284_v9 = vld [vmem:[%s16896_s2 + $0x38] sm:$0xff] }
 0x178   : > { %8214 = vmatmul.mubr.msk.f32.gmra.mrb[104].mxu1 %vm1565_vm0, %v1009_v29 }
 0x179   : > { %v1776_v39 = vpop.f32.mrb[0].mxu0  ;;  %8215 = vmatprep.mubr.msk.f32.mxu1 %vm1565_vm0, %v1010_v33 }
 0x17a   : > { %v2081_v40 = vpop.f32.mrb[0].mxu1  ;;  %v12183_v42 = vadd.f32 %v1776_v39, %v12173_v35  ;;  %v1778_v43 = vpop.f32.mrb[1].mxu0  ;;  %8152 = vmatmul.mubr.msk.f32.gmra.mrb[106].mxu0 %vm1565_vm0, %v994_v31  ;;  %v9295_v31 = vpack.c.bf16 %v1310_v4, %v1309_v18  ;;  %v1327_v39 = vld [vmem:[%s16896_s2 + $0x190] sm:$0xff]  ;;  %v872_v18 = vld [vmem:[%s10928_s5 + $0x358] sm:$0xff] }
 0x17b   : > { %v2083_v44 = vpop.f32.mrb[1].mxu1  ;;  %v12194_v48 = vadd.f32 %v1778_v43, %v12177_v37  ;;  %8153 = vmatprep.mubr.msk.f32.mxu0 %vm1565_vm0, %v995_v36  ;;  %v12207_v56 = vadd.f32 %v2081_v40, %v12173_v35  ;;  %v1328_v40 = vld [vmem:[%s16896_s2 + $0x198] sm:$0xff]  ;;  %v998_v43 = vmul.f32 0.25, %v870_v24 }
 0x17c   : > { %v12210_v57 = vadd.f32 %v2083_v44, %v12177_v37  ;;  %8216 = vmatmul.mubr.msk.f32.gmra.mrb[106].mxu1 %vm1565_vm0, %v1010_v33  ;;  %v1298_v33 = vld [vmem:[%s16896_s2 + $0xa8] sm:$0xff]  ;;  %v888_v24 = vld [vmem:[%s10928_s5 + $0x3d8] sm:$0xff] }
 0x17d   : > { %v1782_v61 = vpop.f32.mrb[2].mxu0  ;;  %v4006_v62 = vmax.f32 %v12183_v42, %v12194_v48  ;;  %8217 = vmatprep.mubr.msk.f32.mxu1 %vm1565_vm0, %v1011_v41  ;;  %v9269_v53 = vpack.c.bf16 %v1298_v33, %v1297_v32  ;;  %9296 = vmatpush3.bf16.msra.mxu1 %v9295_v31  ;;  %v12370_v31 = vld [vmem:[%s12165_s10 + $0x50] sm:$0xff]  ;;  %v1016_v52 = vmul.f32 0.25, %v888_v24 }
 0x17e   : > { %v2087_v60 = vpop.f32.mrb[2].mxu1  ;;  %v1784_v54 = vpop.f32.mrb[3].mxu0  ;;  %8154 = vmatmul.mubr.msk.f32.gmra.mrb[108].mxu0 %vm1565_vm0, %v995_v36  ;;  %v12251_v13 = vadd.f32 %v1782_v61, %v12197_v50  ;;  %v4054_v14 = vmax.f32 %v12207_v56, %v12210_v57  ;;  %v12290_v36 = vld [vmem:[%s12165_s10 + $0x30] sm:$0xff] }
 0x17f   : > { %v12224_v2 = vadd.f32 %v2087_v60, %v12197_v50  ;;  %v2089_v49 = vpop.f32.mrb[3].mxu1  ;;  %4007 = vmax.xlane.f32.xlu0 %v4006_v62  ;;  %8155 = vmatprep.mubr.msk.f32.mxu0 %vm1565_vm0, %v996_v51  ;;  %v12266_v19 = vadd.f32 %v1784_v54, %v12213_v58  ;;  %v887_v62 = vld [vmem:[%s10928_s5 + $0x3d0] sm:$0xff] }
 0x180   : > { %v12238_v8 = vadd.f32 %v2089_v49, %v12213_v58  ;;  %8218 = vmatmul.mubr.msk.f32.gmra.mrb[108].mxu1 %vm1565_vm0, %v1011_v41  ;;  %v12302_v41 = vld [vmem:[%s12165_s10 + $0x38] sm:$0xff]  ;;  %v1282_v49 = vld [vmem:[%s16896_s2 + $0x28] sm:$0xff]  ;;  %v1015_v17 = vmul.f32 0.25, %v887_v62  ;;  %9270 = vmatprep.subr.bf16.mxu0 %v9269_v53  ;;  %v873_v53 = vld [vmem:[%s10928_s5 + $0x360] sm:$0xff] }
 0x181   : > { %v1788_v20 = vpop.f32.mrb[4].mxu0  ;;  %8219 = vmatprep.mubr.msk.f32.mxu1 %vm1565_vm0, %v1012_v0  ;;  %v4009_v46 = vmax.f32 %v12251_v13, %v12266_v19  ;;  %v9271_v4 = vpack.c.bf16 %v1282_v49, %v1281_v1  ;;  %v1283_v49 = vld [vmem:[%s16896_s2 + $0x30] sm:$0xff] }
 0x182   : > { %v4057_v21 = vmax.f32 %v12224_v2, %v12238_v8  ;;  %v2093_v22 = vpop.f32.mrb[4].mxu1  ;;  %v12273_v26 = vadd.f32 %v1788_v20, %v12219_v63  ;;  %v1790_v27 = vpop.f32.mrb[5].mxu0  ;;  %8156 = vmatmul.mubr.msk.f32.gmra.mrb[110].mxu0 %vm1565_vm0, %v996_v51  ;;  %v1014_v51 = vmul.f32 0.25, %v886_v30 }
 0x183   : > { %v12276_v28 = vadd.f32 %v2093_v22, %v12219_v63  ;;  %v2095_v29 = vpop.f32.mrb[5].mxu1  ;;  %v12287_v34 = vadd.f32 %v1790_v27, %v12227_v3  ;;  %4055 = vmax.xlane.f32.xlu0 %v4054_v14  ;;  %8157 = vmatprep.mubr.msk.f32.mxu0 %vm1565_vm0, %v997_v15  ;;  %v1299_v27 = vld [vmem:[%s16896_s2 + $0xb0] sm:$0xff] }
 0x184   : > { %4058 = vmax.xlane.f32.xlu1 %v4057_v21  ;;  %v12293_v38 = vadd.f32 %v2095_v29, %v12227_v3  ;;  %8220 = vmatmul.mubr.msk.f32.gmra.mrb[110].mxu1 %vm1565_vm0, %v1012_v0  ;;  %v9297_v0 = vpack.c.bf16 %v1328_v40, %v1327_v39  ;;  %v1300_v29 = vld [vmem:[%s16896_s2 + $0xb8] sm:$0xff]  ;;  %v1329_v39 = vld [vmem:[%s16896_s2 + $0x1a0] sm:$0xff]  ;;  %v1330_v40 = vld [vmem:[%s16896_s2 + $0x1a8] sm:$0xff] }
 0x185   : > { %v1794_v44 = vpop.f32.mrb[6].mxu0  ;;  %v4012_v45 = vmax.f32 %v12273_v26, %v12287_v34  ;;  %8221 = vmatprep.mubr.msk.f32.mxu1 %vm1565_vm0, %v1013_v23  ;;  %9272 = vmatpush3.bf16.msra.mxu0 %v9271_v4  ;;  %v9301_v1 = vpack.c.bf16 %v1330_v40, %v1329_v39  ;;  %v12424_v4 = vld [vmem:[%s12165_s10 + $0x68] sm:$0xff] }
 0x186   : > { %v2099_v47 = vpop.f32.mrb[6].mxu1  ;;  %v12313_v55 = vadd.f32 %v1794_v44, %v12290_v36  ;;  %v1796_v59 = vpop.f32.mrb[7].mxu0  ;;  %v4060_v61 = vmax.f32 %v12276_v28, %v12293_v38  ;;  %8158 = vmatmul.mubr.msk.f32.gmra.mrb[112].mxu0 %vm1565_vm0, %v997_v15  ;;  %9298 = vmatprep.subr.bf16.mxu1 %v9297_v0  ;;  %v1000_v44 = vmul.f32 0.25, %v872_v18  ;;  %v889_v0 = vld [vmem:[%s10928_s5 + $0x3e0] sm:$0xff]  ;;  %v1314_v18 = vld [vmem:[%s16896_s2 + $0x128] sm:$0xff] }
 0x187   : > { %v2101_v60 = vpop.f32.mrb[7].mxu1  ;;  %v12326_v54 = vadd.f32 %v1796_v59, %v12302_v41  ;;  %4010 = vmax.xlane.f32.xlu0 %v4009_v46  ;;  %v12332_v6 = vadd.f32 %v2099_v47, %v12290_v36  ;;  %8159 = vmatprep.mubr.msk.f32.mxu0 %vm1565_vm0, %v998_v43  ;;  %v9273_v59 = vpack.c.bf16 %v1300_v29, %v1299_v27  ;;  %v1017_v27 = vmul.f32 0.25, %v889_v0  ;;  %v874_v29 = vld [vmem:[%s10928_s5 + $0x368] sm:$0xff] }
 0x188   : > { %4013 = vmax.xlane.f32.xlu1 %v4012_v45  ;;  %v12335_v7 = vadd.f32 %v2101_v60, %v12302_v41  ;;  %8222 = vmatmul.mubr.msk.f32.gmra.mrb[112].mxu1 %vm1565_vm0, %v1013_v23 }
 0x189   : > { %17272 = vst [vmem:[#allocation6_spill] sm:$0xff] %v12332_v6  ;;  %v1800_v14 = vpop.f32.mrb[8].mxu0  ;;  %v4015_v15 = vmax.f32 %v12313_v55, %v12326_v54  ;;  %8223 = vmatprep.mubr.msk.f32.mxu1 %vm1565_vm0, %v1014_v51  ;;  %9300 = vmatpush3.bf16.msra.mxu1 %v9299_v25 }
 0x18a   : > { %17273 = vst [vmem:[#allocation7_spill] sm:$0xff] %v12335_v7  ;;  %v2105_v16 = vpop.f32.mrb[8].mxu1  ;;  %v12353_v20 = vadd.f32 %v1800_v14, %v12329_v5  ;;  %v1802_v21 = vpop.f32.mrb[9].mxu0  ;;  %8160 = vmatmul.mubr.msk.f32.gmra.mrb[114].mxu0 %vm1565_vm0, %v998_v43  ;;  %v4063_v33 = vmax.f32 %v12332_v6, %v12335_v7  ;;  %v12384_v43 = vld [vmem:[%s12165_s10 + $0x58] sm:$0xff]  ;;  %v12409_v14 = vld [vmem:[%s12165_s10 + $0x60] sm:$0xff]  ;;  %9274 = vmatprep.subr.bf16.mxu0 %v9273_v59  ;;  %v1302_v59 = vld [vmem:[%s16896_s2 + $0xc8] sm:$0xff] }
 0x18b   : > { %v12356_v22 = vadd.f32 %v2105_v16, %v12329_v5  ;;  %v2107_v23 = vpop.f32.mrb[9].mxu1  ;;  %v12367_v30 = vadd.f32 %v1802_v21, %v12344_v11  ;;  %4061 = vmax.xlane.f32.xlu0 %v4060_v61  ;;  %8161 = vmatprep.mubr.msk.f32.mxu0 %vm1565_vm0, %v999_v12  ;;  %v1313_v16 = vld [vmem:[%s16896_s2 + $0x120] sm:$0xff]  ;;  %v1001_v21 = vmul.f32 0.25, %v873_v53  ;;  %v1291_v7 = vld [vmem:[%s16896_s2 + $0x70] sm:$0xff] }
 0x18c   : > { %17274 = vst [vmem:[#allocation8_spill] sm:$0xff] %v12353_v20  ;;  %4016 = vmax.xlane.f32.xlu1 %v4015_v15  ;;  %v12373_v32 = vadd.f32 %v2107_v23, %v12344_v11  ;;  %8224 = vmatmul.mubr.msk.f32.gmra.mrb[114].mxu1 %vm1565_vm0, %v1014_v51  ;;  %v1301_v53 = vld [vmem:[%s16896_s2 + $0xc0] sm:$0xff] }
 0x18d   : > { %17275 = vst [vmem:[#allocation9_spill] sm:$0xff] %v12356_v22  ;;  %17276 = vst [vmem:[#allocation10_spill] sm:$0xff] %v12367_v30  ;;  %v1806_v45 = vpop.f32.mrb[10].mxu0  ;;  %v4018_v46 = vmax.f32 %v12353_v20, %v12367_v30  ;;  %8225 = vmatprep.mubr.msk.f32.mxu1 %vm1565_vm0, %v1015_v17  ;;  %9302 = vmatprep.subr.bf16.mxu1 %v9301_v1  ;;  %v1331_v1 = vld [vmem:[%s16896_s2 + $0x1b0] sm:$0xff]  ;;  %v1289_v30 = vld [vmem:[%s16896_s2 + $0x60] sm:$0xff] }
 0x18e   : > { %17277 = vst [vmem:[#allocation11_spill] sm:$0xff] %v12373_v32  ;;  %v2111_v47 = vpop.f32.mrb[10].mxu1  ;;  %v12393_v60 = vadd.f32 %v1806_v45, %v12370_v31  ;;  %v1808_v51 = vpop.f32.mrb[11].mxu0  ;;  %v4066_v62 = vmax.f32 %v12356_v22, %v12373_v32  ;;  %8162 = vmatmul.mubr.msk.f32.gmra.mrb[116].mxu0 %vm1565_vm0, %v999_v12  ;;  %v1305_v22 = vld [vmem:[%s16896_s2 + $0xe0] sm:$0xff] }
 0x18f   : > { %v2113_v61 = vpop.f32.mrb[11].mxu1  ;;  %v12406_v10 = vadd.f32 %v1808_v51, %v12384_v43  ;;  %4019 = vmax.xlane.f32.xlu0 %v4018_v46  ;;  %v12412_v12 = vadd.f32 %v2111_v47, %v12370_v31  ;;  %8163 = vmatprep.mubr.msk.f32.mxu0 %vm1565_vm0, %v1000_v44  ;;  %v890_v46 = vld [vmem:[%s10928_s5 + $0x3e8] sm:$0xff]  ;;  %v9303_v47 = vpack.c.bf16 %v1314_v18, %v1313_v16 }
 0x190   : > { %17278 = vst [vmem:[#allocation12_spill] sm:$0xff] %v12393_v60  ;;  %4064 = vmax.xlane.f32.xlu1 %v4063_v33  ;;  %v12415_v15 = vadd.f32 %v2113_v61, %v12384_v43  ;;  %8226 = vmatmul.mubr.msk.f32.gmra.mrb[116].mxu1 %vm1565_vm0, %v1015_v17  ;;  %v9275_v33 = vpack.c.bf16 %v1284_v9, %v1283_v49  ;;  %v12450_v61 = vld [vmem:[%s12165_s10 + $0x70] sm:$0xff]  ;;  %v1332_v49 = vld [vmem:[%s16896_s2 + $0x1b8] sm:$0xff] }
 0x191   : > { %17279 = vst [vmem:[#allocation13_spill] sm:$0xff] %v12406_v10  ;;  %17280 = vst [vmem:[#allocation14_spill] sm:$0xff] %v12412_v12  ;;  %v1812_v23 = vpop.f32.mrb[12].mxu0  ;;  %v4021_v24 = vmax.f32 %v12393_v60, %v12406_v10  ;;  %8227 = vmatprep.mubr.msk.f32.mxu1 %vm1565_vm0, %v1016_v52  ;;  %v12464_v9 = vld [vmem:[%s12165_s10 + $0x78] sm:$0xff]  ;;  %9304 = vmatpush3.bf16.msra.mxu1 %v9303_v47 }
 0x192   : > { %17281 = vst [vmem:[#allocation15_spill] sm:$0xff] %v12415_v15  ;;  %v2117_v25 = vpop.f32.mrb[12].mxu1  ;;  %v12433_v39 = vadd.f32 %v1812_v23, %v12409_v14  ;;  %v1814_v17 = vpop.f32.mrb[13].mxu0  ;;  %8164 = vmatmul.mubr.msk.f32.gmra.mrb[118].mxu0 %vm1565_vm0, %v1000_v44  ;;  %v4069_v0 = vmax.f32 %v12412_v12, %v12415_v15 }
 0x193   : > { %v12436_v40 = vadd.f32 %v2117_v25, %v12409_v14  ;;  %v2119_v45 = vpop.f32.mrb[13].mxu1  ;;  %v12447_v51 = vadd.f32 %v1814_v17, %v12424_v4  ;;  %4067 = vmax.xlane.f32.xlu0 %v4066_v62  ;;  %8165 = vmatprep.mubr.msk.f32.mxu0 %vm1565_vm0, %v1001_v21  ;;  %v1002_v62 = vmul.f32 0.25, %v874_v29  ;;  %v875_v25 = vld [vmem:[%s10928_s5 + $0x370] sm:$0xff]  ;;  %v9277_v17 = vpack.c.bf16 %v1302_v59, %v1301_v53  ;;  %v12489_v59 = vld [vmem:[%s12165_s10 + $0x80] sm:$0xff] }
 0x194   : > { %17282 = vst [vmem:[#allocation16_spill] sm:$0xff] %v12433_v39  ;;  %4022 = vmax.xlane.f32.xlu1 %v4021_v24  ;;  %v12453_v44 = vadd.f32 %v2119_v45, %v12424_v4  ;;  %8228 = vmatmul.mubr.msk.f32.gmra.mrb[118].mxu1 %vm1565_vm0, %v1016_v52  ;;  %v1018_v24 = vmul.f32 0.25, %v890_v46  ;;  %v1285_v46 = vld [vmem:[%s16896_s2 + $0x40] sm:$0xff] }
 0x195   : > { %17283 = vst [vmem:[#allocation17_spill] sm:$0xff] %v12436_v40  ;;  %17284 = vst [vmem:[#allocation18_spill] sm:$0xff] %v12447_v51  ;;  %v1818_v16 = vpop.f32.mrb[14].mxu0  ;;  %v4024_v18 = vmax.f32 %v12433_v39, %v12447_v51  ;;  %8229 = vmatprep.mubr.msk.f32.mxu1 %vm1565_vm0, %v1017_v27  ;;  %9276 = vmatpush3.bf16.msra.mxu0 %v9275_v33  ;;  %v891_v51 = vld [vmem:[%s10928_s5 + $0x3f0] sm:$0xff]  ;;  %v9305_v39 = vpack.c.bf16 %v1332_v49, %v1331_v1  ;;  %v1286_v33 = vld [vmem:[%s16896_s2 + $0x48] sm:$0xff] }
 0x196   : > { %17285 = vst [vmem:[#allocation19_spill] sm:$0xff] %v12453_v44  ;;  %v2123_v23 = vpop.f32.mrb[14].mxu1  ;;  %v12473_v45 = vadd.f32 %v1818_v16, %v12450_v61  ;;  %v1820_v52 = vpop.f32.mrb[15].mxu0  ;;  %v4072_v29 = vmax.f32 %v12436_v40, %v12453_v44  ;;  %8166 = vmatmul.mubr.msk.f32.gmra.mrb[120].mxu0 %vm1565_vm0, %v1001_v21  ;;  %v1315_v1 = vld [vmem:[%s16896_s2 + $0x130] sm:$0xff]  ;;  %v1316_v49 = vld [vmem:[%s16896_s2 + $0x138] sm:$0xff]  ;;  %v12504_v16 = vld [vmem:[%s12165_s10 + $0x88] sm:$0xff]  ;;  %9278 = vmatprep.subr.bf16.mxu0 %v9277_v17 }
 0x197   : > { %v2125_v15 = vpop.f32.mrb[15].mxu1  ;;  %v12486_v53 = vadd.f32 %v1820_v52, %v12464_v9  ;;  %4025 = vmax.xlane.f32.xlu0 %v4024_v18  ;;  %v12492_v21 = vadd.f32 %v2123_v23, %v12450_v61  ;;  %8167 = vmatprep.mubr.msk.f32.mxu0 %vm1565_vm0, %v1002_v62  ;;  %v1019_v52 = vmul.f32 0.25, %v891_v51  ;;  %v876_v44 = vld [vmem:[%s10928_s5 + $0x378] sm:$0xff]  ;;  %v9279_v40 = vpack.c.bf16 %v1286_v33, %v1285_v46  ;;  %v1303_v51 = vld [vmem:[%s16896_s2 + $0xd0] sm:$0xff] }
 0x198   : > { %17286 = vst [vmem:[#allocation20_spill] sm:$0xff] %v12473_v45  ;;  %4070 = vmax.xlane.f32.xlu1 %v4069_v0  ;;  %v12495_v47 = vadd.f32 %v2125_v15, %v12464_v9  ;;  %8230 = vmatmul.mubr.msk.f32.gmra.mrb[120].mxu1 %vm1565_vm0, %v1017_v27  ;;  %v1003_v0 = vmul.f32 0.25, %v875_v25  ;;  %v1304_v17 = vld [vmem:[%s16896_s2 + $0xd8] sm:$0xff]  ;;  %v12530_v33 = vld [vmem:[%s12165_s10 + $0x90] sm:$0xff] }
 0x199   : > { %17287 = vst [vmem:[#allocation21_spill] sm:$0xff] %v12486_v53  ;;  %17288 = vst [vmem:[#allocation22_spill] sm:$0xff] %v12492_v21  ;;  %v1824_v18 = vpop.f32.mrb[16].mxu0  ;;  %v4027_v15 = vmax.f32 %v12473_v45, %v12486_v53  ;;  %8231 = vmatprep.mubr.msk.f32.mxu1 %vm1565_vm0, %v1018_v24  ;;  %v892_v53 = vld [vmem:[%s10928_s5 + $0x3f8] sm:$0xff]  ;;  %9306 = vmatprep.subr.bf16.mxu1 %v9305_v39  ;;  %v9307_v45 = vpack.c.bf16 %v1316_v49, %v1315_v1  ;;  %v1333_v1 = vld [vmem:[%s16896_s2 + $0x1c0] sm:$0xff]  ;;  %s16847_s5 = scalar_lea.hbm %s16898_s4, %s7720_s13 }
 0x19a   : > { %17289 = vst [vmem:[#allocation23_spill] sm:$0xff] %v12495_v47  ;;  %v2129_v23 = vpop.f32.mrb[16].mxu1  ;;  %v12513_v12 = vadd.f32 %v1824_v18, %v12489_v59  ;;  %v1826_v27 = vpop.f32.mrb[17].mxu0  ;;  %8168 = vmatmul.mubr.msk.f32.gmra.mrb[122].mxu0 %vm1565_vm0, %v1002_v62  ;;  %v4075_v39 = vmax.f32 %v12492_v21, %v12495_v47  ;;  %v1334_v49 = vld [vmem:[%s16896_s2 + $0x1c8] sm:$0xff]  ;;  %v12544_v18 = vld [vmem:[%s12165_s10 + $0x98] sm:$0xff]  ;;  %v9281_v47 = vpack.c.bf16 %v1304_v17, %v1303_v51  ;;  %v1287_v21 = vld [vmem:[%s16896_s2 + $0x50] sm:$0xff] }
 0x19b   : > { %v12516_v32 = vadd.f32 %v2129_v23, %v12489_v59  ;;  %v2131_v25 = vpop.f32.mrb[17].mxu1  ;;  %v12527_v46 = vadd.f32 %v1826_v27, %v12504_v16  ;;  %4073 = vmax.xlane.f32.xlu0 %v4072_v29  ;;  %8169 = vmatprep.mubr.msk.f32.mxu0 %vm1565_vm0, %v1003_v0  ;;  %v1004_v29 = vmul.f32 0.25, %v876_v44  ;;  %v1317_v44 = vld [vmem:[%s16896_s2 + $0x140] sm:$0xff]  ;;  %v9309_v51 = vpack.c.bf16 %v1334_v49, %v1333_v1  ;;  %v1318_v17 = vld [vmem:[%s16896_s2 + $0x148] sm:$0xff]  ;;  %v1335_v49 = vld [vmem:[%s16896_s2 + $0x1d0] sm:$0xff] }
 0x19c   : > { %17290 = vst [vmem:[#allocation24_spill] sm:$0xff] %v12513_v12  ;;  %4028 = vmax.xlane.f32.xlu1 %v4027_v15  ;;  %v12533_v62 = vadd.f32 %v2131_v25, %v12504_v16  ;;  %8232 = vmatmul.mubr.msk.f32.gmra.mrb[122].mxu1 %vm1565_vm0, %v1018_v24  ;;  %v1020_v25 = vmul.f32 0.25, %v892_v53  ;;  %v1288_v24 = vld [vmem:[%s16896_s2 + $0x58] sm:$0xff] }
 0x19d   : > { %17291 = vst [vmem:[#allocation25_spill] sm:$0xff] %v12516_v32  ;;  %17292 = vst [vmem:[#allocation26_spill] sm:$0xff] %v12527_v46  ;;  %v1830_v15 = vpop.f32.mrb[18].mxu0  ;;  %v4030_v23 = vmax.f32 %v12513_v12, %v12527_v46  ;;  %8233 = vmatprep.mubr.msk.f32.mxu1 %vm1565_vm0, %v1019_v52  ;;  %9280 = vmatpush3.bf16.msra.mxu0 %v9279_v40 }
 0x19e   : > { %17293 = vst [vmem:[#allocation27_spill] sm:$0xff] %v12533_v62  ;;  %v2135_v27 = vpop.f32.mrb[18].mxu1  ;;  %v12561_v46 = vadd.f32 %v1830_v15, %v12530_v33  ;;  %v1832_v12 = vpop.f32.mrb[19].mxu0  ;;  %v4078_v40 = vmax.f32 %v12516_v32, %v12533_v62  ;;  %8170 = vmatmul.mubr.msk.f32.gmra.mrb[124].mxu0 %vm1565_vm0, %v1003_v0  ;;  %9308 = vmatpush3.bf16.msra.mxu1 %v9307_v45  ;;  %v1306_v15 = vld [vmem:[%s16896_s2 + $0xe8] sm:$0xff]  ;;  %v12579_v0 = vld [vmem:[%s12165_s10 + $0xa0] sm:$0xff]  ;;  %v1336_v62 = vld [vmem:[%s16896_s2 + $0x1d8] sm:$0xff] }
 0x19f   : > { %v2137_v53 = vpop.f32.mrb[19].mxu1  ;;  %v12576_v10 = vadd.f32 %v1832_v12, %v12544_v18  ;;  %4031 = vmax.xlane.f32.xlu0 %v4030_v23  ;;  %v12582_v45 = vadd.f32 %v2135_v27, %v12530_v33  ;;  %v12594_v12 = vld [vmem:[%s12165_s10 + $0xa8] sm:$0xff]  ;;  %8171 = vmatprep.mubr.msk.f32.mxu0 %vm1565_vm0, %v1004_v29  ;;  %v9311_v32 = vpack.c.bf16 %v1318_v17, %v1317_v44  ;;  %v1320_v17 = vld [vmem:[%s16896_s2 + $0x158] sm:$0xff] }
 0x1a0   : > { %17294 = vst [vmem:[#allocation28_spill] sm:$0xff] %v12561_v46  ;;  %4076 = vmax.xlane.f32.xlu1 %v4075_v39  ;;  %v12585_v1 = vadd.f32 %v2137_v53, %v12544_v18  ;;  %8234 = vmatmul.mubr.msk.f32.gmra.mrb[124].mxu1 %vm1565_vm0, %v1019_v52  ;;  %v9283_v39 = vpack.c.bf16 %v1288_v24, %v1287_v21  ;;  %v1290_v52 = vld [vmem:[%s16896_s2 + $0x68] sm:$0xff]  ;;  %v1319_v21 = vld [vmem:[%s16896_s2 + $0x150] sm:$0xff] }
 0x1a1   : > { %17295 = vst [vmem:[#allocation29_spill] sm:$0xff] %v12576_v10  ;;  %17296 = vst [vmem:[#allocation30_spill] sm:$0xff] %v12582_v45  ;;  %v1836_v23 = vpop.f32.mrb[20].mxu0  ;;  %v4033_v27 = vmax.f32 %v12561_v46, %v12576_v10  ;;  %8235 = vmatprep.mubr.msk.f32.mxu1 %vm1565_vm0, %v1020_v25  ;;  %9282 = vmatprep.subr.bf16.mxu0 %v9281_v47  ;;  %v9285_v60 = vpack.c.bf16 %v1306_v15, %v1305_v22  ;;  %v1307_v15 = vld [vmem:[%s16896_s2 + $0xf0] sm:$0xff]  ;;  %v1338_v46 = vld [vmem:[%s16896_s2 + $0x1e8] sm:$0xff] }
 0x1a2   : > { %17297 = vst [vmem:[#allocation31_spill] sm:$0xff] %v12585_v1  ;;  %v2141_v53 = vpop.f32.mrb[20].mxu1  ;;  %v12611_v24 = vadd.f32 %v1836_v23, %v12579_v0  ;;  %v1838_v10 = vpop.f32.mrb[21].mxu0  ;;  %8172 = vmatmul.mubr.msk.f32.gmra.mrb[126].mxu0 %vm1565_vm0, %v1004_v29  ;;  %9310 = vmatprep.subr.bf16.mxu1 %v9309_v51  ;;  %v9313_v44 = vpack.c.bf16 %v1336_v62, %v1335_v49  ;;  %v1308_v23 = vld [vmem:[%s16896_s2 + $0xf8] sm:$0xff]  ;;  %v12630_v29 = vld [vmem:[%s12165_s10 + $0xb0] sm:$0xff]  ;;  %v1337_v49 = vld [vmem:[%s16896_s2 + $0x1e0] sm:$0xff] }
 0x1a3   : > { %v12614_v47 = vadd.f32 %v2141_v53, %v12579_v0  ;;  %v2143_v22 = vpop.f32.mrb[21].mxu1  ;;  %v12627_v53 = vadd.f32 %v1838_v10, %v12594_v12  ;;  %4079 = vmax.xlane.f32.xlu0 %v4078_v40  ;;  %v4081_v51 = vmax.f32 %v12582_v45, %v12585_v1  ;;  %v12644_v10 = vld [vmem:[%s12165_s10 + $0xb8] sm:$0xff]  ;;  %9284 = vmatpush3.bf16.msra.mxu0 %v9283_v39 }
 0x1a4   : > { %17298 = vst [vmem:[#allocation32_spill] sm:$0xff] %v12611_v24  ;;  %4034 = vmax.xlane.f32.xlu1 %v4033_v27  ;;  %v12633_v62 = vadd.f32 %v2143_v22, %v12594_v12  ;;  %8236 = vmatmul.mubr.msk.f32.gmra.mrb[126].mxu1 %vm1565_vm0, %v1020_v25  ;;  %v9287_v40 = vpack.c.bf16 %v1290_v52, %v1289_v30  ;;  %v1292_v25 = vld [vmem:[%s16896_s2 + $0x78] sm:$0xff] }
 0x1a5   : > { %17299 = vst [vmem:[#allocation33_spill] sm:$0xff] %v12614_v47  ;;  %17300 = vst [vmem:[#allocation34_spill] sm:$0xff] %v12627_v53  ;;  %v1842_v27 = vpop.f32.mrb[22].mxu0  ;;  %v4036_v22 = vmax.f32 %v12611_v24, %v12627_v53  ;;  %9312 = vmatpush3.bf16.msra.mxu1 %v9311_v32  ;;  %9286 = vmatprep.subr.bf16.mxu0 %v9285_v60  ;;  %v9315_v1 = vpack.c.bf16 %v1320_v17, %v1319_v21  ;;  %v1321_v21 = vld [vmem:[%s16896_s2 + $0x160] sm:$0xff]  ;;  %v1322_v17 = vld [vmem:[%s16896_s2 + $0x168] sm:$0xff] }
 0x1a6   : > { %17301 = vst [vmem:[#allocation35_spill] sm:$0xff] %v12633_v62  ;;  %v2147_v20 = vpop.f32.mrb[22].mxu1  ;;  %v9289_v45 = vpack.c.bf16 %v1308_v23, %v1307_v15  ;;  %v12656_v30 = vadd.f32 %v1842_v27, %v12630_v29  ;;  %v1844_v39 = vpop.f32.mrb[23].mxu0  ;;  %v4084_v32 = vmax.f32 %v12614_v47, %v12633_v62  ;;  %9314 = vmatprep.subr.bf16.mxu1 %v9313_v44  ;;  %v12670_v23 = vld [vmem:[%s12165_s10 + $0xc0] sm:$0xff]  ;;  %v1339_v44 = vld [vmem:[%s16896_s2 + $0x1f0] sm:$0xff] }
 0x1a7   : > { %v2149_v52 = vpop.f32.mrb[23].mxu1  ;;  %v9317_v60 = vpack.c.bf16 %v1338_v46, %v1337_v49  ;;  %v12667_v15 = vadd.f32 %v1844_v39, %v12644_v10  ;;  %4037 = vmax.xlane.f32.xlu0 %v4036_v22  ;;  %v12673_v27 = vadd.f32 %v2147_v20, %v12630_v29  ;;  %v1340_v49 = vld [vmem:[%s16896_s2 + $0x1f8] sm:$0xff]  ;;  %v12685_v39 = vld [vmem:[%s12165_s10 + $0xc8] sm:$0xff]  ;;  %9288 = vmatpush3.bf16.msra.mxu0 %v9287_v40  ;;  %v1323_v40 = vld [vmem:[%s16896_s2 + $0x170] sm:$0xff] }
 0x1a8   : > { %17302 = vst [vmem:[#allocation36_spill] sm:$0xff] %v12656_v30  ;;  %4082 = vmax.xlane.f32.xlu1 %v4081_v51  ;;  %v12676_v46 = vadd.f32 %v2149_v52, %v12644_v10  ;;  %v9291_v51 = vpack.c.bf16 %v1292_v25, %v1291_v7  ;;  %9290 = vmatprep.subr.bf16.mxu0 %v9289_v45  ;;  %v1324_v45 = vld [vmem:[%s16896_s2 + $0x178] sm:$0xff]  ;;  %v12705_v25 = vld [vmem:[%s12165_s10 + $0xd0] sm:$0xff] }
 0x1a9   : > { %17303 = vst [vmem:[#allocation37_spill] sm:$0xff] %v12667_v15  ;;  %17304 = vst [vmem:[#allocation38_spill] sm:$0xff] %v12673_v27  ;;  %v1848_v22 = vpop.f32.mrb[24].mxu0  ;;  %v4039_v20 = vmax.f32 %v12656_v30, %v12667_v15  ;;  %9316 = vmatpush3.bf16.msra.mxu1 %v9315_v1  ;;  %v9319_v52 = vpack.c.bf16 %v1322_v17, %v1321_v21  ;;  %v9321_v7 = vpack.c.bf16 %v1340_v49, %v1339_v44  ;;  %v12713_v21 = vld [vmem:[%s12165_s10 + $0xd8] sm:$0xff]  ;;  %v10332_v30 = vld [vmem:[%s12165_s10 + $0x28] sm:$0xff] }
 0x1aa   : > { %17305 = vst [vmem:[#allocation39_spill] sm:$0xff] %v12676_v46  ;;  %v2153_v62 = vpop.f32.mrb[24].mxu1  ;;  %v12690_v47 = vadd.f32 %v1848_v22, %v12670_v23  ;;  %v1850_v53 = vpop.f32.mrb[25].mxu0  ;;  %9318 = vmatprep.subr.bf16.mxu1 %v9317_v60  ;;  %v4087_v60 = vmax.f32 %v12673_v27, %v12676_v46  ;;  %v13284_v15 = vld [vmem:[%s16896_s2 + $0x2d8] sm:$0xff] }
 0x1ab   : > { %v12693_v24 = vadd.f32 %v2153_v62, %v12670_v23  ;;  %v2155_v6 = vpop.f32.mrb[25].mxu1  ;;  %v12702_v1 = vadd.f32 %v1850_v53, %v12685_v39  ;;  %4085 = vmax.xlane.f32.xlu0 %v4084_v32  ;;  %9292 = vmatpush3.bf16.msra.mxu0 %v9291_v51  ;;  %v9323_v32 = vpack.c.bf16 %v1324_v45, %v1323_v40  ;;  %v12726_v51 = vld [vmem:[%s12165_s10 + $0xe0] sm:$0xff]  ;;  %v12735_v45 = vld [vmem:[%s12165_s10 + $0xe8] sm:$0xff] }
 0x1ac   : > { %17306 = vst [vmem:[#allocation40_spill] sm:$0xff] %v12690_v47  ;;  %4040 = vmax.xlane.f32.xlu1 %v4039_v20  ;;  %v12708_v62 = vadd.f32 %v2155_v6, %v12685_v39  ;;  %17413 = vst [vmem:[#allocation147_spill] sm:$0xff] %v13284_v15 }
 0x1ad   : > { %17307 = vst [vmem:[#allocation41_spill] sm:$0xff] %v12693_v24  ;;  %17308 = vst [vmem:[#allocation42_spill] sm:$0xff] %v12702_v1  ;;  %v1854_v17 = vpop.f32.mrb[26].mxu0  ;;  %v4042_v53 = vmax.f32 %v12690_v47, %v12702_v1  ;;  %9320 = vmatpush3.bf16.msra.mxu1 %v9319_v52 }
 0x1ae   : > { %17309 = vst [vmem:[#allocation43_spill] sm:$0xff] %v12708_v62  ;;  %v2159_v44 = vpop.f32.mrb[26].mxu1  ;;  %v12718_v49 = vadd.f32 %v1854_v17, %v12705_v25  ;;  %v1856_v6 = vpop.f32.mrb[27].mxu0  ;;  %v4090_v20 = vmax.f32 %v12693_v24, %v12708_v62  ;;  %9322 = vmatprep.subr.bf16.mxu1 %v9321_v7  ;;  %v12749_v24 = vld [vmem:[%s12165_s10 + $0xf0] sm:$0xff] }
 0x1af   : > { %v2161_v22 = vpop.f32.mrb[27].mxu1  ;;  %v12723_v46 = vadd.f32 %v1856_v6, %v12713_v21  ;;  %4043 = vmax.xlane.f32.xlu0 %v4042_v53  ;;  %v12729_v52 = vadd.f32 %v2159_v44, %v12705_v25 }
 0x1b0   : > { %17310 = vst [vmem:[#allocation44_spill] sm:$0xff] %v12718_v49  ;;  %4088 = vmax.xlane.f32.xlu1 %v4087_v60  ;;  %v12732_v40 = vadd.f32 %v2161_v22, %v12713_v21 }
 0x1b1   : > { %17311 = vst [vmem:[#allocation45_spill] sm:$0xff] %v12723_v46  ;;  %17312 = vst [vmem:[#allocation46_spill] sm:$0xff] %v12729_v52  ;;  %v1860_v17 = vpop.f32.mrb[28].mxu0  ;;  %v4045_v7 = vmax.f32 %v12718_v49, %v12723_v46  ;;  %9324 = vmatpush3.bf16.msra.mxu1 %v9323_v32 }
 0x1b2   : > { %17313 = vst [vmem:[#allocation47_spill] sm:$0xff] %v12732_v40  ;;  %v2165_v6 = vpop.f32.mrb[28].mxu1  ;;  %v12740_v60 = vadd.f32 %v1860_v17, %v12726_v51  ;;  %v1862_v53 = vpop.f32.mrb[29].mxu0  ;;  %v4093_v32 = vmax.f32 %v12729_v52, %v12732_v40  ;;  %v12757_v17 = vld [vmem:[%s12165_s10 + $0xf8] sm:$0xff] }
 0x1b3   : > { %v12743_v62 = vadd.f32 %v2165_v6, %v12726_v51  ;;  %v2167_v44 = vpop.f32.mrb[29].mxu1  ;;  %v12746_v22 = vadd.f32 %v1862_v53, %v12735_v45  ;;  %4091 = vmax.xlane.f32.xlu0 %v4090_v20 }
 0x1b4   : > { %17314 = vst [vmem:[#allocation48_spill] sm:$0xff] %v12740_v60  ;;  %4046 = vmax.xlane.f32.xlu1 %v4045_v7  ;;  %v12752_v1 = vadd.f32 %v2167_v44, %v12735_v45 }
 0x1b5   : > { %17315 = vst [vmem:[#allocation49_spill] sm:$0xff] %v12743_v62  ;;  %17316 = vst [vmem:[#allocation50_spill] sm:$0xff] %v12746_v22  ;;  %v1866_v46 = vpop.f32.mrb[30].mxu0  ;;  %v4048_v6 = vmax.f32 %v12740_v60, %v12746_v22 }
 0x1b6   : > { %17317 = vst [vmem:[#allocation51_spill] sm:$0xff] %v12752_v1  ;;  %v2171_v49 = vpop.f32.mrb[30].mxu1  ;;  %v12762_v53 = vadd.f32 %v1866_v46, %v12749_v24  ;;  %v1868_v7 = vpop.f32.mrb[31].mxu0  ;;  %v4096_v47 = vmax.f32 %v12743_v62, %v12752_v1 }
 0x1b7   : > { %v2173_v20 = vpop.f32.mrb[31].mxu1  ;;  %v12767_v44 = vadd.f32 %v1868_v7, %v12757_v17  ;;  %4049 = vmax.xlane.f32.xlu0 %v4048_v6  ;;  %v12770_v40 = vadd.f32 %v2171_v49, %v12749_v24 }
 0x1b8   : > { %17318 = vst [vmem:[#allocation52_spill] sm:$0xff] %v12762_v53  ;;  %4094 = vmax.xlane.f32.xlu1 %v4093_v32  ;;  %v12773_v52 = vadd.f32 %v2173_v20, %v12757_v17 }
 0x1b9   : > { %17319 = vst [vmem:[#allocation53_spill] sm:$0xff] %v12767_v44  ;;  %17320 = vst [vmem:[#allocation54_spill] sm:$0xff] %v12770_v40  ;;  %v2386_v22 = vpop.f32.mrb[32].mxu0  ;;  %v4051_v46 = vmax.f32 %v12762_v53, %v12767_v44 }
 0x1ba   : > { %17321 = vst [vmem:[#allocation55_spill] sm:$0xff] %v12773_v52  ;;  %v12778_v60 = vadd.f32 %v2386_v22, %v12173_v35  ;;  %v2388_v27 = vpop.f32.mrb[33].mxu0  ;;  %v4099_v49 = vmax.f32 %v12770_v40, %v12773_v52  ;;  %v13294_v40 = vld [vmem:[%s16896_s2 + $0x3d8] sm:$0xff] }
 0x1bb   : > { %v12781_v1 = vadd.f32 %v2388_v27, %v12177_v37  ;;  %4097 = vmax.xlane.f32.xlu0 %v4096_v47  ;;  %v2691_v32 = vpop.f32.mrb[32].mxu1 }
 0x1bc   : > { %17322 = vst [vmem:[#allocation56_spill] sm:$0xff] %v12778_v60  ;;  %4052 = vmax.xlane.f32.xlu1 %v4051_v46  ;;  %v12786_v6 = vadd.f32 %v2691_v32, %v12173_v35  ;;  %v2693_v7 = vpop.f32.mrb[33].mxu1 }
 0x1bd   : > { %17323 = vst [vmem:[#allocation57_spill] sm:$0xff] %v12781_v1  ;;  %v2392_v20 = vpop.f32.mrb[34].mxu0  ;;  %v12789_v62 = vadd.f32 %v2693_v7, %v12177_v37  ;;  %v4102_v22 = vmax.f32 %v12778_v60, %v12781_v1 }
 0x1be   : > { %17324 = vst [vmem:[#allocation58_spill] sm:$0xff] %v12786_v6  ;;  %v12794_v27 = vadd.f32 %v2392_v20, %v12197_v50  ;;  %v2394_v46 = vpop.f32.mrb[35].mxu0 }
 0x1bf   : > { %17325 = vst [vmem:[#allocation59_spill] sm:$0xff] %v12789_v62  ;;  %v12797_v47 = vadd.f32 %v2394_v46, %v12213_v58  ;;  %4103 = vmax.xlane.f32.xlu0 %v4102_v22  ;;  %v2697_v52 = vpop.f32.mrb[34].mxu1  ;;  %v4150_v35 = vmax.f32 %v12786_v6, %v12789_v62 }
 0x1c0   : > { %17326 = vst [vmem:[#allocation60_spill] sm:$0xff] %v12794_v27  ;;  %4100 = vmax.xlane.f32.xlu1 %v4099_v49  ;;  %v12802_v32 = vadd.f32 %v2697_v52, %v12197_v50  ;;  %v2699_v37 = vpop.f32.mrb[35].mxu1 }
 0x1c1   : > { %17327 = vst [vmem:[#allocation61_spill] sm:$0xff] %v12797_v47  ;;  %v2398_v7 = vpop.f32.mrb[36].mxu0  ;;  %v12805_v1 = vadd.f32 %v2699_v37, %v12213_v58  ;;  %v4105_v20 = vmax.f32 %v12794_v27, %v12797_v47  ;;  %v13250_v27 = vld [vmem:[%s16896_s2 + $0x240] sm:$0xff]  ;;  %v13270_v47 = vld [vmem:[%s16896_s2 + $0x2d0] sm:$0xff] }
 0x1c2   : > { %17328 = vst [vmem:[#allocation62_spill] sm:$0xff] %v12802_v32  ;;  %v12810_v46 = vadd.f32 %v2398_v7, %v12219_v63  ;;  %v2400_v49 = vpop.f32.mrb[37].mxu0  ;;  %17408 = vst [vmem:[#allocation142_spill] sm:$0xff] %v13250_v27  ;;  %v10334_v27 = vld [vmem:[%s12165_s10 + $0x38] sm:$0xff] }
 0x1c3   : > { %17329 = vst [vmem:[#allocation63_spill] sm:$0xff] %v12805_v1  ;;  %v12813_v22 = vadd.f32 %v2400_v49, %v12227_v3  ;;  %4151 = vmax.xlane.f32.xlu0 %v4150_v35  ;;  %v2703_v62 = vpop.f32.mrb[36].mxu1  ;;  %v4153_v50 = vmax.f32 %v12802_v32, %v12805_v1  ;;  %17411 = vst [vmem:[#allocation145_spill] sm:$0xff] %v13270_v47 }
 0x1c4   : > { %17330 = vst [vmem:[#allocation64_spill] sm:$0xff] %v12810_v46  ;;  %4106 = vmax.xlane.f32.xlu1 %v4105_v20  ;;  %v12818_v52 = vadd.f32 %v2703_v62, %v12219_v63  ;;  %v2705_v58 = vpop.f32.mrb[37].mxu1 }
 0x1c5   : > { %17331 = vst [vmem:[#allocation65_spill] sm:$0xff] %v12813_v22  ;;  %v2404_v37 = vpop.f32.mrb[38].mxu0  ;;  %v12821_v6 = vadd.f32 %v2705_v58, %v12227_v3  ;;  %v4108_v7 = vmax.f32 %v12810_v46, %v12813_v22  ;;  %v1357_v58 = vld [vmem:[%s16896_s2 + $0x280] sm:$0xff] }
 0x1c6   : > { %17332 = vst [vmem:[#allocation66_spill] sm:$0xff] %v12818_v52  ;;  %v12826_v49 = vadd.f32 %v2404_v37, %v12290_v36  ;;  %v2406_v20 = vpop.f32.mrb[39].mxu0  ;;  %v1358_v37 = vld [vmem:[%s16896_s2 + $0x288] sm:$0xff] }
 0x1c7   : > { %17333 = vst [vmem:[#allocation67_spill] sm:$0xff] %v12821_v6  ;;  %v12829_v35 = vadd.f32 %v2406_v20, %v12302_v41  ;;  %4109 = vmax.xlane.f32.xlu0 %v4108_v7  ;;  %v2709_v1 = vpop.f32.mrb[38].mxu1  ;;  %v4156_v63 = vmax.f32 %v12818_v52, %v12821_v6  ;;  %v1390_v6 = vld [vmem:[%s16896_s2 + $0x388] sm:$0xff] }
 0x1c8   : > { %17334 = vst [vmem:[#allocation68_spill] sm:$0xff] %v12826_v49  ;;  %4154 = vmax.xlane.f32.xlu1 %v4153_v50  ;;  %v12834_v62 = vadd.f32 %v2709_v1, %v12290_v36  ;;  %v2711_v3 = vpop.f32.mrb[39].mxu1  ;;  %v1389_v50 = vld [vmem:[%s16896_s2 + $0x380] sm:$0xff]  ;;  %v9325_v1 = vpack.c.bf16 %v1358_v37, %v1357_v58 }
 0x1c9   : > { %17335 = vst [vmem:[#allocation69_spill] sm:$0xff] %v12829_v35  ;;  %v2410_v7 = vpop.f32.mrb[40].mxu0  ;;  %v12846_v20 = vadd.f32 %v2711_v3, %v12302_v41  ;;  %v4111_v36 = vmax.f32 %v12826_v49, %v12829_v35  ;;  %v9357_v46 = vpack.c.bf16 %v1390_v6, %v1389_v50  ;;  %v13265_v49 = vld [vmem:[%s16896_s2 + $0x348] sm:$0xff] }
 0x1ca   : > { %17336 = vst [vmem:[#allocation70_spill] sm:$0xff] %v12834_v62  ;;  %v12854_v52 = vadd.f32 %v2410_v7, %v12329_v5  ;;  %v2412_v22 = vpop.f32.mrb[41].mxu0  ;;  %9326 = vmatprep.subr.bf16.mxu0 %v9325_v1  ;;  %17410 = vst [vmem:[#allocation144_spill] sm:$0xff] %v13265_v49  ;;  %v13418_v49 = vld [vmem:[%s16896_s2 + $0x270] sm:$0xff] }
 0x1cb   : > { %17337 = vst [vmem:[#allocation71_spill] sm:$0xff] %v12846_v20  ;;  %v12857_v32 = vadd.f32 %v2412_v22, %v12344_v11  ;;  %4157 = vmax.xlane.f32.xlu0 %v4156_v63  ;;  %v2715_v41 = vpop.f32.mrb[40].mxu1  ;;  %v4159_v3 = vmax.f32 %v12834_v62, %v12846_v20  ;;  %9358 = vmatprep.subr.bf16.mxu1 %v9357_v46  ;;  %v13222_v20 = vld [vmem:[%s16896_s2 + $0x2c0] sm:$0xff]  ;;  %17430 = vst [vmem:[#allocation164_spill] sm:$0xff] %v13418_v49 }
 0x1cc   : > { %17338 = vst [vmem:[#allocation72_spill] sm:$0xff] %v12854_v52  ;;  %4112 = vmax.xlane.f32.xlu1 %v4111_v36  ;;  %v12862_v58 = vadd.f32 %v2715_v41, %v12329_v5  ;;  %v2717_v37 = vpop.f32.mrb[41].mxu1  ;;  %17404 = vst [vmem:[#allocation138_spill] sm:$0xff] %v13222_v20  ;;  %v13391_v20 = vld [vmem:[%s16896_s2 + $0x2f0] sm:$0xff] }
 0x1cd   : > { %17339 = vst [vmem:[#allocation73_spill] sm:$0xff] %v12857_v32  ;;  %v2416_v35 = vpop.f32.mrb[42].mxu0  ;;  %v12865_v7 = vadd.f32 %v2717_v37, %v12344_v11  ;;  %v4114_v6 = vmax.f32 %v12854_v52, %v12857_v32  ;;  %v13237_v32 = vld [vmem:[%s16896_s2 + $0x3c8] sm:$0xff] }
 0x1ce   : > { %17340 = vst [vmem:[#allocation74_spill] sm:$0xff] %v12862_v58  ;;  %v12870_v22 = vadd.f32 %v2416_v35, %v12370_v31  ;;  %v2418_v63 = vpop.f32.mrb[43].mxu0  ;;  %17406 = vst [vmem:[#allocation140_spill] sm:$0xff] %v13237_v32 }
 0x1cf   : > { %17341 = vst [vmem:[#allocation75_spill] sm:$0xff] %v12865_v7  ;;  %v12873_v50 = vadd.f32 %v2418_v63, %v12384_v43  ;;  %4115 = vmax.xlane.f32.xlu0 %v4114_v6  ;;  %v2721_v5 = vpop.f32.mrb[42].mxu1  ;;  %v4162_v46 = vmax.f32 %v12862_v58, %v12865_v7  ;;  %v13184_v58 = vld [vmem:[%s16896_s2 + $0x3b0] sm:$0xff] }
 0x1d0   : > { %17342 = vst [vmem:[#allocation76_spill] sm:$0xff] %v12870_v22  ;;  %4160 = vmax.xlane.f32.xlu1 %v4159_v3  ;;  %v12878_v36 = vadd.f32 %v2721_v5, %v12370_v31  ;;  %v2723_v11 = vpop.f32.mrb[43].mxu1 }
 0x1d1   : > { %17343 = vst [vmem:[#allocation77_spill] sm:$0xff] %v12873_v50  ;;  %v2422_v1 = vpop.f32.mrb[44].mxu0  ;;  %v12881_v41 = vadd.f32 %v2723_v11, %v12384_v43  ;;  %v4117_v35 = vmax.f32 %v12870_v22, %v12873_v50  ;;  %v13189_v50 = vld [vmem:[%s16896_s2 + $0x3b8] sm:$0xff] }
 0x1d2   : > { %17344 = vst [vmem:[#allocation78_spill] sm:$0xff] %v12878_v36  ;;  %v12886_v37 = vadd.f32 %v2422_v1, %v12409_v14  ;;  %v2424_v3 = vpop.f32.mrb[45].mxu0 }
 0x1d3   : > { %17345 = vst [vmem:[#allocation79_spill] sm:$0xff] %v12881_v41  ;;  %v12889_v6 = vadd.f32 %v2424_v3, %v12424_v4  ;;  %4163 = vmax.xlane.f32.xlu0 %v4162_v46  ;;  %v2727_v63 = vpop.f32.mrb[44].mxu1  ;;  %v4165_v31 = vmax.f32 %v12878_v36, %v12881_v41  ;;  %v13209_v36 = vld [vmem:[%s16896_s2 + $0x338] sm:$0xff] }
 0x1d4   : > { %17346 = vst [vmem:[#allocation80_spill] sm:$0xff] %v12886_v37  ;;  %4118 = vmax.xlane.f32.xlu1 %v4117_v35  ;;  %v12894_v5 = vadd.f32 %v2727_v63, %v12409_v14  ;;  %v2729_v43 = vpop.f32.mrb[45].mxu1  ;;  %17402 = vst [vmem:[#allocation136_spill] sm:$0xff] %v13209_v36  ;;  %v13401_v36 = vld [vmem:[%s16896_s2 + $0x3f0] sm:$0xff] }
 0x1d5   : > { %17347 = vst [vmem:[#allocation81_spill] sm:$0xff] %v12889_v6  ;;  %v2428_v11 = vpop.f32.mrb[46].mxu0  ;;  %v12897_v7 = vadd.f32 %v2729_v43, %v12424_v4  ;;  %v4120_v1 = vmax.f32 %v12886_v37, %v12889_v6  ;;  %17427 = vst [vmem:[#allocation161_spill] sm:$0xff] %v13401_v36  ;;  %v13500_v36 = vld [vmem:[%s16896_s2 + $0x500] sm:$0xff] }
 0x1d6   : > { %17348 = vst [vmem:[#allocation82_spill] sm:$0xff] %v12894_v5  ;;  %v12902_v3 = vadd.f32 %v2428_v11, %v12450_v61  ;;  %v2430_v35 = vpop.f32.mrb[47].mxu0  ;;  %17444 = vst [vmem:[#allocation178_spill] sm:$0xff] %v13500_v36 }
 0x1d7   : > { %17349 = vst [vmem:[#allocation83_spill] sm:$0xff] %v12897_v7  ;;  %v12905_v46 = vadd.f32 %v2430_v35, %v12464_v9  ;;  %4121 = vmax.xlane.f32.xlu0 %v4120_v1  ;;  %v2733_v41 = vpop.f32.mrb[46].mxu1  ;;  %v4168_v14 = vmax.f32 %v12894_v5, %v12897_v7 }
 0x1d8   : > { %17350 = vst [vmem:[#allocation84_spill] sm:$0xff] %v12902_v3  ;;  %4166 = vmax.xlane.f32.xlu1 %v4165_v31  ;;  %v12910_v63 = vadd.f32 %v2733_v41, %v12450_v61  ;;  %v2735_v4 = vpop.f32.mrb[47].mxu1 }
 0x1d9   : > { %17351 = vst [vmem:[#allocation85_spill] sm:$0xff] %v12905_v46  ;;  %v2434_v43 = vpop.f32.mrb[48].mxu0  ;;  %v12913_v6 = vadd.f32 %v2735_v4, %v12464_v9  ;;  %v4123_v11 = vmax.f32 %v12902_v3, %v12905_v46  ;;  %v13172_v46 = vld [vmem:[%s16896_s2 + $0x2b8] sm:$0xff] }
 0x1da   : > { %17352 = vst [vmem:[#allocation86_spill] sm:$0xff] %v12910_v63  ;;  %v12918_v35 = vadd.f32 %v2434_v43, %v12489_v59  ;;  %v2436_v31 = vpop.f32.mrb[49].mxu0  ;;  %17398 = vst [vmem:[#allocation132_spill] sm:$0xff] %v13172_v46 }
 0x1db   : > { %17353 = vst [vmem:[#allocation87_spill] sm:$0xff] %v12913_v6  ;;  %v12921_v1 = vadd.f32 %v2436_v31, %v12504_v16  ;;  %4169 = vmax.xlane.f32.xlu0 %v4168_v14  ;;  %v2739_v7 = vpop.f32.mrb[48].mxu1  ;;  %v4171_v61 = vmax.f32 %v12910_v63, %v12913_v6  ;;  %v13167_v63 = vld [vmem:[%s16896_s2 + $0x2b0] sm:$0xff] }
 0x1dc   : > { %17354 = vst [vmem:[#allocation88_spill] sm:$0xff] %v12918_v35  ;;  %4124 = vmax.xlane.f32.xlu1 %v4123_v11  ;;  %v12926_v41 = vadd.f32 %v2739_v7, %v12489_v59  ;;  %v2741_v9 = vpop.f32.mrb[49].mxu1  ;;  %17397 = vst [vmem:[#allocation131_spill] sm:$0xff] %v13167_v63 }
 0x1dd   : > { %17355 = vst [vmem:[#allocation89_spill] sm:$0xff] %v12921_v1  ;;  %v2440_v4 = vpop.f32.mrb[50].mxu0  ;;  %v12929_v5 = vadd.f32 %v2741_v9, %v12504_v16  ;;  %v4126_v43 = vmax.f32 %v12918_v35, %v12921_v1  ;;  %v13162_v35 = vld [vmem:[%s16896_s2 + $0x328] sm:$0xff] }
 0x1de   : > { %17356 = vst [vmem:[#allocation90_spill] sm:$0xff] %v12926_v41  ;;  %v12934_v31 = vadd.f32 %v2440_v4, %v12530_v33  ;;  %v2442_v11 = vpop.f32.mrb[51].mxu0  ;;  %17396 = vst [vmem:[#allocation130_spill] sm:$0xff] %v13162_v35  ;;  %v13331_v35 = vld [vmem:[%s16896_s2 + $0x2e8] sm:$0xff] }
 0x1df   : > { %17357 = vst [vmem:[#allocation91_spill] sm:$0xff] %v12929_v5  ;;  %v12937_v14 = vadd.f32 %v2442_v11, %v12544_v18  ;;  %4127 = vmax.xlane.f32.xlu0 %v4126_v43  ;;  %v2745_v6 = vpop.f32.mrb[50].mxu1  ;;  %v4174_v59 = vmax.f32 %v12926_v41, %v12929_v5  ;;  %17419 = vst [vmem:[#allocation153_spill] sm:$0xff] %v13331_v35 }
 0x1e0   : > { %17358 = vst [vmem:[#allocation92_spill] sm:$0xff] %v12934_v31  ;;  %4172 = vmax.xlane.f32.xlu1 %v4171_v61  ;;  %v12942_v7 = vadd.f32 %v2745_v6, %v12530_v33  ;;  %v2747_v16 = vpop.f32.mrb[51].mxu1 }
 0x1e1   : > { %17359 = vst [vmem:[#allocation93_spill] sm:$0xff] %v12937_v14  ;;  %v2446_v9 = vpop.f32.mrb[52].mxu0  ;;  %v12945_v1 = vadd.f32 %v2747_v16, %v12544_v18  ;;  %v4129_v4 = vmax.f32 %v12934_v31, %v12937_v14 }
 0x1e2   : > { %17360 = vst [vmem:[#allocation94_spill] sm:$0xff] %v12942_v7  ;;  %v12950_v11 = vadd.f32 %v2446_v9, %v12579_v0  ;;  %v2448_v61 = vpop.f32.mrb[53].mxu0 }
 0x1e3   : > { %17361 = vst [vmem:[#allocation95_spill] sm:$0xff] %v12945_v1  ;;  %v12953_v43 = vadd.f32 %v2448_v61, %v12594_v12  ;;  %4175 = vmax.xlane.f32.xlu0 %v4174_v59  ;;  %v2751_v5 = vpop.f32.mrb[52].mxu1  ;;  %v4177_v33 = vmax.f32 %v12942_v7, %v12945_v1  ;;  %v13142_v7 = vld [vmem:[%s16896_s2 + $0x220] sm:$0xff] }
 0x1e4   : > { %17362 = vst [vmem:[#allocation96_spill] sm:$0xff] %v12950_v11  ;;  %4130 = vmax.xlane.f32.xlu1 %v4129_v4  ;;  %v12958_v6 = vadd.f32 %v2751_v5, %v12579_v0  ;;  %v2753_v18 = vpop.f32.mrb[53].mxu1  ;;  %17392 = vst [vmem:[#allocation126_spill] sm:$0xff] %v13142_v7  ;;  %v13306_v7 = vld [vmem:[%s16896_s2 + $0x250] sm:$0xff] }
 0x1e5   : > { %17363 = vst [vmem:[#allocation97_spill] sm:$0xff] %v12953_v43  ;;  %v2452_v16 = vpop.f32.mrb[54].mxu0  ;;  %v12961_v41 = vadd.f32 %v2753_v18, %v12594_v12  ;;  %v4132_v9 = vmax.f32 %v12950_v11, %v12953_v43  ;;  %v13137_v11 = vld [vmem:[%s16896_s2 + $0x3a8] sm:$0xff] }
 0x1e6   : > { %17364 = vst [vmem:[#allocation98_spill] sm:$0xff] %v12958_v6  ;;  %v12966_v61 = vadd.f32 %v2452_v16, %v12630_v29  ;;  %v2454_v4 = vpop.f32.mrb[55].mxu0  ;;  %17391 = vst [vmem:[#allocation125_spill] sm:$0xff] %v13137_v11  ;;  %v13344_v11 = vld [vmem:[%s16896_s2 + $0x3e0] sm:$0xff] }
 0x1e7   : > { %17365 = vst [vmem:[#allocation99_spill] sm:$0xff] %v12961_v41  ;;  %v12969_v59 = vadd.f32 %v2454_v4, %v12644_v10  ;;  %4133 = vmax.xlane.f32.xlu0 %v4132_v9  ;;  %v2757_v1 = vpop.f32.mrb[54].mxu1  ;;  %v4180_v0 = vmax.f32 %v12958_v6, %v12961_v41  ;;  %17421 = vst [vmem:[#allocation155_spill] sm:$0xff] %v13344_v11  ;;  %v10336_v11 = vld [vmem:[%s12165_s10 + $0x48] sm:$0xff] }
 0x1e8   : > { %17366 = vst [vmem:[#allocation100_spill] sm:$0xff] %v12966_v61  ;;  %4178 = vmax.xlane.f32.xlu1 %v4177_v33  ;;  %v12974_v5 = vadd.f32 %v2757_v1, %v12630_v29  ;;  %v2759_v12 = vpop.f32.mrb[55].mxu1 }
 0x1e9   : > { %17367 = vst [vmem:[#allocation101_spill] sm:$0xff] %v12969_v59  ;;  %v2458_v18 = vpop.f32.mrb[56].mxu0  ;;  %v12977_v43 = vadd.f32 %v2759_v12, %v12644_v10  ;;  %v4135_v16 = vmax.f32 %v12966_v61, %v12969_v59  ;;  %v13132_v61 = vld [vmem:[%s16896_s2 + $0x3a0] sm:$0xff] }
 0x1ea   : > { %17368 = vst [vmem:[#allocation102_spill] sm:$0xff] %v12974_v5  ;;  %v12982_v4 = vadd.f32 %v2458_v18, %v12670_v23  ;;  %v2460_v33 = vpop.f32.mrb[57].mxu0  ;;  %17390 = vst [vmem:[#allocation124_spill] sm:$0xff] %v13132_v61 }
 0x1eb   : > { %17369 = vst [vmem:[#allocation103_spill] sm:$0xff] %v12977_v43  ;;  %v12985_v9 = vadd.f32 %v2460_v33, %v12685_v39  ;;  %4181 = vmax.xlane.f32.xlu0 %v4180_v0  ;;  %v2763_v41 = vpop.f32.mrb[56].mxu1  ;;  %v4183_v29 = vmax.f32 %v12974_v5, %v12977_v43 }
 0x1ec   : > { %17370 = vst [vmem:[#allocation104_spill] sm:$0xff] %v12982_v4  ;;  %4136 = vmax.xlane.f32.xlu1 %v4135_v16  ;;  %v12990_v1 = vadd.f32 %v2763_v41, %v12670_v23  ;;  %v2765_v10 = vpop.f32.mrb[57].mxu1 }
 0x1ed   : > { %17371 = vst [vmem:[#allocation105_spill] sm:$0xff] %v12985_v9  ;;  %v2464_v12 = vpop.f32.mrb[58].mxu0  ;;  %v12993_v6 = vadd.f32 %v2765_v10, %v12685_v39  ;;  %v4138_v18 = vmax.f32 %v12982_v4, %v12985_v9  ;;  %v13118_v4 = vld [vmem:[%s16896_s2 + $0x2a0] sm:$0xff] }
 0x1ee   : > { %17372 = vst [vmem:[#allocation106_spill] sm:$0xff] %v12990_v1  ;;  %v12998_v33 = vadd.f32 %v2464_v12, %v12705_v25  ;;  %v2466_v16 = vpop.f32.mrb[59].mxu0 }
 0x1ef   : > { %17373 = vst [vmem:[#allocation107_spill] sm:$0xff] %v12993_v6  ;;  %v13001_v0 = vadd.f32 %v2466_v16, %v12713_v21  ;;  %4139 = vmax.xlane.f32.xlu0 %v4138_v18  ;;  %v2769_v43 = vpop.f32.mrb[58].mxu1  ;;  %v4186_v23 = vmax.f32 %v12990_v1, %v12993_v6 }
 0x1f0   : > { %17374 = vst [vmem:[#allocation108_spill] sm:$0xff] %v12998_v33  ;;  %4184 = vmax.xlane.f32.xlu1 %v4183_v29  ;;  %v13006_v41 = vadd.f32 %v2769_v43, %v12705_v25  ;;  %v2771_v39 = vpop.f32.mrb[59].mxu1 }
 0x1f1   : > { %17375 = vst [vmem:[#allocation109_spill] sm:$0xff] %v13001_v0  ;;  %v2470_v10 = vpop.f32.mrb[60].mxu0  ;;  %v13009_v9 = vadd.f32 %v2771_v39, %v12713_v21  ;;  %v4141_v12 = vmax.f32 %v12998_v33, %v13001_v0  ;;  %v13108_v0 = vld [vmem:[%s16896_s2 + $0x310] sm:$0xff]  ;;  %v13113_v33 = vld [vmem:[%s16896_s2 + $0x318] sm:$0xff] }
 0x1f2   : > { %17376 = vst [vmem:[#allocation110_spill] sm:$0xff] %v13006_v41  ;;  %v13014_v16 = vadd.f32 %v2470_v10, %v12726_v51  ;;  %v2472_v29 = vpop.f32.mrb[61].mxu0 }
 0x1f3   : > { %17377 = vst [vmem:[#allocation111_spill] sm:$0xff] %v13009_v9  ;;  %v13017_v18 = vadd.f32 %v2472_v29, %v12735_v45  ;;  %4187 = vmax.xlane.f32.xlu0 %v4186_v23  ;;  %v2775_v6 = vpop.f32.mrb[60].mxu1  ;;  %v4189_v25 = vmax.f32 %v13006_v41, %v13009_v9 }
 0x1f4   : > { %17378 = vst [vmem:[#allocation112_spill] sm:$0xff] %v13014_v16  ;;  %4142 = vmax.xlane.f32.xlu1 %v4141_v12  ;;  %v13022_v43 = vadd.f32 %v2775_v6, %v12726_v51  ;;  %v2777_v21 = vpop.f32.mrb[61].mxu1 }
 0x1f5   : > { %17379 = vst [vmem:[#allocation113_spill] sm:$0xff] %v13017_v18  ;;  %v2476_v39 = vpop.f32.mrb[62].mxu0  ;;  %v13025_v1 = vadd.f32 %v2777_v21, %v12735_v45  ;;  %v4144_v10 = vmax.f32 %v13014_v16, %v13017_v18  ;;  %v13081_v16 = vld [vmem:[%s16896_s2 + $0x298] sm:$0xff] }
 0x1f6   : > { %17380 = vst [vmem:[#allocation114_spill] sm:$0xff] %v13022_v43  ;;  %v13030_v29 = vadd.f32 %v2476_v39, %v12749_v24  ;;  %v2478_v23 = vpop.f32.mrb[63].mxu0 }
 0x1f7   : > { %17381 = vst [vmem:[#allocation115_spill] sm:$0xff] %v13025_v1  ;;  %v13033_v12 = vadd.f32 %v2478_v23, %v12757_v17  ;;  %4145 = vmax.xlane.f32.xlu0 %v4144_v10  ;;  %v2781_v51 = vpop.f32.mrb[62].mxu1  ;;  %v4192_v6 = vmax.f32 %v13022_v43, %v13025_v1  ;;  %v10327_v10 = vld [vmem:[%s12165_s10] sm:$0xff] }
 0x1f8   : > { %17382 = vst [vmem:[#allocation116_spill] sm:$0xff] %v13030_v29  ;;  %4190 = vmax.xlane.f32.xlu1 %v4189_v25  ;;  %v13038_v45 = vadd.f32 %v2781_v51, %v12749_v24  ;;  %v2783_v21 = vpop.f32.mrb[63].mxu1  ;;  %v13048_v25 = vld [vmem:[%s16896_s2 + $0x200] sm:$0xff]  ;;  %v13056_v24 = vld [vmem:[%s16896_s2 + $0x208] sm:$0xff] }
 0x1f9   : > { %17383 = vst [vmem:[#allocation117_spill] sm:$0xff] %v13033_v12  ;;  %v2996_v9 = vpop.f32.mrb[64].mxu0  ;;  %v13041_v18 = vadd.f32 %v2783_v21, %v12757_v17  ;;  %v4147_v39 = vmax.f32 %v13030_v29, %v13033_v12  ;;  %v13061_v17 = vld [vmem:[%s16896_s2 + $0x300] sm:$0xff]  ;;  %v13066_v51 = vld [vmem:[%s16896_s2 + $0x308] sm:$0xff]  ;;  %v13076_v29 = vld [vmem:[%s16896_s2 + $0x290] sm:$0xff] }
 0x1fa   : > { %17384 = vst [vmem:[#allocation118_spill] sm:$0xff] %v13038_v45  ;;  %v13051_v23 = vadd.f32 %v10327_v10, %v2996_v9  ;;  %v2998_v1 = vpop.f32.mrb[65].mxu0  ;;  %v10328_v21 = vld [vmem:[%s12165_s10 + $0x8] sm:$0xff] }
 0x1fb   : > { %17385 = vst [vmem:[#allocation119_spill] sm:$0xff] %v13041_v18  ;;  %v13069_v43 = vadd.f32 %v10328_v21, %v2998_v1  ;;  %4193 = vmax.xlane.f32.xlu0 %v4192_v6  ;;  %v3301_v9 = vpop.f32.mrb[64].mxu1  ;;  %v4195_v12 = vmax.f32 %v13038_v45, %v13041_v18  ;;  %v13086_v1 = vld [vmem:[%s16896_s2 + $0x390] sm:$0xff]  ;;  %v13091_v6 = vld [vmem:[%s16896_s2 + $0x398] sm:$0xff] }
 0x1fc   : > { %17386 = vst [vmem:[#allocation120_spill] sm:$0xff] %v13051_v23  ;;  %4148 = vmax.xlane.f32.xlu1 %v4147_v39  ;;  %v13096_v39 = vld [vmem:[%s16896_s2 + $0x210] sm:$0xff]  ;;  %v13101_v18 = vld [vmem:[%s16896_s2 + $0x218] sm:$0xff]  ;;  %v13103_v45 = vadd.f32 %v10327_v10, %v3301_v9  ;;  %v3303_v41 = vpop.f32.mrb[65].mxu1  ;;  %v13123_v10 = vld [vmem:[%s16896_s2 + $0x2a8] sm:$0xff] }
 0x1fd   : > { %17387 = vst [vmem:[#allocation121_spill] sm:$0xff] %v13069_v43  ;;  %v3002_v9 = vpop.f32.mrb[66].mxu0  ;;  %v13125_v5 = vadd.f32 %v10328_v21, %v3303_v41  ;;  %v4198_v59 = vmax.f32 %v13051_v23, %v13069_v43  ;;  %v13147_v41 = vld [vmem:[%s16896_s2 + $0x228] sm:$0xff]  ;;  %v13152_v21 = vld [vmem:[%s16896_s2 + $0x320] sm:$0xff]  ;;  %v10329_v43 = vld [vmem:[%s12165_s10 + $0x10] sm:$0xff] }
 0x1fe   : > { %17388 = vst [vmem:[#allocation122_spill] sm:$0xff] %v13103_v45  ;;  %17393 = vst [vmem:[#allocation127_spill] sm:$0xff] %v13147_v41  ;;  %v13155_v23 = vadd.f32 %v10329_v43, %v3002_v9  ;;  %v3004_v14 = vpop.f32.mrb[67].mxu0  ;;  %v10330_v9 = vld [vmem:[%s12165_s10 + $0x18] sm:$0xff] }
 0x1ff   : > { %17389 = vst [vmem:[#allocation123_spill] sm:$0xff] %v13125_v5  ;;  %17394 = vst [vmem:[#allocation128_spill] sm:$0xff] %v13152_v21  ;;  %v13175_v3 = vadd.f32 %v10330_v9, %v3004_v14  ;;  %4199 = vmax.xlane.f32.xlu0 %v4198_v59  ;;  %v3307_v31 = vpop.f32.mrb[66].mxu1  ;;  %v4246_v37 = vmax.f32 %v13103_v45, %v13125_v5  ;;  %v13194_v14 = vld [vmem:[%s16896_s2 + $0x230] sm:$0xff]  ;;  %v13199_v59 = vld [vmem:[%s16896_s2 + $0x238] sm:$0xff] }
 0x200   : > { %17395 = vst [vmem:[#allocation129_spill] sm:$0xff] %v13155_v23  ;;  %4196 = vmax.xlane.f32.xlu1 %v4195_v12  ;;  %17400 = vst [vmem:[#allocation134_spill] sm:$0xff] %v13194_v14  ;;  %v13204_v12 = vld [vmem:[%s16896_s2 + $0x330] sm:$0xff]  ;;  %v13211_v5 = vadd.f32 %v10329_v43, %v3307_v31  ;;  %v3309_v45 = vpop.f32.mrb[67].mxu1  ;;  %v13227_v31 = vld [vmem:[%s16896_s2 + $0x2c8] sm:$0xff] }
 0x201   : > { %17399 = vst [vmem:[#allocation133_spill] sm:$0xff] %v13175_v3  ;;  %17401 = vst [vmem:[#allocation135_spill] sm:$0xff] %v13204_v12  ;;  %v13232_v43 = vld [vmem:[%s16896_s2 + $0x3c0] sm:$0xff]  ;;  %v3008_v52 = vpop.f32.mrb[68].mxu0  ;;  %v13239_v22 = vadd.f32 %v10330_v9, %v3309_v45  ;;  %v4201_v62 = vmax.f32 %v13155_v23, %v13175_v3  ;;  %v13255_v45 = vld [vmem:[%s16896_s2 + $0x248] sm:$0xff] }
 0x202   : > { %17403 = vst [vmem:[#allocation137_spill] sm:$0xff] %v13211_v5  ;;  %17405 = vst [vmem:[#allocation139_spill] sm:$0xff] %v13232_v43  ;;  %v13260_v9 = vld [vmem:[%s16896_s2 + $0x340] sm:$0xff]  ;;  %v3010_v60 = vpop.f32.mrb[69].mxu0  ;;  %v13311_v41 = vld [vmem:[%s16896_s2 + $0x258] sm:$0xff] }
 0x203   : > { %17407 = vst [vmem:[#allocation141_spill] sm:$0xff] %v13239_v22  ;;  %17409 = vst [vmem:[#allocation143_spill] sm:$0xff] %v13260_v9  ;;  %v10331_v3 = vld [vmem:[%s12165_s10 + $0x20] sm:$0xff]  ;;  %v13297_v44 = vadd.f32 %v10332_v30, %v3010_v60  ;;  %4247 = vmax.xlane.f32.xlu0 %v4246_v37  ;;  %v3313_v53 = vpop.f32.mrb[68].mxu1  ;;  %v4249_v21 = vmax.f32 %v13211_v5, %v13239_v22  ;;  %v13316_v60 = vld [vmem:[%s16896_s2 + $0x350] sm:$0xff] }
 0x204   : > { %v13273_v23 = vadd.f32 %v10331_v3, %v3008_v52  ;;  %v13289_v52 = vld [vmem:[%s16896_s2 + $0x3d0] sm:$0xff]  ;;  %4202 = vmax.xlane.f32.xlu1 %v4201_v62  ;;  %17416 = vst [vmem:[#allocation150_spill] sm:$0xff] %v13316_v60  ;;  %v13321_v62 = vld [vmem:[%s16896_s2 + $0x358] sm:$0xff]  ;;  %v13326_v37 = vld [vmem:[%s16896_s2 + $0x2e0] sm:$0xff]  ;;  %v13333_v22 = vadd.f32 %v10331_v3, %v3313_v53  ;;  %v3315_v5 = vpop.f32.mrb[69].mxu1 }
 0x205   : > { %17414 = vst [vmem:[#allocation148_spill] sm:$0xff] %v13289_v52  ;;  %17415 = vst [vmem:[#allocation149_spill] sm:$0xff] %v13297_v44  ;;  %v13349_v53 = vld [vmem:[%s16896_s2 + $0x3e8] sm:$0xff]  ;;  %v13354_v3 = vld [vmem:[%s16896_s2 + $0x260] sm:$0xff]  ;;  %v3014_v63 = vpop.f32.mrb[70].mxu0  ;;  %v13356_v46 = vadd.f32 %v10332_v30, %v3315_v5 }
 0x206   : > { %17412 = vst [vmem:[#allocation146_spill] sm:$0xff] %v13273_v23  ;;  %17417 = vst [vmem:[#allocation151_spill] sm:$0xff] %v13321_v62  ;;  %v4204_v61 = vmax.f32 %v13273_v23, %v13297_v44  ;;  %v13367_v14 = vld [vmem:[%s16896_s2 + $0x268] sm:$0xff]  ;;  %v13372_v30 = vld [vmem:[%s16896_s2 + $0x360] sm:$0xff]  ;;  %v3016_v23 = vpop.f32.mrb[71].mxu0 }
 0x207   : > { %17418 = vst [vmem:[#allocation152_spill] sm:$0xff] %v13326_v37  ;;  %17420 = vst [vmem:[#allocation154_spill] sm:$0xff] %v13333_v22  ;;  %v13377_v5 = vld [vmem:[%s16896_s2 + $0x368] sm:$0xff]  ;;  %v10333_v44 = vld [vmem:[%s12165_s10 + $0x30] sm:$0xff]  ;;  %v13404_v43 = vadd.f32 %v10334_v27, %v3016_v23  ;;  %v3319_v32 = vpop.f32.mrb[70].mxu1  ;;  %v4252_v47 = vmax.f32 %v13333_v22, %v13356_v46 }
 0x208   : > { %17422 = vst [vmem:[#allocation156_spill] sm:$0xff] %v13349_v53  ;;  %17423 = vst [vmem:[#allocation157_spill] sm:$0xff] %v13354_v3  ;;  %v13380_v12 = vadd.f32 %v10333_v44, %v3014_v63  ;;  %v13396_v63 = vld [vmem:[%s16896_s2 + $0x2f8] sm:$0xff]  ;;  %4250 = vmax.xlane.f32.xlu1 %v4249_v21  ;;  %4205 = vmax.xlane.f32.xlu0 %v4204_v61  ;;  %v13425_v23 = vadd.f32 %v10333_v44, %v3319_v32  ;;  %v3321_v21 = vpop.f32.mrb[71].mxu1  ;;  %v13436_v52 = vld [vmem:[%s16896_s2 + $0x370] sm:$0xff] }
 0x209   : > { %17424 = vst [vmem:[#allocation158_spill] sm:$0xff] %v13356_v46  ;;  %17425 = vst [vmem:[#allocation159_spill] sm:$0xff] %v13367_v14  ;;  %v13413_v9 = vld [vmem:[%s16896_s2 + $0x3f8] sm:$0xff]  ;;  %v13446_v32 = vld [vmem:[%s16896_s2 + $0x480] sm:$0xff]  ;;  %v3020_v46 = vpop.f32.mrb[72].mxu0  ;;  %v13448_v15 = vadd.f32 %v10334_v27, %v3321_v21 }
 0x20a   : > { %17426 = vst [vmem:[#allocation160_spill] sm:$0xff] %v13380_v12  ;;  %17428 = vst [vmem:[#allocation162_spill] sm:$0xff] %v13404_v43  ;;  %v13423_v61 = vld [vmem:[%s16896_s2 + $0x278] sm:$0xff]  ;;  %v4207_v22 = vmax.f32 %v13380_v12, %v13404_v43  ;;  %v13459_v60 = vld [vmem:[%s16896_s2 + $0x488] sm:$0xff]  ;;  %v3022_v43 = vpop.f32.mrb[73].mxu0 }
 0x20b   : > { %17429 = vst [vmem:[#allocation163_spill] sm:$0xff] %v13413_v9  ;;  %17431 = vst [vmem:[#allocation165_spill] sm:$0xff] %v13423_v61  ;;  %v13441_v44 = vld [vmem:[%s16896_s2 + $0x378] sm:$0xff]  ;;  %v13464_v62 = vld [vmem:[%s16896_s2 + $0x580] sm:$0xff]  ;;  %v13486_v53 = vadd.f32 %v10336_v11, %v3022_v43  ;;  %v4255_v35 = vmax.f32 %v13425_v23, %v13448_v15 }
 0x20c   : > { %17432 = vst [vmem:[#allocation166_spill] sm:$0xff] %v13425_v23  ;;  %17433 = vst [vmem:[#allocation167_spill] sm:$0xff] %v13436_v52  ;;  %v13469_v27 = vld [vmem:[%s16896_s2 + $0x588] sm:$0xff]  ;;  %v10335_v21 = vld [vmem:[%s12165_s10 + $0x40] sm:$0xff]  ;;  %4208 = vmax.xlane.f32.xlu1 %v4207_v22  ;;  %4253 = vmax.xlane.f32.xlu0 %v4252_v47  ;;  %v4008_v22 = vpop.xlane.xlu0 %4007 }
 0x20d   : > { %17434 = vst [vmem:[#allocation168_spill] sm:$0xff] %v13441_v44  ;;  %17435 = vst [vmem:[#allocation169_spill] sm:$0xff] %v13446_v32  ;;  %v13472_v37 = vadd.f32 %v10335_v21, %v3020_v46  ;;  %v13483_v14 = vld [vmem:[%s16896_s2 + $0x400] sm:$0xff]  ;;  %v3325_v46 = vpop.f32.mrb[72].mxu1  ;;  %v13495_v3 = vld [vmem:[%s16896_s2 + $0x408] sm:$0xff]  ;;  %v4390_v23 = vsub.f32 %v12183_v42, %v4008_v22  ;;  %v3026_v49 = vpop.f32.mrb[74].mxu0 }
 0x20e   : > { %17436 = vst [vmem:[#allocation170_spill] sm:$0xff] %v13448_v15  ;;  %17437 = vst [vmem:[#allocation171_spill] sm:$0xff] %v13459_v60  ;;  %v13505_v47 = vld [vmem:[%s16896_s2 + $0x508] sm:$0xff]  ;;  %v13507_v43 = vadd.f32 %v10335_v21, %v3325_v46  ;;  %v3327_v12 = vpop.f32.mrb[73].mxu1  ;;  %v13518_v61 = vld [vmem:[%s16896_s2 + $0x490] sm:$0xff]  ;;  %v4391_v15 = vsub.f32 %v12194_v48, %v4008_v22 }
 0x20f   : > { %17438 = vst [vmem:[#allocation172_spill] sm:$0xff] %v13464_v62  ;;  %17439 = vst [vmem:[#allocation173_spill] sm:$0xff] %v13469_v27  ;;  %v13523_v21 = vld [vmem:[%s16896_s2 + $0x498] sm:$0xff]  ;;  %v13528_v46 = vld [vmem:[%s16896_s2 + $0x590] sm:$0xff]  ;;  %v13532_v62 = vadd.f32 %v10336_v11, %v3327_v12  ;;  %v4210_v27 = vmax.f32 %v13472_v37, %v13486_v53  ;;  %v3028_v12 = vpop.f32.mrb[75].mxu0  ;;  %v3331_v22 = vpop.f32.mrb[74].mxu1 }
 0x210   : > { %17440 = vst [vmem:[#allocation174_spill] sm:$0xff] %v13472_v37  ;;  %17441 = vst [vmem:[#allocation175_spill] sm:$0xff] %v13483_v14  ;;  %v13539_v32 = vld [vmem:[%s16896_s2 + $0x598] sm:$0xff]  ;;  %v13544_v60 = vld [vmem:[%s16896_s2 + $0x410] sm:$0xff]  ;;  %v4646_v44 = vmul.f32 1.442695, %v4390_v23  ;;  %4256 = vmax.xlane.f32.xlu1 %v4255_v35 }
 0x211   : > { %17442 = vst [vmem:[#allocation176_spill] sm:$0xff] %v13486_v53  ;;  %17443 = vst [vmem:[#allocation177_spill] sm:$0xff] %v13495_v3  ;;  %v13549_v42 = vld [vmem:[%s16896_s2 + $0x418] sm:$0xff]  ;;  %v10337_v48 = vld [vmem:[%s12165_s10 + $0x50] sm:$0xff]  ;;  %v4648_v9 = vmul.f32 1.442695, %v4391_v15  ;;  %4211 = vmax.xlane.f32.xlu0 %v4210_v27  ;;  %v4258_v53 = vmax.f32 %v13507_v43, %v13532_v62  ;;  %v4059_v36 = vpop.xlane.xlu1 %4058 }
 0x212   : > { %17445 = vst [vmem:[#allocation179_spill] sm:$0xff] %v13505_v47  ;;  %17446 = vst [vmem:[#allocation180_spill] sm:$0xff] %v13507_v43  ;;  %v13552_v11 = vadd.f32 %v10337_v48, %v3026_v49  ;;  %v13563_v52 = vld [vmem:[%s16896_s2 + $0x510] sm:$0xff]  ;;  %v13568_v49 = vld [vmem:[%s16896_s2 + $0x518] sm:$0xff]  ;;  %v4056_v47 = vpop.xlane.xlu0 %4055  ;;  %v13577_v14 = vadd.f32 %v10337_v48, %v3331_v22  ;;  %9559 = vpow2.f32 %v4646_v44  ;;  %v4424_v23 = vsub.f32 %v12224_v2, %v4059_v36  ;;  %v3032_v37 = vpop.f32.mrb[76].mxu0 }
 0x213   : > { %17447 = vst [vmem:[#allocation181_spill] sm:$0xff] %v13518_v61  ;;  %17448 = vst [vmem:[#allocation182_spill] sm:$0xff] %v13523_v21  ;;  %v10338_v61 = vld [vmem:[%s12165_s10 + $0x58] sm:$0xff]  ;;  %v4425_v27 = vsub.f32 %v12238_v8, %v4059_v36  ;;  %v13589_v48 = vld [vmem:[%s16896_s2 + $0x4a0] sm:$0xff]  ;;  %9561 = vpow2.f32 %v4648_v9  ;;  %v4423_v2 = vsub.f32 %v12210_v57, %v4056_v47  ;;  %v3034_v8 = vpop.f32.mrb[77].mxu0 }
 0x214   : > { %17449 = vst [vmem:[#allocation183_spill] sm:$0xff] %v13528_v46  ;;  %17450 = vst [vmem:[#allocation184_spill] sm:$0xff] %v13532_v62  ;;  %v13575_v21 = vadd.f32 %v10338_v61, %v3028_v12  ;;  %v4422_v12 = vsub.f32 %v12207_v56, %v4056_v47  ;;  %v3333_v62 = vpop.f32.mrb[75].mxu1  ;;  %v13594_v22 = vld [vmem:[%s16896_s2 + $0x4a8] sm:$0xff]  ;;  %v10339_v44 = vld [vmem:[%s12165_s10 + $0x60] sm:$0xff] }
 0x215   : > { %17451 = vst [vmem:[#allocation185_spill] sm:$0xff] %v13539_v32  ;;  %17452 = vst [vmem:[#allocation186_spill] sm:$0xff] %v13544_v60  ;;  %v13598_v35 = vadd.f32 %v10339_v44, %v3032_v37  ;;  %v13600_v56 = vadd.f32 %v10338_v61, %v3333_v62  ;;  %v4714_v36 = vmul.f32 1.442695, %v4424_v23  ;;  %v4716_v15 = vmul.f32 1.442695, %v4425_v27  ;;  %4259 = vmax.xlane.f32.xlu0 %v4258_v53 }
 0x216   : > { %17453 = vst [vmem:[#allocation187_spill] sm:$0xff] %v13549_v42  ;;  %17454 = vst [vmem:[#allocation188_spill] sm:$0xff] %v13552_v11  ;;  %v4710_v43 = vmul.f32 1.442695, %v4422_v12  ;;  %v4712_v60 = vmul.f32 1.442695, %v4423_v2  ;;  %v4213_v9 = vmax.f32 %v13552_v11, %v13575_v21  ;;  %v4014_v42 = vpop.xlane.xlu1 %4013  ;;  %v4011_v57 = vpop.xlane.xlu0 %4010 }
 0x217   : > { %17455 = vst [vmem:[#allocation189_spill] sm:$0xff] %v13563_v52  ;;  %17456 = vst [vmem:[#allocation190_spill] sm:$0xff] %v13568_v49  ;;  %v10340_v52 = vld [vmem:[%s12165_s10 + $0x68] sm:$0xff]  ;;  %v4261_v37 = vmax.f32 %v13577_v14, %v13600_v56  ;;  %9563 = vpow2.f32 %v4714_v36  ;;  %v4394_v61 = vsub.f32 %v12273_v26, %v4014_v42  ;;  %v4395_v47 = vsub.f32 %v12287_v34, %v4014_v42  ;;  %v3038_v23 = vpop.f32.mrb[78].mxu0  ;;  %v3337_v27 = vpop.f32.mrb[76].mxu1  ;;  %v10341_v2 = vld [vmem:[%s12165_s10 + $0x70] sm:$0xff] }
 0x218   : > { %17457 = vst [vmem:[#allocation191_spill] sm:$0xff] %v13575_v21  ;;  %17458 = vst [vmem:[#allocation192_spill] sm:$0xff] %v13577_v14  ;;  %v13603_v49 = vadd.f32 %v10340_v52, %v3034_v8  ;;  %v4392_v53 = vsub.f32 %v12251_v13, %v4011_v57  ;;  %9565 = vpow2.f32 %v4716_v15  ;;  %4214 = vmax.xlane.f32.xlu1 %v4213_v9  ;;  %v3040_v62 = vpop.f32.mrb[79].mxu0  ;;  %v3339_v36 = vpop.f32.mrb[77].mxu1  ;;  %v10342_v42 = vld [vmem:[%s12165_s10 + $0x78] sm:$0xff]  ;;  %v17519_v21 = vld [vmem:[#allocation132_spill] sm:$0xff] }
 0x219   : > { %17459 = vst [vmem:[#allocation193_spill] sm:$0xff] %v13589_v48  ;;  %17460 = vst [vmem:[#allocation194_spill] sm:$0xff] %v13594_v22  ;;  %v4393_v12 = vsub.f32 %v12266_v19, %v4011_v57  ;;  %v13616_v8 = vadd.f32 %v10341_v2, %v3038_v23  ;;  %9567 = vpow2.f32 %v4710_v43  ;;  %v4654_v26 = vmul.f32 1.442695, %v4394_v61  ;;  %v3343_v61 = vpop.f32.mrb[78].mxu1  ;;  %v17542_v3 = vld [vmem:[#allocation138_spill] sm:$0xff] }
 0x21a   : > { %17461 = vst [vmem:[#allocation195_spill] sm:$0xff] %v13598_v35  ;;  %17462 = vst [vmem:[#allocation196_spill] sm:$0xff] %v13600_v56  ;;  %v13618_v56 = vadd.f32 %v10339_v44, %v3337_v27  ;;  %v4656_v14 = vmul.f32 1.442695, %v4395_v47  ;;  %v4650_v34 = vmul.f32 1.442695, %v4392_v53  ;;  %9569 = vpow2.f32 %v4712_v60  ;;  %v4017_v9 = vpop.xlane.xlu1 %4016  ;;  %v4062_v19 = vpop.xlane.xlu0 %4061 }
 0x21b   : > { %17463 = vst [vmem:[#allocation197_spill] sm:$0xff] %v13603_v49  ;;  %17464 = vst [vmem:[#allocation198_spill] sm:$0xff] %v13616_v8  ;;  %v4652_v13 = vmul.f32 1.442695, %v4393_v12  ;;  %v13621_v11 = vadd.f32 %v10342_v42, %v3040_v62  ;;  %v13623_v15 = vadd.f32 %v10340_v52, %v3339_v36  ;;  %9571 = vpow2.f32 %v4654_v26  ;;  %v3044_v47 = vpop.f32.mrb[80].mxu0  ;;  %v3345_v53 = vpop.f32.mrb[79].mxu1 }
 0x21c   : > { %17465 = vst [vmem:[#allocation199_spill] sm:$0xff] %v13618_v56  ;;  %v4216_v44 = vmax.f32 %v13598_v35, %v13603_v49  ;;  %v4396_v57 = vsub.f32 %v12313_v55, %v4017_v9  ;;  %v4397_v43 = vsub.f32 %v12326_v54, %v4017_v9  ;;  %9573 = vpow2.f32 %v4656_v14  ;;  %4262 = vmax.xlane.f32.xlu1 %v4261_v37  ;;  %v3046_v23 = vpop.f32.mrb[81].mxu0  ;;  %v9560_v27 = vpop.eup %9559 }
 0x21d   : > { %17466 = vst [vmem:[#allocation200_spill] sm:$0xff] %v13621_v11  ;;  %17467 = vst [vmem:[#allocation201_spill] sm:$0xff] %v13623_v15  ;;  %v4426_v60 = vsub.f32 %v12276_v28, %v4062_v19  ;;  %v4427_v62 = vsub.f32 %v12293_v38, %v4062_v19  ;;  %v13631_v52 = vadd.f32 %v10341_v2, %v3343_v61  ;;  %9575 = vpow2.f32 %v4650_v34  ;;  %v3349_v54 = vpop.f32.mrb[80].mxu1  ;;  %v9562_v26 = vpop.eup %9561  ;;  %v17470_v34 = vld [vmem:[#allocation6_spill] sm:$0xff] }
 0x21e   : > { %4217 = vmax.xlane.f32.xlu0 %v4216_v44  ;;  %v4658_v12 = vmul.f32 1.442695, %v4396_v57  ;;  %v4660_v36 = vmul.f32 1.442695, %v4397_v43  ;;  %v13633_v55 = vadd.f32 %v10342_v42, %v3345_v53  ;;  %9577 = vpow2.f32 %v4652_v13  ;;  %v4065_v38 = vpop.xlane.xlu1 %4064  ;;  %v4020_v2 = vpop.xlane.xlu0 %4019  ;;  %v17471_v44 = vld [vmem:[#allocation7_spill] sm:$0xff]  ;;  %5606 = vmatprep.mubr.f32.mxu0 %v9562_v26  ;;  %v17472_v13 = vld [vmem:[#allocation8_spill] sm:$0xff] }
 0x21f   : > { %17468 = vst [vmem:[#allocation202_spill] sm:$0xff] %v13631_v52  ;;  %v4718_v14 = vmul.f32 1.442695, %v4426_v60  ;;  %v4720_v37 = vmul.f32 1.442695, %v4427_v62  ;;  %v4219_v28 = vmax.f32 %v13616_v8, %v13621_v11  ;;  %v4264_v9 = vmax.f32 %v13618_v56, %v13623_v15  ;;  %v3351_v42 = vpop.f32.mrb[81].mxu1  ;;  %5607 = vmatmul.mubr.f32.vlgmr.msra.gmra.mrb[128].mxu0 %v9560_v27 }
 0x220   : > { %17469 = vst [vmem:[#allocation203_spill] sm:$0xff] %v13633_v55  ;;  %9579 = vpow2.f32 %v4658_v12  ;;  %v4428_v19 = vsub.f32 %v17470_v34, %v4065_v38  ;;  %v4429_v57 = vsub.f32 %v17471_v44, %v4065_v38  ;;  %v13641_v43 = vpop.f32.mrb[82].mxu0  ;;  %v4398_v61 = vsub.f32 %v17472_v13, %v4020_v2  ;;  %v17473_v60 = vld [vmem:[#allocation10_spill] sm:$0xff]  ;;  %v10344_v11 = vld [vmem:[%s12165_s10 + $0x88] sm:$0xff] }
 0x221   : > { %9581 = vpow2.f32 %v4660_v36  ;;  %4220 = vmax.xlane.f32.xlu1 %v4219_v28  ;;  %v4399_v62 = vsub.f32 %v17473_v60, %v4020_v2  ;;  %v4267_v53 = vmax.f32 %v13631_v52, %v13633_v55  ;;  %v13647_v12 = vpop.f32.mrb[83].mxu0  ;;  %v13649_v34 = vpop.eup %9563  ;;  %v5158_v8 = vadd.f32 %v9562_v26, %v9560_v27  ;;  %v10343_v15 = vld [vmem:[%s12165_s10 + $0x80] sm:$0xff] }
 0x222   : > { %9583 = vpow2.f32 %v4718_v14  ;;  %4265 = vmax.xlane.f32.xlu0 %v4264_v9  ;;  %v4722_v38 = vmul.f32 1.442695, %v4428_v19  ;;  %v4724_v44 = vmul.f32 1.442695, %v4429_v57  ;;  %v13651_v36 = vpop.f32.mrb[82].mxu1  ;;  %v17474_v28 = vpack.c.bf16 %v13056_v24, %v13048_v25  ;;  %v13656_v2 = vpop.eup %9565  ;;  %v17477_v9 = vld [vmem:[#allocation12_spill] sm:$0xff] }
 0x223   : > { %9585 = vpow2.f32 %v4720_v37  ;;  %v4662_v13 = vmul.f32 1.442695, %v4398_v61  ;;  %v4664_v60 = vmul.f32 1.442695, %v4399_v62  ;;  %v4023_v55 = vpop.xlane.xlu1 %4022  ;;  %v4068_v52 = vpop.xlane.xlu0 %4067  ;;  %v13659_v14 = vadd.f32 %v10343_v15, %v3044_v47  ;;  %v17478_v24 = vld [vmem:[#allocation13_spill] sm:$0xff]  ;;  %v17480_v47 = vld [vmem:[#allocation11_spill] sm:$0xff] }
 0x224   : > { %9328 = vmatpush3.bf16.msra.mxu0 %v17474_v28  ;;  %v17476_v27 = vpack.c.bf16 %v13081_v16, %v13076_v29  ;;  %v9568_v26 = vpop.eup %9567  ;;  %9587 = vpow2.f32 %v4722_v38  ;;  %v4400_v25 = vsub.f32 %v17477_v9, %v4023_v55  ;;  %v4401_v19 = vsub.f32 %v17478_v24, %v4023_v55  ;;  %v17479_v57 = vld [vmem:[#allocation9_spill] sm:$0xff]  ;;  %v13667_v61 = vpop.f32.mrb[83].mxu1 }
 0x225   : > { %17475 = vst [vmem:[#allocation6_spill] sm:$0xff] %v13659_v14  ;;  %v4430_v37 = vsub.f32 %v17479_v57, %v4068_v52  ;;  %v13669_v62 = vpop.f32.mrb[84].mxu0  ;;  %v9570_v28 = vpop.eup %9569  ;;  %9589 = vpow2.f32 %v4724_v44  ;;  %4268 = vmax.xlane.f32.xlu1 %v4267_v53  ;;  %v4431_v56 = vsub.f32 %v17480_v47, %v4068_v52  ;;  %v13673_v16 = vadd.f32 %v10344_v11, %v3046_v23  ;;  %v10345_v47 = vld [vmem:[%s12165_s10 + $0x90] sm:$0xff] }
 0x226   : > { %9330 = vmatprep.subr.bf16.mxu0 %v17476_v27  ;;  %v13675_v29 = vadd.f32 %v10343_v15, %v3349_v54  ;;  %v13677_v38 = vpop.f32.mrb[85].mxu0  ;;  %v13679_v27 = vpop.eup %9571  ;;  %9591 = vpow2.f32 %v4662_v13  ;;  %5159 = vadd.xlane.f32.xlu0 %v5158_v8  ;;  %v4666_v55 = vmul.f32 1.442695, %v4400_v25  ;;  %v4668_v9 = vmul.f32 1.442695, %v4401_v19  ;;  %v17485_v13 = vld [vmem:[#allocation14_spill] sm:$0xff] }
 0x227   : > { %17481 = vst [vmem:[#allocation7_spill] sm:$0xff] %v13673_v16  ;;  %5751 = vmatprep.mubr.f32.mxu1 %v9570_v28  ;;  %v4726_v24 = vmul.f32 1.442695, %v4430_v37  ;;  %v13681_v57 = vpop.eup %9573  ;;  %9593 = vpow2.f32 %v4664_v60  ;;  %v4728_v53 = vmul.f32 1.442695, %v4431_v56  ;;  %v5206_v52 = vadd.f32 %v9570_v28, %v9568_v26  ;;  %v4071_v23 = vpop.xlane.xlu1 %4070  ;;  %v17486_v19 = vld [vmem:[#allocation15_spill] sm:$0xff] }
 0x228   : > { %17482 = vst [vmem:[#allocation8_spill] sm:$0xff] %v13675_v29  ;;  %5752 = vmatmul.mubr.f32.vlgmr.msra.gmra.mrb[128].mxu1 %v9568_v26  ;;  %v4026_v15 = vpop.xlane.xlu0 %4025  ;;  %v13683_v54 = vadd.f32 %v10344_v11, %v3351_v42  ;;  %v17484_v44 = vpack.c.bf16 %v13101_v18, %v13096_v39  ;;  %v9576_v8 = vpop.eup %9575  ;;  %9595 = vpow2.f32 %v4666_v55  ;;  %v4432_v25 = vsub.f32 %v17485_v13, %v4071_v23  ;;  %v17487_v56 = vld [vmem:[#allocation16_spill] sm:$0xff]  ;;  %v17489_v39 = vld [vmem:[#allocation18_spill] sm:$0xff] }
 0x229   : > { %5756 = vmatprep.mubr.f32.mxu1 %v13656_v2  ;;  %v4433_v60 = vsub.f32 %v17486_v19, %v4071_v23  ;;  %v4402_v37 = vsub.f32 %v17487_v56, %v4026_v15  ;;  %v13692_v26 = vpop.f32.mrb[84].mxu1  ;;  %v13694_v28 = vpop.f32.mrb[86].mxu0  ;;  %v17488_v11 = vpack.c.bf16 %v13066_v51, %v13061_v17  ;;  %9597 = vpow2.f32 %v4668_v9 }
 0x22a   : > { %17483 = vst [vmem:[#allocation10_spill] sm:$0xff] %v13683_v54  ;;  %9332 = vmatpush3.bf16.msra.mxu0 %v17484_v44  ;;  %v9578_v18 = vpop.eup %9577  ;;  %v4403_v42 = vsub.f32 %v17489_v39, %v4026_v15  ;;  %v13702_v55 = vadd.f32 %v10345_v47, %v13641_v43  ;;  %v4222_v23 = vmax.f32 %v13659_v14, %v13673_v16  ;;  %v13706_v44 = vpop.f32.mrb[85].mxu1  ;;  %9599 = vpow2.f32 %v4726_v24  ;;  %v17500_v16 = vld [vmem:[#allocation125_spill] sm:$0xff]  ;;  %v17501_v14 = vld [vmem:[#allocation124_spill] sm:$0xff] }
 0x22b   : > { %9360 = vmatpush3.bf16.msra.mxu1 %v17488_v11  ;;  %v13708_v13 = vpop.f32.mrb[87].mxu0  ;;  %v17491_v19 = vpack.c.bf16 %v13091_v6, %v13086_v1  ;;  %v17492_v17 = vpack.c.bf16 %v13123_v10, %v13118_v4  ;;  %v13716_v51 = vpop.eup %9579  ;;  %5207 = vadd.xlane.f32.xlu0 %v5206_v52  ;;  %v4730_v43 = vmul.f32 1.442695, %v4432_v25  ;;  %v4732_v9 = vmul.f32 1.442695, %v4433_v60  ;;  %v10346_v6 = vld [vmem:[%s12165_s10 + $0x98] sm:$0xff] }
 0x22c   : > { %17490 = vst [vmem:[#allocation12_spill] sm:$0xff] %v13702_v55  ;;  %5611 = vmatprep.mubr.f32.mxu0 %v9578_v18  ;;  %v4670_v15 = vmul.f32 1.442695, %v4402_v37  ;;  %v13718_v56 = vpop.eup %9581  ;;  %9601 = vpow2.f32 %v4728_v53  ;;  %v4672_v11 = vmul.f32 1.442695, %v4403_v42  ;;  %5757 = vmatmul.mubr.f32.gmra.mrb[130].mxu1 %v13649_v34  ;;  %v5161_v1 = vadd.f32 %v9578_v18, %v9576_v8  ;;  %v4029_v10 = vpop.xlane.xlu1 %4028  ;;  %v17494_v52 = vld [vmem:[#allocation20_spill] sm:$0xff] }
 0x22d   : > { %9362 = vmatprep.subr.bf16.mxu1 %v17491_v19  ;;  %9334 = vmatprep.subr.bf16.mxu0 %v17492_v17  ;;  %v13723_v4 = vadd.f32 %v10346_v6, %v13647_v12  ;;  %v4074_v39 = vpop.xlane.xlu0 %4073  ;;  %v13725_v24 = vpop.eup %9583  ;;  %9603 = vpow2.f32 %v4730_v43  ;;  %v4404_v25 = vsub.f32 %v17494_v52, %v4029_v10  ;;  %v17495_v60 = vld [vmem:[#allocation21_spill] sm:$0xff]  ;;  %v17497_v12 = vpack.c.bf16 %v13113_v33, %v13108_v0  ;;  %v17498_v17 = vld [vmem:[#allocation19_spill] sm:$0xff] }
 0x22e   : > { %5612 = vmatmul.mubr.f32.gmra.mrb[130].mxu0 %v9576_v8  ;;  %v4405_v53 = vsub.f32 %v17495_v60, %v4029_v10  ;;  %v17496_v37 = vld [vmem:[#allocation17_spill] sm:$0xff]  ;;  %v13731_v19 = vpop.f32.mrb[86].mxu1  ;;  %v13733_v8 = vpop.f32.mrb[88].mxu0  ;;  %9605 = vpow2.f32 %v4732_v9  ;;  %5162 = vadd.xlane.f32.xlu1 %v5161_v1  ;;  %v4435_v43 = vsub.f32 %v17498_v17, %v4074_v39  ;;  %v5209_v52 = vadd.f32 %v13656_v2, %v13649_v34 }
 0x22f   : > { %17493 = vst [vmem:[#allocation13_spill] sm:$0xff] %v13723_v4  ;;  %5616 = vmatprep.mubr.f32.mxu0 %v13681_v57  ;;  %v4434_v42 = vsub.f32 %v17496_v37, %v4074_v39  ;;  %9364 = vmatpush3.bf16.msra.mxu1 %v17497_v12  ;;  %v13738_v18 = vpop.eup %9585  ;;  %v13744_v10 = vadd.f32 %v10345_v47, %v13651_v36  ;;  %v13746_v60 = vpop.f32.mrb[87].mxu1  ;;  %9607 = vpow2.f32 %v4670_v15  ;;  %v4674_v9 = vmul.f32 1.442695, %v4404_v25  ;;  %v17504_v39 = vld [vmem:[#allocation22_spill] sm:$0xff]  ;;  %v17505_v25 = vld [vmem:[#allocation23_spill] sm:$0xff] }
 0x230   : > { %v13748_v37 = vpop.f32.mrb[89].mxu0  ;;  %v17502_v33 = vpack.c.bf16 %v17500_v16, %v17501_v14  ;;  %v13753_v0 = vpop.eup %9587  ;;  %4223 = vmax.xlane.f32.xlu0 %v4222_v23  ;;  %v4676_v1 = vmul.f32 1.442695, %v4405_v53  ;;  %5761 = vmatprep.mubr.f32.mxu1 %v13738_v18  ;;  %9609 = vpow2.f32 %v4672_v11  ;;  %v4736_v36 = vmul.f32 1.442695, %v4435_v43 }
 0x231   : > { %17499 = vst [vmem:[#allocation9_spill] sm:$0xff] %v13744_v10  ;;  %v4734_v34 = vmul.f32 1.442695, %v4434_v42  ;;  %v13756_v2 = vpop.eup %9589  ;;  %5762 = vmatmul.mubr.f32.gmra.mrb[132].mxu1 %v13725_v24  ;;  %v4270_v14 = vmax.f32 %v13675_v29, %v13683_v54  ;;  %v13763_v16 = vadd.f32 %v10346_v6, %v13667_v61  ;;  %v4077_v47 = vpop.xlane.xlu1 %4076  ;;  %9611 = vpow2.f32 %v4674_v9  ;;  %v17506_v42 = vld [vmem:[#allocation24_spill] sm:$0xff]  ;;  %v17507_v6 = vld [vmem:[#allocation26_spill] sm:$0xff] }
 0x232   : > { %9366 = vmatprep.subr.bf16.mxu1 %v17502_v33  ;;  %5617 = vmatmul.mubr.f32.gmra.mrb[132].mxu0 %v13679_v27  ;;  %v4032_v23 = vpop.xlane.xlu0 %4031  ;;  %v13765_v15 = vpop.eup %9591  ;;  %v4436_v11 = vsub.f32 %v17504_v39, %v4077_v47  ;;  %v4437_v53 = vsub.f32 %v17505_v25, %v4077_v47  ;;  %9613 = vpow2.f32 %v4676_v1  ;;  %v4225_v9 = vmax.f32 %v13702_v55, %v13723_v4  ;;  %v17509_v54 = vld [vmem:[#allocation126_spill] sm:$0xff]  ;;  %v17512_v4 = vld [vmem:[#allocation128_spill] sm:$0xff] }
 0x233   : > { %17503 = vst [vmem:[#allocation11_spill] sm:$0xff] %v13763_v16  ;;  %5621 = vmatprep.mubr.f32.mxu0 %v13718_v56  ;;  %5766 = vmatprep.mubr.f32.mxu1 %v13756_v2  ;;  %v4406_v12 = vsub.f32 %v17506_v42, %v4032_v23  ;;  %v13772_v17 = vpop.f32.mrb[88].mxu1  ;;  %v13774_v43 = vpop.f32.mrb[90].mxu0  ;;  %v4407_v33 = vsub.f32 %v17507_v6, %v4032_v23  ;;  %v17508_v42 = vld [vmem:[#allocation127_spill] sm:$0xff]  ;;  %9615 = vpow2.f32 %v4734_v34  ;;  %v17511_v6 = vld [vmem:[#allocation130_spill] sm:$0xff] }
 0x234   : > { %v13776_v61 = vpop.eup %9593  ;;  %5210 = vadd.xlane.f32.xlu1 %v5209_v52  ;;  %v5164_v47 = vadd.f32 %v13681_v57, %v13679_v27  ;;  %v13783_v39 = vpop.f32.mrb[89].mxu1  ;;  %v17510_v29 = vpack.c.bf16 %v17508_v42, %v17509_v54  ;;  %4271 = vmax.xlane.f32.xlu0 %v4270_v14  ;;  %v4738_v52 = vmul.f32 1.442695, %v4436_v11  ;;  %v4740_v1 = vmul.f32 1.442695, %v4437_v53  ;;  %v10347_v42 = vld [vmem:[%s12165_s10 + $0xa0] sm:$0xff] }
 0x235   : > { %v13785_v25 = vpop.f32.mrb[91].mxu0  ;;  %v13790_v49 = vpop.eup %9595  ;;  %v4678_v23 = vmul.f32 1.442695, %v4406_v12  ;;  %v17513_v27 = vpack.c.bf16 %v17511_v6, %v17512_v4  ;;  %9617 = vpow2.f32 %v4736_v36  ;;  %v4680_v55 = vmul.f32 1.442695, %v4407_v33  ;;  %5767 = vmatmul.mubr.f32.gmra.mrb[134].mxu1 %v13753_v0  ;;  %v10348_v14 = vld [vmem:[%s12165_s10 + $0xa8] sm:$0xff] }
 0x236   : > { %9336 = vmatpush3.bf16.msra.mxu0 %v17510_v29  ;;  %v13795_v57 = vpop.eup %9597  ;;  %v4035_v29 = vpop.xlane.xlu1 %4034  ;;  %v13801_v34 = vadd.f32 %v10347_v42, %v13669_v62  ;;  %v13805_v11 = vadd.f32 %v10348_v14, %v13677_v38  ;;  %9619 = vpow2.f32 %v4738_v52  ;;  %v17516_v36 = vld [vmem:[#allocation28_spill] sm:$0xff]  ;;  %v17517_v12 = vld [vmem:[#allocation29_spill] sm:$0xff]  ;;  %v17520_v62 = vld [vmem:[#allocation131_spill] sm:$0xff] }
 0x237   : > { %9368 = vmatpush3.bf16.msra.mxu1 %v17513_v27  ;;  %5622 = vmatmul.mubr.f32.gmra.mrb[134].mxu0 %v13716_v51  ;;  %v4080_v54 = vpop.xlane.xlu0 %4079  ;;  %v13807_v4 = vpop.eup %9599  ;;  %v4408_v53 = vsub.f32 %v17516_v36, %v4035_v29  ;;  %v4409_v33 = vsub.f32 %v17517_v12, %v4035_v29  ;;  %v17518_v6 = vld [vmem:[#allocation25_spill] sm:$0xff]  ;;  %v17521_v48 = vpack.c.bf16 %v17519_v21, %v17520_v62  ;;  %9621 = vpow2.f32 %v4740_v1  ;;  %v17522_v52 = vld [vmem:[#allocation27_spill] sm:$0xff] }
 0x238   : > { %17514 = vst [vmem:[#allocation14_spill] sm:$0xff] %v13801_v34  ;;  %17515 = vst [vmem:[#allocation15_spill] sm:$0xff] %v13805_v11  ;;  %5626 = vmatprep.mubr.f32.mxu0 %v13776_v61  ;;  %v4438_v27 = vsub.f32 %v17518_v6, %v4080_v54  ;;  %v13813_v35 = vpop.f32.mrb[90].mxu1  ;;  %v13818_v22 = vpop.f32.mrb[92].mxu0  ;;  %4226 = vmax.xlane.f32.xlu1 %v4225_v9  ;;  %v4439_v46 = vsub.f32 %v17522_v52, %v4080_v54  ;;  %9623 = vpow2.f32 %v4678_v23 }
 0x239   : > { %9338 = vmatprep.subr.bf16.mxu0 %v17521_v48  ;;  %v13820_v38 = vpop.eup %9601  ;;  %v4273_v36 = vmax.f32 %v13744_v10, %v13763_v16  ;;  %v5212_v29 = vadd.f32 %v13738_v18, %v13725_v24  ;;  %v13827_v12 = vpop.f32.mrb[91].mxu1  ;;  %v17523_v21 = vpack.c.bf16 %v13189_v50, %v13184_v58  ;;  %5165 = vadd.xlane.f32.xlu0 %v5164_v47  ;;  %v4682_v9 = vmul.f32 1.442695, %v4408_v53  ;;  %v17527_v53 = vld [vmem:[#allocation31_spill] sm:$0xff] }
 0x23a   : > { %v13832_v48 = vpop.f32.mrb[93].mxu0  ;;  %v13834_v6 = vpop.eup %9603  ;;  %v4684_v1 = vmul.f32 1.442695, %v4409_v33  ;;  %5771 = vmatprep.mubr.f32.mxu1 %v13820_v38  ;;  %v4742_v54 = vmul.f32 1.442695, %v4438_v27  ;;  %9625 = vpow2.f32 %v4680_v55  ;;  %v13842_v18 = vadd.f32 %v10347_v42, %v13692_v26  ;;  %v17526_v55 = vld [vmem:[#allocation30_spill] sm:$0xff] }
 0x23b   : > { %9370 = vmatprep.subr.bf16.mxu1 %v17523_v21  ;;  %v13837_v62 = vpop.eup %9605  ;;  %v4744_v24 = vmul.f32 1.442695, %v4439_v46  ;;  %5627 = vmatmul.mubr.f32.gmra.mrb[136].mxu0 %v13765_v15  ;;  %v4083_v58 = vpop.xlane.xlu1 %4082  ;;  %v13845_v47 = vadd.f32 %v10348_v14, %v13706_v44  ;;  %9627 = vpow2.f32 %v4682_v9  ;;  %v17528_v27 = vld [vmem:[#allocation32_spill] sm:$0xff]  ;;  %v17530_v44 = vld [vmem:[#allocation34_spill] sm:$0xff]  ;;  %v5167_v9 = vadd.f32 %v13718_v56, %v13716_v51 }
 0x23c   : > { %5772 = vmatmul.mubr.f32.gmra.mrb[136].mxu1 %v13807_v4  ;;  %v4038_v50 = vpop.xlane.xlu0 %4037  ;;  %17524 = vst [vmem:[#allocation16_spill] sm:$0xff] %v13842_v18  ;;  %v13847_v23 = vpop.eup %9607  ;;  %5631 = vmatprep.mubr.f32.mxu0 %v13795_v57  ;;  %v4440_v46 = vsub.f32 %v17526_v55, %v4083_v58  ;;  %v4441_v33 = vsub.f32 %v17527_v53, %v4083_v58  ;;  %9629 = vpow2.f32 %v4684_v1  ;;  %v10349_v55 = vld [vmem:[%s12165_s10 + $0xb0] sm:$0xff]  ;;  %v17532_v53 = vld [vmem:[#allocation134_spill] sm:$0xff] }
 0x23d   : > { %17525 = vst [vmem:[#allocation18_spill] sm:$0xff] %v13845_v47  ;;  %5776 = vmatprep.mubr.f32.mxu1 %v13837_v62  ;;  %v4410_v52 = vsub.f32 %v17528_v27, %v4038_v50  ;;  %v13854_v21 = vpop.f32.mrb[92].mxu1  ;;  %v13856_v26 = vpop.f32.mrb[94].mxu0  ;;  %4274 = vmax.xlane.f32.xlu1 %v4273_v36  ;;  %v4411_v14 = vsub.f32 %v17530_v44, %v4038_v50  ;;  %9631 = vpow2.f32 %v4742_v54  ;;  %v17535_v56 = vld [vmem:[#allocation136_spill] sm:$0xff]  ;;  %v17536_v44 = vld [vmem:[#allocation135_spill] sm:$0xff]  ;;  %v10350_v54 = vld [vmem:[%s12165_s10 + $0xb8] sm:$0xff] }
 0x23e   : > { %17529 = vst [vmem:[#allocation20_spill] sm:$0xff] %v13856_v26  ;;  %v13858_v42 = vpop.eup %9609  ;;  %v13865_v58 = vadd.f32 %v10349_v55, %v13694_v28  ;;  %v17533_v27 = vpack.c.bf16 %v13199_v59, %v17532_v53  ;;  %v13870_v16 = vpop.f32.mrb[93].mxu1  ;;  %5213 = vadd.xlane.f32.xlu0 %v5212_v29  ;;  %v4746_v36 = vmul.f32 1.442695, %v4440_v46  ;;  %v4748_v50 = vmul.f32 1.442695, %v4441_v33 }
 0x23f   : > { %v13872_v10 = vpop.f32.mrb[95].mxu0  ;;  %v13874_v1 = vpop.eup %9611  ;;  %v4686_v51 = vmul.f32 1.442695, %v4410_v52  ;;  %v17537_v28 = vpack.c.bf16 %v17535_v56, %v17536_v44  ;;  %9633 = vpow2.f32 %v4744_v24  ;;  %v4688_v59 = vmul.f32 1.442695, %v4411_v14  ;;  %5632 = vmatmul.mubr.f32.gmra.mrb[138].mxu0 %v13790_v49  ;;  %v17539_v24 = vld [vmem:[#allocation36_spill] sm:$0xff] }
 0x240   : > { %17531 = vst [vmem:[#allocation21_spill] sm:$0xff] %v13865_v58  ;;  %9340 = vmatpush3.bf16.msra.mxu0 %v17533_v27  ;;  %17534 = vst [vmem:[#allocation17_spill] sm:$0xff] %v13872_v10  ;;  %v13879_v32 = vpop.eup %9613  ;;  %5777 = vmatmul.mubr.f32.gmra.mrb[138].mxu1 %v13834_v6  ;;  %v4228_v53 = vmax.f32 %v13801_v34, %v13805_v11  ;;  %v13887_v29 = vadd.f32 %v10350_v54, %v13708_v13  ;;  %v4041_v46 = vpop.xlane.xlu1 %4040  ;;  %9635 = vpow2.f32 %v4746_v36  ;;  %v17540_v27 = vld [vmem:[#allocation37_spill] sm:$0xff]  ;;  %v17545_v36 = vld [vmem:[#allocation35_spill] sm:$0xff] }
 0x241   : > { %9372 = vmatpush3.bf16.msra.mxu1 %v17537_v28  ;;  %v4086_v33 = vpop.xlane.xlu0 %4085  ;;  %v13889_v52 = vpop.eup %9615  ;;  %5636 = vmatprep.mubr.f32.mxu0 %v13858_v42  ;;  %v4412_v14 = vsub.f32 %v17539_v24, %v4041_v46  ;;  %v4413_v56 = vsub.f32 %v17540_v27, %v4041_v46  ;;  %v17541_v44 = vld [vmem:[#allocation33_spill] sm:$0xff]  ;;  %v17543_v11 = vpack.c.bf16 %v13227_v31, %v17542_v3  ;;  %9637 = vpow2.f32 %v4748_v50  ;;  %v17547_v27 = vld [vmem:[#allocation140_spill] sm:$0xff] }
 0x242   : > { %17538 = vst [vmem:[#allocation19_spill] sm:$0xff] %v13887_v29  ;;  %v4442_v28 = vsub.f32 %v17541_v44, %v4086_v33  ;;  %v13898_v34 = vpop.f32.mrb[94].mxu1  ;;  %v13900_v13 = vpop.f32.mrb[96].mxu0  ;;  %5168 = vadd.xlane.f32.xlu1 %v5167_v9  ;;  %v4443_v26 = vsub.f32 %v17545_v36, %v4086_v33  ;;  %v5215_v24 = vadd.f32 %v13756_v2, %v13753_v0  ;;  %v17548_v44 = vld [vmem:[#allocation139_spill] sm:$0xff]  ;;  %9639 = vpow2.f32 %v4686_v51  ;;  %v17554_v36 = vld [vmem:[#allocation40_spill] sm:$0xff] }
 0x243   : > { %9342 = vmatprep.subr.bf16.mxu0 %v17543_v11  ;;  %17544 = vst [vmem:[#allocation125_spill] sm:$0xff] %v13900_v13  ;;  %v13902_v10 = vpop.eup %9617  ;;  %v13908_v46 = vadd.f32 %v10349_v55, %v13731_v19  ;;  %v17549_v31 = vpack.c.bf16 %v17547_v27, %v17548_v44  ;;  %v13913_v3 = vpop.f32.mrb[95].mxu1  ;;  %4229 = vmax.xlane.f32.xlu0 %v4228_v53  ;;  %v4690_v9 = vmul.f32 1.442695, %v4412_v14  ;;  %v4692_v50 = vmul.f32 1.442695, %v4413_v56 }
 0x244   : > { %v13915_v11 = vpop.f32.mrb[97].mxu0  ;;  %v13917_v13 = vpop.eup %9619  ;;  %5781 = vmatprep.mubr.f32.mxu1 %v13902_v10  ;;  %v4750_v0 = vmul.f32 1.442695, %v4442_v28  ;;  %9641 = vpow2.f32 %v4688_v59  ;;  %v4752_v19 = vmul.f32 1.442695, %v4443_v26  ;;  %5637 = vmatmul.mubr.f32.gmra.mrb[140].mxu0 %v13847_v23  ;;  %v4276_v55 = vmax.f32 %v13842_v18, %v13845_v47  ;;  %v17552_v56 = vld [vmem:[#allocation38_spill] sm:$0xff] }
 0x245   : > { %17546 = vst [vmem:[#allocation124_spill] sm:$0xff] %v13908_v46  ;;  %9374 = vmatprep.subr.bf16.mxu1 %v17549_v31  ;;  %17550 = vst [vmem:[#allocation22_spill] sm:$0xff] %v13915_v11  ;;  %v13920_v2 = vpop.eup %9621  ;;  %5782 = vmatmul.mubr.f32.gmra.mrb[140].mxu1 %v13889_v52  ;;  %v13927_v33 = vadd.f32 %v10350_v54, %v13746_v60  ;;  %v4089_v51 = vpop.xlane.xlu1 %4088  ;;  %9643 = vpow2.f32 %v4690_v9  ;;  %v17553_v26 = vld [vmem:[#allocation39_spill] sm:$0xff]  ;;  %v17558_v54 = vld [vmem:[#allocation42_spill] sm:$0xff]  ;;  %v4231_v47 = vmax.f32 %v13865_v58, %v13887_v29 }
 0x246   : > { %v4044_v53 = vpop.xlane.xlu0 %4043  ;;  %v13929_v14 = vpop.eup %9623  ;;  %5641 = vmatprep.mubr.f32.mxu0 %v13879_v32  ;;  %v4444_v59 = vsub.f32 %v17552_v56, %v4089_v51  ;;  %v4445_v28 = vsub.f32 %v17553_v26, %v4089_v51  ;;  %5786 = vmatprep.mubr.f32.mxu1 %v13920_v2  ;;  %9645 = vpow2.f32 %v4692_v50  ;;  %v5170_v51 = vadd.f32 %v13776_v61, %v13765_v15  ;;  %v17559_v56 = vld [vmem:[#allocation142_spill] sm:$0xff]  ;;  %v17564_v29 = vld [vmem:[#allocation143_spill] sm:$0xff] }
 0x247   : > { %17551 = vst [vmem:[#allocation23_spill] sm:$0xff] %v13927_v33  ;;  %v4414_v27 = vsub.f32 %v17554_v36, %v4044_v53  ;;  %v13936_v44 = vpop.f32.mrb[96].mxu1  ;;  %v13938_v31 = vpop.f32.mrb[98].mxu0  ;;  %5216 = vadd.xlane.f32.xlu1 %v5215_v24  ;;  %v4415_v9 = vsub.f32 %v17558_v54, %v4044_v53  ;;  %v17560_v26 = vpack.c.bf16 %v13255_v45, %v17559_v56  ;;  %9647 = vpow2.f32 %v4750_v0  ;;  %v17563_v54 = vld [vmem:[#allocation144_spill] sm:$0xff]  ;;  %v10351_v58 = vld [vmem:[%s12165_s10 + $0xc0] sm:$0xff] }
 0x248   : > { %17555 = vst [vmem:[#allocation24_spill] sm:$0xff] %v13936_v44  ;;  %17556 = vst [vmem:[#allocation26_spill] sm:$0xff] %v13938_v31  ;;  %v13940_v60 = vpop.eup %9625  ;;  %v13950_v36 = vpop.f32.mrb[97].mxu1  ;;  %4277 = vmax.xlane.f32.xlu0 %v4276_v55  ;;  %v4754_v24 = vmul.f32 1.442695, %v4444_v59  ;;  %v17565_v15 = vpack.c.bf16 %v17563_v54, %v17564_v29  ;;  %9649 = vpow2.f32 %v4752_v19  ;;  %5642 = vmatmul.mubr.f32.gmra.mrb[142].mxu0 %v13874_v1  ;;  %v10352_v55 = vld [vmem:[%s12165_s10 + $0xc8] sm:$0xff] }
 0x249   : > { %17557 = vst [vmem:[#allocation127_spill] sm:$0xff] %v13940_v60  ;;  %9344 = vmatpush3.bf16.msra.mxu0 %v17560_v26  ;;  %17561 = vst [vmem:[#allocation126_spill] sm:$0xff] %v13950_v36  ;;  %v13952_v18 = vpop.f32.mrb[99].mxu0  ;;  %v13954_v31 = vpop.eup %9627  ;;  %v4756_v50 = vmul.f32 1.442695, %v4445_v28  ;;  %5787 = vmatmul.mubr.f32.gmra.mrb[142].mxu1 %v13917_v13  ;;  %v13965_v0 = vadd.f32 %v10351_v58, %v13733_v8  ;;  %v13969_v59 = vadd.f32 %v10352_v55, %v13748_v37  ;;  %v17568_v19 = vld [vmem:[#allocation44_spill] sm:$0xff] }
 0x24a   : > { %17562 = vst [vmem:[#allocation130_spill] sm:$0xff] %v13952_v18  ;;  %v4694_v53 = vmul.f32 1.442695, %v4414_v27  ;;  %9376 = vmatpush3.bf16.msra.mxu1 %v17565_v15  ;;  %v13959_v61 = vpop.eup %9629  ;;  %v4696_v45 = vmul.f32 1.442695, %v4415_v9  ;;  %v4047_v56 = vpop.xlane.xlu1 %4046  ;;  %9651 = vpow2.f32 %v4754_v24  ;;  %5646 = vmatprep.mubr.f32.mxu0 %v13940_v60  ;;  %v17569_v27 = vld [vmem:[#allocation45_spill] sm:$0xff] }
 0x24b   : > { %v4092_v26 = vpop.xlane.xlu0 %4091  ;;  %17566 = vst [vmem:[#allocation128_spill] sm:$0xff] %v13965_v0  ;;  %17567 = vst [vmem:[#allocation28_spill] sm:$0xff] %v13969_v59  ;;  %v13971_v29 = vpop.eup %9631  ;;  %v4416_v28 = vsub.f32 %v17568_v19, %v4047_v56  ;;  %v4417_v9 = vsub.f32 %v17569_v27, %v4047_v56  ;;  %v17570_v54 = vld [vmem:[#allocation41_spill] sm:$0xff]  ;;  %v17571_v18 = vld [vmem:[#allocation147_spill] sm:$0xff]  ;;  %9653 = vpow2.f32 %v4756_v50  ;;  %4232 = vmax.xlane.f32.xlu1 %v4231_v47 }
 0x24c   : > { %v4446_v15 = vsub.f32 %v17570_v54, %v4092_v26  ;;  %v17572_v36 = vld [vmem:[#allocation145_spill] sm:$0xff]  ;;  %v13980_v8 = vpop.f32.mrb[98].mxu1  ;;  %v13982_v11 = vpop.f32.mrb[100].mxu0  ;;  %v17575_v24 = vld [vmem:[#allocation43_spill] sm:$0xff]  ;;  %v4279_v56 = vmax.f32 %v13908_v46, %v13927_v33  ;;  %v17576_v27 = vld [vmem:[#allocation148_spill] sm:$0xff]  ;;  %9655 = vpow2.f32 %v4694_v53  ;;  %5171 = vadd.xlane.f32.xlu0 %v5170_v51  ;;  %5647 = vmatmul.mubr.f32.gmra.mrb[144].mxu0 %v13929_v14  ;;  %v14008_v51 = vadd.f32 %v10351_v58, %v13772_v17 }
 0x24d   : > { %v17573_v44 = vpack.c.bf16 %v17571_v18, %v17572_v36  ;;  %17574 = vst [vmem:[#allocation29_spill] sm:$0xff] %v13982_v11  ;;  %v13984_v37 = vpop.eup %9633  ;;  %v4447_v60 = vsub.f32 %v17575_v24, %v4092_v26  ;;  %v17577_v18 = vpack.c.bf16 %v13294_v40, %v17576_v27  ;;  %v13996_v36 = vpop.f32.mrb[101].mxu0  ;;  %v4698_v47 = vmul.f32 1.442695, %v4416_v28  ;;  %5651 = vmatprep.mubr.f32.mxu0 %v13959_v61  ;;  %v17580_v28 = vld [vmem:[#allocation46_spill] sm:$0xff] }
 0x24e   : > { %17578 = vst [vmem:[#allocation25_spill] sm:$0xff] %v13996_v36  ;;  %v13998_v54 = vpop.eup %9635  ;;  %v4700_v50 = vmul.f32 1.442695, %v4417_v9  ;;  %5791 = vmatprep.mubr.f32.mxu1 %v13984_v37  ;;  %v4758_v26 = vmul.f32 1.442695, %v4446_v15  ;;  %9657 = vpow2.f32 %v4696_v45  ;;  %v5218_v40 = vadd.f32 %v13820_v38, %v13807_v4  ;;  %v4095_v27 = vpop.xlane.xlu1 %4094  ;;  %17579 = vst [vmem:[#allocation132_spill] sm:$0xff] %v14008_v51 }
 0x24f   : > { %9346 = vmatprep.subr.bf16.mxu0 %v17573_v44  ;;  %9378 = vmatprep.subr.bf16.mxu1 %v17577_v18  ;;  %v13994_v44 = vpop.f32.mrb[99].mxu1  ;;  %v14001_v24 = vpop.eup %9637  ;;  %v4760_v19 = vmul.f32 1.442695, %v4447_v60  ;;  %9659 = vpow2.f32 %v4698_v47  ;;  %v4448_v45 = vsub.f32 %v17580_v28, %v4095_v27  ;;  %v17581_v60 = vld [vmem:[#allocation47_spill] sm:$0xff]  ;;  %v17582_v15 = vld [vmem:[#allocation48_spill] sm:$0xff]  ;;  %v17585_v17 = vld [vmem:[#allocation50_spill] sm:$0xff]  ;;  %v14025_v47 = vadd.f32 %v10352_v55, %v13783_v39 }
 0x250   : > { %5792 = vmatmul.mubr.f32.gmra.mrb[144].mxu1 %v13971_v29  ;;  %v4050_v18 = vpop.xlane.xlu0 %4049  ;;  %v14010_v53 = vpop.eup %9639  ;;  %v4449_v9 = vsub.f32 %v17581_v60, %v4095_v27  ;;  %9661 = vpow2.f32 %v4700_v50  ;;  %4280 = vmax.xlane.f32.xlu1 %v4279_v56  ;;  %v5173_v27 = vadd.f32 %v13795_v57, %v13790_v49  ;;  %v17587_v28 = vpack.c.bf16 %v13311_v41, %v13306_v7  ;;  %v17590_v55 = vld [vmem:[#allocation151_spill] sm:$0xff] }
 0x251   : > { %5796 = vmatprep.mubr.f32.mxu1 %v14001_v24  ;;  %v4418_v33 = vsub.f32 %v17582_v15, %v4050_v18  ;;  %v14017_v46 = vpop.f32.mrb[100].mxu1  ;;  %v14019_v4 = vpop.f32.mrb[102].mxu0  ;;  %v4419_v58 = vsub.f32 %v17585_v17, %v4050_v18  ;;  %17586 = vst [vmem:[#allocation30_spill] sm:$0xff] %v14025_v47  ;;  %9663 = vpow2.f32 %v4758_v26  ;;  %5219 = vadd.xlane.f32.xlu0 %v5218_v40  ;;  %v4762_v56 = vmul.f32 1.442695, %v4448_v45  ;;  %v17591_v18 = vld [vmem:[#allocation150_spill] sm:$0xff] }
 0x252   : > { %17583 = vst [vmem:[#allocation131_spill] sm:$0xff] %v14017_v46  ;;  %17584 = vst [vmem:[#allocation27_spill] sm:$0xff] %v14019_v4  ;;  %v14021_v38 = vpop.eup %9641  ;;  %9348 = vmatpush3.bf16.msra.mxu0 %v17587_v28  ;;  %v14032_v60 = vpop.f32.mrb[101].mxu1  ;;  %v4764_v50 = vmul.f32 1.442695, %v4449_v9  ;;  %v17592_v49 = vpack.c.bf16 %v17590_v55, %v17591_v18  ;;  %9665 = vpow2.f32 %v4760_v19  ;;  %v4282_v41 = vmax.f32 %v14008_v51, %v14025_v47  ;;  %v10353_v26 = vld [vmem:[%s12165_s10 + $0xd0] sm:$0xff] }
 0x253   : > { %17588 = vst [vmem:[#allocation31_spill] sm:$0xff] %v14032_v60  ;;  %v14034_v15 = vpop.f32.mrb[103].mxu0  ;;  %v14036_v4 = vpop.eup %9643  ;;  %v4702_v39 = vmul.f32 1.442695, %v4418_v33  ;;  %v4704_v7 = vmul.f32 1.442695, %v4419_v58  ;;  %5652 = vmatmul.mubr.f32.gmra.mrb[146].mxu0 %v13954_v31  ;;  %v14049_v40 = vadd.f32 %v10353_v26, %v13774_v43  ;;  %9667 = vpow2.f32 %v4762_v56 }
 0x254   : > { %17589 = vst [vmem:[#allocation32_spill] sm:$0xff] %v14034_v15  ;;  %9380 = vmatpush3.bf16.msra.mxu1 %v17592_v49  ;;  %v14041_v57 = vpop.eup %9645  ;;  %v4053_v33 = vpop.xlane.xlu1 %4052  ;;  %5656 = vmatprep.mubr.f32.mxu0 %v14021_v38  ;;  %v10354_v19 = vld [vmem:[%s12165_s10 + $0xd8] sm:$0xff]  ;;  %v17595_v58 = vld [vmem:[#allocation52_spill] sm:$0xff]  ;;  %9669 = vpow2.f32 %v4764_v50 }
 0x255   : > { %5797 = vmatmul.mubr.f32.gmra.mrb[146].mxu1 %v13998_v54  ;;  %17593 = vst [vmem:[#allocation34_spill] sm:$0xff] %v14049_v40  ;;  %v4098_v45 = vpop.xlane.xlu0 %4097  ;;  %v14051_v9 = vpop.eup %9647  ;;  %v14056_v17 = vadd.f32 %v10354_v19, %v13785_v25  ;;  %v4420_v28 = vsub.f32 %v17595_v58, %v4053_v33  ;;  %v17596_v55 = vld [vmem:[#allocation53_spill] sm:$0xff]  ;;  %v17598_v47 = vld [vmem:[#allocation152_spill] sm:$0xff]  ;;  %5174 = vadd.xlane.f32.xlu1 %v5173_v27  ;;  %v17601_v25 = vld [vmem:[#allocation51_spill] sm:$0xff]  ;;  %9671 = vpow2.f32 %v4702_v39 }
 0x256   : > { %v4421_v18 = vsub.f32 %v17596_v55, %v4053_v33  ;;  %v17597_v49 = vld [vmem:[#allocation153_spill] sm:$0xff]  ;;  %v14063_v43 = vpop.f32.mrb[102].mxu1  ;;  %v14065_v15 = vpop.f32.mrb[104].mxu0  ;;  %v4451_v36 = vsub.f32 %v17601_v25, %v4098_v45  ;;  %v5221_v58 = vadd.f32 %v13837_v62, %v13834_v6  ;;  %v17602_v33 = vld [vmem:[#allocation156_spill] sm:$0xff]  ;;  %v17603_v55 = vld [vmem:[#allocation155_spill] sm:$0xff]  ;;  %v17605_v27 = vmax.f32 %v13965_v0, %v13969_v59 }
 0x257   : > { %17594 = vst [vmem:[#allocation134_spill] sm:$0xff] %v14056_v17  ;;  %v17599_v51 = vpack.c.bf16 %v17597_v49, %v17598_v47  ;;  %v14067_v60 = vpop.eup %9649  ;;  %v17600_v56 = vld [vmem:[#allocation49_spill] sm:$0xff]  ;;  %v17604_v11 = vpack.c.bf16 %v17602_v33, %v17603_v55  ;;  %v14078_v47 = vpop.f32.mrb[105].mxu0  ;;  %v4237_v50 = vmax.f32 %v14049_v40, %v14056_v17  ;;  %9673 = vpow2.f32 %v4704_v7  ;;  %5657 = vmatmul.mubr.f32.gmra.mrb[148].mxu0 %v14010_v53  ;;  %v17608_v7 = vld [vmem:[#allocation54_spill] sm:$0xff] }
 0x258   : > { %v4450_v46 = vsub.f32 %v17600_v56, %v4098_v45  ;;  %v14080_v49 = vpop.eup %9651  ;;  %4235 = vmax.xlane.f32.xlu0 %v17605_v27  ;;  %v4706_v45 = vmul.f32 1.442695, %v4420_v28  ;;  %v4708_v6 = vmul.f32 1.442695, %v4421_v18  ;;  %5801 = vmatprep.mubr.f32.mxu1 %v14067_v60  ;;  %v4768_v25 = vmul.f32 1.442695, %v4451_v36  ;;  %v4101_v33 = vpop.xlane.xlu1 %4100 }
 0x259   : > { %9350 = vmatprep.subr.bf16.mxu0 %v17599_v51  ;;  %9382 = vmatprep.subr.bf16.mxu1 %v17604_v11  ;;  %v14076_v51 = vpop.f32.mrb[103].mxu1  ;;  %v14090_v11 = vpop.eup %9653  ;;  %v14095_v39 = vadd.f32 %v10353_v26, %v13813_v35  ;;  %v14101_v18 = vadd.f32 %v10354_v19, %v13827_v12  ;;  %v17609_v36 = vld [vmem:[#allocation55_spill] sm:$0xff]  ;;  %v17612_v59 = vld [vmem:[#allocation57_spill] sm:$0xff]  ;;  %v5176_v12 = vadd.f32 %v13858_v42, %v13847_v23 }
 0x25a   : > { %v14088_v62 = vpop.f32.mrb[104].mxu1  ;;  %v4766_v56 = vmul.f32 1.442695, %v4450_v46  ;;  %5802 = vmatmul.mubr.f32.gmra.mrb[148].mxu1 %v14051_v9  ;;  %v4104_v55 = vpop.xlane.xlu0 %4103  ;;  %9675 = vpow2.f32 %v4706_v45  ;;  %5661 = vmatprep.mubr.f32.mxu0 %v14041_v57  ;;  %v4452_v46 = vsub.f32 %v17608_v7, %v4101_v33  ;;  %v4453_v27 = vsub.f32 %v17609_v36, %v4101_v33  ;;  %v17611_v45 = vld [vmem:[#allocation56_spill] sm:$0xff]  ;;  %v17613_v19 = vld [vmem:[#allocation159_spill] sm:$0xff]  ;;  %v17614_v7 = vld [vmem:[#allocation157_spill] sm:$0xff] }
 0x25b   : > { %17606 = vst [vmem:[#allocation136_spill] sm:$0xff] %v14095_v39  ;;  %v14097_v28 = vpop.eup %9655  ;;  %17607 = vst [vmem:[#allocation135_spill] sm:$0xff] %v14101_v18  ;;  %5806 = vmatprep.mubr.f32.mxu1 %v14090_v11  ;;  %v14106_v17 = vpop.f32.mrb[105].mxu1  ;;  %9677 = vpow2.f32 %v4708_v6  ;;  %5222 = vadd.xlane.f32.xlu1 %v5221_v58  ;;  %v4454_v40 = vsub.f32 %v17611_v45, %v4104_v55  ;;  %v4455_v0 = vsub.f32 %v17612_v59, %v4104_v55 }
 0x25c   : > { %17610 = vst [vmem:[#allocation36_spill] sm:$0xff] %v14106_v17  ;;  %v14108_v35 = vpop.f32.mrb[106].mxu0  ;;  %v14110_v26 = vpop.eup %9657  ;;  %v17615_v33 = vpack.c.bf16 %v17613_v19, %v17614_v7  ;;  %9679 = vpow2.f32 %v4766_v56  ;;  %4283 = vmax.xlane.f32.xlu0 %v4282_v41  ;;  %v4285_v58 = vmax.f32 %v14095_v39, %v14101_v18  ;;  %v4770_v6 = vmul.f32 1.442695, %v4452_v46  ;;  %5662 = vmatmul.mubr.f32.gmra.mrb[150].mxu0 %v14036_v4  ;;  %v10355_v46 = vld [vmem:[%s12165_s10 + $0xe0] sm:$0xff] }
 0x25d   : > { %v14119_v36 = vpop.f32.mrb[107].mxu0  ;;  %v14121_v17 = vpop.eup %9659  ;;  %v4772_v45 = vmul.f32 1.442695, %v4453_v27  ;;  %v17617_v59 = vpack.c.bf16 %v13377_v5, %v13372_v30  ;;  %9681 = vpow2.f32 %v4768_v25  ;;  %v4774_v55 = vmul.f32 1.442695, %v4454_v40  ;;  %5666 = vmatprep.mubr.f32.mxu0 %v14110_v26  ;;  %v17620_v5 = vld [vmem:[#allocation60_spill] sm:$0xff] }
 0x25e   : > { %9352 = vmatpush3.bf16.msra.mxu0 %v17615_v33  ;;  %17616 = vst [vmem:[#allocation37_spill] sm:$0xff] %v14119_v36  ;;  %v14128_v23 = vpop.f32.mrb[106].mxu1  ;;  %v14130_v42 = vpop.eup %9661  ;;  %v4776_v19 = vmul.f32 1.442695, %v4455_v0  ;;  %5807 = vmatmul.mubr.f32.gmra.mrb[150].mxu1 %v14080_v49  ;;  %v14136_v27 = vadd.f32 %v10355_v46, %v13818_v22  ;;  %9683 = vpow2.f32 %v4770_v6  ;;  %v17621_v40 = vld [vmem:[#allocation61_spill] sm:$0xff]  ;;  %v17622_v7 = vld [vmem:[#allocation58_spill] sm:$0xff] }
 0x25f   : > { %9384 = vmatpush3.bf16.msra.mxu1 %v17617_v59  ;;  %17618 = vst [vmem:[#allocation33_spill] sm:$0xff] %v14128_v23  ;;  %v4107_v41 = vpop.xlane.xlu1 %4106  ;;  %v4152_v56 = vpop.xlane.xlu0 %4151  ;;  %v17623_v59 = vpack.c.bf16 %v13396_v63, %v13391_v20  ;;  %9685 = vpow2.f32 %v4772_v45  ;;  %4238 = vmax.xlane.f32.xlu1 %v4237_v50  ;;  %v17626_v6 = vld [vmem:[#allocation59_spill] sm:$0xff]  ;;  %v17629_v20 = vld [vmem:[#allocation161_spill] sm:$0xff] }
 0x260   : > { %17619 = vst [vmem:[#allocation138_spill] sm:$0xff] %v14136_v27  ;;  %v14138_v30 = vpop.eup %9663  ;;  %v4456_v25 = vsub.f32 %v17620_v5, %v4107_v41  ;;  %v4457_v0 = vsub.f32 %v17621_v40, %v4107_v41  ;;  %v4486_v33 = vsub.f32 %v17622_v7, %v4152_v56  ;;  %v14147_v18 = vpop.f32.mrb[107].mxu1  ;;  %v4487_v23 = vsub.f32 %v17626_v6, %v4152_v56  ;;  %v10356_v36 = vld [vmem:[%s12165_s10 + $0xe8] sm:$0xff] }
 0x261   : > { %9354 = vmatprep.subr.bf16.mxu0 %v17623_v59  ;;  %17624 = vst [vmem:[#allocation35_spill] sm:$0xff] %v14147_v18  ;;  %v14149_v39 = vpop.f32.mrb[108].mxu0  ;;  %v14151_v22 = vpop.eup %9665  ;;  %v14156_v5 = vadd.f32 %v10356_v36, %v13832_v48  ;;  %v5224_v41 = vadd.f32 %v13902_v10, %v13889_v52  ;;  %v17628_v40 = vld [vmem:[#allocation163_spill] sm:$0xff]  ;;  %9687 = vpow2.f32 %v4774_v55  ;;  %5177 = vadd.xlane.f32.xlu0 %v5176_v12 }
 0x262   : > { %17625 = vst [vmem:[#allocation140_spill] sm:$0xff] %v14149_v39  ;;  %v17630_v63 = vpack.c.bf16 %v17628_v40, %v17629_v20  ;;  %v14163_v7 = vpop.f32.mrb[109].mxu0  ;;  %v14165_v59 = vpop.eup %9667  ;;  %v4778_v50 = vmul.f32 1.442695, %v4456_v25  ;;  %v4780_v45 = vmul.f32 1.442695, %v4457_v0  ;;  %5811 = vmatprep.mubr.f32.mxu1 %v14151_v22  ;;  %9689 = vpow2.f32 %v4776_v19  ;;  %5667 = vmatmul.mubr.f32.gmra.mrb[152].mxu0 %v14097_v28 }
 0x263   : > { %17627 = vst [vmem:[#allocation139_spill] sm:$0xff] %v14156_v5  ;;  %17631 = vst [vmem:[#allocation38_spill] sm:$0xff] %v14163_v7  ;;  %v4838_v56 = vmul.f32 1.442695, %v4486_v33  ;;  %v14168_v48 = vpop.eup %9669  ;;  %v4840_v6 = vmul.f32 1.442695, %v4487_v23  ;;  %5812 = vmatmul.mubr.f32.gmra.mrb[152].mxu1 %v14138_v30  ;;  %v4240_v10 = vmax.f32 %v14136_v27, %v14156_v5  ;;  %v4155_v52 = vpop.xlane.xlu1 %4154  ;;  %v14175_v12 = vadd.f32 %v10355_v46, %v13854_v21 }
 0x264   : > { %9386 = vmatprep.subr.bf16.mxu1 %v17630_v63  ;;  %17632 = vst [vmem:[#allocation39_spill] sm:$0xff] %v14165_v59  ;;  %17633 = vst [vmem:[#allocation40_spill] sm:$0xff] %v14168_v48  ;;  %v4110_v40 = vpop.xlane.xlu0 %4109  ;;  %v14177_v55 = vpop.eup %9671  ;;  %9691 = vpow2.f32 %v4778_v50  ;;  %5671 = vmatprep.mubr.f32.mxu0 %v14130_v42  ;;  %v17635_v25 = vld [vmem:[#allocation62_spill] sm:$0xff]  ;;  %v17636_v23 = vld [vmem:[#allocation63_spill] sm:$0xff]  ;;  %v14192_v50 = vadd.f32 %v10356_v36, %v13870_v16 }
 0x265   : > { %17634 = vst [vmem:[#allocation42_spill] sm:$0xff] %v14175_v12  ;;  %v4488_v19 = vsub.f32 %v17635_v25, %v4155_v52  ;;  %v4489_v0 = vsub.f32 %v17636_v23, %v4155_v52  ;;  %5816 = vmatprep.mubr.f32.mxu1 %v14168_v48  ;;  %v17637_v33 = vld [vmem:[#allocation64_spill] sm:$0xff]  ;;  %v14184_v63 = vpop.f32.mrb[108].mxu1  ;;  %v14186_v5 = vpop.f32.mrb[110].mxu0  ;;  %9693 = vpow2.f32 %v4780_v45  ;;  %4286 = vmax.xlane.f32.xlu1 %v4285_v58  ;;  %v17641_v21 = vld [vmem:[#allocation65_spill] sm:$0xff] }
 0x266   : > { %v4458_v20 = vsub.f32 %v17637_v33, %v4110_v40  ;;  %17638 = vst [vmem:[#allocation142_spill] sm:$0xff] %v14184_v63  ;;  %17639 = vst [vmem:[#allocation144_spill] sm:$0xff] %v14186_v5  ;;  %v14188_v27 = vpop.eup %9673  ;;  %v4459_v46 = vsub.f32 %v17641_v21, %v4110_v40  ;;  %v5179_v52 = vadd.f32 %v13879_v32, %v13874_v1  ;;  %v17643_v25 = vld [vmem:[#allocation165_spill] sm:$0xff]  ;;  %v17644_v23 = vld [vmem:[#allocation164_spill] sm:$0xff]  ;;  %v14199_v33 = vpop.f32.mrb[109].mxu1  ;;  %9695 = vpow2.f32 %v4838_v56 }
 0x267   : > { %17640 = vst [vmem:[#allocation143_spill] sm:$0xff] %v14188_v27  ;;  %17642 = vst [vmem:[#allocation44_spill] sm:$0xff] %v14192_v50  ;;  %v17645_v7 = vpack.c.bf16 %v17643_v25, %v17644_v23  ;;  %v14201_v5 = vpop.f32.mrb[111].mxu0  ;;  %v14203_v63 = vpop.eup %9675  ;;  %5225 = vadd.xlane.f32.xlu0 %v5224_v41  ;;  %v4842_v58 = vmul.f32 1.442695, %v4488_v19  ;;  %v17648_v36 = vld [vmem:[#allocation168_spill] sm:$0xff]  ;;  %9697 = vpow2.f32 %v4840_v6  ;;  %5672 = vmatmul.mubr.f32.gmra.mrb[154].mxu0 %v14121_v17 }
 0x268   : > { %17646 = vst [vmem:[#allocation45_spill] sm:$0xff] %v14199_v33  ;;  %17647 = vst [vmem:[#allocation41_spill] sm:$0xff] %v14201_v5  ;;  %v4844_v45 = vmul.f32 1.442695, %v4489_v0  ;;  %v4782_v16 = vmul.f32 1.442695, %v4458_v20  ;;  %v14208_v1 = vpop.eup %9677  ;;  %5817 = vmatmul.mubr.f32.gmra.mrb[154].mxu1 %v14165_v59  ;;  %v4288_v56 = vmax.f32 %v14175_v12, %v14192_v50  ;;  %v4113_v20 = vpop.xlane.xlu1 %4112  ;;  %5676 = vmatprep.mubr.f32.mxu0 %v14188_v27 }
 0x269   : > { %9356 = vmatpush3.bf16.msra.mxu0 %v17645_v7  ;;  %v17649_v40 = vld [vmem:[#allocation167_spill] sm:$0xff]  ;;  %v4784_v7 = vmul.f32 1.442695, %v4459_v46  ;;  %v10357_v41 = vld [vmem:[%s12165_s10 + $0xf0] sm:$0xff]  ;;  %v4158_v21 = vpop.xlane.xlu0 %4157  ;;  %v14218_v25 = vpop.eup %9679  ;;  %9699 = vpow2.f32 %v4842_v58  ;;  %v10358_v6 = vld [vmem:[%s12165_s10 + $0xf8] sm:$0xff]  ;;  %5180 = vadd.xlane.f32.xlu1 %v5179_v52 }
 0x26a   : > { %v17650_v32 = vpack.c.bf16 %v17648_v36, %v17649_v40  ;;  %v17651_v19 = vld [vmem:[#allocation20_spill] sm:$0xff]  ;;  %v17653_v46 = vld [vmem:[#allocation17_spill] sm:$0xff]  ;;  %v17657_v50 = vld [vmem:[#allocation171_spill] sm:$0xff]  ;;  %v14232_v39 = vpop.f32.mrb[112].mxu0  ;;  %v14234_v18 = vpop.eup %9681  ;;  %9701 = vpow2.f32 %v4844_v45 }
 0x26b   : > { %v14216_v0 = vadd.f32 %v10357_v41, %v17651_v19  ;;  %v14223_v23 = vadd.f32 %v10358_v6, %v17653_v46  ;;  %v17655_v36 = vld [vmem:[#allocation68_spill] sm:$0xff]  ;;  %v17658_v12 = vld [vmem:[#allocation169_spill] sm:$0xff]  ;;  %v14230_v19 = vpop.f32.mrb[110].mxu1  ;;  %17661 = vst [vmem:[#allocation148_spill] sm:$0xff] %v14232_v39  ;;  %v17662_v58 = vld [vmem:[#allocation66_spill] sm:$0xff]  ;;  %9703 = vpow2.f32 %v4782_v16  ;;  %4241 = vmax.xlane.f32.xlu0 %v4240_v10  ;;  %5821 = vmatprep.mubr.f32.mxu1 %v14234_v18 }
 0x26c   : > { %9388 = vmatpush3.bf16.msra.mxu1 %v17650_v32  ;;  %v4460_v40 = vsub.f32 %v17655_v36, %v4113_v20  ;;  %v17656_v32 = vld [vmem:[#allocation69_spill] sm:$0xff]  ;;  %v17659_v33 = vpack.c.bf16 %v17657_v50, %v17658_v12  ;;  %17660 = vst [vmem:[#allocation43_spill] sm:$0xff] %v14230_v19  ;;  %v4490_v27 = vsub.f32 %v17662_v58, %v4158_v21  ;;  %v17663_v46 = vld [vmem:[#allocation67_spill] sm:$0xff]  ;;  %v14243_v12 = vpop.f32.mrb[111].mxu1  ;;  %v14245_v50 = vpop.f32.mrb[113].mxu0  ;;  %9705 = vpow2.f32 %v4784_v7  ;;  %v17672_v7 = vld [vmem:[#allocation70_spill] sm:$0xff] }
 0x26d   : > { %17652 = vst [vmem:[#allocation147_spill] sm:$0xff] %v14216_v0  ;;  %17654 = vst [vmem:[#allocation145_spill] sm:$0xff] %v14223_v23  ;;  %v4461_v5 = vsub.f32 %v17656_v32, %v4113_v20  ;;  %v4491_v48 = vsub.f32 %v17663_v46, %v4158_v21  ;;  %v5227_v36 = vadd.f32 %v13920_v2, %v13917_v13  ;;  %v17664_v20 = vld [vmem:[#allocation173_spill] sm:$0xff]  ;;  %v17665_v32 = vld [vmem:[#allocation172_spill] sm:$0xff]  ;;  %v14252_v13 = vpop.f32.mrb[112].mxu1  ;;  %5677 = vmatmul.mubr.f32.gmra.mrb[156].mxu0 %v14177_v55  ;;  %v4161_v16 = vpop.xlane.xlu1 %4160 }
 0x26e   : > { %9390 = vmatprep.subr.bf16.mxu0 %v17659_v33  ;;  %v17666_v59 = vpack.c.bf16 %v17664_v20, %v17665_v32  ;;  %17667 = vst [vmem:[#allocation46_spill] sm:$0xff] %v14243_v12  ;;  %17668 = vst [vmem:[#allocation47_spill] sm:$0xff] %v14245_v50  ;;  %v14247_v33 = vpop.eup %9683  ;;  %v4243_v52 = vmax.f32 %v14216_v0, %v14223_v23  ;;  %v4786_v45 = vmul.f32 1.442695, %v4460_v40  ;;  %5822 = vmatmul.mubr.f32.gmra.mrb[156].mxu1 %v14218_v25  ;;  %v4116_v46 = vpop.xlane.xlu0 %4115  ;;  %v17677_v0 = vld [vmem:[#allocation73_spill] sm:$0xff]  ;;  %v10360_v12 = vld [vmem:[%s12165_s10 + $0x8] sm:$0xff] }
 0x26f   : > { %v4788_v21 = vmul.f32 1.442695, %v4461_v5  ;;  %17669 = vst [vmem:[#allocation48_spill] sm:$0xff] %v14252_v13  ;;  %v14254_v2 = vpop.eup %9685  ;;  %v4848_v58 = vmul.f32 1.442695, %v4491_v48  ;;  %v14259_v10 = vadd.f32 %v10357_v41, %v13898_v34  ;;  %5681 = vmatprep.mubr.f32.mxu0 %v14208_v1  ;;  %v14265_v5 = vadd.f32 %v10358_v6, %v13913_v3  ;;  %v17673_v48 = vld [vmem:[#allocation71_spill] sm:$0xff]  ;;  %5228 = vadd.xlane.f32.xlu1 %v5227_v36 }
 0x270   : > { %9422 = vmatprep.subr.bf16.mxu1 %v17666_v59  ;;  %v4846_v59 = vmul.f32 1.442695, %v4490_v27  ;;  %v14261_v40 = vpop.eup %9687  ;;  %9707 = vpow2.f32 %v4786_v45  ;;  %v4492_v27 = vsub.f32 %v17672_v7, %v4161_v16  ;;  %v4493_v20 = vsub.f32 %v17673_v48, %v4161_v16  ;;  %5826 = vmatprep.mubr.f32.mxu1 %v14254_v2  ;;  %v14270_v32 = vpop.f32.mrb[113].mxu1  ;;  %v17676_v45 = vld [vmem:[#allocation72_spill] sm:$0xff]  ;;  %v17678_v3 = vld [vmem:[#allocation127_spill] sm:$0xff] }
 0x271   : > { %17670 = vst [vmem:[#allocation50_spill] sm:$0xff] %v14259_v10  ;;  %17671 = vst [vmem:[#allocation151_spill] sm:$0xff] %v14265_v5  ;;  %v14272_v34 = vpop.f32.mrb[114].mxu0  ;;  %v14274_v41 = vpop.eup %9689  ;;  %9709 = vpow2.f32 %v4788_v21  ;;  %v4462_v23 = vsub.f32 %v17676_v45, %v4116_v46  ;;  %v4463_v13 = vsub.f32 %v17677_v0, %v4116_v46  ;;  %v5182_v6 = vadd.f32 %v17678_v3, %v13929_v14  ;;  %v17683_v3 = vld [vmem:[#allocation125_spill] sm:$0xff] }
 0x272   : > { %17674 = vst [vmem:[#allocation150_spill] sm:$0xff] %v14270_v32  ;;  %17675 = vst [vmem:[#allocation52_spill] sm:$0xff] %v14272_v34  ;;  %v14280_v7 = vpop.f32.mrb[115].mxu0  ;;  %v14282_v16 = vpop.eup %9691  ;;  %9711 = vpow2.f32 %v4846_v59  ;;  %4289 = vmax.xlane.f32.xlu0 %v4288_v56  ;;  %v4291_v48 = vmax.f32 %v14259_v10, %v14265_v5  ;;  %v4850_v34 = vmul.f32 1.442695, %v4492_v27  ;;  %5682 = vmatmul.mubr.f32.gmra.mrb[158].mxu0 %v14203_v63  ;;  %v10359_v56 = vld [vmem:[%s12165_s10] sm:$0xff] }
 0x273   : > { %17679 = vst [vmem:[#allocation53_spill] sm:$0xff] %v14280_v7  ;;  %17680 = vst [vmem:[#allocation153_spill] sm:$0xff] %v14282_v16  ;;  %v4852_v21 = vmul.f32 1.442695, %v4493_v20  ;;  %v14286_v36 = vpop.f32.mrb[114].mxu1  ;;  %v14288_v45 = vpop.eup %9693  ;;  %9713 = vpow2.f32 %v4848_v58  ;;  %5827 = vmatmul.mubr.f32.gmra.mrb[158].mxu1 %v14247_v33  ;;  %v14294_v7 = vadd.f32 %v10359_v56, %v17683_v3  ;;  %5896 = vmatprep.mubr.f32.mxu0 %v14274_v41  ;;  %v17686_v20 = vld [vmem:[#allocation76_spill] sm:$0xff] }
 0x274   : > { %17681 = vst [vmem:[#allocation152_spill] sm:$0xff] %v14286_v36  ;;  %17682 = vst [vmem:[#allocation49_spill] sm:$0xff] %v14288_v45  ;;  %v4790_v0 = vmul.f32 1.442695, %v4462_v23  ;;  %v4792_v46 = vmul.f32 1.442695, %v4463_v13  ;;  %v4119_v14 = vpop.xlane.xlu1 %4118  ;;  %v4164_v59 = vpop.xlane.xlu0 %4163  ;;  %9715 = vpow2.f32 %v4850_v34  ;;  %4244 = vmax.xlane.f32.xlu1 %v4243_v52 }
 0x275   : > { %17684 = vst [vmem:[#allocation51_spill] sm:$0xff] %v14294_v7  ;;  %v14296_v27 = vpop.eup %9695  ;;  %v4464_v58 = vsub.f32 %v17686_v20, %v4119_v14  ;;  %v17687_v23 = vld [vmem:[#allocation77_spill] sm:$0xff]  ;;  %v17688_v5 = vld [vmem:[#allocation74_spill] sm:$0xff]  ;;  %v14302_v36 = vpop.f32.mrb[115].mxu1  ;;  %9717 = vpow2.f32 %v4852_v21  ;;  %v17692_v3 = vld [vmem:[#allocation75_spill] sm:$0xff]  ;;  %v5230_v20 = vadd.f32 %v13984_v37, %v13971_v29 }
 0x276   : > { %17685 = vst [vmem:[#allocation156_spill] sm:$0xff] %v14296_v27  ;;  %v4465_v13 = vsub.f32 %v17687_v23, %v4119_v14  ;;  %v4494_v10 = vsub.f32 %v17688_v5, %v4164_v59  ;;  %17689 = vst [vmem:[#allocation155_spill] sm:$0xff] %v14302_v36  ;;  %v14304_v32 = vpop.f32.mrb[116].mxu0  ;;  %v14306_v50 = vpop.eup %9697  ;;  %v4495_v39 = vsub.f32 %v17692_v3, %v4164_v59  ;;  %v17693_v34 = vld [vmem:[#allocation22_spill] sm:$0xff]  ;;  %9719 = vpow2.f32 %v4790_v0  ;;  %v17698_v0 = vld [vmem:[#allocation24_spill] sm:$0xff] }
 0x277   : > { %17690 = vst [vmem:[#allocation54_spill] sm:$0xff] %v14304_v32  ;;  %17691 = vst [vmem:[#allocation55_spill] sm:$0xff] %v14306_v50  ;;  %v14311_v19 = vadd.f32 %v10360_v12, %v17693_v34  ;;  %v14315_v14 = vpop.f32.mrb[117].mxu0  ;;  %v14317_v5 = vpop.eup %9699  ;;  %5183 = vadd.xlane.f32.xlu0 %v5182_v6  ;;  %v4794_v23 = vmul.f32 1.442695, %v4464_v58  ;;  %6041 = vmatprep.mubr.f32.mxu1 %v14306_v50  ;;  %9721 = vpow2.f32 %v4792_v46  ;;  %v17702_v34 = vld [vmem:[#allocation80_spill] sm:$0xff] }
 0x278   : > { %17695 = vst [vmem:[#allocation57_spill] sm:$0xff] %v14315_v14  ;;  %17696 = vst [vmem:[#allocation159_spill] sm:$0xff] %v14317_v5  ;;  %v4796_v32 = vmul.f32 1.442695, %v4465_v13  ;;  %v4854_v52 = vmul.f32 1.442695, %v4494_v10  ;;  %v14320_v21 = vpop.eup %9701  ;;  %5897 = vmatmul.mubr.f32.vlgmr.msra.gmra.mrb[160].mxu0 %v14261_v40  ;;  %6042 = vmatmul.mubr.f32.vlgmr.msra.gmra.mrb[160].mxu1 %v14296_v27  ;;  %v4167_v37 = vpop.xlane.xlu1 %4166  ;;  %v14327_v6 = vadd.f32 %v10359_v56, %v17698_v0 }
 0x279   : > { %17694 = vst [vmem:[#allocation56_spill] sm:$0xff] %v14311_v19  ;;  %17697 = vst [vmem:[#allocation157_spill] sm:$0xff] %v14320_v21  ;;  %v4856_v59 = vmul.f32 1.442695, %v4495_v39  ;;  %v4294_v29 = vmax.f32 %v14294_v7, %v14311_v19  ;;  %v4122_v3 = vpop.xlane.xlu0 %4121  ;;  %v14329_v58 = vpop.eup %9703  ;;  %9723 = vpow2.f32 %v4794_v23  ;;  %5901 = vmatprep.mubr.f32.mxu0 %v14288_v45  ;;  %v17700_v10 = vld [vmem:[#allocation78_spill] sm:$0xff]  ;;  %v17701_v39 = vld [vmem:[#allocation79_spill] sm:$0xff]  ;;  %6046 = vmatprep.mubr.f32.mxu1 %v14320_v21 }
 0x27a   : > { %17699 = vst [vmem:[#allocation60_spill] sm:$0xff] %v14327_v6  ;;  %v4496_v46 = vsub.f32 %v17700_v10, %v4167_v37  ;;  %v4497_v13 = vsub.f32 %v17701_v39, %v4167_v37  ;;  %v4466_v14 = vsub.f32 %v17702_v34, %v4122_v3  ;;  %v14336_v36 = vpop.f32.mrb[116].mxu1  ;;  %v14338_v19 = vpop.f32.mrb[118].mxu0  ;;  %9725 = vpow2.f32 %v4796_v32  ;;  %4292 = vmax.xlane.f32.xlu1 %v4291_v48  ;;  %v17706_v56 = vld [vmem:[#allocation81_spill] sm:$0xff]  ;;  %v17707_v0 = vld [vmem:[#allocation126_spill] sm:$0xff]  ;;  %v17710_v39 = vld [vmem:[#allocation175_spill] sm:$0xff] }
 0x27b   : > { %17703 = vst [vmem:[#allocation61_spill] sm:$0xff] %v14336_v36  ;;  %17704 = vst [vmem:[#allocation58_spill] sm:$0xff] %v14338_v19  ;;  %v14340_v7 = vpop.eup %9705  ;;  %v4467_v23 = vsub.f32 %v17706_v56, %v4122_v3  ;;  %v14344_v45 = vadd.f32 %v10360_v12, %v17707_v0  ;;  %v5185_v37 = vadd.f32 %v13959_v61, %v13954_v31  ;;  %v17709_v10 = vld [vmem:[#allocation177_spill] sm:$0xff]  ;;  %v14351_v34 = vpop.f32.mrb[117].mxu1  ;;  %9727 = vpow2.f32 %v4854_v52  ;;  %v17714_v3 = vld [vmem:[#allocation179_spill] sm:$0xff] }
 0x27c   : > { %17705 = vst [vmem:[#allocation59_spill] sm:$0xff] %v14340_v7  ;;  %v17711_v21 = vpack.c.bf16 %v17709_v10, %v17710_v39  ;;  %17712 = vst [vmem:[#allocation161_spill] sm:$0xff] %v14351_v34  ;;  %v14353_v19 = vpop.f32.mrb[119].mxu0  ;;  %v14355_v36 = vpop.eup %9707  ;;  %5231 = vadd.xlane.f32.xlu0 %v5230_v20  ;;  %v4858_v32 = vmul.f32 1.442695, %v4496_v46  ;;  %v17715_v56 = vld [vmem:[#allocation178_spill] sm:$0xff]  ;;  %9729 = vpow2.f32 %v4856_v59  ;;  %5902 = vmatmul.mubr.f32.gmra.mrb[162].mxu0 %v14282_v16 }
 0x27d   : > { %17708 = vst [vmem:[#allocation163_spill] sm:$0xff] %v14344_v45  ;;  %17713 = vst [vmem:[#allocation62_spill] sm:$0xff] %v14353_v19  ;;  %v4860_v48 = vmul.f32 1.442695, %v4497_v13  ;;  %v4798_v12 = vmul.f32 1.442695, %v4466_v14  ;;  %v17716_v31 = vpack.c.bf16 %v17714_v3, %v17715_v56  ;;  %v14360_v61 = vpop.eup %9709  ;;  %6047 = vmatmul.mubr.f32.gmra.mrb[162].mxu1 %v14317_v5  ;;  %v4342_v52 = vmax.f32 %v14327_v6, %v14344_v45  ;;  %v4125_v14 = vpop.xlane.xlu1 %4124 }
 0x27e   : > { %9392 = vmatpush3.bf16.msra.mxu0 %v17711_v21  ;;  %v4800_v21 = vmul.f32 1.442695, %v4467_v23  ;;  %v10361_v20 = vld [vmem:[%s12165_s10 + $0x10] sm:$0xff]  ;;  %v17717_v46 = vld [vmem:[#allocation26_spill] sm:$0xff]  ;;  %v4170_v0 = vpop.xlane.xlu0 %4169  ;;  %v14370_v10 = vpop.eup %9711  ;;  %9731 = vpow2.f32 %v4858_v32  ;;  %5906 = vmatprep.mubr.f32.mxu0 %v14340_v7  ;;  %v10362_v59 = vld [vmem:[%s12165_s10 + $0x18] sm:$0xff] }
 0x27f   : > { %9424 = vmatpush3.bf16.msra.mxu1 %v17716_v31  ;;  %v14368_v13 = vadd.f32 %v10361_v20, %v17717_v46  ;;  %v17719_v23 = vld [vmem:[#allocation130_spill] sm:$0xff]  ;;  %v17721_v3 = vld [vmem:[#allocation84_spill] sm:$0xff]  ;;  %v17722_v31 = vld [vmem:[#allocation85_spill] sm:$0xff]  ;;  %v14382_v46 = vpop.f32.mrb[118].mxu1  ;;  %v14384_v5 = vpop.f32.mrb[120].mxu0  ;;  %9733 = vpow2.f32 %v4860_v48  ;;  %5186 = vadd.xlane.f32.xlu1 %v5185_v37 }
 0x280   : > { %v14375_v39 = vadd.f32 %v10362_v59, %v17719_v23  ;;  %v4468_v56 = vsub.f32 %v17721_v3, %v4125_v14  ;;  %v4469_v19 = vsub.f32 %v17722_v31, %v4125_v14  ;;  %v17723_v45 = vld [vmem:[#allocation182_spill] sm:$0xff]  ;;  %v17724_v6 = vld [vmem:[#allocation181_spill] sm:$0xff]  ;;  %17726 = vst [vmem:[#allocation65_spill] sm:$0xff] %v14384_v5  ;;  %v14386_v16 = vpop.eup %9713  ;;  %v17728_v23 = vld [vmem:[#allocation83_spill] sm:$0xff]  ;;  %v5233_v3 = vadd.f32 %v14001_v24, %v13998_v54 }
 0x281   : > { %17718 = vst [vmem:[#allocation63_spill] sm:$0xff] %v14368_v13  ;;  %v17725_v34 = vpack.c.bf16 %v17723_v45, %v17724_v6  ;;  %v17727_v32 = vld [vmem:[#allocation82_spill] sm:$0xff]  ;;  %v4499_v50 = vsub.f32 %v17728_v23, %v4170_v0  ;;  %v17729_v14 = vld [vmem:[#allocation185_spill] sm:$0xff]  ;;  %v17730_v31 = vld [vmem:[#allocation183_spill] sm:$0xff]  ;;  %v14395_v45 = vpop.f32.mrb[119].mxu1  ;;  %v14397_v6 = vpop.f32.mrb[121].mxu0  ;;  %9735 = vpow2.f32 %v4798_v12  ;;  %4295 = vmax.xlane.f32.xlu0 %v4294_v29  ;;  %6051 = vmatprep.mubr.f32.mxu1 %v14386_v16 }
 0x282   : > { %17720 = vst [vmem:[#allocation64_spill] sm:$0xff] %v14375_v39  ;;  %v4498_v7 = vsub.f32 %v17727_v32, %v4170_v0  ;;  %v17731_v27 = vpack.c.bf16 %v17729_v14, %v17730_v31  ;;  %17732 = vst [vmem:[#allocation165_spill] sm:$0xff] %v14397_v6  ;;  %v4297_v37 = vmax.f32 %v14368_v13, %v14375_v39  ;;  %v4802_v48 = vmul.f32 1.442695, %v4468_v56  ;;  %v14404_v54 = vpop.f32.mrb[120].mxu1  ;;  %v4173_v12 = vpop.xlane.xlu1 %4172  ;;  %v17744_v13 = vld [vmem:[#allocation89_spill] sm:$0xff] }
 0x283   : > { %9394 = vmatprep.subr.bf16.mxu0 %v17725_v34  ;;  %v14399_v34 = vpop.eup %9715  ;;  %v4804_v0 = vmul.f32 1.442695, %v4469_v19  ;;  %17734 = vst [vmem:[#allocation168_spill] sm:$0xff] %v14404_v54  ;;  %9737 = vpow2.f32 %v4800_v21  ;;  %v4864_v32 = vmul.f32 1.442695, %v4499_v50  ;;  %5907 = vmatmul.mubr.f32.gmra.mrb[164].mxu0 %v14329_v58  ;;  %v14411_v29 = vadd.f32 %v10361_v20, %v13980_v8  ;;  %v4128_v23 = vpop.xlane.xlu0 %4127  ;;  %v17738_v21 = vld [vmem:[#allocation86_spill] sm:$0xff] }
 0x284   : > { %9426 = vmatprep.subr.bf16.mxu1 %v17731_v27  ;;  %17733 = vst [vmem:[#allocation164_spill] sm:$0xff] %v14399_v34  ;;  %v14406_v24 = vpop.eup %9717  ;;  %v4862_v27 = vmul.f32 1.442695, %v4498_v7  ;;  %6052 = vmatmul.mubr.f32.gmra.mrb[164].mxu1 %v14370_v10  ;;  %9739 = vpow2.f32 %v4802_v48  ;;  %v14417_v19 = vadd.f32 %v10362_v59, %v13994_v44  ;;  %v4500_v7 = vsub.f32 %v17738_v21, %v4173_v12  ;;  %v17739_v50 = vld [vmem:[#allocation87_spill] sm:$0xff]  ;;  %v14422_v31 = vpop.f32.mrb[121].mxu1  ;;  %v17743_v48 = vld [vmem:[#allocation88_spill] sm:$0xff] }
 0x285   : > { %17735 = vst [vmem:[#allocation167_spill] sm:$0xff] %v14406_v24  ;;  %17736 = vst [vmem:[#allocation20_spill] sm:$0xff] %v14411_v29  ;;  %v14413_v56 = vpop.eup %9719  ;;  %5911 = vmatprep.mubr.f32.mxu0 %v14360_v61  ;;  %v4501_v14 = vsub.f32 %v17739_v50, %v4173_v12  ;;  %6056 = vmatprep.mubr.f32.mxu1 %v14406_v24  ;;  %v14424_v8 = vpop.f32.mrb[122].mxu0  ;;  %9741 = vpow2.f32 %v4804_v0  ;;  %v4470_v39 = vsub.f32 %v17743_v48, %v4128_v23  ;;  %v17745_v59 = vld [vmem:[#allocation187_spill] sm:$0xff]  ;;  %v17746_v21 = vld [vmem:[#allocation186_spill] sm:$0xff] }
 0x286   : > { %17737 = vst [vmem:[#allocation17_spill] sm:$0xff] %v14417_v19  ;;  %17740 = vst [vmem:[#allocation68_spill] sm:$0xff] %v14422_v31  ;;  %v14426_v20 = vpop.eup %9721  ;;  %5234 = vadd.xlane.f32.xlu1 %v5233_v3  ;;  %v4471_v54 = vsub.f32 %v17744_v13, %v4128_v23  ;;  %v5188_v44 = vadd.f32 %v14021_v38, %v14010_v53  ;;  %v17747_v12 = vpack.c.bf16 %v17745_v59, %v17746_v21  ;;  %v14435_v50 = vpop.f32.mrb[123].mxu0  ;;  %v17750_v13 = vld [vmem:[#allocation190_spill] sm:$0xff]  ;;  %v17751_v23 = vld [vmem:[#allocation189_spill] sm:$0xff] }
 0x287   : > { %17741 = vst [vmem:[#allocation69_spill] sm:$0xff] %v14424_v8  ;;  %17742 = vst [vmem:[#allocation171_spill] sm:$0xff] %v14426_v20  ;;  %v14437_v31 = vpop.eup %9723  ;;  %9743 = vpow2.f32 %v4862_v27  ;;  %4343 = vmax.xlane.f32.xlu0 %v4342_v52  ;;  %v4345_v3 = vmax.f32 %v14411_v29, %v14417_v19  ;;  %v4866_v0 = vmul.f32 1.442695, %v4500_v7  ;;  %v4868_v48 = vmul.f32 1.442695, %v4501_v14  ;;  %5912 = vmatmul.mubr.f32.gmra.mrb[166].mxu0 %v14355_v36  ;;  %v4131_v52 = vpop.xlane.xlu1 %4130 }
 0x288   : > { %9396 = vmatpush3.bf16.msra.mxu0 %v17747_v12  ;;  %17748 = vst [vmem:[#allocation169_spill] sm:$0xff] %v14435_v50  ;;  %17749 = vst [vmem:[#allocation66_spill] sm:$0xff] %v14437_v31  ;;  %v17752_v8 = vpack.c.bf16 %v17750_v13, %v17751_v23  ;;  %v14444_v53 = vpop.f32.mrb[122].mxu1  ;;  %v14446_v38 = vpop.eup %9725  ;;  %9745 = vpow2.f32 %v4864_v32  ;;  %v4806_v59 = vmul.f32 1.442695, %v4470_v39  ;;  %6057 = vmatmul.mubr.f32.gmra.mrb[166].mxu1 %v14399_v34  ;;  %v10363_v7 = vld [vmem:[%s12165_s10 + $0x20] sm:$0xff] }
 0x289   : > { %17753 = vst [vmem:[#allocation67_spill] sm:$0xff] %v14444_v53  ;;  %17754 = vst [vmem:[#allocation173_spill] sm:$0xff] %v14446_v38  ;;  %v4808_v21 = vmul.f32 1.442695, %v4471_v54  ;;  %v4176_v27 = vpop.xlane.xlu0 %4175  ;;  %v17755_v14 = vld [vmem:[#allocation29_spill] sm:$0xff]  ;;  %v14454_v13 = vpop.eup %9727  ;;  %9747 = vpow2.f32 %v4866_v0  ;;  %5916 = vmatprep.mubr.f32.mxu0 %v14426_v20  ;;  %v17759_v23 = vld [vmem:[#allocation90_spill] sm:$0xff] }
 0x28a   : > { %9428 = vmatpush3.bf16.msra.mxu1 %v17752_v8  ;;  %v14452_v12 = vadd.f32 %v10363_v7, %v17755_v14  ;;  %v17757_v8 = vld [vmem:[#allocation92_spill] sm:$0xff]  ;;  %v17758_v39 = vld [vmem:[#allocation93_spill] sm:$0xff]  ;;  %v4502_v19 = vsub.f32 %v17759_v23, %v4176_v27  ;;  %v17760_v29 = vld [vmem:[#allocation194_spill] sm:$0xff]  ;;  %v14463_v6 = vpop.f32.mrb[123].mxu1  ;;  %v14465_v5 = vpop.f32.mrb[124].mxu0  ;;  %9749 = vpow2.f32 %v4868_v48  ;;  %4298 = vmax.xlane.f32.xlu1 %v4297_v37 }
 0x28b   : > { %v4472_v32 = vsub.f32 %v17757_v8, %v4131_v52  ;;  %v4473_v54 = vsub.f32 %v17758_v39, %v4131_v52  ;;  %v17761_v53 = vld [vmem:[#allocation193_spill] sm:$0xff]  ;;  %v14467_v14 = vpop.eup %9729  ;;  %v17763_v0 = vld [vmem:[#allocation91_spill] sm:$0xff]  ;;  %v5236_v52 = vadd.f32 %v14067_v60, %v14051_v9  ;;  %v14476_v39 = vpop.f32.mrb[125].mxu0  ;;  %9751 = vpow2.f32 %v4806_v59  ;;  %5189 = vadd.xlane.f32.xlu0 %v5188_v44  ;;  %5917 = vmatmul.mubr.f32.gmra.mrb[168].mxu0 %v14413_v56 }
 0x28c   : > { %17756 = vst [vmem:[#allocation172_spill] sm:$0xff] %v14452_v12  ;;  %v17762_v50 = vpack.c.bf16 %v17760_v29, %v17761_v53  ;;  %v4503_v20 = vsub.f32 %v17763_v0, %v4176_v27  ;;  %v10364_v24 = vld [vmem:[%s12165_s10 + $0x28] sm:$0xff]  ;;  %v17764_v8 = vld [vmem:[#allocation25_spill] sm:$0xff]  ;;  %17766 = vst [vmem:[#allocation71_spill] sm:$0xff] %v14476_v39  ;;  %v14478_v29 = vpop.eup %9731  ;;  %6061 = vmatprep.mubr.f32.mxu1 %v14467_v14  ;;  %v4870_v37 = vmul.f32 1.442695, %v4502_v19  ;;  %9753 = vpow2.f32 %v4808_v21  ;;  %v4179_v9 = vpop.xlane.xlu1 %4178 }
 0x28d   : > { %v14472_v34 = vadd.f32 %v10364_v24, %v17764_v8  ;;  %17767 = vst [vmem:[#allocation72_spill] sm:$0xff] %v14478_v29  ;;  %v4812_v53 = vmul.f32 1.442695, %v4473_v54  ;;  %v14481_v48 = vpop.eup %9733  ;;  %6062 = vmatmul.mubr.f32.gmra.mrb[168].mxu1 %v14454_v13  ;;  %v4134_v23 = vpop.xlane.xlu0 %4133  ;;  %v17769_v59 = vld [vmem:[#allocation131_spill] sm:$0xff]  ;;  %5921 = vmatprep.mubr.f32.mxu0 %v14446_v38  ;;  %v17771_v19 = vld [vmem:[#allocation94_spill] sm:$0xff]  ;;  %v17773_v0 = vld [vmem:[#allocation96_spill] sm:$0xff] }
 0x28e   : > { %9398 = vmatprep.subr.bf16.mxu0 %v17762_v50  ;;  %v4810_v50 = vmul.f32 1.442695, %v4472_v32  ;;  %17768 = vst [vmem:[#allocation73_spill] sm:$0xff] %v14481_v48  ;;  %v4872_v27 = vmul.f32 1.442695, %v4503_v20  ;;  %v14488_v44 = vadd.f32 %v10363_v7, %v17769_v59  ;;  %v14490_v32 = vpop.eup %9735  ;;  %v4504_v21 = vsub.f32 %v17771_v19, %v4179_v9  ;;  %v17772_v20 = vld [vmem:[#allocation95_spill] sm:$0xff]  ;;  %6066 = vmatprep.mubr.f32.mxu1 %v14481_v48 }
 0x28f   : > { %17765 = vst [vmem:[#allocation70_spill] sm:$0xff] %v14472_v34  ;;  %v4300_v60 = vmax.f32 %v14452_v12, %v14472_v34  ;;  %v4505_v54 = vsub.f32 %v17772_v20, %v4179_v9  ;;  %v4474_v8 = vsub.f32 %v17773_v0, %v4134_v23  ;;  %v14497_v39 = vpop.f32.mrb[124].mxu1  ;;  %v14499_v34 = vpop.f32.mrb[126].mxu0  ;;  %4346 = vmax.xlane.f32.xlu1 %v4345_v3  ;;  %v17777_v7 = vld [vmem:[#allocation97_spill] sm:$0xff]  ;;  %v17778_v59 = vld [vmem:[#allocation31_spill] sm:$0xff] }
 0x290   : > { %17770 = vst [vmem:[#allocation127_spill] sm:$0xff] %v14488_v44  ;;  %9755 = vpow2.f32 %v4810_v50  ;;  %17774 = vst [vmem:[#allocation125_spill] sm:$0xff] %v14497_v39  ;;  %v14501_v12 = vpop.eup %9737  ;;  %v4475_v50 = vsub.f32 %v17777_v7, %v4134_v23  ;;  %v14505_v38 = vadd.f32 %v10364_v24, %v17778_v59  ;;  %v5191_v9 = vadd.f32 %v14041_v57, %v14036_v4  ;;  %v14509_v19 = vpop.f32.mrb[125].mxu1  ;;  %v10365_v57 = vld [vmem:[%s12165_s10 + $0x30] sm:$0xff]  ;;  %v17782_v7 = vld [vmem:[#allocation27_spill] sm:$0xff] }
 0x291   : > { %17775 = vst [vmem:[#allocation76_spill] sm:$0xff] %v14499_v34  ;;  %17776 = vst [vmem:[#allocation77_spill] sm:$0xff] %v14501_v12  ;;  %9757 = vpow2.f32 %v4812_v53  ;;  %v14511_v20 = vpop.f32.mrb[127].mxu0  ;;  %v14513_v0 = vpop.eup %9739  ;;  %5237 = vadd.xlane.f32.xlu0 %v5236_v52  ;;  %v4874_v34 = vmul.f32 1.442695, %v4504_v21  ;;  %5922 = vmatmul.mubr.f32.gmra.mrb[170].mxu0 %v14437_v31  ;;  %v14523_v59 = vadd.f32 %v10365_v57, %v17782_v7  ;;  %v17787_v48 = vld [vmem:[#allocation101_spill] sm:$0xff] }
 0x292   : > { %17779 = vst [vmem:[#allocation74_spill] sm:$0xff] %v14505_v38  ;;  %17780 = vst [vmem:[#allocation75_spill] sm:$0xff] %v14509_v19  ;;  %9759 = vpow2.f32 %v4870_v37  ;;  %v4876_v3 = vmul.f32 1.442695, %v4505_v54  ;;  %v4814_v53 = vmul.f32 1.442695, %v4474_v8  ;;  %v14515_v23 = vpop.eup %9741  ;;  %6067 = vmatmul.mubr.f32.gmra.mrb[170].mxu1 %v14478_v29  ;;  %v4348_v4 = vmax.f32 %v14488_v44, %v14505_v38  ;;  %v4137_v52 = vpop.xlane.xlu1 %4136  ;;  %5926 = vmatprep.mubr.f32.mxu0 %v14501_v12 }
 0x293   : > { %17781 = vst [vmem:[#allocation22_spill] sm:$0xff] %v14511_v20  ;;  %9761 = vpow2.f32 %v4872_v27  ;;  %v4816_v24 = vmul.f32 1.442695, %v4475_v50  ;;  %17783 = vst [vmem:[#allocation24_spill] sm:$0xff] %v14523_v59  ;;  %v4182_v37 = vpop.xlane.xlu0 %4181  ;;  %v14525_v21 = vpop.eup %9743  ;;  %v10366_v27 = vld [vmem:[%s12165_s10 + $0x38] sm:$0xff]  ;;  %v17784_v54 = vld [vmem:[#allocation32_spill] sm:$0xff]  ;;  %v4477_v29 = vsub.f32 %v17787_v48, %v4137_v52  ;;  %5192 = vadd.xlane.f32.xlu1 %v5191_v9  ;;  %v5239_v12 = vadd.f32 %v14090_v11, %v14080_v49 }
 0x294   : > { %9763 = vpow2.f32 %v4874_v34  ;;  %v14530_v8 = vadd.f32 %v10366_v27, %v17784_v54  ;;  %v17786_v50 = vld [vmem:[#allocation100_spill] sm:$0xff]  ;;  %v14534_v38 = vpop.f32.mrb[126].mxu1  ;;  %v14536_v44 = vpop.eup %9745  ;;  %v17788_v7 = vld [vmem:[#allocation98_spill] sm:$0xff]  ;;  %v17789_v19 = vld [vmem:[#allocation99_spill] sm:$0xff]  ;;  %v14554_v49 = vadd.f32 %v10365_v57, %v14063_v43 }
 0x295   : > { %v4476_v20 = vsub.f32 %v17786_v50, %v4137_v52  ;;  %9765 = vpow2.f32 %v4876_v3  ;;  %v4506_v31 = vsub.f32 %v17788_v7, %v4182_v37  ;;  %v4507_v34 = vsub.f32 %v17789_v19, %v4182_v37  ;;  %v14542_v39 = vpop.f32.mrb[127].mxu1  ;;  %v14544_v54 = vpop.eup %9747  ;;  %4301 = vmax.xlane.f32.xlu0 %v4300_v60  ;;  %6071 = vmatprep.mubr.f32.mxu1 %v14536_v44  ;;  %v17795_v43 = vld [vmem:[#allocation104_spill] sm:$0xff] }
 0x296   : > { %17785 = vst [vmem:[#allocation78_spill] sm:$0xff] %v14530_v8  ;;  %9767 = vpow2.f32 %v4814_v53  ;;  %v4303_v48 = vmax.f32 %v14523_v59, %v14530_v8  ;;  %v4820_v50 = vmul.f32 1.442695, %v4477_v29  ;;  %v14549_v9 = vpop.eup %9749  ;;  %5927 = vmatmul.mubr.f32.gmra.mrb[172].mxu0 %v14490_v32  ;;  %6072 = vmatmul.mubr.f32.gmra.mrb[172].mxu1 %v14525_v21  ;;  %17790 = vst [vmem:[#allocation79_spill] sm:$0xff] %v14554_v49  ;;  %v4185_v11 = vpop.xlane.xlu1 %4184  ;;  %v10368_v59 = vld [vmem:[%s12165_s10 + $0x48] sm:$0xff] }
 0x297   : > { %v4818_v52 = vmul.f32 1.442695, %v4476_v20  ;;  %9769 = vpow2.f32 %v4816_v24  ;;  %v4878_v19 = vmul.f32 1.442695, %v4506_v31  ;;  %v4880_v3 = vmul.f32 1.442695, %v4507_v34  ;;  %v4140_v60 = vpop.xlane.xlu0 %4139  ;;  %v14556_v53 = vpop.eup %9751  ;;  %5931 = vmatprep.mubr.f32.mxu0 %v14515_v23  ;;  %6076 = vmatprep.mubr.f32.mxu1 %v14549_v9 }
 0x298   : > { %v14560_v29 = vadd.f32 %v10366_v27, %v14076_v51  ;;  %v17792_v20 = vld [vmem:[#allocation102_spill] sm:$0xff]  ;;  %v17793_v24 = vld [vmem:[#allocation103_spill] sm:$0xff]  ;;  %v14565_v7 = vpop.eup %9753  ;;  %5240 = vadd.xlane.f32.xlu1 %v5239_v12  ;;  %v4478_v57 = vsub.f32 %v17795_v43, %v4140_v60  ;;  %v17796_v34 = vld [vmem:[#allocation105_spill] sm:$0xff] }
 0x299   : > { %9771 = vpow2.f32 %v4818_v52  ;;  %v4508_v31 = vsub.f32 %v17792_v20, %v4185_v11  ;;  %v4509_v37 = vsub.f32 %v17793_v24, %v4185_v11  ;;  %17794 = vst [vmem:[#allocation81_spill] sm:$0xff] %v14565_v7  ;;  %v4479_v8 = vsub.f32 %v17796_v34, %v4140_v60  ;;  %4349 = vmax.xlane.f32.xlu0 %v4348_v4  ;;  %v10367_v60 = vld [vmem:[%s12165_s10 + $0x40] sm:$0xff] }
 0x29a   : > { %17791 = vst [vmem:[#allocation80_spill] sm:$0xff] %v14560_v29  ;;  %9773 = vpow2.f32 %v4820_v50  ;;  %v5194_v52 = vadd.f32 %v14110_v26, %v14097_v28  ;;  %v14571_v51 = vpop.eup %9755  ;;  %v4351_v27 = vmax.f32 %v14554_v49, %v14560_v29  ;;  %v4822_v12 = vmul.f32 1.442695, %v4478_v57  ;;  %5932 = vmatmul.mubr.f32.gmra.mrb[174].mxu0 %v14513_v0  ;;  %6077 = vmatmul.mubr.f32.gmra.mrb[174].mxu1 %v14544_v54  ;;  %v4143_v28 = vpop.xlane.xlu1 %4142  ;;  %v17803_v43 = vld [vmem:[#allocation106_spill] sm:$0xff]  ;;  %v17805_v29 = vld [vmem:[#allocation107_spill] sm:$0xff] }
 0x29b   : > { %17797 = vst [vmem:[#allocation126_spill] sm:$0xff] %v14571_v51  ;;  %9775 = vpow2.f32 %v4878_v19  ;;  %v4882_v11 = vmul.f32 1.442695, %v4508_v31  ;;  %v4884_v20 = vmul.f32 1.442695, %v4509_v37  ;;  %v14575_v24 = vpop.eup %9757  ;;  %v4188_v26 = vpop.xlane.xlu0 %4187  ;;  %v14581_v4 = vadd.f32 %v10367_v60, %v14065_v15  ;;  %5936 = vmatprep.mubr.f32.mxu0 %v14565_v7  ;;  %v17801_v31 = vld [vmem:[#allocation108_spill] sm:$0xff] }
 0x29c   : > { %17798 = vst [vmem:[#allocation177_spill] sm:$0xff] %v14575_v24  ;;  %9777 = vpow2.f32 %v4880_v3  ;;  %v4824_v50 = vmul.f32 1.442695, %v4479_v8  ;;  %v14583_v19 = vpop.eup %9759  ;;  %v4480_v3 = vsub.f32 %v17801_v31, %v4143_v28  ;;  %v17802_v37 = vld [vmem:[#allocation109_spill] sm:$0xff]  ;;  %v4510_v57 = vsub.f32 %v17803_v43, %v4188_v26  ;;  %4304 = vmax.xlane.f32.xlu1 %v4303_v48 }
 0x29d   : > { %17799 = vst [vmem:[#allocation175_spill] sm:$0xff] %v14581_v4  ;;  %17800 = vst [vmem:[#allocation179_spill] sm:$0xff] %v14583_v19  ;;  %9779 = vpow2.f32 %v4882_v11  ;;  %v4481_v8 = vsub.f32 %v17802_v37, %v4143_v28  ;;  %v14589_v34 = vpop.eup %9761  ;;  %v4511_v49 = vsub.f32 %v17805_v29, %v4188_v26  ;;  %v14594_v15 = vadd.f32 %v10368_v59, %v14078_v47 }
 0x29e   : > { %17804 = vst [vmem:[#allocation178_spill] sm:$0xff] %v14589_v34  ;;  %9781 = vpow2.f32 %v4884_v20  ;;  %v5242_v11 = vadd.f32 %v14151_v22, %v14138_v30  ;;  %v14598_v7 = vpop.eup %9763  ;;  %5195 = vadd.xlane.f32.xlu0 %v5194_v52  ;;  %v4826_v28 = vmul.f32 1.442695, %v4480_v3  ;;  %6081 = vmatprep.mubr.f32.mxu1 %v14589_v34  ;;  %v4886_v37 = vmul.f32 1.442695, %v4510_v57  ;;  %v4191_v30 = vpop.xlane.xlu1 %4190  ;;  %v17813_v3 = vld [vmem:[#allocation112_spill] sm:$0xff] }
 0x29f   : > { %17806 = vst [vmem:[#allocation26_spill] sm:$0xff] %v14594_v15  ;;  %17807 = vst [vmem:[#allocation130_spill] sm:$0xff] %v14598_v7  ;;  %9783 = vpow2.f32 %v4822_v12  ;;  %v4828_v31 = vmul.f32 1.442695, %v4481_v8  ;;  %v14601_v20 = vpop.eup %9765  ;;  %v4888_v48 = vmul.f32 1.442695, %v4511_v49  ;;  %5937 = vmatmul.mubr.f32.gmra.mrb[176].mxu0 %v14556_v53  ;;  %6082 = vmatmul.mubr.f32.gmra.mrb[176].mxu1 %v14583_v19  ;;  %v4306_v47 = vmax.f32 %v14581_v4, %v14594_v15  ;;  %v4146_v22 = vpop.xlane.xlu0 %4145 }
 0x2a0   : > { %17808 = vst [vmem:[#allocation84_spill] sm:$0xff] %v14601_v20  ;;  %9785 = vpow2.f32 %v4824_v50  ;;  %v14608_v29 = vadd.f32 %v10367_v60, %v14088_v62  ;;  %v14610_v52 = vpop.eup %9767  ;;  %5941 = vmatprep.mubr.f32.mxu0 %v14575_v24  ;;  %v17811_v12 = vld [vmem:[#allocation110_spill] sm:$0xff]  ;;  %v17812_v49 = vld [vmem:[#allocation111_spill] sm:$0xff]  ;;  %6086 = vmatprep.mubr.f32.mxu1 %v14601_v20  ;;  %v4482_v8 = vsub.f32 %v17813_v3, %v4146_v22  ;;  %v17815_v57 = vld [vmem:[#allocation113_spill] sm:$0xff] }
 0x2a1   : > { %17810 = vst [vmem:[#allocation182_spill] sm:$0xff] %v14610_v52  ;;  %9787 = vpow2.f32 %v4826_v28  ;;  %v4512_v50 = vsub.f32 %v17811_v12, %v4191_v30  ;;  %v4513_v26 = vsub.f32 %v17812_v49, %v4191_v30  ;;  %v14617_v43 = vpop.eup %9769  ;;  %4352 = vmax.xlane.f32.xlu1 %v4351_v27  ;;  %v4483_v62 = vsub.f32 %v17815_v57, %v4146_v22  ;;  %v17816_v60 = vld [vmem:[#allocation36_spill] sm:$0xff]  ;;  %v1457_v30 = vld [vmem:[%s16896_s2 + $0x5a0] sm:$0xff]  ;;  %v1458_v12 = vld [vmem:[%s16896_s2 + $0x5a8] sm:$0xff] }
 0x2a2   : > { %17809 = vst [vmem:[#allocation85_spill] sm:$0xff] %v14608_v29  ;;  %17814 = vst [vmem:[#allocation181_spill] sm:$0xff] %v14617_v43  ;;  %9789 = vpow2.f32 %v4828_v31  ;;  %v14621_v15 = vadd.f32 %v10368_v59, %v17816_v60  ;;  %v5197_v28 = vadd.f32 %v14130_v42, %v14121_v17  ;;  %5243 = vadd.xlane.f32.xlu0 %v5242_v11  ;;  %v4830_v31 = vmul.f32 1.442695, %v4482_v8  ;;  %v10369_v3 = vld [vmem:[%s12165_s10 + $0x50] sm:$0xff]  ;;  %v4149_v11 = vpop.xlane.xlu1 %4148  ;;  %v17825_v4 = vld [vmem:[#allocation117_spill] sm:$0xff] }
 0x2a3   : > { %v14631_v49 = vpop.eup %9771  ;;  %9791 = vpow2.f32 %v4886_v37  ;;  %v4890_v27 = vmul.f32 1.442695, %v4512_v50  ;;  %v4892_v59 = vmul.f32 1.442695, %v4513_v26  ;;  %v4832_v17 = vmul.f32 1.442695, %v4483_v62  ;;  %5942 = vmatmul.mubr.f32.gmra.mrb[178].mxu0 %v14571_v51  ;;  %6087 = vmatmul.mubr.f32.gmra.mrb[178].mxu1 %v14598_v7  ;;  %v4194_v37 = vpop.xlane.xlu0 %4193 }
 0x2a4   : > { %17817 = vst [vmem:[#allocation82_spill] sm:$0xff] %v14621_v15  ;;  %17818 = vst [vmem:[#allocation83_spill] sm:$0xff] %v14631_v49  ;;  %v14633_v22 = vpop.eup %9773  ;;  %9793 = vpow2.f32 %v4888_v48  ;;  %v14641_v57 = vadd.f32 %v10369_v3, %v14108_v35  ;;  %5946 = vmatprep.mubr.f32.mxu0 %v14617_v43  ;;  %v10370_v48 = vld [vmem:[%s12165_s10 + $0x58] sm:$0xff]  ;;  %v17824_v62 = vld [vmem:[#allocation116_spill] sm:$0xff]  ;;  %v4485_v20 = vsub.f32 %v17825_v4, %v4149_v11 }
 0x2a5   : > { %17819 = vst [vmem:[#allocation185_spill] sm:$0xff] %v14633_v22  ;;  %v14643_v50 = vpop.eup %9775  ;;  %9795 = vpow2.f32 %v4890_v27  ;;  %v17822_v26 = vld [vmem:[#allocation37_spill] sm:$0xff]  ;;  %v4484_v60 = vsub.f32 %v17824_v62, %v4149_v11  ;;  %v1409_v35 = vld [vmem:[%s16896_s2 + $0x420] sm:$0xff]  ;;  %5198 = vadd.xlane.f32.xlu1 %v5197_v28  ;;  %v17828_v24 = vld [vmem:[#allocation115_spill] sm:$0xff]  ;;  %v9429_v51 = vpack.c.bf16 %v1458_v12, %v1457_v30 }
 0x2a6   : > { %17820 = vst [vmem:[#allocation183_spill] sm:$0xff] %v14641_v57  ;;  %17821 = vst [vmem:[#allocation86_spill] sm:$0xff] %v14643_v50  ;;  %v14648_v8 = vadd.f32 %v10370_v48, %v17822_v26  ;;  %v14655_v42 = vpop.eup %9777  ;;  %9797 = vpow2.f32 %v4892_v59  ;;  %v17827_v7 = vld [vmem:[#allocation114_spill] sm:$0xff]  ;;  %v4515_v43 = vsub.f32 %v17828_v24, %v4194_v37  ;;  %v1410_v26 = vld [vmem:[%s16896_s2 + $0x428] sm:$0xff]  ;;  %4307 = vmax.xlane.f32.xlu0 %v4306_v47  ;;  %v4836_v28 = vmul.f32 1.442695, %v4485_v20  ;;  %v4197_v47 = vpop.xlane.xlu1 %4196 }
 0x2a7   : > { %17826 = vst [vmem:[#allocation88_spill] sm:$0xff] %v14655_v42  ;;  %v4514_v27 = vsub.f32 %v17827_v7, %v4194_v37  ;;  %v1441_v4 = vld [vmem:[%s16896_s2 + $0x520] sm:$0xff]  ;;  %v1442_v11 = vld [vmem:[%s16896_s2 + $0x528] sm:$0xff]  ;;  %v14668_v62 = vpop.eup %9779  ;;  %9799 = vpow2.f32 %v4830_v31  ;;  %v4834_v24 = vmul.f32 1.442695, %v4484_v60  ;;  %6091 = vmatprep.mubr.f32.mxu1 %v14655_v42  ;;  %5947 = vmatmul.mubr.f32.gmra.mrb[180].mxu0 %v14610_v52  ;;  %v17832_v34 = vld [vmem:[#allocation40_spill] sm:$0xff]  ;;  %v4200_v19 = vpop.xlane.xlu0 %4199 }
 0x2a8   : > { %17823 = vst [vmem:[#allocation87_spill] sm:$0xff] %v14648_v8  ;;  %17829 = vst [vmem:[#allocation89_spill] sm:$0xff] %v14668_v62  ;;  %v4309_v7 = vmax.f32 %v14641_v57, %v14648_v8  ;;  %v14673_v30 = vpop.eup %9781  ;;  %9801 = vpow2.f32 %v4832_v17  ;;  %v4896_v59 = vmul.f32 1.442695, %v4515_v43  ;;  %6092 = vmatmul.mubr.f32.gmra.mrb[180].mxu1 %v14643_v50  ;;  %v17831_v37 = vld [vmem:[#allocation39_spill] sm:$0xff]  ;;  %v1427_v20 = vld [vmem:[%s16896_s2 + $0x4b0] sm:$0xff]  ;;  %9430 = vmatprep.subr.bf16.mxu1 %v9429_v51 }
 0x2a9   : > { %17830 = vst [vmem:[#allocation187_spill] sm:$0xff] %v14673_v30  ;;  %v4894_v12 = vmul.f32 1.442695, %v4514_v27  ;;  %v5245_v31 = vadd.f32 %v17832_v34, %v17831_v37  ;;  %v1428_v60 = vld [vmem:[%s16896_s2 + $0x4b8] sm:$0xff]  ;;  %v14685_v17 = vpop.eup %9783  ;;  %9803 = vpow2.f32 %v4834_v24  ;;  %5951 = vmatprep.mubr.f32.mxu0 %v14633_v22  ;;  %v9399_v43 = vpack.c.bf16 %v1410_v26, %v1409_v35  ;;  %v1459_v37 = vld [vmem:[%s16896_s2 + $0x5b0] sm:$0xff]  ;;  %v17836_v42 = vld [vmem:[#allocation35_spill] sm:$0xff]  ;;  %6096 = vmatprep.mubr.f32.mxu1 %v14673_v30 }
 0x2aa   : > { %v9431_v27 = vpack.c.bf16 %v1442_v11, %v1441_v4  ;;  %v17833_v8 = vld [vmem:[#allocation33_spill] sm:$0xff]  ;;  %v14694_v57 = vpop.eup %9785  ;;  %9805 = vpow2.f32 %v4836_v28  ;;  %v14697_v50 = vadd.f32 %v10370_v48, %v17836_v42  ;;  %v17838_v24 = vld [vmem:[#allocation118_spill] sm:$0xff]  ;;  %v17839_v52 = vld [vmem:[#allocation119_spill] sm:$0xff]  ;;  %v9401_v11 = vpack.c.bf16 %v1428_v60, %v1427_v20  ;;  %v4203_v60 = vpop.xlane.xlu1 %4202 }
 0x2ab   : > { %v14689_v34 = vadd.f32 %v10369_v3, %v17833_v8  ;;  %17835 = vst [vmem:[#allocation190_spill] sm:$0xff] %v14694_v57  ;;  %5246 = vadd.xlane.f32.xlu1 %v5245_v31  ;;  %v4516_v51 = vsub.f32 %v17838_v24, %v4197_v47  ;;  %v4517_v22 = vsub.f32 %v17839_v52, %v4197_v47  ;;  %v1460_v3 = vld [vmem:[%s16896_s2 + $0x5b8] sm:$0xff]  ;;  %v1411_v8 = vld [vmem:[%s16896_s2 + $0x430] sm:$0xff]  ;;  %v14711_v42 = vpop.eup %9787  ;;  %9807 = vpow2.f32 %v4894_v12 }
 0x2ac   : > { %17837 = vst [vmem:[#allocation189_spill] sm:$0xff] %v14697_v50  ;;  %v1412_v35 = vld [vmem:[%s16896_s2 + $0x438] sm:$0xff]  ;;  %17840 = vst [vmem:[#allocation29_spill] sm:$0xff] %v14711_v42  ;;  %9400 = vmatpush3.bf16.msra.mxu0 %v9399_v43  ;;  %9432 = vmatpush3.bf16.msra.mxu1 %v9431_v27  ;;  %v17841_v52 = vld [vmem:[#allocation120_spill] sm:$0xff]  ;;  %v14721_v47 = vpop.eup %9789  ;;  %9809 = vpow2.f32 %v4896_v59  ;;  %v17844_v12 = vmax.f32 %v14608_v29, %v14621_v15  ;;  %v4248_v27 = vpop.xlane.xlu0 %4247  ;;  %v9433_v59 = vpack.c.bf16 %v1460_v3, %v1459_v37 }
 0x2ad   : > { %17834 = vst [vmem:[#allocation186_spill] sm:$0xff] %v14689_v34  ;;  %v4518_v48 = vsub.f32 %v17841_v52, %v4200_v19  ;;  %v17842_v26 = vld [vmem:[#allocation121_spill] sm:$0xff]  ;;  %v1443_v28 = vld [vmem:[%s16896_s2 + $0x530] sm:$0xff]  ;;  %17843 = vst [vmem:[#allocation92_spill] sm:$0xff] %v14721_v47  ;;  %v4357_v43 = vmax.f32 %v14689_v34, %v14697_v50  ;;  %v4900_v20 = vmul.f32 1.442695, %v4517_v22  ;;  %5952 = vmatmul.mubr.f32.gmra.mrb[182].mxu0 %v14631_v49  ;;  %v14729_v24 = vpop.eup %9791  ;;  %6097 = vmatmul.mubr.f32.gmra.mrb[182].mxu1 %v14668_v62 }
 0x2ae   : > { %v4519_v4 = vsub.f32 %v17842_v26, %v4200_v19  ;;  %v1444_v31 = vld [vmem:[%s16896_s2 + $0x538] sm:$0xff]  ;;  %4355 = vmax.xlane.f32.xlu0 %v17844_v12  ;;  %v4898_v19 = vmul.f32 1.442695, %v4516_v51  ;;  %17845 = vst [vmem:[#allocation93_spill] sm:$0xff] %v14729_v24  ;;  %9402 = vmatprep.subr.bf16.mxu0 %v9401_v11  ;;  %v9403_v30 = vpack.c.bf16 %v1412_v35, %v1411_v8  ;;  %v1429_v12 = vld [vmem:[%s16896_s2 + $0x4c0] sm:$0xff]  ;;  %v1430_v22 = vld [vmem:[%s16896_s2 + $0x4c8] sm:$0xff]  ;;  %v14738_v51 = vpop.eup %9793  ;;  %v4251_v15 = vpop.xlane.xlu1 %4250 }
 0x2af   : > { %v4902_v52 = vmul.f32 1.442695, %v4518_v48  ;;  %17846 = vst [vmem:[#allocation90_spill] sm:$0xff] %v14738_v51  ;;  %4310 = vmax.xlane.f32.xlu1 %v4309_v7  ;;  %5956 = vmatprep.mubr.f32.mxu0 %v14694_v57  ;;  %v9435_v48 = vpack.c.bf16 %v1444_v31, %v1443_v28  ;;  %v17848_v37 = vld [vmem:[#allocation129_spill] sm:$0xff]  ;;  %v1461_v8 = vld [vmem:[%s16896_s2 + $0x5c0] sm:$0xff]  ;;  %v14747_v35 = vpop.eup %9795  ;;  %v17852_v28 = vld [vmem:[#allocation123_spill] sm:$0xff] }
 0x2b0   : > { %v4904_v26 = vmul.f32 1.442695, %v4519_v4  ;;  %9811 = vpow2.f32 %v4898_v19  ;;  %v17847_v4 = vld [vmem:[#allocation143_spill] sm:$0xff]  ;;  %v4520_v3 = vsub.f32 %v17848_v37, %v4203_v60  ;;  %17849 = vst [vmem:[#allocation194_spill] sm:$0xff] %v14747_v35  ;;  %9434 = vmatprep.subr.bf16.mxu1 %v9433_v59  ;;  %9404 = vmatpush3.bf16.msra.mxu0 %v9403_v30  ;;  %v17850_v19 = vld [vmem:[#allocation133_spill] sm:$0xff]  ;;  %v17851_v50 = vld [vmem:[#allocation122_spill] sm:$0xff]  ;;  %v4551_v31 = vsub.f32 %v17852_v28, %v4248_v27  ;;  %v14761_v59 = vpop.eup %9797  ;;  %v4206_v29 = vpop.xlane.xlu0 %4205 }
 0x2b1   : > { %v5200_v11 = vadd.f32 %v17847_v4, %v14177_v55  ;;  %9813 = vpow2.f32 %v4900_v20  ;;  %v4521_v7 = vsub.f32 %v17850_v19, %v4203_v60  ;;  %v4550_v34 = vsub.f32 %v17851_v50, %v4248_v27  ;;  %v1462_v55 = vld [vmem:[%s16896_s2 + $0x5c8] sm:$0xff]  ;;  %v1413_v4 = vld [vmem:[%s16896_s2 + $0x440] sm:$0xff]  ;;  %17853 = vst [vmem:[#allocation193_spill] sm:$0xff] %v14761_v59  ;;  %9436 = vmatpush3.bf16.msra.mxu1 %v9435_v48  ;;  %v17854_v60 = vld [vmem:[#allocation140_spill] sm:$0xff] }
 0x2b2   : > { %v1414_v20 = vld [vmem:[%s16896_s2 + $0x448] sm:$0xff]  ;;  %9815 = vpow2.f32 %v4902_v52  ;;  %v4906_v50 = vmul.f32 1.442695, %v4520_v3  ;;  %v10371_v30 = vld [vmem:[%s12165_s10 + $0x60] sm:$0xff]  ;;  %v9405_v37 = vpack.c.bf16 %v1430_v22, %v1429_v12  ;;  %v14773_v52 = vpop.eup %9799  ;;  %6101 = vmatprep.mubr.f32.mxu1 %v14738_v51  ;;  %v4968_v3 = vmul.f32 1.442695, %v4551_v31  ;;  %5957 = vmatmul.mubr.f32.gmra.mrb[184].mxu0 %v14685_v17 }
 0x2b3   : > { %5201 = vadd.xlane.f32.xlu0 %v5200_v11  ;;  %v14765_v27 = vadd.f32 %v10371_v30, %v17854_v60  ;;  %v1445_v19 = vld [vmem:[%s16896_s2 + $0x540] sm:$0xff]  ;;  %v1446_v28 = vld [vmem:[%s16896_s2 + $0x548] sm:$0xff]  ;;  %9817 = vpow2.f32 %v4904_v26  ;;  %v4908_v48 = vmul.f32 1.442695, %v4521_v7  ;;  %v4966_v11 = vmul.f32 1.442695, %v4550_v34  ;;  %v14777_v12 = vpop.eup %9801  ;;  %6102 = vmatmul.mubr.f32.gmra.mrb[184].mxu1 %v14729_v24 }
 0x2b4   : > { %17856 = vst [vmem:[#allocation25_spill] sm:$0xff] %v14777_v12  ;;  %9819 = vpow2.f32 %v4906_v50  ;;  %9406 = vmatprep.subr.bf16.mxu0 %v9405_v37  ;;  %v9437_v22 = vpack.c.bf16 %v1462_v55, %v1461_v8  ;;  %v10372_v60 = vld [vmem:[%s12165_s10 + $0x68] sm:$0xff]  ;;  %v17857_v62 = vld [vmem:[#allocation38_spill] sm:$0xff]  ;;  %v9407_v57 = vpack.c.bf16 %v1414_v20, %v1413_v4  ;;  %v1431_v26 = vld [vmem:[%s16896_s2 + $0x4d0] sm:$0xff]  ;;  %v14787_v34 = vpop.eup %9803  ;;  %4358 = vmax.xlane.f32.xlu1 %v4357_v43 }
 0x2b5   : > { %17855 = vst [vmem:[#allocation91_spill] sm:$0xff] %v14765_v27  ;;  %v14782_v49 = vadd.f32 %v10372_v60, %v17857_v62  ;;  %9821 = vpow2.f32 %v4908_v48  ;;  %5961 = vmatprep.mubr.f32.mxu0 %v14721_v47  ;;  %v9439_v7 = vpack.c.bf16 %v1446_v28, %v1445_v19  ;;  %v5248_v31 = vadd.f32 %v14234_v18, %v14218_v25  ;;  %v17859_v8 = vld [vmem:[#allocation137_spill] sm:$0xff]  ;;  %v1463_v4 = vld [vmem:[%s16896_s2 + $0x5d0] sm:$0xff]  ;;  %v14802_v20 = vpop.eup %9805  ;;  %v17861_v50 = vld [vmem:[#allocation146_spill] sm:$0xff]  ;;  %v14809_v28 = vpop.xlane.xlu1 %4208 }
 0x2b6   : > { %v4552_v55 = vsub.f32 %v17859_v8, %v4251_v15  ;;  %v1432_v62 = vld [vmem:[%s16896_s2 + $0x4d8] sm:$0xff]  ;;  %9823 = vpow2.f32 %v4966_v11  ;;  %9438 = vmatprep.subr.bf16.mxu1 %v9437_v22  ;;  %9408 = vmatpush3.bf16.msra.mxu0 %v9407_v57  ;;  %v4522_v37 = vsub.f32 %v17861_v50, %v4206_v29  ;;  %v1415_v19 = vld [vmem:[%s16896_s2 + $0x450] sm:$0xff]  ;;  %v14811_v48 = vpop.xlane.xlu0 %4253  ;;  %v14813_v8 = vpop.eup %9807  ;;  %v17863_v22 = vld [vmem:[#allocation142_spill] sm:$0xff]  ;;  %v5203_v24 = vadd.f32 %v14208_v1, %v14203_v63 }
 0x2b7   : > { %17858 = vst [vmem:[#allocation131_spill] sm:$0xff] %v14782_v49  ;;  %v1464_v43 = vld [vmem:[%s16896_s2 + $0x5d8] sm:$0xff]  ;;  %v4312_v47 = vmax.f32 %v14765_v27, %v14782_v49  ;;  %9440 = vmatpush3.bf16.msra.mxu1 %v9439_v7  ;;  %5249 = vadd.xlane.f32.xlu0 %v5248_v31  ;;  %v1447_v51 = vld [vmem:[%s16896_s2 + $0x550] sm:$0xff]  ;;  %v14830_v7 = vpop.eup %9809  ;;  %9825 = vpow2.f32 %v4968_v3  ;;  %v1434_v63 = vld [vmem:[%s16896_s2 + $0x4e8] sm:$0xff] }
 0x2b8   : > { %v17860_v18 = vld [vmem:[#allocation141_spill] sm:$0xff]  ;;  %v4970_v57 = vmul.f32 1.442695, %v4552_v55  ;;  %6106 = vmatprep.mubr.f32.mxu1 %v14761_v59  ;;  %5962 = vmatmul.mubr.f32.gmra.mrb[186].mxu0 %v14711_v42  ;;  %v9441_v55 = vpack.c.bf16 %v1464_v43, %v1463_v4  ;;  %v1465_v1 = vld [vmem:[%s16896_s2 + $0x5e0] sm:$0xff]  ;;  %v1466_v43 = vld [vmem:[%s16896_s2 + $0x5e8] sm:$0xff]  ;;  %v5251_v42 = vadd.f32 %v14254_v2, %v14247_v33 }
 0x2b9   : > { %v4553_v25 = vsub.f32 %v17860_v18, %v4251_v15  ;;  %v17862_v11 = vld [vmem:[#allocation149_spill] sm:$0xff]  ;;  %v14819_v18 = vadd.f32 %v10371_v30, %v17863_v22  ;;  %v9409_v30 = vpack.c.bf16 %v1432_v62, %v1431_v26  ;;  %6107 = vmatmul.mubr.f32.gmra.mrb[186].mxu1 %v14747_v35  ;;  %5966 = vmatprep.mubr.f32.mxu0 %v14777_v12  ;;  %v10373_v62 = vld [vmem:[%s12165_s10 + $0x70] sm:$0xff]  ;;  %v1449_v35 = vld [vmem:[%s16896_s2 + $0x560] sm:$0xff] }
 0x2ba   : > { %v4523_v15 = vsub.f32 %v17862_v11, %v4206_v29  ;;  %v1416_v50 = vld [vmem:[%s16896_s2 + $0x458] sm:$0xff]  ;;  %v4910_v29 = vmul.f32 1.442695, %v4522_v37  ;;  %v14844_v37 = vpop.eup %9811  ;;  %9827 = vpow2.f32 %v4970_v57  ;;  %9442 = vmatprep.subr.bf16.mxu1 %v9441_v55  ;;  %v14859_v57 = vpop.xlane.xlu0 %4211  ;;  %5204 = vadd.xlane.f32.xlu1 %v5203_v24  ;;  %v17872_v24 = vld [vmem:[#allocation162_spill] sm:$0xff]  ;;  %v1467_v33 = vld [vmem:[%s16896_s2 + $0x5f0] sm:$0xff] }
 0x2bb   : > { %17864 = vst [vmem:[#allocation94_spill] sm:$0xff] %v14819_v18  ;;  %v1448_v49 = vld [vmem:[%s16896_s2 + $0x558] sm:$0xff]  ;;  %v4972_v31 = vmul.f32 1.442695, %v4553_v25  ;;  %v1433_v25 = vld [vmem:[%s16896_s2 + $0x4e0] sm:$0xff]  ;;  %9410 = vmatprep.subr.bf16.mxu0 %v9409_v30  ;;  %v9411_v3 = vpack.c.bf16 %v1416_v50, %v1415_v19  ;;  %v14861_v19 = vpop.eup %9813  ;;  %4313 = vmax.xlane.f32.xlu0 %v4312_v47  ;;  %v17871_v30 = vld [vmem:[#allocation160_spill] sm:$0xff]  ;;  %v4525_v47 = vsub.f32 %v17872_v24, %v14809_v28 }
 0x2bc   : > { %v4912_v11 = vmul.f32 1.442695, %v4523_v15  ;;  %v17865_v22 = vld [vmem:[#allocation45_spill] sm:$0xff]  ;;  %v9443_v26 = vpack.c.bf16 %v1448_v49, %v1447_v51  ;;  %v4524_v55 = vsub.f32 %v17871_v30, %v14809_v28  ;;  %v14874_v59 = vpop.eup %9815  ;;  %v1418_v30 = vld [vmem:[%s16896_s2 + $0x468] sm:$0xff]  ;;  %6111 = vmatprep.mubr.f32.mxu1 %v14830_v7  ;;  %5967 = vmatmul.mubr.f32.gmra.mrb[188].mxu0 %v14773_v52 }
 0x2bd   : > { %v14836_v27 = vadd.f32 %v10372_v60, %v17865_v22  ;;  %v17867_v60 = vld [vmem:[#allocation144_spill] sm:$0xff]  ;;  %9829 = vpow2.f32 %v4972_v31  ;;  %v10374_v51 = vld [vmem:[%s12165_s10 + $0x78] sm:$0xff]  ;;  %v1417_v22 = vld [vmem:[%s16896_s2 + $0x460] sm:$0xff]  ;;  %9412 = vmatpush3.bf16.msra.mxu0 %v9411_v3  ;;  %v14891_v3 = vpop.eup %9817  ;;  %6112 = vmatmul.mubr.f32.gmra.mrb[188].mxu1 %v14813_v8 }
 0x2be   : > { %v14848_v4 = vadd.f32 %v10373_v62, %v17867_v60  ;;  %v17869_v15 = vld [vmem:[#allocation41_spill] sm:$0xff]  ;;  %v4257_v60 = vpop.xlane.xlu1 %4256  ;;  %9831 = vpow2.f32 %v4910_v29  ;;  %9444 = vmatpush3.bf16.msra.mxu1 %v9443_v26  ;;  %v17873_v31 = vld [vmem:[#allocation154_spill] sm:$0xff]  ;;  %v1450_v29 = vld [vmem:[%s16896_s2 + $0x568] sm:$0xff]  ;;  %v4914_v28 = vmul.f32 1.442695, %v4524_v55  ;;  %v14895_v26 = vpop.eup %9819  ;;  %5971 = vmatprep.mubr.f32.mxu0 %v14802_v20 }
 0x2bf   : > { %17866 = vst [vmem:[#allocation95_spill] sm:$0xff] %v14836_v27  ;;  %v4360_v49 = vmax.f32 %v14819_v18, %v14836_v27  ;;  %v14867_v50 = vadd.f32 %v10374_v51, %v17869_v15  ;;  %v4554_v15 = vsub.f32 %v17873_v31, %v14811_v48  ;;  %v17874_v27 = vld [vmem:[#allocation158_spill] sm:$0xff]  ;;  %9833 = vpow2.f32 %v4912_v11  ;;  %17875 = vst [vmem:[#allocation31_spill] sm:$0xff] %v14895_v26  ;;  %v1435_v11 = vld [vmem:[%s16896_s2 + $0x4f0] sm:$0xff] }
 0x2c0   : > { %17868 = vst [vmem:[#allocation96_spill] sm:$0xff] %v14848_v4  ;;  %v4555_v18 = vsub.f32 %v17874_v27, %v14811_v48  ;;  %v9413_v27 = vpack.c.bf16 %v1434_v63, %v1433_v25  ;;  %v9445_v48 = vpack.c.bf16 %v1466_v43, %v1465_v1  ;;  %v4916_v31 = vmul.f32 1.442695, %v4525_v47  ;;  %v1436_v25 = vld [vmem:[%s16896_s2 + $0x4f8] sm:$0xff]  ;;  %v14909_v63 = vpop.eup %9821  ;;  %v17877_v55 = vld [vmem:[#allocation43_spill] sm:$0xff]  ;;  %5252 = vadd.xlane.f32.xlu1 %v5251_v42 }
 0x2c1   : > { %17870 = vst [vmem:[#allocation97_spill] sm:$0xff] %v14867_v50  ;;  %v4315_v24 = vmax.f32 %v14848_v4, %v14867_v50  ;;  %17876 = vst [vmem:[#allocation27_spill] sm:$0xff] %v14909_v63  ;;  %v4974_v1 = vmul.f32 1.442695, %v4554_v15  ;;  %v9447_v43 = vpack.c.bf16 %v1450_v29, %v1449_v35  ;;  %v14912_v47 = vadd.f32 %v10373_v62, %v17877_v55  ;;  %v14917_v2 = vpop.eup %9823  ;;  %v17879_v50 = vld [vmem:[#allocation46_spill] sm:$0xff]  ;;  %v1468_v35 = vld [vmem:[%s16896_s2 + $0x5f8] sm:$0xff] }
 0x2c2   : > { %v4976_v12 = vmul.f32 1.442695, %v4555_v18  ;;  %9414 = vmatprep.subr.bf16.mxu0 %v9413_v27  ;;  %9446 = vmatprep.subr.bf16.mxu1 %v9445_v48  ;;  %v9415_v18 = vpack.c.bf16 %v1418_v30, %v1417_v22  ;;  %9835 = vpow2.f32 %v4914_v28  ;;  %v14920_v4 = vadd.f32 %v10374_v51, %v17879_v50  ;;  %v17881_v15 = vld [vmem:[#allocation166_spill] sm:$0xff]  ;;  %v1419_v62 = vld [vmem:[%s16896_s2 + $0x470] sm:$0xff]  ;;  %v1420_v42 = vld [vmem:[%s16896_s2 + $0x478] sm:$0xff] }
 0x2c3   : > { %17878 = vst [vmem:[#allocation32_spill] sm:$0xff] %v14912_v47  ;;  %4361 = vmax.xlane.f32.xlu0 %v4360_v49  ;;  %v4556_v27 = vsub.f32 %v17881_v15, %v4257_v60  ;;  %v17882_v48 = vld [vmem:[#allocation170_spill] sm:$0xff]  ;;  %v4260_v49 = vpop.xlane.xlu0 %4259  ;;  %9837 = vpow2.f32 %v4916_v31  ;;  %9448 = vmatpush3.bf16.msra.mxu1 %v9447_v43  ;;  %v9417_v29 = vpack.c.bf16 %v1436_v25, %v1435_v11  ;;  %v1451_v28 = vld [vmem:[%s16896_s2 + $0x570] sm:$0xff]  ;;  %v1452_v55 = vld [vmem:[%s16896_s2 + $0x578] sm:$0xff]  ;;  %v14943_v15 = vpop.xlane.xlu1 %4214 }
 0x2c4   : > { %17880 = vst [vmem:[#allocation100_spill] sm:$0xff] %v14920_v4  ;;  %v4557_v22 = vsub.f32 %v17882_v48, %v4257_v60  ;;  %9416 = vmatpush3.bf16.msra.mxu0 %v9415_v18  ;;  %v17883_v51 = vld [vmem:[#allocation174_spill] sm:$0xff]  ;;  %v17884_v60 = vld [vmem:[#allocation176_spill] sm:$0xff]  ;;  %9839 = vpow2.f32 %v4976_v12  ;;  %6116 = vmatprep.mubr.f32.mxu1 %v14861_v19  ;;  %v14947_v18 = vpop.eup %9825  ;;  %v9449_v11 = vpack.c.bf16 %v1468_v35, %v1467_v33  ;;  %v17888_v33 = vld [vmem:[#allocation191_spill] sm:$0xff] }
 0x2c5   : > { %v4526_v50 = vsub.f32 %v17883_v51, %v14859_v57  ;;  %v4527_v30 = vsub.f32 %v17884_v60, %v14859_v57  ;;  %5972 = vmatmul.mubr.f32.gmra.mrb[190].mxu0 %v14787_v34  ;;  %17885 = vst [vmem:[#allocation101_spill] sm:$0xff] %v14947_v18  ;;  %9841 = vpow2.f32 %v4974_v1  ;;  %v4978_v57 = vmul.f32 1.442695, %v4556_v27  ;;  %6117 = vmatmul.mubr.f32.gmra.mrb[190].mxu1 %v14844_v37  ;;  %v14950_v43 = vpop.eup %9827 }
 0x2c6   : > { %v4980_v31 = vmul.f32 1.442695, %v4557_v22  ;;  %9418 = vmatprep.subr.bf16.mxu0 %v9417_v29  ;;  %v9419_v25 = vpack.c.bf16 %v1420_v42, %v1419_v62  ;;  %17886 = vst [vmem:[#allocation98_spill] sm:$0xff] %v14950_v43  ;;  %v4363_v48 = vmax.f32 %v14912_v47, %v14920_v4  ;;  %4316 = vmax.xlane.f32.xlu1 %v4315_v24  ;;  %v17889_v62 = vld [vmem:[#allocation180_spill] sm:$0xff] }
 0x2c7   : > { %v4918_v12 = vmul.f32 1.442695, %v4526_v50  ;;  %6186 = vmatprep.mubr.f32.mxu0 %v14891_v3  ;;  %v9451_v22 = vpack.c.bf16 %v1452_v55, %v1451_v28  ;;  %v5254_v1 = vadd.f32 %v14274_v41, %v14261_v40  ;;  %v14957_v27 = vpop.eup %9829  ;;  %v4920_v51 = vmul.f32 1.442695, %v4527_v30  ;;  %9450 = vmatprep.subr.bf16.mxu1 %v9449_v11  ;;  %v17890_v50 = vld [vmem:[#allocation184_spill] sm:$0xff]  ;;  %v4263_v60 = vpop.xlane.xlu1 %4262  ;;  %v10375_v28 = vld [vmem:[%s12165_s10 + $0x80] sm:$0xff] }
 0x2c8   : > { %17887 = vst [vmem:[#allocation99_spill] sm:$0xff] %v14957_v27  ;;  %9420 = vmatpush3.bf16.msra.mxu0 %v9419_v25  ;;  %v4529_v35 = vsub.f32 %v17888_v33, %v14943_v15  ;;  %v4558_v42 = vsub.f32 %v17889_v62, %v4260_v49  ;;  %v4559_v24 = vsub.f32 %v17890_v50, %v4260_v49  ;;  %v14963_v29 = vpop.eup %9831  ;;  %9843 = vpow2.f32 %v4980_v31  ;;  %v17891_v40 = vld [vmem:[#allocation148_spill] sm:$0xff]  ;;  %v10376_v30 = vld [vmem:[%s12165_s10 + $0x88] sm:$0xff]  ;;  %v4218_v25 = vpop.xlane.xlu0 %4217 }
 0x2c9   : > { %9452 = vmatpush3.bf16.msra.mxu1 %v9451_v22  ;;  %5255 = vadd.xlane.f32.xlu0 %v5254_v1  ;;  %v14967_v41 = vadd.f32 %v10375_v28, %v17891_v40  ;;  %v17893_v55 = vld [vmem:[#allocation47_spill] sm:$0xff]  ;;  %v14973_v33 = vpop.eup %9833  ;;  %9845 = vpow2.f32 %v4978_v57  ;;  %v17896_v49 = vld [vmem:[#allocation188_spill] sm:$0xff] }
 0x2ca   : > { %v14971_v11 = vadd.f32 %v10376_v30, %v17893_v55  ;;  %17895 = vst [vmem:[#allocation104_spill] sm:$0xff] %v14973_v33  ;;  %v4528_v62 = vsub.f32 %v17896_v49, %v14943_v15  ;;  %v4924_v50 = vmul.f32 1.442695, %v4529_v35  ;;  %6331 = vmatprep.mubr.f32.mxu1 %v14947_v18  ;;  %v4984_v31 = vmul.f32 1.442695, %v4559_v24  ;;  %4364 = vmax.xlane.f32.xlu1 %v4363_v48  ;;  %v17897_v1 = vld [vmem:[#allocation156_spill] sm:$0xff] }
 0x2cb   : > { %17892 = vst [vmem:[#allocation102_spill] sm:$0xff] %v14967_v41  ;;  %9847 = vpow2.f32 %v4918_v12  ;;  %v4982_v22 = vmul.f32 1.442695, %v4558_v42  ;;  %6187 = vmatmul.mubr.f32.vlgmr.msra.gmra.mrb[192].mxu0 %v14874_v59  ;;  %v17898_v40 = vld [vmem:[#allocation55_spill] sm:$0xff]  ;;  %v17899_v4 = vld [vmem:[#allocation192_spill] sm:$0xff]  ;;  %v17902_v24 = vld [vmem:[#allocation197_spill] sm:$0xff]  ;;  %v4221_v42 = vpop.xlane.xlu1 %4220 }
 0x2cc   : > { %17894 = vst [vmem:[#allocation103_spill] sm:$0xff] %v14971_v11  ;;  %v5302_v55 = vadd.f32 %v17898_v40, %v17897_v1  ;;  %v4560_v47 = vsub.f32 %v17899_v4, %v4263_v60  ;;  %9849 = vpow2.f32 %v4920_v51  ;;  %6332 = vmatmul.mubr.f32.vlgmr.msra.gmra.mrb[192].mxu1 %v14917_v2  ;;  %6191 = vmatprep.mubr.f32.mxu0 %v14909_v63  ;;  %v17900_v15 = vld [vmem:[#allocation196_spill] sm:$0xff]  ;;  %v17901_v35 = vld [vmem:[#allocation195_spill] sm:$0xff]  ;;  %v14987_v18 = vpop.eup %9835  ;;  %v17905_v1 = vld [vmem:[#allocation150_spill] sm:$0xff] }
 0x2cd   : > { %v4561_v57 = vsub.f32 %v17900_v15, %v4263_v60  ;;  %v4530_v49 = vsub.f32 %v17901_v35, %v4218_v25  ;;  %v4531_v12 = vsub.f32 %v17902_v24, %v4218_v25  ;;  %9851 = vpow2.f32 %v4924_v50  ;;  %6336 = vmatprep.mubr.f32.mxu1 %v14957_v27  ;;  %v17903_v4 = vld [vmem:[#allocation48_spill] sm:$0xff]  ;;  %v4266_v60 = vpop.xlane.xlu0 %4265  ;;  %v14998_v15 = vpop.eup %9837 }
 0x2ce   : > { %v4318_v48 = vmax.f32 %v14967_v41, %v14971_v11  ;;  %5303 = vadd.xlane.f32.xlu0 %v5302_v55  ;;  %v14993_v51 = vadd.f32 %v10375_v28, %v17903_v4  ;;  %v14996_v40 = vadd.f32 %v10376_v30, %v17905_v1  ;;  %v4922_v25 = vmul.f32 1.442695, %v4528_v62  ;;  %v15000_v50 = vpop.eup %9839  ;;  %v17907_v28 = vld [vmem:[#allocation153_spill] sm:$0xff] }
 0x2cf   : > { %9853 = vpow2.f32 %v4984_v31  ;;  %v4988_v35 = vmul.f32 1.442695, %v4561_v57  ;;  %v4986_v55 = vmul.f32 1.442695, %v4560_v47  ;;  %v4926_v24 = vmul.f32 1.442695, %v4530_v49  ;;  %6192 = vmatmul.mubr.f32.gmra.mrb[194].mxu0 %v14895_v26  ;;  %v15005_v30 = vpop.eup %9841 }
 0x2d0   : > { %17904 = vst [vmem:[#allocation105_spill] sm:$0xff] %v14993_v51  ;;  %17906 = vst [vmem:[#allocation108_spill] sm:$0xff] %v14996_v40  ;;  %9855 = vpow2.f32 %v4982_v22  ;;  %v17908_v4 = vld [vmem:[#allocation49_spill] sm:$0xff]  ;;  %v4928_v1 = vmul.f32 1.442695, %v4531_v12  ;;  %6337 = vmatmul.mubr.f32.gmra.mrb[194].mxu1 %v14950_v43  ;;  %v4366_v62 = vmax.f32 %v14993_v51, %v14996_v40  ;;  %6196 = vmatprep.mubr.f32.mxu0 %v14973_v33  ;;  %v10377_v31 = vld [vmem:[%s12165_s10 + $0x90] sm:$0xff]  ;;  %v4269_v40 = vpop.xlane.xlu1 %4268 }
 0x2d1   : > { %v5257_v11 = vadd.f32 %v17908_v4, %v17907_v28  ;;  %v17909_v22 = vld [vmem:[#allocation52_spill] sm:$0xff]  ;;  %9857 = vpow2.f32 %v4988_v35  ;;  %v10378_v28 = vld [vmem:[%s12165_s10 + $0x98] sm:$0xff]  ;;  %v17914_v12 = vld [vmem:[#allocation199_spill] sm:$0xff]  ;;  %v15022_v51 = vpop.xlane.xlu0 %5159  ;;  %6341 = vmatprep.mubr.f32.mxu1 %v15000_v50 }
 0x2d2   : > { %v15013_v57 = vadd.f32 %v10377_v31, %v17909_v22  ;;  %v17911_v47 = vld [vmem:[#allocation200_spill] sm:$0xff]  ;;  %4319 = vmax.xlane.f32.xlu0 %v4318_v48  ;;  %v17912_v4 = vld [vmem:[#allocation53_spill] sm:$0xff]  ;;  %v4562_v27 = vsub.f32 %v17914_v12, %v4266_v60  ;;  %17916 = vst [vmem:[#allocation107_spill] sm:$0xff] %v15022_v51  ;;  %9859 = vpow2.f32 %v4922_v25  ;;  %v17917_v33 = vld [vmem:[#allocation198_spill] sm:$0xff] }
 0x2d3   : > { %v4533_v49 = vsub.f32 %v17911_v47, %v4221_v42  ;;  %5258 = vadd.xlane.f32.xlu1 %v5257_v11  ;;  %v15018_v41 = vadd.f32 %v10378_v28, %v17912_v4  ;;  %v17915_v43 = vld [vmem:[#allocation201_spill] sm:$0xff]  ;;  %v4532_v22 = vsub.f32 %v17917_v33, %v4221_v42  ;;  %v15026_v47 = vpop.eup %9843  ;;  %9861 = vpow2.f32 %v4986_v55  ;;  %6197 = vmatmul.mubr.f32.gmra.mrb[196].mxu0 %v14963_v29  ;;  %v17919_v35 = vld [vmem:[#allocation159_spill] sm:$0xff]  ;;  %v17922_v33 = vld [vmem:[#allocation202_spill] sm:$0xff] }
 0x2d4   : > { %17910 = vst [vmem:[#allocation109_spill] sm:$0xff] %v15013_v57  ;;  %v4563_v63 = vsub.f32 %v17915_v43, %v4266_v60  ;;  %17918 = vst [vmem:[#allocation110_spill] sm:$0xff] %v15026_v47  ;;  %v4990_v11 = vmul.f32 1.442695, %v4562_v27  ;;  %v17920_v4 = vld [vmem:[#allocation157_spill] sm:$0xff]  ;;  %v15031_v26 = vpop.eup %9845  ;;  %9863 = vpow2.f32 %v4926_v24  ;;  %6342 = vmatmul.mubr.f32.gmra.mrb[196].mxu1 %v15005_v30  ;;  %6201 = vmatprep.mubr.f32.mxu0 %v14998_v15  ;;  %v17923_v60 = vld [vmem:[#allocation203_spill] sm:$0xff] }
 0x2d5   : > { %17913 = vst [vmem:[#allocation106_spill] sm:$0xff] %v15018_v41  ;;  %v5305_v12 = vadd.f32 %v17920_v4, %v17919_v35  ;;  %17921 = vst [vmem:[#allocation111_spill] sm:$0xff] %v15031_v26  ;;  %v4932_v43 = vmul.f32 1.442695, %v4533_v49  ;;  %v4564_v42 = vsub.f32 %v17922_v33, %v4269_v40  ;;  %v4565_v25 = vsub.f32 %v17923_v60, %v4269_v40  ;;  %v15037_v55 = vpop.eup %9847  ;;  %v17924_v27 = vld [vmem:[#allocation152_spill] sm:$0xff]  ;;  %v17926_v24 = vld [vmem:[#allocation155_spill] sm:$0xff]  ;;  %v15047_v4 = vpop.xlane.xlu0 %5207 }
 0x2d6   : > { %v4992_v48 = vmul.f32 1.442695, %v4563_v63  ;;  %9865 = vpow2.f32 %v4928_v1  ;;  %v4321_v63 = vmax.f32 %v15013_v57, %v15018_v41  ;;  %v15042_v35 = vadd.f32 %v10377_v31, %v17924_v27  ;;  %4367 = vmax.xlane.f32.xlu0 %v4366_v62  ;;  %17928 = vst [vmem:[#allocation36_spill] sm:$0xff] %v15047_v4  ;;  %v15049_v51 = vpop.eup %9849  ;;  %6346 = vmatprep.mubr.f32.mxu1 %v15026_v47  ;;  %v17931_v62 = vld [vmem:[#allocation59_spill] sm:$0xff]  ;;  %v17935_v60 = vld [vmem:[#allocation54_spill] sm:$0xff]  ;;  %v18009_v47 = vld [vmem:[#allocation76_spill] sm:$0xff] }
 0x2d7   : > { %5306 = vadd.xlane.f32.xlu1 %v5305_v12  ;;  %v15045_v49 = vadd.f32 %v10378_v28, %v17926_v24  ;;  %17929 = vst [vmem:[#allocation37_spill] sm:$0xff] %v15049_v51  ;;  %v4930_v33 = vmul.f32 1.442695, %v4532_v22  ;;  %9867 = vpow2.f32 %v4990_v11  ;;  %v4996_v40 = vmul.f32 1.442695, %v4565_v25  ;;  %v15052_v1 = vpop.eup %9851  ;;  %6202 = vmatmul.mubr.f32.gmra.mrb[198].mxu0 %v14987_v18  ;;  %v15061_v22 = vpop.xlane.xlu1 %5162  ;;  %v10380_v25 = vld [vmem:[%s12165_s10 + $0xa8] sm:$0xff] }
 0x2d8   : > { %17925 = vst [vmem:[#allocation112_spill] sm:$0xff] %v15042_v35  ;;  %17930 = vst [vmem:[#allocation116_spill] sm:$0xff] %v15052_v1  ;;  %9869 = vpow2.f32 %v4992_v48  ;;  %v4994_v31 = vmul.f32 1.442695, %v4564_v42  ;;  %v5260_v28 = vadd.f32 %v17931_v62, %v14329_v58  ;;  %6347 = vmatmul.mubr.f32.gmra.mrb[198].mxu1 %v15031_v26  ;;  %6206 = vmatprep.mubr.f32.mxu0 %v15049_v51  ;;  %v10379_v42 = vld [vmem:[%s12165_s10 + $0xa0] sm:$0xff]  ;;  %v17940_v57 = vld [vmem:[#allocation7_spill] sm:$0xff] }
 0x2d9   : > { %17927 = vst [vmem:[#allocation113_spill] sm:$0xff] %v15045_v49  ;;  %v15057_v12 = vpop.eup %9853  ;;  %9871 = vpow2.f32 %v4932_v43  ;;  %17933 = vst [vmem:[#allocation114_spill] sm:$0xff] %v15061_v22  ;;  %v4369_v48 = vmax.f32 %v15042_v35, %v15045_v49  ;;  %v15069_v58 = vadd.f32 %v10379_v42, %v17935_v60  ;;  %v17937_v43 = vld [vmem:[#allocation57_spill] sm:$0xff]  ;;  %v4224_v24 = vpop.xlane.xlu0 %4223  ;;  %v17939_v62 = vld [vmem:[#allocation6_spill] sm:$0xff] }
 0x2da   : > { %17932 = vst [vmem:[#allocation117_spill] sm:$0xff] %v15057_v12  ;;  %v15063_v11 = vpop.eup %9855  ;;  %9873 = vpow2.f32 %v4996_v40  ;;  %5261 = vadd.xlane.f32.xlu0 %v5260_v28  ;;  %v15073_v27 = vadd.f32 %v10380_v25, %v17937_v43  ;;  %6351 = vmatprep.mubr.f32.mxu1 %v15057_v12  ;;  %v4534_v41 = vsub.f32 %v17939_v62, %v4224_v24  ;;  %v17942_v60 = vld [vmem:[#allocation61_spill] sm:$0xff]  ;;  %v17947_v62 = vld [vmem:[#allocation58_spill] sm:$0xff]  ;;  %v1519_v51 = vld [vmem:[%s16896_s2 + $0x790] sm:$0xff] }
 0x2db   : > { %17934 = vst [vmem:[#allocation115_spill] sm:$0xff] %v15063_v11  ;;  %4322 = vmax.xlane.f32.xlu1 %v4321_v63  ;;  %17936 = vst [vmem:[#allocation39_spill] sm:$0xff] %v15069_v58  ;;  %9875 = vpow2.f32 %v4930_v33  ;;  %v4535_v40 = vsub.f32 %v17940_v57, %v4224_v24  ;;  %v15078_v63 = vpop.eup %9857  ;;  %6207 = vmatmul.mubr.f32.gmra.mrb[200].mxu0 %v15037_v55  ;;  %v5308_v28 = vadd.f32 %v14386_v16, %v14370_v10  ;;  %v17944_v49 = vld [vmem:[#allocation161_spill] sm:$0xff]  ;;  %v15097_v4 = vpop.xlane.xlu1 %5210  ;;  %v17950_v10 = vld [vmem:[#allocation62_spill] sm:$0xff] }
 0x2dc   : > { %17938 = vst [vmem:[#allocation40_spill] sm:$0xff] %v15073_v27  ;;  %17941 = vst [vmem:[#allocation33_spill] sm:$0xff] %v15078_v63  ;;  %9877 = vpow2.f32 %v4994_v31  ;;  %v15084_v43 = vadd.f32 %v10379_v42, %v17942_v60  ;;  %v15087_v33 = vadd.f32 %v10380_v25, %v17944_v49  ;;  %v15089_v35 = vpop.eup %9859  ;;  %6352 = vmatmul.mubr.f32.gmra.mrb[200].mxu1 %v15063_v11  ;;  %6211 = vmatprep.mubr.f32.mxu0 %v15052_v1  ;;  %v10381_v31 = vld [vmem:[%s12165_s10 + $0xb0] sm:$0xff]  ;;  %v10382_v16 = vld [vmem:[%s12165_s10 + $0xb8] sm:$0xff] }
 0x2dd   : > { %17946 = vst [vmem:[#allocation119_spill] sm:$0xff] %v15089_v35  ;;  %v4934_v57 = vmul.f32 1.442695, %v4534_v41  ;;  %v4936_v24 = vmul.f32 1.442695, %v4535_v40  ;;  %v15095_v22 = vadd.f32 %v10381_v31, %v17947_v62  ;;  %17949 = vst [vmem:[#allocation121_spill] sm:$0xff] %v15097_v4  ;;  %v15101_v42 = vadd.f32 %v10382_v16, %v17950_v10  ;;  %v15103_v49 = vpop.eup %9861  ;;  %v4272_v60 = vpop.xlane.xlu0 %4271  ;;  %6356 = vmatprep.mubr.f32.mxu1 %v15078_v63 }
 0x2de   : > { %17943 = vst [vmem:[#allocation35_spill] sm:$0xff] %v15084_v43  ;;  %17945 = vst [vmem:[#allocation118_spill] sm:$0xff] %v15087_v33  ;;  %v4324_v25 = vmax.f32 %v15069_v58, %v15073_v27  ;;  %5309 = vadd.xlane.f32.xlu0 %v5308_v28  ;;  %v15108_v41 = vadd.f32 %v10381_v31, %v14382_v46  ;;  %v15110_v40 = vpop.eup %9863  ;;  %v17955_v62 = vld [vmem:[#allocation8_spill] sm:$0xff]  ;;  %v17956_v10 = vld [vmem:[#allocation10_spill] sm:$0xff]  ;;  %v15116_v11 = vadd.f32 %v10382_v16, %v14395_v45 }
 0x2df   : > { %17948 = vst [vmem:[#allocation120_spill] sm:$0xff] %v15095_v22  ;;  %17951 = vst [vmem:[#allocation143_spill] sm:$0xff] %v15101_v42  ;;  %4370 = vmax.xlane.f32.xlu1 %v4369_v48  ;;  %9879 = vpow2.f32 %v4934_v57  ;;  %v4566_v4 = vsub.f32 %v17955_v62, %v4272_v60  ;;  %v4567_v1 = vsub.f32 %v17956_v10, %v4272_v60  ;;  %6212 = vmatmul.mubr.f32.gmra.mrb[202].mxu0 %v15089_v35  ;;  %v17959_v28 = vld [vmem:[#allocation164_spill] sm:$0xff]  ;;  %v17960_v57 = vld [vmem:[#allocation167_spill] sm:$0xff]  ;;  %v4227_v60 = vpop.xlane.xlu1 %4226 }
 0x2e0   : > { %17952 = vst [vmem:[#allocation129_spill] sm:$0xff] %v15103_v49  ;;  %17953 = vst [vmem:[#allocation133_spill] sm:$0xff] %v15108_v41  ;;  %v15118_v12 = vpop.eup %9865  ;;  %9881 = vpow2.f32 %v4936_v24  ;;  %v4372_v46 = vmax.f32 %v15084_v43, %v15087_v33  ;;  %v5263_v48 = vadd.f32 %v14360_v61, %v14355_v36  ;;  %v5311_v31 = vadd.f32 %v17960_v57, %v17959_v28  ;;  %v17962_v10 = vld [vmem:[#allocation171_spill] sm:$0xff]  ;;  %v17964_v28 = vld [vmem:[#allocation12_spill] sm:$0xff] }
 0x2e1   : > { %17954 = vst [vmem:[#allocation122_spill] sm:$0xff] %v15110_v40  ;;  %17957 = vst [vmem:[#allocation123_spill] sm:$0xff] %v15116_v11  ;;  %v15127_v62 = vpop.eup %9867  ;;  %6357 = vmatmul.mubr.f32.gmra.mrb[202].mxu1 %v15103_v49  ;;  %6216 = vmatprep.mubr.f32.mxu0 %v15118_v12  ;;  %v4998_v24 = vmul.f32 1.442695, %v4566_v4  ;;  %v5000_v16 = vmul.f32 1.442695, %v4567_v1  ;;  %v5266_v36 = vadd.f32 %v17962_v10, %v14413_v56  ;;  %v15139_v27 = vpop.xlane.xlu0 %5165 }
 0x2e2   : > { %17958 = vst [vmem:[#allocation140_spill] sm:$0xff] %v15118_v12  ;;  %17961 = vst [vmem:[#allocation38_spill] sm:$0xff] %v15127_v62  ;;  %v15135_v61 = vpop.eup %9869  ;;  %4325 = vmax.xlane.f32.xlu0 %v4324_v25  ;;  %v4536_v57 = vsub.f32 %v17964_v28, %v4227_v60  ;;  %v17965_v33 = vld [vmem:[#allocation13_spill] sm:$0xff]  ;;  %v10383_v58 = vld [vmem:[%s12165_s10 + $0xc0] sm:$0xff] }
 0x2e3   : > { %17963 = vst [vmem:[#allocation137_spill] sm:$0xff] %v15135_v61  ;;  %5264 = vadd.xlane.f32.xlu1 %v5263_v48  ;;  %v4537_v43 = vsub.f32 %v17965_v33, %v4227_v60  ;;  %17966 = vst [vmem:[#allocation141_spill] sm:$0xff] %v15139_v27  ;;  %v17967_v49 = vld [vmem:[#allocation65_spill] sm:$0xff]  ;;  %v15145_v4 = vpop.eup %9871  ;;  %6361 = vmatprep.mubr.f32.mxu1 %v15135_v61  ;;  %9883 = vpow2.f32 %v4998_v24  ;;  %v10384_v1 = vld [vmem:[%s12165_s10 + $0xc8] sm:$0xff] }
 0x2e4   : > { %v15143_v45 = vadd.f32 %v10383_v58, %v17967_v49  ;;  %17969 = vst [vmem:[#allocation149_spill] sm:$0xff] %v15145_v4  ;;  %v17970_v25 = vld [vmem:[#allocation165_spill] sm:$0xff]  ;;  %v17972_v33 = vld [vmem:[#allocation168_spill] sm:$0xff]  ;;  %v15157_v10 = vpop.eup %9873  ;;  %9885 = vpow2.f32 %v5000_v16  ;;  %6217 = vmatmul.mubr.f32.gmra.mrb[204].mxu0 %v15110_v40  ;;  %v4938_v49 = vmul.f32 1.442695, %v4536_v57  ;;  %v17986_v12 = vld [vmem:[#allocation11_spill] sm:$0xff] }
 0x2e5   : > { %v15152_v48 = vadd.f32 %v10384_v1, %v17970_v25  ;;  %v15155_v60 = vadd.f32 %v10383_v58, %v17972_v33  ;;  %17974 = vst [vmem:[#allocation144_spill] sm:$0xff] %v15157_v10  ;;  %v4940_v28 = vmul.f32 1.442695, %v4537_v43  ;;  %v17975_v27 = vld [vmem:[#allocation68_spill] sm:$0xff]  ;;  %v15163_v61 = vpop.eup %9875  ;;  %6362 = vmatmul.mubr.f32.gmra.mrb[204].mxu1 %v15127_v62  ;;  %6221 = vmatprep.mubr.f32.mxu0 %v15145_v4  ;;  %v4275_v25 = vpop.xlane.xlu1 %4274  ;;  %v17978_v58 = vld [vmem:[#allocation69_spill] sm:$0xff]  ;;  %v17982_v43 = vld [vmem:[#allocation67_spill] sm:$0xff] }
 0x2e6   : > { %17968 = vst [vmem:[#allocation146_spill] sm:$0xff] %v15143_v45  ;;  %v15161_v24 = vadd.f32 %v10384_v1, %v17975_v27  ;;  %17977 = vst [vmem:[#allocation160_spill] sm:$0xff] %v15163_v61  ;;  %v10385_v56 = vld [vmem:[%s12165_s10 + $0xd0] sm:$0xff]  ;;  %v10386_v16 = vld [vmem:[%s12165_s10 + $0xd8] sm:$0xff]  ;;  %v15178_v1 = vpop.eup %9877  ;;  %9887 = vpow2.f32 %v4938_v49  ;;  %4373 = vmax.xlane.f32.xlu0 %v4372_v46  ;;  %v4569_v40 = vsub.f32 %v17986_v12, %v4275_v25  ;;  %v15182_v35 = vpop.xlane.xlu0 %5213  ;;  %6366 = vmatprep.mubr.f32.mxu1 %v15157_v10 }
 0x2e7   : > { %17971 = vst [vmem:[#allocation142_spill] sm:$0xff] %v15152_v48  ;;  %17973 = vst [vmem:[#allocation45_spill] sm:$0xff] %v15155_v60  ;;  %v15169_v33 = vadd.f32 %v10385_v56, %v17978_v58  ;;  %v17980_v63 = vld [vmem:[#allocation169_spill] sm:$0xff]  ;;  %v15176_v27 = vadd.f32 %v10385_v56, %v17982_v43  ;;  %5312 = vadd.xlane.f32.xlu1 %v5311_v31  ;;  %v15185_v58 = vadd.f32 %v10386_v16, %v14463_v6  ;;  %v10387_v56 = vld [vmem:[%s12165_s10 + $0xe0] sm:$0xff] }
 0x2e8   : > { %17976 = vst [vmem:[#allocation41_spill] sm:$0xff] %v15161_v24  ;;  %v15173_v57 = vadd.f32 %v10386_v16, %v17980_v63  ;;  %17984 = vst [vmem:[#allocation43_spill] sm:$0xff] %v15178_v1  ;;  %v17985_v4 = vld [vmem:[#allocation9_spill] sm:$0xff]  ;;  %9889 = vpow2.f32 %v4940_v28  ;;  %v5314_v63 = vadd.f32 %v14467_v14, %v14454_v13  ;;  %v15192_v31 = vadd.f32 %v10387_v56, %v14465_v5  ;;  %v10388_v46 = vld [vmem:[%s12165_s10 + $0xe8] sm:$0xff] }
 0x2e9   : > { %17979 = vst [vmem:[#allocation162_spill] sm:$0xff] %v15169_v33  ;;  %17983 = vst [vmem:[#allocation158_spill] sm:$0xff] %v15176_v27  ;;  %v4568_v62 = vsub.f32 %v17985_v4, %v4275_v25  ;;  %v17990_v49 = vld [vmem:[#allocation71_spill] sm:$0xff]  ;;  %6222 = vmatmul.mubr.f32.gmra.mrb[206].mxu0 %v15163_v61  ;;  %v5004_v25 = vmul.f32 1.442695, %v4569_v40  ;;  %v17992_v6 = vld [vmem:[#allocation125_spill] sm:$0xff]  ;;  %6367 = vmatmul.mubr.f32.gmra.mrb[206].mxu1 %v15178_v1  ;;  %v15210_v13 = vpop.xlane.xlu1 %5168  ;;  %v18003_v14 = vmax.f32 %v15095_v22, %v15101_v42 }
 0x2ea   : > { %17981 = vst [vmem:[#allocation154_spill] sm:$0xff] %v15173_v57  ;;  %17987 = vst [vmem:[#allocation46_spill] sm:$0xff] %v15182_v35  ;;  %v15196_v4 = vadd.f32 %v10388_v46, %v17990_v49  ;;  %v15200_v16 = vadd.f32 %v10387_v56, %v17992_v6  ;;  %v17994_v28 = vld [vmem:[#allocation75_spill] sm:$0xff]  ;;  %v15205_v35 = vpop.eup %9879  ;;  %v17999_v40 = vld [vmem:[#allocation173_spill] sm:$0xff]  ;;  %5267 = vadd.xlane.f32.xlu0 %v5266_v36 }
 0x2eb   : > { %17988 = vst [vmem:[#allocation166_spill] sm:$0xff] %v15185_v58  ;;  %17989 = vst [vmem:[#allocation170_spill] sm:$0xff] %v15192_v31  ;;  %v5002_v12 = vmul.f32 1.442695, %v4568_v62  ;;  %v15203_v43 = vadd.f32 %v10388_v46, %v17994_v28  ;;  %v17998_v62 = vld [vmem:[#allocation66_spill] sm:$0xff]  ;;  %v18000_v56 = vld [vmem:[#allocation72_spill] sm:$0xff]  ;;  %4328 = vmax.xlane.f32.xlu1 %v18003_v14 }
 0x2ec   : > { %17991 = vst [vmem:[#allocation174_spill] sm:$0xff] %v15196_v4  ;;  %17993 = vst [vmem:[#allocation176_spill] sm:$0xff] %v15200_v16  ;;  %v15216_v49 = vadd.f32 %v17999_v40, %v17998_v62  ;;  %v18001_v6 = vld [vmem:[#allocation73_spill] sm:$0xff]  ;;  %v1485_v28 = vld [vmem:[%s16896_s2 + $0x680] sm:$0xff]  ;;  %v4230_v62 = vpop.xlane.xlu0 %4229 }
 0x2ed   : > { %17995 = vst [vmem:[#allocation191_spill] sm:$0xff] %v15203_v43  ;;  %17996 = vst [vmem:[#allocation180_spill] sm:$0xff] %v15205_v35  ;;  %v15220_v46 = vadd.f32 %v18001_v6, %v18000_v56  ;;  %v1486_v5 = vld [vmem:[%s16896_s2 + $0x688] sm:$0xff]  ;;  %9891 = vpow2.f32 %v5002_v12  ;;  %v18004_v6 = vld [vmem:[#allocation77_spill] sm:$0xff]  ;;  %v15282_v26 = vpop.xlane.xlu1 %5216 }
 0x2ee   : > { %17997 = vst [vmem:[#allocation184_spill] sm:$0xff] %v15210_v13  ;;  %v15228_v13 = vpop.eup %9881  ;;  %v15239_v1 = vadd.f32 %v18004_v6, %v14490_v32  ;;  %v1469_v10 = vld [vmem:[%s16896_s2 + $0x600] sm:$0xff]  ;;  %v1470_v12 = vld [vmem:[%s16896_s2 + $0x608] sm:$0xff]  ;;  %v1487_v36 = vld [vmem:[%s16896_s2 + $0x690] sm:$0xff]  ;;  %9893 = vpow2.f32 %v5004_v25  ;;  %v15255_v6 = vadd.f32 %v14536_v44, %v14525_v21  ;;  %v15273_v21 = vadd.f32 %v14515_v23, %v14513_v0  ;;  %5315 = vadd.xlane.f32.xlu0 %v5314_v63 }
 0x2ef   : > { %18002 = vst [vmem:[#allocation148_spill] sm:$0xff] %v15228_v13  ;;  %6226 = vmatprep.mubr.f32.mxu0 %v15228_v13  ;;  %v18005_v14 = vld [vmem:[#allocation14_spill] sm:$0xff]  ;;  %v18006_v40 = vld [vmem:[#allocation15_spill] sm:$0xff]  ;;  %v1488_v42 = vld [vmem:[%s16896_s2 + $0x698] sm:$0xff]  ;;  %v15280_v13 = vpop.eup %9883  ;;  %v9455_v43 = vpack.c.bf16 %v1470_v12, %v1469_v10 }
 0x2f0   : > { %v4538_v56 = vsub.f32 %v18005_v14, %v4230_v62  ;;  %v4539_v32 = vsub.f32 %v18006_v40, %v4230_v62  ;;  %v1517_v22 = vld [vmem:[%s16896_s2 + $0x780] sm:$0xff]  ;;  %v1518_v25 = vld [vmem:[%s16896_s2 + $0x788] sm:$0xff]  ;;  %6227 = vmatmul.mubr.f32.gmra.mrb[208].mxu0 %v15205_v35  ;;  %v9453_v40 = vpack.c.bf16 %v1486_v5, %v1485_v28  ;;  %v15278_v14 = vld [vmem:[%s16896_s2 + $0x610] sm:$0xff]  ;;  %18007 = vst [vmem:[#allocation47_spill] sm:$0xff] %v15280_v13  ;;  %v15294_v5 = vpop.eup %9885 }
 0x2f1   : > { %18008 = vst [vmem:[#allocation188_spill] sm:$0xff] %v15282_v26  ;;  %v10389_v62 = vld [vmem:[%s12165_s10 + $0xf0] sm:$0xff]  ;;  %v1501_v0 = vld [vmem:[%s16896_s2 + $0x700] sm:$0xff]  ;;  %v1502_v23 = vld [vmem:[%s16896_s2 + $0x708] sm:$0xff]  ;;  %v18012_v28 = vmax.f32 %v15108_v41, %v15116_v11  ;;  %v9457_v10 = vpack.c.bf16 %v1488_v42, %v1487_v36  ;;  %v9485_v12 = vpack.c.bf16 %v1518_v25, %v1517_v22  ;;  %6371 = vmatprep.mubr.f32.mxu1 %v15294_v5  ;;  %v15331_v11 = vpop.eup %9887 }
 0x2f2   : > { %v4942_v35 = vmul.f32 1.442695, %v4538_v56  ;;  %v4944_v61 = vmul.f32 1.442695, %v4539_v32  ;;  %v15286_v44 = vadd.f32 %v10389_v62, %v18009_v47  ;;  %18011 = vst [vmem:[#allocation55_spill] sm:$0xff] %v15294_v5  ;;  %v4278_v56 = vpop.xlane.xlu0 %4277  ;;  %v10390_v32 = vld [vmem:[%s12165_s10 + $0xf8] sm:$0xff]  ;;  %v15319_v36 = vadd.f32 %v14549_v9, %v14544_v54  ;;  %9454 = vmatprep.subr.bf16.mxu0 %v9453_v40  ;;  %6372 = vmatmul.mubr.f32.gmra.mrb[208].mxu1 %v15280_v13 }
 0x2f3   : > { %4376 = vmax.xlane.f32.xlu1 %v18012_v28  ;;  %v18013_v47 = vld [vmem:[#allocation22_spill] sm:$0xff]  ;;  %v15306_v16 = vld [vmem:[%s16896_s2 + $0x618] sm:$0xff]  ;;  %v18015_v28 = vld [vmem:[#allocation16_spill] sm:$0xff]  ;;  %v15338_v54 = vadd.f32 %v10390_v32, %v14542_v39  ;;  %9456 = vmatpush3.bf16.msra.mxu0 %v9455_v43  ;;  %v9487_v9 = vpack.c.bf16 %v1502_v23, %v1501_v0  ;;  %v15365_v43 = vpop.eup %9889  ;;  %v4233_v23 = vpop.xlane.xlu1 %4232 }
 0x2f4   : > { %18010 = vst [vmem:[#allocation156_spill] sm:$0xff] %v15286_v44  ;;  %v15301_v26 = vadd.f32 %v10390_v32, %v18013_v47  ;;  %v1520_v63 = vld [vmem:[%s16896_s2 + $0x798] sm:$0xff]  ;;  %9895 = vpow2.f32 %v4942_v35  ;;  %v4570_v47 = vsub.f32 %v18015_v28, %v4278_v56  ;;  %v18016_v42 = vld [vmem:[#allocation18_spill] sm:$0xff]  ;;  %v15329_v35 = vld [vmem:[%s16896_s2 + $0x6a8] sm:$0xff]  ;;  %9458 = vmatprep.subr.bf16.mxu0 %v9457_v10  ;;  %9486 = vmatprep.subr.bf16.mxu1 %v9485_v12 }
 0x2f5   : > { %v4571_v22 = vsub.f32 %v18016_v42, %v4278_v56  ;;  %v15324_v25 = vld [vmem:[%s16896_s2 + $0x6a0] sm:$0xff]  ;;  %9897 = vpow2.f32 %v4944_v61  ;;  %v15335_v56 = vadd.f32 %v10389_v62, %v14534_v38  ;;  %18018 = vst [vmem:[#allocation195_spill] sm:$0xff] %v15338_v54  ;;  %v15348_v28 = vld [vmem:[%s16896_s2 + $0x628] sm:$0xff]  ;;  %v15353_v38 = vld [vmem:[%s16896_s2 + $0x710] sm:$0xff]  ;;  %v9459_v32 = vpack.c.bf16 %v15306_v16, %v15278_v14  ;;  %6231 = vmatprep.mubr.f32.mxu0 %v15365_v43 }
 0x2f6   : > { %18014 = vst [vmem:[#allocation192_spill] sm:$0xff] %v15301_v26  ;;  %v15343_v40 = vld [vmem:[%s16896_s2 + $0x620] sm:$0xff]  ;;  %v15358_v39 = vld [vmem:[%s16896_s2 + $0x718] sm:$0xff]  ;;  %v15363_v61 = vld [vmem:[%s16896_s2 + $0x6b0] sm:$0xff]  ;;  %v5006_v62 = vmul.f32 1.442695, %v4570_v47  ;;  %v9489_v42 = vpack.c.bf16 %v1520_v63, %v1519_v51  ;;  %v18019_v10 = vmax.f32 %v15143_v45, %v15152_v48  ;;  %v15385_v14 = vpop.xlane.xlu0 %5171  ;;  %9488 = vmatpush3.bf16.msra.mxu1 %v9487_v9  ;;  %6232 = vmatmul.mubr.f32.gmra.mrb[210].mxu0 %v15331_v11 }
 0x2f7   : > { %18017 = vst [vmem:[#allocation196_spill] sm:$0xff] %v15335_v56  ;;  %v5008_v0 = vmul.f32 1.442695, %v4571_v22  ;;  %v15372_v41 = vld [vmem:[%s16896_s2 + $0x6b8] sm:$0xff]  ;;  %v15377_v5 = vld [vmem:[%s16896_s2 + $0x7a0] sm:$0xff]  ;;  %5270 = vadd.xlane.f32.xlu1 %v15216_v49  ;;  %v18021_v16 = vld [vmem:[#allocation19_spill] sm:$0xff]  ;;  %9460 = vmatpush3.bf16.msra.mxu0 %v9459_v32 }
 0x2f8   : > { %4331 = vmax.xlane.f32.xlu0 %v18019_v10  ;;  %v18020_v12 = vld [vmem:[#allocation21_spill] sm:$0xff]  ;;  %v4541_v51 = vsub.f32 %v18021_v16, %v4233_v23  ;;  %18022 = vst [vmem:[#allocation197_spill] sm:$0xff] %v15385_v14  ;;  %v15394_v13 = vld [vmem:[%s16896_s2 + $0x7a8] sm:$0xff]  ;;  %v15399_v49 = vld [vmem:[%s16896_s2 + $0x630] sm:$0xff]  ;;  %9899 = vpow2.f32 %v5006_v62  ;;  %v9461_v10 = vpack.c.bf16 %v15329_v35, %v15324_v25  ;;  %v15430_v25 = vpop.eup %9891  ;;  %9490 = vmatprep.subr.bf16.mxu1 %v9489_v42 }
 0x2f9   : > { %v4540_v47 = vsub.f32 %v18020_v12, %v4233_v23  ;;  %v18023_v63 = vld [vmem:[#allocation81_spill] sm:$0xff]  ;;  %v18024_v12 = vld [vmem:[#allocation190_spill] sm:$0xff]  ;;  %v15423_v62 = vld [vmem:[%s16896_s2 + $0x728] sm:$0xff]  ;;  %18026 = vst [vmem:[#allocation150_spill] sm:$0xff] %v15430_v25  ;;  %9901 = vpow2.f32 %v5008_v0  ;;  %v15445_v45 = vpop.eup %9893  ;;  %v4281_v0 = vpop.xlane.xlu1 %4280  ;;  %v9463_v42 = vpack.c.bf16 %v15348_v28, %v15343_v40 }
 0x2fa   : > { %v15389_v22 = vadd.f32 %v18023_v63, %v14556_v53  ;;  %v15404_v23 = vld [vmem:[%s16896_s2 + $0x638] sm:$0xff]  ;;  %v15413_v16 = vadd.f32 %v18024_v12, %v14685_v17  ;;  %v15418_v63 = vld [vmem:[%s16896_s2 + $0x720] sm:$0xff]  ;;  %v4948_v35 = vmul.f32 1.442695, %v4541_v51  ;;  %v15438_v53 = vld [vmem:[%s16896_s2 + $0x6c8] sm:$0xff]  ;;  %18027 = vst [vmem:[#allocation153_spill] sm:$0xff] %v15445_v45  ;;  %v9491_v12 = vpack.c.bf16 %v15358_v39, %v15353_v38  ;;  %v15478_v32 = vpop.xlane.xlu0 %5219  ;;  %6376 = vmatprep.mubr.f32.mxu1 %v15445_v45 }
 0x2fb   : > { %v15428_v9 = vld [vmem:[%s16896_s2 + $0x6c0] sm:$0xff]  ;;  %v4946_v17 = vmul.f32 1.442695, %v4540_v47  ;;  %v15443_v48 = vld [vmem:[%s16896_s2 + $0x7b0] sm:$0xff]  ;;  %v18028_v47 = vld [vmem:[#allocation179_spill] sm:$0xff]  ;;  %5318 = vadd.xlane.f32.xlu1 %v15220_v46  ;;  %18034 = vst [vmem:[#allocation52_spill] sm:$0xff] %v15478_v32  ;;  %9462 = vmatprep.subr.bf16.mxu0 %v9461_v10 }
 0x2fc   : > { %18025 = vst [vmem:[#allocation48_spill] sm:$0xff] %v15413_v16  ;;  %v18029_v51 = vld [vmem:[#allocation178_spill] sm:$0xff]  ;;  %v9465_v16 = vpack.c.bf16 %v15372_v41, %v15363_v61  ;;  %v15460_v54 = vld [vmem:[%s16896_s2 + $0x7b8] sm:$0xff]  ;;  %v15470_v40 = vld [vmem:[%s16896_s2 + $0x648] sm:$0xff]  ;;  %v18031_v41 = vmax.f32 %v15155_v60, %v15161_v24  ;;  %6377 = vmatmul.mubr.f32.gmra.mrb[210].mxu1 %v15430_v25  ;;  %9464 = vmatpush3.bf16.msra.mxu0 %v9463_v42 }
 0x2fd   : > { %v15449_v14 = vadd.f32 %v18029_v51, %v18028_v47  ;;  %v15465_v47 = vld [vmem:[%s16896_s2 + $0x640] sm:$0xff]  ;;  %9903 = vpow2.f32 %v4946_v17  ;;  %v18032_v28 = vld [vmem:[#allocation124_spill] sm:$0xff]  ;;  %v18033_v39 = vld [vmem:[#allocation23_spill] sm:$0xff]  ;;  %v9493_v51 = vpack.c.bf16 %v15394_v13, %v15377_v5  ;;  %v9467_v13 = vpack.c.bf16 %v15404_v23, %v15399_v49  ;;  %9492 = vmatpush3.bf16.msra.mxu1 %v9491_v12 }
 0x2fe   : > { %4379 = vmax.xlane.f32.xlu0 %v18031_v41  ;;  %v4572_v38 = vsub.f32 %v18032_v28, %v4281_v0  ;;  %v4573_v61 = vsub.f32 %v18033_v39, %v4281_v0  ;;  %v15490_v46 = vld [vmem:[%s16896_s2 + $0x738] sm:$0xff]  ;;  %v15495_v17 = vld [vmem:[%s16896_s2 + $0x6d0] sm:$0xff]  ;;  %9905 = vpow2.f32 %v4948_v35  ;;  %v9495_v5 = vpack.c.bf16 %v15423_v62, %v15418_v63  ;;  %v18036_v41 = vld [vmem:[#allocation90_spill] sm:$0xff]  ;;  %9466 = vmatprep.subr.bf16.mxu0 %v9465_v16 }
 0x2ff   : > { %18030 = vst [vmem:[#allocation49_spill] sm:$0xff] %v15449_v14  ;;  %v15485_v14 = vld [vmem:[%s16896_s2 + $0x730] sm:$0xff]  ;;  %v18035_v0 = vld [vmem:[#allocation93_spill] sm:$0xff]  ;;  %v15514_v35 = vld [vmem:[%s16896_s2 + $0x7c0] sm:$0xff]  ;;  %9494 = vmatprep.subr.bf16.mxu1 %v9493_v51 }
 0x300   : > { %v15504_v28 = vadd.f32 %v18036_v41, %v18035_v0  ;;  %v15509_v39 = vld [vmem:[%s16896_s2 + $0x6d8] sm:$0xff]  ;;  %v15519_v49 = vld [vmem:[%s16896_s2 + $0x7c8] sm:$0xff]  ;;  %v5010_v23 = vmul.f32 1.442695, %v4572_v38  ;;  %v5012_v10 = vmul.f32 1.442695, %v4573_v61  ;;  %v15538_v38 = vpop.eup %9895  ;;  %v15540_v61 = vpop.xlane.xlu1 %5174  ;;  %9468 = vmatpush3.bf16.msra.mxu0 %v9467_v13  ;;  %v18052_v13 = vmax.f32 %v15176_v27, %v15185_v58 }
 0x301   : > { %v18038_v62 = vld [vmem:[#allocation29_spill] sm:$0xff]  ;;  %v18039_v0 = vld [vmem:[#allocation92_spill] sm:$0xff]  ;;  %18041 = vst [vmem:[#allocation199_spill] sm:$0xff] %v15540_v61  ;;  %v15558_v42 = vld [vmem:[%s16896_s2 + $0x748] sm:$0xff]  ;;  %9496 = vmatpush3.bf16.msra.mxu1 %v9495_v5 }
 0x302   : > { %18037 = vst [vmem:[#allocation200_spill] sm:$0xff] %v15504_v28  ;;  %v15526_v41 = vadd.f32 %v18039_v0, %v18038_v62  ;;  %v15531_v24 = vld [vmem:[%s16896_s2 + $0x650] sm:$0xff]  ;;  %v15536_v60 = vld [vmem:[%s16896_s2 + $0x658] sm:$0xff]  ;;  %v15553_v28 = vld [vmem:[%s16896_s2 + $0x740] sm:$0xff]  ;;  %v15565_v0 = vpop.eup %9897  ;;  %9907 = vpow2.f32 %v5010_v23  ;;  %5273 = vadd.xlane.f32.xlu0 %v15239_v1 }
 0x303   : > { %v18042_v63 = vld [vmem:[#allocation25_spill] sm:$0xff]  ;;  %v15563_v12 = vld [vmem:[%s16896_s2 + $0x6e0] sm:$0xff]  ;;  %v15582_v45 = vld [vmem:[%s16896_s2 + $0x6e8] sm:$0xff]  ;;  %9909 = vpow2.f32 %v5012_v10  ;;  %6236 = vmatprep.mubr.f32.mxu0 %v15565_v0 }
 0x304   : > { %18040 = vst [vmem:[#allocation53_spill] sm:$0xff] %v15526_v41  ;;  %v15548_v41 = vadd.f32 %v18042_v63, %v14773_v52  ;;  %v18044_v52 = vmax.f32 %v15169_v33, %v15173_v57  ;;  %v4236_v63 = vpop.xlane.xlu0 %4235  ;;  %v18045_v61 = vld [vmem:[#allocation194_spill] sm:$0xff]  ;;  %v18046_v32 = vld [vmem:[#allocation193_spill] sm:$0xff]  ;;  %v15587_v1 = vld [vmem:[%s16896_s2 + $0x7d0] sm:$0xff]  ;;  %6237 = vmatmul.mubr.f32.gmra.mrb[212].mxu0 %v15538_v38 }
 0x305   : > { %v15577_v56 = vadd.f32 %v18046_v32, %v18045_v61  ;;  %v15592_v23 = vld [vmem:[%s16896_s2 + $0x7d8] sm:$0xff]  ;;  %v18048_v32 = vld [vmem:[#allocation128_spill] sm:$0xff]  ;;  %v15602_v57 = vld [vmem:[%s16896_s2 + $0x660] sm:$0xff] }
 0x306   : > { %18043 = vst [vmem:[#allocation201_spill] sm:$0xff] %v15548_v41  ;;  %4334 = vmax.xlane.f32.xlu1 %v18044_v52  ;;  %v4542_v61 = vsub.f32 %v18048_v32, %v4236_v63  ;;  %v18049_v52 = vld [vmem:[#allocation28_spill] sm:$0xff]  ;;  %v15607_v33 = vld [vmem:[%s16896_s2 + $0x668] sm:$0xff]  ;;  %v15621_v32 = vadd.f32 %v14830_v7, %v14813_v8  ;;  %v15636_v51 = vld [vmem:[%s16896_s2 + $0x6f8] sm:$0xff]  ;;  %v15640_v7 = vpop.xlane.xlu1 %5222  ;;  %5321 = vadd.xlane.f32.xlu0 %v15255_v6 }
 0x307   : > { %18047 = vst [vmem:[#allocation198_spill] sm:$0xff] %v15577_v56  ;;  %v4543_v41 = vsub.f32 %v18049_v52, %v4236_v63  ;;  %v15612_v10 = vld [vmem:[%s16896_s2 + $0x750] sm:$0xff]  ;;  %v15626_v52 = vld [vmem:[%s16896_s2 + $0x758] sm:$0xff]  ;;  %v15638_v63 = vpop.eup %9899  ;;  %v15646_v56 = vadd.f32 %v14802_v20, %v14787_v34  ;;  %v15651_v25 = vld [vmem:[%s16896_s2 + $0x7e0] sm:$0xff] }
 0x308   : > { %18050 = vst [vmem:[#allocation159_spill] sm:$0xff] %v15621_v32  ;;  %v15631_v62 = vld [vmem:[%s16896_s2 + $0x6f0] sm:$0xff]  ;;  %v4950_v16 = vmul.f32 1.442695, %v4542_v61  ;;  %v15658_v61 = vpop.eup %9901  ;;  %v4284_v34 = vpop.xlane.xlu0 %4283  ;;  %v15670_v32 = vadd.f32 %v14891_v3, %v14874_v59  ;;  %v15680_v6 = vld [vmem:[%s16896_s2 + $0x678] sm:$0xff]  ;;  %v18055_v5 = vld [vmem:[#allocation30_spill] sm:$0xff]  ;;  %v18056_v59 = vpack.c.bf16 %v15438_v53, %v15428_v9  ;;  %v18057_v53 = vpack.c.bf16 %v15460_v54, %v15443_v48 }
 0x309   : > { %v4952_v8 = vmul.f32 1.442695, %v4543_v41  ;;  %18051 = vst [vmem:[#allocation157_spill] sm:$0xff] %v15646_v56  ;;  %v15656_v41 = vld [vmem:[%s16896_s2 + $0x7e8] sm:$0xff]  ;;  %v15675_v56 = vld [vmem:[%s16896_s2 + $0x670] sm:$0xff]  ;;  %6381 = vmatprep.mubr.f32.mxu1 %v15658_v61  ;;  %v4575_v58 = vsub.f32 %v18055_v5, %v4284_v34  ;;  %v15693_v27 = vld [vmem:[%s16896_s2 + $0x760] sm:$0xff]  ;;  %v15712_v5 = vadd.f32 %v14861_v19, %v14844_v37  ;;  %v18060_v37 = vpack.c.bf16 %v15490_v46, %v15485_v14 }
 0x30a   : > { %4382 = vmax.xlane.f32.xlu1 %v18052_v13  ;;  %18053 = vst [vmem:[#allocation202_spill] sm:$0xff] %v15670_v32  ;;  %9911 = vpow2.f32 %v4950_v16  ;;  %v18054_v13 = vld [vmem:[#allocation132_spill] sm:$0xff]  ;;  %9470 = vmatprep.subr.bf16.mxu0 %v18056_v59  ;;  %v15698_v16 = vld [vmem:[%s16896_s2 + $0x768] sm:$0xff]  ;;  %v15722_v48 = vld [vmem:[%s16896_s2 + $0x7f8] sm:$0xff]  ;;  %v4239_v9 = vpop.xlane.xlu1 %4238  ;;  %v9483_v19 = vpack.c.bf16 %v15680_v6, %v15675_v56 }
 0x30b   : > { %v4574_v20 = vsub.f32 %v18054_v13, %v4284_v34  ;;  %v15700_v13 = vpop.eup %9903  ;;  %9913 = vpow2.f32 %v4952_v8  ;;  %6382 = vmatmul.mubr.f32.gmra.mrb[212].mxu1 %v15638_v63  ;;  %9498 = vmatprep.subr.bf16.mxu1 %v18057_v53  ;;  %18058 = vst [vmem:[#allocation203_spill] sm:$0xff] %v15712_v5  ;;  %v15717_v8 = vld [vmem:[%s16896_s2 + $0x7f0] sm:$0xff]  ;;  %v5016_v53 = vmul.f32 1.442695, %v4575_v58  ;;  %v18059_v34 = vpack.c.bf16 %v15470_v40, %v15465_v47  ;;  %v18061_v3 = vld [vmem:[#allocation101_spill] sm:$0xff]  ;;  %v18064_v40 = vld [vmem:[#allocation134_spill] sm:$0xff] }
 0x30c   : > { %v15724_v54 = vpop.eup %9905  ;;  %9500 = vmatpush3.bf16.msra.mxu1 %v18060_v37  ;;  %v15736_v5 = vadd.f32 %v18061_v3, %v14917_v2  ;;  %v18062_v58 = vmax.f32 %v15192_v31, %v15196_v4  ;;  %v15744_v32 = vpop.xlane.xlu0 %5177  ;;  %v18065_v2 = vpack.c.bf16 %v15509_v39, %v15495_v17  ;;  %v18066_v46 = vld [vmem:[#allocation31_spill] sm:$0xff]  ;;  %v18069_v17 = vpack.c.bf16 %v15519_v49, %v15514_v35  ;;  %v18070_v39 = vld [vmem:[#allocation98_spill] sm:$0xff]  ;;  %v15786_v35 = vld [vmem:[%s16896_s2 + $0x778] sm:$0xff] }
 0x30d   : > { %v5014_v59 = vmul.f32 1.442695, %v4574_v20  ;;  %9472 = vmatpush3.bf16.msra.mxu0 %v18059_v34  ;;  %v18063_v20 = vld [vmem:[#allocation34_spill] sm:$0xff]  ;;  %v4545_v34 = vsub.f32 %v18064_v40, %v4239_v9  ;;  %6241 = vmatprep.mubr.f32.mxu0 %v15724_v54  ;;  %v18067_v3 = vld [vmem:[#allocation27_spill] sm:$0xff]  ;;  %v15790_v49 = vadd.f32 %v15005_v30, %v15000_v50 }
 0x30e   : > { %5276 = vadd.xlane.f32.xlu1 %v15273_v21  ;;  %4337 = vmax.xlane.f32.xlu0 %v18062_v58  ;;  %v4544_v47 = vsub.f32 %v18063_v20, %v4239_v9  ;;  %v15756_v37 = vadd.f32 %v18067_v3, %v18066_v46  ;;  %v18068_v9 = vld [vmem:[#allocation104_spill] sm:$0xff]  ;;  %v15762_v20 = vpop.eup %9907  ;;  %v4287_v3 = vpop.xlane.xlu1 %4286  ;;  %v18118_v6 = vld [vmem:[#allocation42_spill] sm:$0xff] }
 0x30f   : > { %9915 = vpow2.f32 %v5014_v59  ;;  %9474 = vmatprep.subr.bf16.mxu0 %v18065_v2  ;;  %v15760_v58 = vadd.f32 %v18068_v9, %v14963_v29  ;;  %v4956_v40 = vmul.f32 1.442695, %v4545_v34  ;;  %6242 = vmatmul.mubr.f32.gmra.mrb[214].mxu0 %v15700_v13  ;;  %v18071_v2 = vld [vmem:[#allocation99_spill] sm:$0xff]  ;;  %v9910_v46 = vpop.eup %9909  ;;  %v18072_v29 = vpack.c.bf16 %v15536_v60, %v15531_v24  ;;  %v18074_v24 = vld [vmem:[#allocation37_spill] sm:$0xff] }
 0x310   : > { %9917 = vpow2.f32 %v5016_v53  ;;  %v4954_v59 = vmul.f32 1.442695, %v4544_v47  ;;  %9502 = vmatprep.subr.bf16.mxu1 %v18069_v17  ;;  %v15770_v21 = vadd.f32 %v18071_v2, %v18070_v39  ;;  %v18073_v53 = vpack.c.bf16 %v15558_v42, %v15553_v28  ;;  %v15781_v47 = vld [vmem:[%s16896_s2 + $0x770] sm:$0xff]  ;;  %v18076_v34 = vld [vmem:[#allocation191_spill] sm:$0xff]  ;;  %v15806_v30 = vpop.xlane.xlu0 %5225  ;;  %6386 = vmatprep.mubr.f32.mxu1 %v9910_v46 }
 0x311   : > { %9476 = vmatpush3.bf16.msra.mxu0 %v18072_v29  ;;  %v15794_v60 = vadd.f32 %v14998_v15, %v14987_v18  ;;  %v15798_v28 = vadd.f32 %v18074_v24, %v15037_v55  ;;  %v18075_v42 = vld [vmem:[#allocation176_spill] sm:$0xff]  ;;  %v18079_v2 = vld [vmem:[#allocation135_spill] sm:$0xff]  ;;  %v18080_v29 = vld [vmem:[#allocation110_spill] sm:$0xff]  ;;  %v18082_v55 = vpack.c.bf16 %v15582_v45, %v15563_v12  ;;  %6387 = vmatmul.mubr.f32.gmra.mrb[214].mxu1 %v15762_v20 }
 0x312   : > { %9504 = vmatpush3.bf16.msra.mxu1 %v18073_v53  ;;  %5324 = vadd.xlane.f32.xlu1 %v15319_v36  ;;  %9919 = vpow2.f32 %v4954_v59  ;;  %v18077_v9 = vmax.f32 %v18075_v42, %v18076_v34  ;;  %v18078_v17 = vld [vmem:[#allocation136_spill] sm:$0xff]  ;;  %v4577_v50 = vsub.f32 %v18079_v2, %v4287_v3  ;;  %v18081_v18 = vld [vmem:[#allocation111_spill] sm:$0xff]  ;;  %v18083_v36 = vld [vmem:[#allocation117_spill] sm:$0xff]  ;;  %v18089_v45 = vpack.c.bf16 %v15592_v23, %v15587_v1 }
 0x313   : > { %v4576_v39 = vsub.f32 %v18078_v17, %v4287_v3  ;;  %v15810_v15 = vadd.f32 %v18081_v18, %v18080_v29  ;;  %9921 = vpow2.f32 %v4956_v40  ;;  %9478 = vmatprep.subr.bf16.mxu0 %v18082_v55  ;;  %v18084_v59 = vld [vmem:[#allocation115_spill] sm:$0xff]  ;;  %v18085_v24 = vld [vmem:[#allocation116_spill] sm:$0xff]  ;;  %v18087_v3 = vld [vmem:[#allocation122_spill] sm:$0xff]  ;;  %v9515_v12 = vpack.c.bf16 %v15786_v35, %v15781_v47 }
 0x314   : > { %4385 = vmax.xlane.f32.xlu0 %v18077_v9  ;;  %v15817_v53 = vadd.f32 %v18084_v59, %v18083_v36  ;;  %v18086_v9 = vld [vmem:[#allocation119_spill] sm:$0xff]  ;;  %v18088_v2 = vld [vmem:[#allocation140_spill] sm:$0xff]  ;;  %v5020_v18 = vmul.f32 1.442695, %v4577_v50  ;;  %9506 = vmatprep.subr.bf16.mxu1 %v18089_v45  ;;  %v18090_v40 = vld [vmem:[#allocation33_spill] sm:$0xff]  ;;  %v9912_v59 = vpop.eup %9911  ;;  %v18093_v50 = vpack.c.bf16 %v15626_v52, %v15612_v10 }
 0x315   : > { %v15821_v17 = vadd.f32 %v18086_v9, %v18085_v24  ;;  %v15825_v14 = vadd.f32 %v18088_v2, %v18087_v3  ;;  %v5018_v29 = vmul.f32 1.442695, %v4576_v39  ;;  %v18091_v55 = vld [vmem:[#allocation129_spill] sm:$0xff]  ;;  %v15837_v24 = vpop.xlane.xlu1 %5180  ;;  %v18092_v39 = vpack.c.bf16 %v15607_v33, %v15602_v57  ;;  %v18094_v1 = vld [vmem:[#allocation38_spill] sm:$0xff]  ;;  %v18097_v35 = vld [vmem:[#allocation160_spill] sm:$0xff]  ;;  %v4242_v57 = vpop.xlane.xlu0 %4241 }
 0x316   : > { %v15835_v36 = vadd.f32 %v18091_v55, %v18090_v40  ;;  %9508 = vmatpush3.bf16.msra.mxu1 %v18093_v50  ;;  %v18095_v23 = vld [vmem:[#allocation137_spill] sm:$0xff]  ;;  %v18098_v2 = vld [vmem:[#allocation180_spill] sm:$0xff]  ;;  %v9914_v55 = vpop.eup %9913  ;;  %v18100_v33 = vmax.f32 %v15286_v44, %v15301_v26  ;;  %v18102_v52 = vld [vmem:[#allocation43_spill] sm:$0xff] }
 0x317   : > { %9480 = vmatpush3.bf16.msra.mxu0 %v18092_v39  ;;  %v15847_v9 = vadd.f32 %v18095_v23, %v18094_v1  ;;  %v18096_v47 = vld [vmem:[#allocation149_spill] sm:$0xff]  ;;  %v18099_v45 = vld [vmem:[#allocation148_spill] sm:$0xff]  ;;  %9923 = vpow2.f32 %v5018_v29  ;;  %v18103_v50 = vld [vmem:[#allocation47_spill] sm:$0xff]  ;;  %6246 = vmatprep.mubr.f32.mxu0 %v9914_v55 }
 0x318   : > { %v15851_v3 = vadd.f32 %v18097_v35, %v18096_v47  ;;  %v15855_v40 = vadd.f32 %v18099_v45, %v18098_v2  ;;  %4340 = vmax.xlane.f32.xlu1 %v18100_v33  ;;  %5279 = vadd.xlane.f32.xlu0 %v15389_v22  ;;  %v18101_v10 = vld [vmem:[#allocation144_spill] sm:$0xff]  ;;  %v18104_v1 = vld [vmem:[#allocation55_spill] sm:$0xff]  ;;  %v15871_v47 = vadd.f32 %v15365_v43, %v15331_v11  ;;  %9925 = vpow2.f32 %v5020_v18  ;;  %v18105_v35 = vld [vmem:[#allocation138_spill] sm:$0xff] }
 0x319   : > { %v15863_v39 = vadd.f32 %v18102_v52, %v18101_v10  ;;  %v15867_v23 = vadd.f32 %v18104_v1, %v18103_v50  ;;  %v4546_v2 = vsub.f32 %v18105_v35, %v4242_v57  ;;  %v18106_v29 = vld [vmem:[#allocation139_spill] sm:$0xff]  ;;  %v18107_v22 = vpack.c.bf16 %v15636_v51, %v15631_v62  ;;  %6247 = vmatmul.mubr.f32.gmra.mrb[216].mxu0 %v9912_v59  ;;  %v18110_v43 = vld [vmem:[#allocation150_spill] sm:$0xff]  ;;  %v18111_v18 = vld [vmem:[#allocation153_spill] sm:$0xff]  ;;  %v15898_v50 = vpop.xlane.xlu1 %5228  ;;  %v4290_v56 = vpop.xlane.xlu0 %4289 }
 0x31a   : > { %v4547_v45 = vsub.f32 %v18106_v29, %v4242_v57  ;;  %v15880_v33 = vadd.f32 %v15565_v0, %v15538_v38  ;;  %v18108_v10 = vld [vmem:[#allocation107_spill] sm:$0xff]  ;;  %v18109_v11 = vpack.c.bf16 %v15656_v41, %v15651_v25  ;;  %v15888_v52 = vadd.f32 %v18111_v18, %v18110_v43  ;;  %v9916_v38 = vpop.eup %9915  ;;  %v18122_v29 = vld [vmem:[#allocation177_spill] sm:$0xff]  ;;  %v18125_v18 = vld [vmem:[#allocation114_spill] sm:$0xff] }
 0x31b   : > { %9482 = vmatprep.subr.bf16.mxu0 %v18107_v22  ;;  %9927 = vrcp.f32 %v18108_v10  ;;  %v15892_v57 = vadd.f32 %v15658_v61, %v15638_v63  ;;  %v15896_v62 = vadd.f32 %v15724_v54, %v15700_v13  ;;  %v4958_v0 = vmul.f32 1.442695, %v4546_v2  ;;  %v9918_v61 = vpop.eup %9917  ;;  %v18113_v13 = vld [vmem:[#allocation36_spill] sm:$0xff]  ;;  %v18115_v1 = vld [vmem:[#allocation195_spill] sm:$0xff]  ;;  %v18117_v2 = vld [vmem:[#allocation49_spill] sm:$0xff] }
 0x31c   : > { %9510 = vmatprep.subr.bf16.mxu1 %v18109_v11  ;;  %v4960_v51 = vmul.f32 1.442695, %v4547_v45  ;;  %9484 = vmatpush3.bf16.msra.mxu0 %v9483_v19  ;;  %v18112_v25 = vpack.c.bf16 %v15698_v16, %v15693_v27  ;;  %v15906_v41 = vadd.f32 %v9914_v55, %v9912_v59  ;;  %v15909_v63 = vadd.f32 %v9910_v46, %v15762_v20  ;;  %v18114_v54 = vld [vmem:[#allocation196_spill] sm:$0xff]  ;;  %v9920_v59 = vpop.eup %9919  ;;  %v18121_v55 = vld [vmem:[#allocation126_spill] sm:$0xff]  ;;  %v18124_v10 = vld [vmem:[#allocation181_spill] sm:$0xff] }
 0x31d   : > { %9929 = vrcp.f32 %v18113_v13  ;;  %v18116_v35 = vmax.f32 %v18114_v54, %v18115_v1  ;;  %5327 = vadd.xlane.f32.xlu0 %v18117_v2  ;;  %6391 = vmatprep.mubr.f32.mxu1 %v9918_v61  ;;  %v4578_v27 = vsub.f32 %v18118_v6, %v4290_v56  ;;  %v18119_v16 = vld [vmem:[#allocation44_spill] sm:$0xff]  ;;  %v18120_v20 = vpack.c.bf16 %v15722_v48, %v15717_v8  ;;  %v18123_v22 = vld [vmem:[#allocation182_spill] sm:$0xff]  ;;  %v9922_v43 = vpop.eup %9921  ;;  %v4245_v13 = vpop.xlane.xlu1 %4244  ;;  %v18126_v8 = vld [vmem:[#allocation121_spill] sm:$0xff] }
 0x31e   : > { %9512 = vmatpush3.bf16.msra.mxu1 %v18112_v25  ;;  %9931 = vpow2.f32 %v4958_v0  ;;  %v4579_v19 = vsub.f32 %v18119_v16, %v4290_v56  ;;  %v15921_v46 = vadd.f32 %v9918_v61, %v9916_v38  ;;  %v5281_v45 = vadd.f32 %v18122_v29, %v18121_v55  ;;  %v18127_v48 = vld [vmem:[#allocation147_spill] sm:$0xff]  ;;  %v18128_v61 = vld [vmem:[#allocation145_spill] sm:$0xff]  ;;  %v15931_v2 = vpop.xlane.xlu0 %5183  ;;  %v18130_v6 = vld [vmem:[#allocation84_spill] sm:$0xff]  ;;  %6251 = vmatprep.mubr.f32.mxu0 %v9922_v43 }
 0x31f   : > { %4388 = vmax.xlane.f32.xlu1 %v18116_v35  ;;  %9514 = vmatprep.subr.bf16.mxu1 %v18120_v20  ;;  %9933 = vpow2.f32 %v4960_v51  ;;  %v5284_v11 = vadd.f32 %v18124_v10, %v18123_v22  ;;  %v5022_v0 = vmul.f32 1.442695, %v4578_v27  ;;  %v4548_v51 = vsub.f32 %v18127_v48, %v4245_v13  ;;  %v8269_v27 = vpop.f32.mrb[128].mxu0  ;;  %v18131_v55 = vld [vmem:[#allocation86_spill] sm:$0xff]  ;;  %v18132_v29 = vld [vmem:[#allocation88_spill] sm:$0xff]  ;;  %v18135_v48 = vld [vmem:[#allocation151_spill] sm:$0xff] }
 0x320   : > { %6392 = vmatmul.mubr.f32.gmra.mrb[216].mxu1 %v9916_v38  ;;  %9935 = vrcp.f32 %v18125_v18  ;;  %v5024_v25 = vmul.f32 1.442695, %v4579_v19  ;;  %v4549_v35 = vsub.f32 %v18128_v61, %v4245_v13  ;;  %v15933_v56 = vadd.f32 %v9922_v43, %v9920_v59  ;;  %v18129_v38 = vld [vmem:[#allocation130_spill] sm:$0xff]  ;;  %6252 = vmatmul.mubr.f32.gmra.mrb[218].mxu0 %v9920_v59  ;;  %v8270_v22 = vpop.f32.mrb[129].mxu0 }
 0x321   : > { %9937 = vrcp.f32 %v18126_v8  ;;  %5285 = vadd.xlane.f32.xlu0 %v5284_v11  ;;  %v5329_v16 = vadd.f32 %v18130_v6, %v18129_v38  ;;  %v9924_v19 = vpop.eup %9923  ;;  %v18133_v11 = vld [vmem:[#allocation141_spill] sm:$0xff]  ;;  %v4293_v18 = vpop.xlane.xlu1 %4292  ;;  %v8271_v13 = vadd.f32 %v8270_v22, %v8269_v27  ;;  %v18134_v43 = vld [vmem:[#allocation50_spill] sm:$0xff]  ;;  %v18138_v6 = vld [vmem:[#allocation83_spill] sm:$0xff] }
 0x322   : > { %9516 = vmatpush3.bf16.msra.mxu1 %v9515_v12  ;;  %9939 = vpow2.f32 %v5022_v0  ;;  %v4962_v12 = vmul.f32 1.442695, %v4548_v51  ;;  %v4964_v20 = vmul.f32 1.442695, %v4549_v35  ;;  %v9926_v10 = vpop.eup %9925  ;;  %v4580_v8 = vsub.f32 %v18134_v43, %v4293_v18  ;;  %v15942_v51 = vpop.xlane.xlu0 %5231  ;;  %v18137_v38 = vld [vmem:[#allocation46_spill] sm:$0xff]  ;;  %v18139_v27 = vld [vmem:[#allocation185_spill] sm:$0xff] }
 0x323   : > { %5282 = vadd.xlane.f32.xlu1 %v5281_v45  ;;  %9941 = vpow2.f32 %v5024_v25  ;;  %v5332_v45 = vadd.f32 %v18132_v29, %v18131_v55  ;;  %v4581_v25 = vsub.f32 %v18135_v48, %v4293_v18  ;;  %v15944_v61 = vadd.f32 %v9926_v10, %v9924_v19  ;;  %6396 = vmatprep.mubr.f32.mxu1 %v9926_v10  ;;  %v18142_v43 = vld [vmem:[#allocation51_spill] sm:$0xff]  ;;  %v18143_v48 = vld [vmem:[#allocation56_spill] sm:$0xff] }
 0x324   : > { %9943 = vrcp.f32 %v18133_v11  ;;  %6397 = vmatmul.mubr.f32.gmra.mrb[218].mxu1 %v9924_v19  ;;  %v8349_v11 = vpop.f32.mrb[128].mxu1 }
 0x325   : > { %v9928_v0 = vpop.eup %9927  ;;  %9945 = vpow2.f32 %v4962_v12  ;;  %5333 = vadd.xlane.f32.xlu0 %v5332_v45  ;;  %v5026_v12 = vmul.f32 1.442695, %v4580_v8  ;;  %v5028_v55 = vmul.f32 1.442695, %v4581_v25  ;;  %v18140_v45 = vld [vmem:[#allocation184_spill] sm:$0xff]  ;;  %v15952_v22 = vpop.xlane.xlu1 %5186 }
 0x326   : > { %9947 = vpow2.f32 %v4964_v20  ;;  %v15946_v59 = vmul.f32 %v9928_v0, %v8271_v13  ;;  %v18141_v20 = vld [vmem:[#allocation48_spill] sm:$0xff]  ;;  %v4296_v10 = vpop.xlane.xlu0 %4295  ;;  %v8350_v13 = vpop.f32.mrb[129].mxu1 }
 0x327   : > { %5330 = vadd.xlane.f32.xlu1 %v5329_v16  ;;  %v9930_v35 = vpop.eup %9929  ;;  %9949 = vrcp.f32 %v18137_v38  ;;  %v5287_v16 = vadd.f32 %v18139_v27, %v18138_v6  ;;  %v4582_v8 = vsub.f32 %v18142_v43, %v4296_v10  ;;  %v4583_v19 = vsub.f32 %v18143_v48, %v4296_v10  ;;  %v18144_v6 = vld [vmem:[#allocation188_spill] sm:$0xff]  ;;  %v18145_v27 = vld [vmem:[#allocation89_spill] sm:$0xff]  ;;  %v8272_v10 = vpop.f32.mrb[130].mxu0 }
 0x328   : > { %18136 = vst [vmem:[#allocation152_spill] sm:$0xff] %v15946_v59  ;;  %v9932_v29 = vpop.eup %9931  ;;  %9951 = vrcp.f32 %v18140_v45  ;;  %v8351_v25 = vadd.f32 %v8350_v13, %v8349_v11  ;;  %v18146_v45 = vld [vmem:[#allocation187_spill] sm:$0xff]  ;;  %v18149_v13 = vld [vmem:[#allocation52_spill] sm:$0xff] }
 0x329   : > { %v9934_v18 = vpop.eup %9933  ;;  %9953 = vpow2.f32 %v5026_v12  ;;  %5291 = vadd.xlane.f32.xlu0 %v18141_v20  ;;  %v5335_v59 = vadd.f32 %v18146_v45, %v18145_v27  ;;  %v18147_v20 = vld [vmem:[#allocation197_spill] sm:$0xff]  ;;  %v5030_v1 = vmul.f32 1.442695, %v4582_v8  ;;  %v15965_v43 = vpop.xlane.xlu1 %5234  ;;  %v18150_v48 = vld [vmem:[#allocation200_spill] sm:$0xff]  ;;  %v18152_v8 = vld [vmem:[#allocation163_spill] sm:$0xff] }
 0x32a   : > { %v9936_v0 = vpop.eup %9935  ;;  %9955 = vpow2.f32 %v5028_v55  ;;  %6256 = vmatprep.mubr.f32.mxu0 %v9934_v18  ;;  %v5032_v55 = vmul.f32 1.442695, %v4583_v19  ;;  %v15963_v54 = vmul.f32 %v9930_v35, %v8351_v25  ;;  %v4344_v27 = vpop.xlane.xlu0 %4343 }
 0x32b   : > { %5288 = vadd.xlane.f32.xlu1 %v5287_v16  ;;  %v9938_v38 = vpop.eup %9937  ;;  %9957 = vrcp.f32 %v18144_v6  ;;  %6257 = vmatmul.mubr.f32.gmra.mrb[220].mxu0 %v9932_v29  ;;  %v15960_v16 = vadd.f32 %v9934_v18, %v9932_v29  ;;  %v8352_v6 = vpop.f32.mrb[130].mxu1  ;;  %v18151_v18 = vld [vmem:[#allocation60_spill] sm:$0xff]  ;;  %v4615_v19 = vsub.f32 %v18152_v8, %v4344_v27 }
 0x32c   : > { %v9940_v12 = vpop.eup %9939  ;;  %9959 = vrcp.f32 %v18147_v20  ;;  %18148 = vst [vmem:[#allocation155_spill] sm:$0xff] %v15963_v54  ;;  %v4614_v45 = vsub.f32 %v18151_v18, %v4344_v27  ;;  %v8273_v35 = vpop.f32.mrb[131].mxu0  ;;  %v18154_v27 = vld [vmem:[#allocation53_spill] sm:$0xff] }
 0x32d   : > { %v9942_v11 = vpop.eup %9941  ;;  %9961 = vrcp.f32 %v18149_v13  ;;  %5339 = vadd.xlane.f32.xlu0 %v18150_v48  ;;  %v8353_v25 = vpop.f32.mrb[131].mxu1  ;;  %v8274_v26 = vadd.f32 %v8273_v35, %v8272_v10  ;;  %v18153_v48 = vld [vmem:[#allocation199_spill] sm:$0xff]  ;;  %v5096_v34 = vmul.f32 1.442695, %v4615_v19  ;;  %v18155_v18 = vld [vmem:[#allocation201_spill] sm:$0xff]  ;;  %v18159_v19 = vld [vmem:[#allocation64_spill] sm:$0xff] }
 0x32e   : > { %v9944_v29 = vpop.eup %9943  ;;  %9963 = vpow2.f32 %v5030_v1  ;;  %6401 = vmatprep.mubr.f32.mxu1 %v9942_v11  ;;  %v15971_v20 = vadd.f32 %v9942_v11, %v9940_v12  ;;  %v8354_v13 = vadd.f32 %v8353_v25, %v8352_v6  ;;  %v5094_v44 = vmul.f32 1.442695, %v4614_v45  ;;  %v4299_v1 = vpop.xlane.xlu1 %4298  ;;  %v18158_v10 = vld [vmem:[#allocation63_spill] sm:$0xff] }
 0x32f   : > { %5336 = vadd.xlane.f32.xlu1 %v5335_v59  ;;  %v9946_v54 = vpop.eup %9945  ;;  %9965 = vpow2.f32 %v5032_v55  ;;  %6402 = vmatmul.mubr.f32.gmra.mrb[220].mxu1 %v9940_v12  ;;  %v8275_v42 = vpop.f32.mrb[132].mxu0  ;;  %v15977_v11 = vmul.f32 %v9936_v0, %v8274_v26  ;;  %v4584_v12 = vsub.f32 %v18158_v10, %v4299_v1  ;;  %v4585_v35 = vsub.f32 %v18159_v19, %v4299_v1  ;;  %v18161_v1 = vld [vmem:[#allocation159_spill] sm:$0xff] }
 0x330   : > { %v9948_v59 = vpop.eup %9947  ;;  %9967 = vrcp.f32 %v18153_v48  ;;  %v15979_v55 = vmul.f32 %v9938_v38, %v8354_v13  ;;  %v8355_v6 = vpop.f32.mrb[132].mxu1 }
 0x331   : > { %v9950_v4 = vpop.eup %9949  ;;  %9969 = vrcp.f32 %v15640_v7  ;;  %5297 = vadd.xlane.f32.xlu0 %v18155_v18  ;;  %18156 = vst [vmem:[#allocation59_spill] sm:$0xff] %v15977_v11  ;;  %v15982_v8 = vpop.xlane.xlu0 %5189  ;;  %6261 = vmatprep.mubr.f32.mxu0 %v9948_v59  ;;  %v15985_v48 = vadd.f32 %v9948_v59, %v9946_v54  ;;  %v5034_v26 = vmul.f32 1.442695, %v4584_v12  ;;  %v5036_v18 = vmul.f32 1.442695, %v4585_v35  ;;  %v18160_v11 = vld [vmem:[#allocation198_spill] sm:$0xff] }
 0x332   : > { %18157 = vst [vmem:[#allocation54_spill] sm:$0xff] %v15979_v55  ;;  %v9952_v45 = vpop.eup %9951  ;;  %9971 = vpow2.f32 %v5094_v44  ;;  %v8276_v25 = vpop.f32.mrb[133].mxu0  ;;  %6262 = vmatmul.mubr.f32.gmra.mrb[222].mxu0 %v9946_v54 }
 0x333   : > { %5294 = vadd.xlane.f32.xlu1 %v18154_v27  ;;  %v8356_v7 = vpop.f32.mrb[133].mxu1  ;;  %v9954_v27 = vpop.eup %9953  ;;  %9973 = vpow2.f32 %v5096_v34  ;;  %v8277_v0 = vadd.f32 %v8276_v25, %v8275_v42  ;;  %v18164_v34 = vld [vmem:[#allocation20_spill] sm:$0xff] }
 0x334   : > { %v8357_v38 = vadd.f32 %v8356_v7, %v8355_v6  ;;  %v9956_v13 = vpop.eup %9955  ;;  %9975 = vrcp.f32 %v15744_v32  ;;  %v4347_v10 = vpop.xlane.xlu1 %4346  ;;  %v18165_v32 = vld [vmem:[#allocation17_spill] sm:$0xff] }
 0x335   : > { %v8278_v55 = vpop.f32.mrb[134].mxu0  ;;  %v9958_v44 = vpop.eup %9957  ;;  %9977 = vpow2.f32 %v5034_v26  ;;  %5345 = vadd.xlane.f32.xlu0 %v18161_v1  ;;  %v15990_v59 = vmul.f32 %v9944_v29, %v8277_v0  ;;  %v4616_v54 = vsub.f32 %v18164_v34, %v4347_v10  ;;  %v4617_v35 = vsub.f32 %v18165_v32, %v4347_v10  ;;  %6406 = vmatprep.mubr.f32.mxu1 %v9956_v13  ;;  %v18166_v32 = vld [vmem:[#allocation157_spill] sm:$0xff] }
 0x336   : > { %v15992_v19 = vmul.f32 %v9950_v4, %v8357_v38  ;;  %v8358_v42 = vpop.f32.mrb[134].mxu1  ;;  %v15995_v12 = vpop.xlane.xlu0 %5237  ;;  %9979 = vpow2.f32 %v5036_v18  ;;  %6407 = vmatmul.mubr.f32.gmra.mrb[222].mxu1 %v9954_v27 }
 0x337   : > { %5342 = vadd.xlane.f32.xlu1 %v18160_v11  ;;  %18162 = vst [vmem:[#allocation57_spill] sm:$0xff] %v15990_v59  ;;  %v9960_v6 = vpop.eup %9959  ;;  %v8279_v25 = vpop.f32.mrb[135].mxu0  ;;  %v15998_v11 = vadd.f32 %v9956_v13, %v9954_v27  ;;  %9981 = vrcp.f32 %v15806_v30  ;;  %v5098_v29 = vmul.f32 1.442695, %v4616_v54  ;;  %v5100_v1 = vmul.f32 1.442695, %v4617_v35 }
 0x338   : > { %18163 = vst [vmem:[#allocation6_spill] sm:$0xff] %v15992_v19  ;;  %v8359_v7 = vpop.f32.mrb[135].mxu1  ;;  %v9962_v26 = vpop.eup %9961  ;;  %v8280_v4 = vadd.f32 %v8279_v25, %v8278_v55  ;;  %9983 = vrcp.f32 %v15837_v24  ;;  %v18167_v13 = vld [vmem:[#allocation202_spill] sm:$0xff]  ;;  %v18169_v24 = vld [vmem:[#allocation172_spill] sm:$0xff] }
 0x339   : > { %v8360_v0 = vadd.f32 %v8359_v7, %v8358_v42  ;;  %v9964_v38 = vpop.eup %9963  ;;  %v16002_v34 = vpop.xlane.xlu1 %5192  ;;  %9985 = vpow2.f32 %v5098_v29  ;;  %5351 = vadd.xlane.f32.xlu0 %v18167_v13  ;;  %v18170_v35 = vld [vmem:[#allocation70_spill] sm:$0xff] }
 0x33a   : > { %v8281_v18 = vpop.f32.mrb[136].mxu0  ;;  %v9966_v10 = vpop.eup %9965  ;;  %v16006_v19 = vmul.f32 %v9952_v45, %v8280_v4  ;;  %9987 = vpow2.f32 %v5100_v1 }
 0x33b   : > { %5300 = vadd.xlane.f32.xlu1 %v18166_v32  ;;  %v16008_v30 = vmul.f32 %v9958_v44, %v8360_v0  ;;  %v8361_v27 = vpop.f32.mrb[136].mxu1  ;;  %v4302_v55 = vpop.xlane.xlu0 %4301  ;;  %6476 = vmatprep.mubr.f32.mxu0 %v9966_v10  ;;  %v16012_v31 = vadd.f32 %v9966_v10, %v9964_v38  ;;  %9989 = vrcp.f32 %v15898_v50 }
 0x33c   : > { %v9968_v54 = vpop.eup %9967  ;;  %v4586_v42 = vsub.f32 %v18169_v24, %v4302_v55  ;;  %v4587_v25 = vsub.f32 %v18170_v35, %v4302_v55  ;;  %v8282_v7 = vpop.f32.mrb[137].mxu0  ;;  %6477 = vmatmul.mubr.f32.vlgmr.msra.gmra.mrb[224].mxu0 %v9964_v38  ;;  %9991 = vrcp.f32 %v15931_v2  ;;  %v18171_v55 = vld [vmem:[#allocation203_spill] sm:$0xff] }
 0x33d   : > { %18168 = vst [vmem:[#allocation7_spill] sm:$0xff] %v16008_v30  ;;  %v8362_v59 = vpop.f32.mrb[137].mxu1  ;;  %v9970_v29 = vpop.eup %9969  ;;  %v8283_v45 = vadd.f32 %v8282_v7, %v8281_v18  ;;  %9993 = vrcp.f32 %v15942_v51  ;;  %5399 = vadd.xlane.f32.xlu0 %v15736_v5  ;;  %v18173_v2 = vld [vmem:[#allocation127_spill] sm:$0xff] }
 0x33e   : > { %v8363_v4 = vadd.f32 %v8362_v59, %v8361_v27  ;;  %v9972_v44 = vpop.eup %9971  ;;  %v5038_v0 = vmul.f32 1.442695, %v4586_v42  ;;  %v5040_v1 = vmul.f32 1.442695, %v4587_v25  ;;  %v16016_v32 = vpop.xlane.xlu1 %5240  ;;  %v18174_v42 = vld [vmem:[#allocation74_spill] sm:$0xff] }
 0x33f   : > { %v8284_v13 = vpop.f32.mrb[138].mxu0  ;;  %v9974_v24 = vpop.eup %9973  ;;  %5348 = vadd.xlane.f32.xlu1 %v18171_v55  ;;  %v16021_v10 = vmul.f32 %v9960_v6, %v8283_v45 }
 0x340   : > { %v16023_v50 = vmul.f32 %v9962_v26, %v8363_v4  ;;  %v8364_v59 = vpop.f32.mrb[138].mxu1  ;;  %v4350_v38 = vpop.xlane.xlu0 %4349  ;;  %9995 = vpow2.f32 %v5038_v0  ;;  %6621 = vmatprep.mubr.f32.mxu1 %v9974_v24  ;;  %v16027_v51 = vadd.f32 %v9974_v24, %v9972_v44 }
 0x341   : > { %v9976_v18 = vpop.eup %9975  ;;  %v4618_v27 = vsub.f32 %v18173_v2, %v4350_v38  ;;  %v4619_v35 = vsub.f32 %v18174_v42, %v4350_v38  ;;  %v8285_v25 = vpop.f32.mrb[139].mxu0  ;;  %9997 = vpow2.f32 %v5040_v1  ;;  %6622 = vmatmul.mubr.f32.vlgmr.msra.gmra.mrb[224].mxu1 %v9972_v44  ;;  %5357 = vadd.xlane.f32.xlu0 %v15760_v58  ;;  %v18176_v2 = vld [vmem:[#allocation78_spill] sm:$0xff] }
 0x342   : > { %18172 = vst [vmem:[#allocation61_spill] sm:$0xff] %v16023_v50  ;;  %v8365_v7 = vpop.f32.mrb[139].mxu1  ;;  %v9978_v55 = vpop.eup %9977  ;;  %v8286_v5 = vadd.f32 %v8285_v25, %v8284_v13  ;;  %9999 = vrcp.f32 %v15952_v22  ;;  %v18175_v13 = vld [vmem:[#allocation24_spill] sm:$0xff] }
 0x343   : > { %v8366_v6 = vadd.f32 %v8365_v7, %v8364_v59  ;;  %v9980_v26 = vpop.eup %9979  ;;  %v5102_v45 = vmul.f32 1.442695, %v4618_v27  ;;  %v5104_v4 = vmul.f32 1.442695, %v4619_v35  ;;  %v4305_v0 = vpop.xlane.xlu1 %4304  ;;  %10001 = vrcp.f32 %v15965_v43  ;;  %5354 = vadd.xlane.f32.xlu1 %v15756_v37 }
 0x344   : > { %v8287_v50 = vpop.f32.mrb[140].mxu0  ;;  %v9982_v30 = vpop.eup %9981  ;;  %v16033_v24 = vmul.f32 %v9968_v54, %v8286_v5  ;;  %v4588_v44 = vsub.f32 %v18175_v13, %v4305_v0  ;;  %v4589_v27 = vsub.f32 %v18176_v2, %v4305_v0  ;;  %6481 = vmatprep.mubr.f32.mxu0 %v9980_v26  ;;  %v16041_v35 = vadd.f32 %v9980_v26, %v9978_v55 }
 0x345   : > { %v16035_v1 = vmul.f32 %v9970_v29, %v8366_v6  ;;  %v8367_v59 = vpop.f32.mrb[140].mxu1  ;;  %v16038_v38 = vpop.xlane.xlu0 %5195  ;;  %10003 = vpow2.f32 %v5102_v45  ;;  %6482 = vmatmul.mubr.f32.gmra.mrb[226].mxu0 %v9978_v55  ;;  %5405 = vadd.xlane.f32.xlu0 %v15790_v49 }
 0x346   : > { %v9984_v22 = vpop.eup %9983  ;;  %v8288_v42 = vpop.f32.mrb[141].mxu0  ;;  %10005 = vpow2.f32 %v5104_v4  ;;  %v5042_v58 = vmul.f32 1.442695, %v4588_v44  ;;  %v5044_v7 = vmul.f32 1.442695, %v4589_v27  ;;  %v18177_v4 = vld [vmem:[#allocation79_spill] sm:$0xff] }
 0x347   : > { %v8368_v43 = vpop.f32.mrb[141].mxu1  ;;  %v9986_v37 = vpop.eup %9985  ;;  %v8289_v54 = vadd.f32 %v8288_v42, %v8287_v50  ;;  %10007 = vrcp.f32 %v15982_v8  ;;  %5402 = vadd.xlane.f32.xlu1 %v15770_v21  ;;  %v18178_v8 = vld [vmem:[#allocation80_spill] sm:$0xff] }
 0x348   : > { %v8369_v29 = vadd.f32 %v8368_v43, %v8367_v59  ;;  %v9988_v25 = vpop.eup %9987  ;;  %v4353_v5 = vpop.xlane.xlu1 %4352  ;;  %10009 = vpow2.f32 %v5042_v58 }
 0x349   : > { %v8290_v6 = vpop.f32.mrb[142].mxu0  ;;  %v9990_v45 = vpop.eup %9989  ;;  %v16046_v26 = vmul.f32 %v9976_v18, %v8289_v54  ;;  %v4620_v55 = vsub.f32 %v18177_v4, %v4353_v5  ;;  %10011 = vpow2.f32 %v5044_v7  ;;  %v4621_v59 = vsub.f32 %v18178_v8, %v4353_v5  ;;  %6626 = vmatprep.mubr.f32.mxu1 %v9988_v25  ;;  %5363 = vadd.xlane.f32.xlu0 %v15798_v28 }
 0x34a   : > { %v16048_v0 = vmul.f32 %v9982_v30, %v8369_v29  ;;  %v8370_v50 = vpop.f32.mrb[142].mxu1  ;;  %v5244_v13 = vpop.xlane.xlu0 %5243  ;;  %v16052_v42 = vadd.f32 %v9988_v25, %v9986_v37  ;;  %10013 = vrcp.f32 %v15995_v12  ;;  %6627 = vmatmul.mubr.f32.gmra.mrb[226].mxu1 %v9986_v37 }
 0x34b   : > { %v9992_v44 = vpop.eup %9991  ;;  %v8291_v2 = vpop.f32.mrb[143].mxu0  ;;  %v5106_v49 = vmul.f32 1.442695, %v4620_v55  ;;  %10015 = vrcp.f32 %v16002_v34  ;;  %v5108_v58 = vmul.f32 1.442695, %v4621_v59  ;;  %5360 = vadd.xlane.f32.xlu1 %v15794_v60  ;;  %v18179_v34 = vld [vmem:[#allocation175_spill] sm:$0xff] }
 0x34c   : > { %v8371_v27 = vpop.f32.mrb[143].mxu1  ;;  %v9994_v21 = vpop.eup %9993  ;;  %v8292_v30 = vadd.f32 %v8291_v2, %v8290_v6  ;;  %v18180_v55 = vld [vmem:[#allocation26_spill] sm:$0xff] }
 0x34d   : > { %v8372_v18 = vadd.f32 %v8371_v27, %v8370_v50  ;;  %v16055_v43 = vpop.eup %9995  ;;  %v5199_v54 = vpop.xlane.xlu1 %5198  ;;  %10017 = vpow2.f32 %v5106_v49  ;;  %5411 = vadd.xlane.f32.xlu0 %v15817_v53 }
 0x34e   : > { %v8293_v29 = vpop.f32.mrb[144].mxu0  ;;  %v16058_v7 = vpop.eup %9997  ;;  %v16062_v25 = vmul.f32 %v9984_v22, %v8292_v30  ;;  %10019 = vpow2.f32 %v5108_v58 }
 0x34f   : > { %v16064_v12 = vmul.f32 %v9990_v45, %v8372_v18  ;;  %v8373_v37 = vpop.f32.mrb[144].mxu1  ;;  %v4308_v5 = vpop.xlane.xlu0 %4307  ;;  %6486 = vmatprep.mubr.f32.mxu0 %v16058_v7  ;;  %10021 = vrcp.f32 %v16016_v32  ;;  %5408 = vadd.xlane.f32.xlu1 %v15810_v15 }
 0x350   : > { %v10000_v6 = vpop.eup %9999  ;;  %v4590_v4 = vsub.f32 %v18179_v34, %v4308_v5  ;;  %v4591_v50 = vsub.f32 %v18180_v55, %v4308_v5  ;;  %v8294_v8 = vpop.f32.mrb[145].mxu0  ;;  %6487 = vmatmul.mubr.f32.gmra.mrb[228].mxu0 %v16055_v43  ;;  %10023 = vrcp.f32 %v16038_v38 }
 0x351   : > { %v8374_v59 = vpop.f32.mrb[145].mxu1  ;;  %v10002_v60 = vpop.eup %10001  ;;  %v8295_v28 = vadd.f32 %v8294_v8, %v8293_v29  ;;  %10025 = vrcp.f32 %v5244_v13  ;;  %v18182_v13 = vld [vmem:[#allocation85_spill] sm:$0xff]  ;;  %5369 = vadd.xlane.f32.xlu0 %v15825_v14 }
 0x352   : > { %v8375_v22 = vadd.f32 %v8374_v59, %v8373_v37  ;;  %v16071_v45 = vpop.eup %10003  ;;  %v5046_v2 = vmul.f32 1.442695, %v4590_v4  ;;  %v5048_v27 = vmul.f32 1.442695, %v4591_v50  ;;  %v5247_v49 = vpop.xlane.xlu1 %5246  ;;  %v18183_v50 = vld [vmem:[#allocation82_spill] sm:$0xff] }
 0x353   : > { %v8296_v30 = vpop.f32.mrb[146].mxu0  ;;  %v16074_v18 = vpop.eup %10005  ;;  %v16078_v32 = vmul.f32 %v9992_v44, %v8295_v28  ;;  %5366 = vadd.xlane.f32.xlu1 %v15821_v17 }
 0x354   : > { %v16080_v58 = vmul.f32 %v9994_v21, %v8375_v22  ;;  %v8376_v29 = vpop.f32.mrb[146].mxu1  ;;  %v8297_v37 = vpop.f32.mrb[147].mxu0  ;;  %10027 = vpow2.f32 %v5046_v2  ;;  %6631 = vmatprep.mubr.f32.mxu1 %v16074_v18 }
 0x355   : > { %v10008_v5 = vpop.eup %10007  ;;  %v4356_v38 = vpop.xlane.xlu0 %4355  ;;  %v8298_v34 = vadd.f32 %v8297_v37, %v8296_v30  ;;  %10029 = vpow2.f32 %v5048_v27  ;;  %6632 = vmatmul.mubr.f32.gmra.mrb[228].mxu1 %v16071_v45  ;;  %v18185_v37 = vld [vmem:[#allocation183_spill] sm:$0xff]  ;;  %5417 = vadd.xlane.f32.xlu0 %v15847_v9 }
 0x356   : > { %18181 = vst [vmem:[#allocation161_spill] sm:$0xff] %v16080_v58  ;;  %v8377_v4 = vpop.f32.mrb[147].mxu1  ;;  %v16083_v55 = vpop.eup %10009  ;;  %v4622_v15 = vsub.f32 %v18182_v13, %v4356_v38  ;;  %v4623_v53 = vsub.f32 %v18183_v50, %v4356_v38  ;;  %10031 = vrcp.f32 %v5199_v54  ;;  %v18186_v54 = vld [vmem:[#allocation87_spill] sm:$0xff] }
 0x357   : > { %v8378_v44 = vadd.f32 %v8377_v4, %v8376_v29  ;;  %v16088_v21 = vpop.eup %10011  ;;  %v16090_v8 = vmul.f32 %v10000_v6, %v8298_v34  ;;  %v4311_v59 = vpop.xlane.xlu1 %4310  ;;  %10033 = vrcp.f32 %v5247_v49  ;;  %5414 = vadd.xlane.f32.xlu1 %v15835_v36 }
 0x358   : > { %v8299_v28 = vpop.f32.mrb[148].mxu0  ;;  %v10014_v22 = vpop.eup %10013  ;;  %v5110_v2 = vmul.f32 1.442695, %v4622_v15  ;;  %v5112_v27 = vmul.f32 1.442695, %v4623_v53  ;;  %v4592_v29 = vsub.f32 %v18185_v37, %v4311_v59  ;;  %v4593_v6 = vsub.f32 %v18186_v54, %v4311_v59  ;;  %6491 = vmatprep.mubr.f32.mxu0 %v16088_v21 }
 0x359   : > { %v16094_v30 = vmul.f32 %v10002_v60, %v8378_v44  ;;  %v8379_v38 = vpop.f32.mrb[148].mxu1  ;;  %v8300_v4 = vpop.f32.mrb[149].mxu0  ;;  %6492 = vmatmul.mubr.f32.gmra.mrb[230].mxu0 %v16083_v55  ;;  %5375 = vadd.xlane.f32.xlu0 %v15855_v40  ;;  %v18192_v40 = vld [vmem:[#allocation131_spill] sm:$0xff] }
 0x35a   : > { %v10016_v13 = vpop.eup %10015  ;;  %v5202_v34 = vpop.xlane.xlu0 %5201  ;;  %v8301_v50 = vadd.f32 %v8300_v4, %v8299_v28  ;;  %10035 = vpow2.f32 %v5110_v2  ;;  %v5050_v14 = vmul.f32 1.442695, %v4592_v29  ;;  %v5052_v53 = vmul.f32 1.442695, %v4593_v6 }
 0x35b   : > { %18184 = vst [vmem:[#allocation58_spill] sm:$0xff] %v16094_v30  ;;  %v8380_v58 = vpop.f32.mrb[149].mxu1  ;;  %v16099_v17 = vpop.eup %10017  ;;  %10037 = vpow2.f32 %v5112_v27  ;;  %v18189_v27 = vld [vmem:[#allocation189_spill] sm:$0xff]  ;;  %5372 = vadd.xlane.f32.xlu1 %v15851_v3  ;;  %v18191_v3 = vld [vmem:[#allocation91_spill] sm:$0xff] }
 0x35c   : > { %v8381_v60 = vadd.f32 %v8380_v58, %v8379_v38  ;;  %v16102_v15 = vpop.eup %10019  ;;  %v16104_v44 = vmul.f32 %v10008_v5, %v8301_v50  ;;  %v8302_v49 = vpop.f32.mrb[150].mxu0  ;;  %10039 = vpow2.f32 %v5050_v14  ;;  %v18188_v58 = vld [vmem:[#allocation186_spill] sm:$0xff] }
 0x35d   : > { %v8382_v59 = vpop.f32.mrb[150].mxu1  ;;  %v10022_v37 = vpop.eup %10021  ;;  %10041 = vpow2.f32 %v5052_v53  ;;  %6636 = vmatprep.mubr.f32.mxu1 %v16102_v15  ;;  %5423 = vadd.xlane.f32.xlu0 %v15867_v23 }
 0x35e   : > { %v16108_v28 = vmul.f32 %v10014_v22, %v8381_v60  ;;  %v4359_v2 = vpop.xlane.xlu1 %4358  ;;  %v8303_v29 = vpop.f32.mrb[151].mxu0  ;;  %6637 = vmatmul.mubr.f32.gmra.mrb[230].mxu1 %v16099_v17  ;;  %10043 = vrcp.f32 %v5202_v34 }
 0x35f   : > { %v10024_v4 = vpop.eup %10023  ;;  %v4624_v38 = vsub.f32 %v18188_v58, %v4359_v2  ;;  %v4625_v54 = vsub.f32 %v18189_v27, %v4359_v2  ;;  %v8304_v5 = vadd.f32 %v8303_v29, %v8302_v49  ;;  %v8383_v6 = vpop.f32.mrb[151].mxu1  ;;  %5420 = vadd.xlane.f32.xlu1 %v15863_v39 }
 0x360   : > { %18187 = vst [vmem:[#allocation62_spill] sm:$0xff] %v16108_v28  ;;  %v10026_v50 = vpop.eup %10025  ;;  %v5250_v36 = vpop.xlane.xlu0 %5249  ;;  %v8384_v14 = vadd.f32 %v8383_v6, %v8382_v59 }
 0x361   : > { %v16114_v9 = vpop.eup %10027  ;;  %v5114_v22 = vmul.f32 1.442695, %v4624_v38  ;;  %v5116_v60 = vmul.f32 1.442695, %v4625_v54  ;;  %v16116_v28 = vmul.f32 %v10016_v13, %v8304_v5  ;;  %v8305_v53 = vpop.f32.mrb[152].mxu0  ;;  %10045 = vrcp.f32 %v5250_v36  ;;  %5381 = vadd.xlane.f32.xlu0 %v15880_v33 }
 0x362   : > { %v8385_v58 = vpop.f32.mrb[152].mxu1  ;;  %v16118_v30 = vpop.eup %10029  ;;  %v16122_v49 = vmul.f32 %v10022_v37, %v8384_v14 }
 0x363   : > { %v8306_v2 = vpop.f32.mrb[153].mxu0  ;;  %v8386_v59 = vpop.f32.mrb[153].mxu1  ;;  %10047 = vpow2.f32 %v5114_v22  ;;  %6496 = vmatprep.mubr.f32.mxu0 %v16118_v30  ;;  %5378 = vadd.xlane.f32.xlu1 %v15871_v47 }
 0x364   : > { %18190 = vst [vmem:[#allocation8_spill] sm:$0xff] %v16122_v49  ;;  %v10032_v29 = vpop.eup %10031  ;;  %v8307_v34 = vadd.f32 %v8306_v2, %v8305_v53  ;;  %v8387_v13 = vadd.f32 %v8386_v59, %v8385_v58  ;;  %10049 = vpow2.f32 %v5116_v60  ;;  %v5205_v38 = vpop.xlane.xlu1 %5204  ;;  %6497 = vmatmul.mubr.f32.gmra.mrb[232].mxu0 %v16114_v9 }
 0x365   : > { %v4314_v27 = vpop.xlane.xlu0 %4313  ;;  %v10034_v54 = vpop.eup %10033  ;;  %10051 = vrcp.f32 %v5205_v38  ;;  %5429 = vadd.xlane.f32.xlu0 %v15892_v57 }
 0x366   : > { %v4594_v5 = vsub.f32 %v18191_v3, %v4314_v27  ;;  %v4595_v6 = vsub.f32 %v18192_v40, %v4314_v27  ;;  %v16128_v37 = vmul.f32 %v10024_v4, %v8307_v34  ;;  %v8308_v36 = vpop.f32.mrb[154].mxu0  ;;  %v8388_v14 = vpop.f32.mrb[154].mxu1  ;;  %v16134_v22 = vmul.f32 %v10026_v50, %v8387_v13  ;;  %v18197_v13 = vld [vmem:[#allocation94_spill] sm:$0xff]  ;;  %v18198_v40 = vld [vmem:[#allocation95_spill] sm:$0xff] }
 0x367   : > { %v16130_v49 = vpop.eup %10035  ;;  %v8309_v60 = vpop.f32.mrb[155].mxu0  ;;  %5426 = vadd.xlane.f32.xlu1 %v15888_v52 }
 0x368   : > { %18193 = vst [vmem:[#allocation10_spill] sm:$0xff] %v16128_v37  ;;  %18194 = vst [vmem:[#allocation164_spill] sm:$0xff] %v16134_v22  ;;  %v8389_v53 = vpop.f32.mrb[155].mxu1  ;;  %v16136_v58 = vpop.eup %10037  ;;  %v5054_v2 = vmul.f32 1.442695, %v4594_v5  ;;  %v8310_v27 = vadd.f32 %v8309_v60, %v8308_v36 }
 0x369   : > { %v5056_v59 = vmul.f32 1.442695, %v4595_v6  ;;  %v8390_v4 = vadd.f32 %v8389_v53, %v8388_v14  ;;  %v16138_v34 = vpop.eup %10039  ;;  %6641 = vmatprep.mubr.f32.mxu1 %v16136_v58  ;;  %v5253_v39 = vpop.xlane.xlu1 %5252  ;;  %5387 = vadd.xlane.f32.xlu0 %v15906_v41 }
 0x36a   : > { %v16141_v3 = vpop.eup %10041  ;;  %10053 = vpow2.f32 %v5054_v2  ;;  %v4362_v38 = vpop.xlane.xlu0 %4361  ;;  %v16143_v23 = vmul.f32 %v10032_v29, %v8310_v27  ;;  %6642 = vmatmul.mubr.f32.gmra.mrb[232].mxu1 %v16130_v49 }
 0x36b   : > { %v16145_v50 = vmul.f32 %v10034_v54, %v8390_v4  ;;  %10055 = vpow2.f32 %v5056_v59  ;;  %v4626_v5 = vsub.f32 %v18197_v13, %v4362_v38  ;;  %v4627_v6 = vsub.f32 %v18198_v40, %v4362_v38  ;;  %v8311_v36 = vpop.f32.mrb[156].mxu0  ;;  %v8391_v14 = vpop.f32.mrb[156].mxu1  ;;  %6501 = vmatprep.mubr.f32.mxu0 %v16141_v3  ;;  %5384 = vadd.xlane.f32.xlu1 %v15896_v62 }
 0x36c   : > { %18195 = vst [vmem:[#allocation167_spill] sm:$0xff] %v16143_v23  ;;  %v10044_v60 = vpop.eup %10043  ;;  %10057 = vrcp.f32 %v5253_v39  ;;  %v8312_v29 = vpop.f32.mrb[157].mxu0  ;;  %6502 = vmatmul.mubr.f32.gmra.mrb[234].mxu0 %v16138_v34  ;;  %v18199_v39 = vld [vmem:[#allocation96_spill] sm:$0xff] }
 0x36d   : > { %18196 = vst [vmem:[#allocation171_spill] sm:$0xff] %v16145_v50  ;;  %v8392_v54 = vpop.f32.mrb[157].mxu1  ;;  %v10046_v53 = vpop.eup %10045  ;;  %v5118_v2 = vmul.f32 1.442695, %v4626_v5  ;;  %v5120_v27 = vmul.f32 1.442695, %v4627_v6  ;;  %v8313_v47 = vadd.f32 %v8312_v29, %v8311_v36  ;;  %5435 = vadd.xlane.f32.xlu0 %v15921_v46 }
 0x36e   : > { %v8393_v59 = vadd.f32 %v8392_v54, %v8391_v14  ;;  %v16154_v33 = vpop.eup %10047  ;;  %v4317_v4 = vpop.xlane.xlu1 %4316  ;;  %v18200_v50 = vld [vmem:[#allocation97_spill] sm:$0xff] }
 0x36f   : > { %v8314_v13 = vpop.f32.mrb[158].mxu0  ;;  %v16156_v38 = vpop.eup %10049  ;;  %10059 = vpow2.f32 %v5118_v2  ;;  %v4596_v40 = vsub.f32 %v18199_v39, %v4317_v4  ;;  %v4597_v22 = vsub.f32 %v18200_v50, %v4317_v4  ;;  %v16162_v5 = vmul.f32 %v10044_v60, %v8313_v47  ;;  %5432 = vadd.xlane.f32.xlu1 %v15909_v63 }
 0x370   : > { %v8394_v6 = vpop.f32.mrb[158].mxu1  ;;  %v8315_v36 = vpop.f32.mrb[159].mxu0  ;;  %10061 = vpow2.f32 %v5120_v27  ;;  %v16164_v29 = vmul.f32 %v10046_v53, %v8393_v59  ;;  %6646 = vmatprep.mubr.f32.mxu1 %v16156_v38  ;;  %v18204_v53 = vld [vmem:[#allocation32_spill] sm:$0xff] }
 0x371   : > { %18201 = vst [vmem:[#allocation12_spill] sm:$0xff] %v16162_v5  ;;  %v5256_v14 = vpop.xlane.xlu0 %5255  ;;  %v8316_v54 = vadd.f32 %v8315_v36, %v8314_v13  ;;  %v8395_v2 = vpop.f32.mrb[159].mxu1  ;;  %v5058_v52 = vmul.f32 1.442695, %v4596_v40  ;;  %v5060_v37 = vmul.f32 1.442695, %v4597_v22  ;;  %6647 = vmatmul.mubr.f32.gmra.mrb[234].mxu1 %v16154_v33  ;;  %5393 = vadd.xlane.f32.xlu0 %v15960_v16 }
 0x372   : > { %18202 = vst [vmem:[#allocation13_spill] sm:$0xff] %v16164_v29  ;;  %v10052_v23 = vpop.eup %10051  ;;  %10063 = vrcp.f32 %v5256_v14  ;;  %v8396_v50 = vadd.f32 %v8395_v2, %v8394_v6  ;;  %v4365_v57 = vpop.xlane.xlu1 %4364  ;;  %v18205_v59 = vld [vmem:[#allocation100_spill] sm:$0xff] }
 0x373   : > { %v16168_v60 = vmul.f32 %v10052_v23, %v8316_v54  ;;  %v8429_v47 = vpop.f32.mrb[160].mxu0  ;;  %10065 = vpow2.f32 %v5058_v52  ;;  %v4628_v27 = vsub.f32 %v18204_v53, %v4365_v57  ;;  %v4629_v4 = vsub.f32 %v18205_v59, %v4365_v57  ;;  %v8509_v13 = vpop.f32.mrb[160].mxu1  ;;  %5390 = vadd.xlane.f32.xlu1 %v15933_v56  ;;  %v18211_v56 = vld [vmem:[#allocation108_spill] sm:$0xff] }
 0x374   : > { %v8430_v39 = vpop.f32.mrb[161].mxu0  ;;  %v16174_v22 = vpop.eup %10053  ;;  %10067 = vpow2.f32 %v5060_v37 }
 0x375   : > { %18203 = vst [vmem:[#allocation65_spill] sm:$0xff] %v16168_v60  ;;  %v5304_v40 = vpop.xlane.xlu0 %5303  ;;  %v8431_v6 = vadd.f32 %v8430_v39, %v8429_v47  ;;  %v8510_v36 = vpop.f32.mrb[161].mxu1  ;;  %v5122_v14 = vmul.f32 1.442695, %v4628_v27  ;;  %v5124_v54 = vmul.f32 1.442695, %v4629_v4  ;;  %5441 = vadd.xlane.f32.xlu0 %v15971_v20 }
 0x376   : > { %v16176_v23 = vpop.eup %10055  ;;  %10069 = vrcp.f32 %v5304_v40  ;;  %v8511_v62 = vadd.f32 %v8510_v36, %v8509_v13  ;;  %v8432_v52 = vpop.f32.mrb[162].mxu0  ;;  %v18207_v39 = vld [vmem:[#allocation102_spill] sm:$0xff]  ;;  %v18208_v40 = vld [vmem:[#allocation103_spill] sm:$0xff] }
 0x377   : > { %v10058_v2 = vpop.eup %10057  ;;  %6506 = vmatprep.mubr.f32.mxu0 %v16176_v23  ;;  %v8512_v57 = vpop.f32.mrb[162].mxu1  ;;  %10071 = vpow2.f32 %v5122_v14  ;;  %5438 = vadd.xlane.f32.xlu1 %v15944_v61  ;;  %v18214_v61 = vld [vmem:[#allocation106_spill] sm:$0xff] }
 0x378   : > { %v16179_v41 = vmul.f32 %v10058_v2, %v8396_v50  ;;  %v8433_v37 = vpop.f32.mrb[163].mxu0  ;;  %v8513_v47 = vpop.f32.mrb[163].mxu1  ;;  %10073 = vpow2.f32 %v5124_v54  ;;  %6507 = vmatmul.mubr.f32.gmra.mrb[236].mxu0 %v16174_v22 }
 0x379   : > { %v5259_v53 = vpop.xlane.xlu1 %5258  ;;  %v4320_v27 = vpop.xlane.xlu0 %4319  ;;  %v8434_v59 = vadd.f32 %v8433_v37, %v8432_v52  ;;  %v16184_v4 = vadd.f32 %v8513_v47, %v8512_v57  ;;  %5447 = vadd.xlane.f32.xlu0 %v16012_v31 }
 0x37a   : > { %18206 = vst [vmem:[#allocation165_spill] sm:$0xff] %v16179_v41  ;;  %v16186_v13 = vpop.eup %10059  ;;  %10075 = vrcp.f32 %v5259_v53  ;;  %v4598_v50 = vsub.f32 %v18207_v39, %v4320_v27  ;;  %v4599_v36 = vsub.f32 %v18208_v40, %v4320_v27  ;;  %v8435_v46 = vpop.f32.mrb[164].mxu0 }
 0x37b   : > { %v16190_v63 = vpop.eup %10061  ;;  %v8515_v14 = vpop.f32.mrb[164].mxu1  ;;  %5396 = vadd.xlane.f32.xlu1 %v15985_v48 }
 0x37c   : > { %v10064_v2 = vpop.eup %10063  ;;  %v5062_v54 = vmul.f32 1.442695, %v4598_v50  ;;  %v5064_v41 = vmul.f32 1.442695, %v4599_v36  ;;  %v8436_v52 = vpop.f32.mrb[165].mxu0  ;;  %6651 = vmatprep.mubr.f32.mxu1 %v16190_v63  ;;  %v18210_v50 = vld [vmem:[#allocation105_spill] sm:$0xff] }
 0x37d   : > { %v8516_v57 = vpop.f32.mrb[165].mxu1  ;;  %v16194_v37 = vmul.f32 %v10064_v2, %v8431_v6  ;;  %v5307_v47 = vpop.xlane.xlu1 %5306  ;;  %v16197_v27 = vadd.f32 %v8436_v52, %v8435_v46  ;;  %6652 = vmatmul.mubr.f32.gmra.mrb[236].mxu1 %v16186_v13  ;;  %5495 = vadd.xlane.f32.xlu0 %v16027_v51  ;;  %v5452_v51 = vadd.f32 %v16058_v7, %v16055_v43 }
 0x37e   : > { %v4368_v53 = vpop.xlane.xlu0 %4367  ;;  %v16199_v39 = vadd.f32 %v8516_v57, %v8515_v14  ;;  %v16201_v40 = vpop.eup %10065  ;;  %10077 = vpow2.f32 %v5062_v54 }
 0x37f   : > { %18209 = vst [vmem:[#allocation168_spill] sm:$0xff] %v16194_v37  ;;  %v4630_v36 = vsub.f32 %v18210_v50, %v4368_v53  ;;  %v4631_v29 = vsub.f32 %v18211_v56, %v4368_v53  ;;  %v16206_v16 = vpop.eup %10067  ;;  %10079 = vpow2.f32 %v5064_v41  ;;  %v8438_v6 = vpop.f32.mrb[166].mxu0  ;;  %5444 = vadd.xlane.f32.xlu1 %v15998_v11 }
 0x380   : > { %v8518_v2 = vpop.f32.mrb[166].mxu1  ;;  %v10070_v37 = vpop.eup %10069  ;;  %10081 = vrcp.f32 %v5307_v47  ;;  %6511 = vmatprep.mubr.f32.mxu0 %v16206_v16 }
 0x381   : > { %v5126_v46 = vmul.f32 1.442695, %v4630_v36  ;;  %v5128_v52 = vmul.f32 1.442695, %v4631_v29  ;;  %v8439_v14 = vpop.f32.mrb[167].mxu0  ;;  %v8519_v54 = vpop.f32.mrb[167].mxu1  ;;  %v16210_v57 = vmul.f32 %v10070_v37, %v8511_v62  ;;  %6512 = vmatmul.mubr.f32.gmra.mrb[238].mxu0 %v16201_v40  ;;  %5453 = vadd.xlane.f32.xlu0 %v5452_v51 }
 0x382   : > { %v4323_v53 = vpop.xlane.xlu1 %4322  ;;  %v5262_v50 = vpop.xlane.xlu0 %5261  ;;  %v16213_v56 = vadd.f32 %v8439_v14, %v8438_v6  ;;  %v16215_v41 = vadd.f32 %v8519_v54, %v8518_v2  ;;  %v18213_v29 = vld [vmem:[#allocation109_spill] sm:$0xff] }
 0x383   : > { %18212 = vst [vmem:[#allocation68_spill] sm:$0xff] %v16210_v57  ;;  %v16217_v60 = vpop.eup %10071  ;;  %10083 = vpow2.f32 %v5126_v46  ;;  %v4600_v47 = vsub.f32 %v18213_v29, %v4323_v53  ;;  %v4601_v36 = vsub.f32 %v18214_v61, %v4323_v53  ;;  %v8441_v62 = vpop.f32.mrb[168].mxu0  ;;  %5450 = vadd.xlane.f32.xlu1 %v16041_v35  ;;  %v5500_v35 = vadd.f32 %v16074_v18, %v16071_v45 }
 0x384   : > { %v16222_v20 = vpop.eup %10073  ;;  %10085 = vpow2.f32 %v5128_v52  ;;  %v8521_v37 = vpop.f32.mrb[168].mxu1 }
 0x385   : > { %v10076_v57 = vpop.eup %10075  ;;  %v5066_v5 = vmul.f32 1.442695, %v4600_v47  ;;  %v5068_v6 = vmul.f32 1.442695, %v4601_v36  ;;  %10087 = vrcp.f32 %v5262_v50  ;;  %v8442_v2 = vpop.f32.mrb[169].mxu0  ;;  %6656 = vmatprep.mubr.f32.mxu1 %v16222_v20  ;;  %v18216_v47 = vld [vmem:[#allocation112_spill] sm:$0xff]  ;;  %5501 = vadd.xlane.f32.xlu0 %v5500_v35 }
 0x386   : > { %v8522_v46 = vpop.f32.mrb[169].mxu1  ;;  %v16226_v14 = vmul.f32 %v10076_v57, %v8434_v59  ;;  %v4371_v54 = vpop.xlane.xlu1 %4370  ;;  %v16229_v29 = vadd.f32 %v8442_v2, %v8441_v62  ;;  %v18217_v50 = vld [vmem:[#allocation113_spill] sm:$0xff]  ;;  %6657 = vmatmul.mubr.f32.gmra.mrb[238].mxu1 %v16217_v60 }
 0x387   : > { %v5310_v53 = vpop.xlane.xlu0 %5309  ;;  %v16231_v52 = vadd.f32 %v8522_v46, %v8521_v37  ;;  %10089 = vpow2.f32 %v5066_v5  ;;  %v4632_v61 = vsub.f32 %v18216_v47, %v4371_v54  ;;  %v4633_v36 = vsub.f32 %v18217_v50, %v4371_v54  ;;  %v8444_v31 = vpop.f32.mrb[170].mxu0  ;;  %v18220_v50 = vld [vmem:[#allocation40_spill] sm:$0xff]  ;;  %5498 = vadd.xlane.f32.xlu1 %v16052_v42  ;;  %v18227_v42 = vld [vmem:[#allocation143_spill] sm:$0xff] }
 0x388   : > { %18215 = vst [vmem:[#allocation69_spill] sm:$0xff] %v16226_v14  ;;  %10091 = vpow2.f32 %v5068_v6  ;;  %v8524_v48 = vpop.f32.mrb[170].mxu1  ;;  %v16236_v59 = vpop.eup %10077 }
 0x389   : > { %v5130_v57 = vmul.f32 1.442695, %v4632_v61  ;;  %v5132_v14 = vmul.f32 1.442695, %v4633_v36  ;;  %10093 = vrcp.f32 %v5310_v53  ;;  %v8445_v62 = vpop.f32.mrb[171].mxu0  ;;  %v8525_v5 = vpop.f32.mrb[171].mxu1 }
 0x38a   : > { %v16240_v37 = vpop.eup %10079  ;;  %v5265_v2 = vpop.xlane.xlu1 %5264  ;;  %v16242_v54 = vadd.f32 %v8445_v62, %v8444_v31  ;;  %v16244_v6 = vadd.f32 %v8525_v5, %v8524_v48  ;;  %v18219_v61 = vld [vmem:[#allocation39_spill] sm:$0xff] }
 0x38b   : > { %v4326_v46 = vpop.xlane.xlu0 %4325  ;;  %v10082_v47 = vpop.eup %10081  ;;  %10095 = vpow2.f32 %v5130_v57  ;;  %6516 = vmatprep.mubr.f32.mxu0 %v16240_v37 }
 0x38c   : > { %18218 = vst [vmem:[#allocation169_spill] sm:$0xff] %v16242_v54  ;;  %v4602_v53 = vsub.f32 %v18219_v61, %v4326_v46  ;;  %v4603_v11 = vsub.f32 %v18220_v50, %v4326_v46  ;;  %v16252_v36 = vmul.f32 %v10082_v47, %v16184_v4  ;;  %10097 = vpow2.f32 %v5132_v14  ;;  %6517 = vmatmul.mubr.f32.gmra.mrb[240].mxu0 %v16236_v59  ;;  %v8447_v31 = vpop.f32.mrb[172].mxu0  ;;  %v8527_v48 = vpop.f32.mrb[172].mxu1 }
 0x38d   : > { %v16255_v62 = vpop.eup %10083  ;;  %10099 = vrcp.f32 %v5265_v2  ;;  %v8448_v46 = vpop.f32.mrb[173].mxu0  ;;  %v18223_v2 = vld [vmem:[#allocation35_spill] sm:$0xff] }
 0x38e   : > { %18221 = vst [vmem:[#allocation67_spill] sm:$0xff] %v16252_v36  ;;  %v5070_v57 = vmul.f32 1.442695, %v4602_v53  ;;  %v5072_v5 = vmul.f32 1.442695, %v4603_v11  ;;  %v8528_v61 = vpop.f32.mrb[173].mxu1  ;;  %v16258_v50 = vpop.eup %10085  ;;  %v16260_v4 = vadd.f32 %v8448_v46, %v8447_v31 }
 0x38f   : > { %v5313_v43 = vpop.xlane.xlu1 %5312  ;;  %v4374_v7 = vpop.xlane.xlu0 %4373  ;;  %v16262_v14 = vadd.f32 %v8528_v61, %v8527_v48  ;;  %6661 = vmatprep.mubr.f32.mxu1 %v16258_v50  ;;  %v18224_v11 = vld [vmem:[#allocation118_spill] sm:$0xff] }
 0x390   : > { %18222 = vst [vmem:[#allocation9_spill] sm:$0xff] %v16260_v4  ;;  %v10088_v47 = vpop.eup %10087  ;;  %10101 = vpow2.f32 %v5070_v57  ;;  %v4634_v53 = vsub.f32 %v18223_v2, %v4374_v7  ;;  %v4635_v54 = vsub.f32 %v18224_v11, %v4374_v7  ;;  %6662 = vmatmul.mubr.f32.gmra.mrb[240].mxu1 %v16255_v62  ;;  %v8450_v31 = vpop.f32.mrb[174].mxu0  ;;  %v5458_v4 = vadd.f32 %v16118_v30, %v16114_v9 }
 0x391   : > { %v16270_v51 = vmul.f32 %v10088_v47, %v16197_v27  ;;  %10103 = vpow2.f32 %v5072_v5  ;;  %v8530_v48 = vpop.f32.mrb[174].mxu1  ;;  %v16273_v46 = vpop.eup %10089  ;;  %v5455_v27 = vadd.f32 %v16088_v21, %v16083_v55  ;;  %v5503_v9 = vadd.f32 %v16102_v15, %v16099_v17 }
 0x392   : > { %10105 = vrcp.f32 %v5313_v43  ;;  %v5134_v57 = vmul.f32 1.442695, %v4634_v53  ;;  %v5136_v61 = vmul.f32 1.442695, %v4635_v54  ;;  %v8451_v7 = vpop.f32.mrb[175].mxu0  ;;  %v8531_v2 = vpop.f32.mrb[175].mxu1  ;;  %5459 = vadd.xlane.f32.xlu0 %v5458_v4  ;;  %v5506_v4 = vadd.f32 %v16136_v58, %v16130_v49 }
 0x393   : > { %v16276_v11 = vpop.eup %10091  ;;  %v4329_v45 = vpop.xlane.xlu1 %4328  ;;  %v16282_v5 = vadd.f32 %v8451_v7, %v8450_v31  ;;  %v16284_v47 = vadd.f32 %v8531_v2, %v8530_v48  ;;  %v18226_v54 = vld [vmem:[#allocation120_spill] sm:$0xff]  ;;  %5456 = vadd.xlane.f32.xlu1 %v5455_v27 }
 0x394   : > { %v16278_v18 = vpop.xlane.xlu0 %5267  ;;  %v10094_v43 = vpop.eup %10093  ;;  %10107 = vpow2.f32 %v5134_v57  ;;  %v4604_v53 = vsub.f32 %v18226_v54, %v4329_v45  ;;  %v4605_v35 = vsub.f32 %v18227_v42, %v4329_v45  ;;  %6521 = vmatprep.mubr.f32.mxu0 %v16276_v11 }
 0x395   : > { %18225 = vst [vmem:[#allocation11_spill] sm:$0xff] %v16282_v5  ;;  %10109 = vpow2.f32 %v5136_v61  ;;  %6522 = vmatmul.mubr.f32.gmra.mrb[242].mxu0 %v16273_v46  ;;  %v8453_v36 = vpop.f32.mrb[176].mxu0  ;;  %v8533_v55 = vpop.f32.mrb[176].mxu1  ;;  %v16293_v21 = vmul.f32 %v10094_v43, %v16199_v39  ;;  %v18228_v43 = vld [vmem:[#allocation133_spill] sm:$0xff] }
 0x396   : > { %v16295_v31 = vpop.eup %10095  ;;  %v5074_v48 = vmul.f32 1.442695, %v4604_v53  ;;  %v5076_v57 = vmul.f32 1.442695, %v4605_v35  ;;  %v8454_v7 = vpop.f32.mrb[177].mxu0  ;;  %v18229_v35 = vld [vmem:[#allocation123_spill] sm:$0xff]  ;;  %5507 = vadd.xlane.f32.xlu0 %v5506_v4 }
 0x397   : > { %v8534_v2 = vpop.f32.mrb[177].mxu1  ;;  %v16297_v45 = vpop.eup %10097  ;;  %v16301_v61 = vadd.f32 %v8454_v7, %v8453_v36  ;;  %5504 = vadd.xlane.f32.xlu1 %v5503_v9 }
 0x398   : > { %v4377_v54 = vpop.xlane.xlu1 %4376  ;;  %v5316_v30 = vpop.xlane.xlu0 %5315  ;;  %v16303_v42 = vadd.f32 %v8534_v2, %v8533_v55  ;;  %10111 = vpow2.f32 %v5074_v48  ;;  %6666 = vmatprep.mubr.f32.mxu1 %v16297_v45 }
 0x399   : > { %v10100_v39 = vpop.eup %10099  ;;  %v4636_v53 = vsub.f32 %v18228_v43, %v4377_v54  ;;  %v4637_v27 = vsub.f32 %v18229_v35, %v4377_v54  ;;  %10113 = vpow2.f32 %v5076_v57  ;;  %6667 = vmatmul.mubr.f32.gmra.mrb[242].mxu1 %v16295_v31  ;;  %v8456_v5 = vpop.f32.mrb[178].mxu0  ;;  %v5461_v57 = vadd.f32 %v16141_v3, %v16138_v34 }
 0x39a   : > { %v8536_v17 = vpop.f32.mrb[178].mxu1  ;;  %v16312_v15 = vmul.f32 %v10100_v39, %v16213_v56  ;;  %v16314_v36 = vpop.eup %10101  ;;  %10115 = vrcp.f32 %v5316_v30  ;;  %v18230_v30 = vld [vmem:[#allocation146_spill] sm:$0xff] }
 0x39b   : > { %v5138_v55 = vmul.f32 1.442695, %v4636_v53  ;;  %v5140_v48 = vmul.f32 1.442695, %v4637_v27  ;;  %v8457_v7 = vpop.f32.mrb[179].mxu0  ;;  %v8537_v2 = vpop.f32.mrb[179].mxu1  ;;  %v5464_v27 = vadd.f32 %v16176_v23, %v16174_v22  ;;  %5462 = vadd.xlane.f32.xlu1 %v5461_v57  ;;  %v5509_v23 = vadd.f32 %v16156_v38, %v16154_v33 }
 0x39c   : > { %v16316_v54 = vpop.eup %10103  ;;  %v16318_v49 = vpop.xlane.xlu1 %5270  ;;  %v16322_v43 = vadd.f32 %v8457_v7, %v8456_v5  ;;  %v16324_v56 = vadd.f32 %v8537_v2, %v8536_v17  ;;  %v18231_v53 = vld [vmem:[#allocation142_spill] sm:$0xff]  ;;  %v18234_v57 = vld [vmem:[#allocation41_spill] sm:$0xff] }
 0x39d   : > { %v4332_v58 = vpop.xlane.xlu0 %4331  ;;  %v10106_v39 = vpop.eup %10105  ;;  %10117 = vpow2.f32 %v5138_v55  ;;  %6526 = vmatprep.mubr.f32.mxu0 %v16316_v54  ;;  %5465 = vadd.xlane.f32.xlu0 %v5464_v27 }
 0x39e   : > { %v4606_v9 = vsub.f32 %v18230_v30, %v4332_v58  ;;  %v4607_v35 = vsub.f32 %v18231_v53, %v4332_v58  ;;  %10119 = vpow2.f32 %v5140_v48  ;;  %6527 = vmatmul.mubr.f32.gmra.mrb[244].mxu0 %v16314_v36  ;;  %v8459_v4 = vpop.f32.mrb[180].mxu0  ;;  %v8539_v34 = vpop.f32.mrb[180].mxu1  ;;  %v16333_v3 = vmul.f32 %v10106_v39, %v16215_v41  ;;  %v18233_v41 = vld [vmem:[#allocation45_spill] sm:$0xff] }
 0x39f   : > { %v16335_v5 = vpop.eup %10107  ;;  %v8460_v7 = vpop.f32.mrb[181].mxu0  ;;  %5510 = vadd.xlane.f32.xlu1 %v5509_v23  ;;  %v5470_v23 = vadd.f32 %v16240_v37, %v16236_v59  ;;  %v5515_v37 = vadd.f32 %v16222_v20, %v16217_v60 }
 0x3a0   : > { %18232 = vst [vmem:[#allocation71_spill] sm:$0xff] %v16333_v3  ;;  %v5078_v17 = vmul.f32 1.442695, %v4606_v9  ;;  %v5080_v55 = vmul.f32 1.442695, %v4607_v35  ;;  %v8540_v2 = vpop.f32.mrb[181].mxu1  ;;  %v16337_v58 = vpop.eup %10109  ;;  %v16341_v48 = vadd.f32 %v8460_v7, %v8459_v4  ;;  %v5512_v35 = vadd.f32 %v16190_v63, %v16186_v13 }
 0x3a1   : > { %v5319_v30 = vpop.xlane.xlu1 %5318  ;;  %v4380_v22 = vpop.xlane.xlu0 %4379  ;;  %v16343_v53 = vadd.f32 %v8540_v2, %v8539_v34  ;;  %6671 = vmatprep.mubr.f32.mxu1 %v16337_v58  ;;  %v5467_v13 = vadd.f32 %v16206_v16, %v16201_v40 }
 0x3a2   : > { %10121 = vpow2.f32 %v5078_v17  ;;  %v4638_v39 = vsub.f32 %v18233_v41, %v4380_v22  ;;  %v4639_v9 = vsub.f32 %v18234_v57, %v4380_v22  ;;  %6672 = vmatmul.mubr.f32.gmra.mrb[244].mxu1 %v16335_v5  ;;  %v8462_v27 = vpop.f32.mrb[182].mxu0  ;;  %v16351_v3 = vpop.eup %10111  ;;  %5513 = vadd.xlane.f32.xlu0 %v5512_v35  ;;  %v18235_v22 = vld [vmem:[#allocation162_spill] sm:$0xff] }
 0x3a3   : > { %10123 = vpow2.f32 %v5080_v55  ;;  %v8542_v4 = vpop.f32.mrb[182].mxu1  ;;  %v8463_v34 = vpop.f32.mrb[183].mxu0  ;;  %v18236_v41 = vld [vmem:[#allocation154_spill] sm:$0xff]  ;;  %5468 = vadd.xlane.f32.xlu1 %v5467_v13 }
 0x3a4   : > { %10125 = vrcp.f32 %v5319_v30  ;;  %v5142_v33 = vmul.f32 1.442695, %v4638_v39  ;;  %v5144_v38 = vmul.f32 1.442695, %v4639_v9  ;;  %v16353_v17 = vpop.eup %10113  ;;  %v16359_v63 = vadd.f32 %v8463_v34, %v8462_v27  ;;  %v8543_v57 = vpop.f32.mrb[183].mxu1 }
 0x3a5   : > { %v4335_v7 = vpop.xlane.xlu1 %4334  ;;  %v16355_v2 = vpop.xlane.xlu0 %5273  ;;  %6531 = vmatprep.mubr.f32.mxu0 %v16353_v17  ;;  %v16367_v9 = vadd.f32 %v8543_v57, %v8542_v4 }
 0x3a6   : > { %v10116_v55 = vpop.eup %10115  ;;  %10127 = vpow2.f32 %v5142_v33  ;;  %v4608_v30 = vsub.f32 %v18235_v22, %v4335_v7  ;;  %v4609_v39 = vsub.f32 %v18236_v41, %v4335_v7  ;;  %6532 = vmatmul.mubr.f32.gmra.mrb[246].mxu0 %v16351_v3  ;;  %5471 = vadd.xlane.f32.xlu0 %v5470_v23  ;;  %v8465_v33 = vpop.f32.mrb[184].mxu0  ;;  %v18238_v22 = vld [vmem:[#allocation166_spill] sm:$0xff] }
 0x3a7   : > { %10129 = vpow2.f32 %v5144_v38  ;;  %v16370_v40 = vmul.f32 %v10116_v55, %v16231_v52  ;;  %v16372_v16 = vpop.eup %10117  ;;  %v18237_v38 = vld [vmem:[#allocation158_spill] sm:$0xff]  ;;  %v5518_v55 = vadd.f32 %v16258_v50, %v16255_v62  ;;  %v8545_v13 = vpop.f32.mrb[184].mxu1  ;;  %5516 = vadd.xlane.f32.xlu1 %v5515_v37  ;;  %v5473_v50 = vadd.f32 %v16276_v11, %v16273_v46 }
 0x3a8   : > { %v5082_v35 = vmul.f32 1.442695, %v4608_v30  ;;  %v5084_v27 = vmul.f32 1.442695, %v4609_v39  ;;  %v16374_v34 = vpop.eup %10119  ;;  %v8466_v30 = vpop.f32.mrb[185].mxu0 }
 0x3a9   : > { %v4383_v7 = vpop.xlane.xlu1 %4382  ;;  %v5322_v59 = vpop.xlane.xlu0 %5321  ;;  %6676 = vmatprep.mubr.f32.mxu1 %v16374_v34  ;;  %v16384_v41 = vadd.f32 %v8466_v30, %v8465_v33  ;;  %v18239_v33 = vld [vmem:[#allocation170_spill] sm:$0xff] }
 0x3aa   : > { %10131 = vpow2.f32 %v5082_v35  ;;  %v4640_v4 = vsub.f32 %v18237_v38, %v4383_v7  ;;  %v4641_v52 = vsub.f32 %v18238_v22, %v4383_v7  ;;  %6677 = vmatmul.mubr.f32.gmra.mrb[246].mxu1 %v16372_v16  ;;  %v8546_v39 = vpop.f32.mrb[185].mxu1  ;;  %5519 = vadd.xlane.f32.xlu0 %v5518_v55  ;;  %v18240_v22 = vld [vmem:[#allocation174_spill] sm:$0xff]  ;;  %v8468_v37 = vpop.f32.mrb[186].mxu0 }
 0x3ab   : > { %10133 = vpow2.f32 %v5084_v27  ;;  %v16388_v57 = vadd.f32 %v8546_v39, %v8545_v13  ;;  %v8469_v55 = vpop.f32.mrb[187].mxu0  ;;  %5474 = vadd.xlane.f32.xlu1 %v5473_v50  ;;  %v5524_v50 = vadd.f32 %v16337_v58, %v16335_v5  ;;  %v5479_v5 = vadd.f32 %v16353_v17, %v16351_v3 }
 0x3ac   : > { %v16386_v23 = vpop.eup %10121  ;;  %v5146_v60 = vmul.f32 1.442695, %v4640_v4  ;;  %v5148_v20 = vmul.f32 1.442695, %v4641_v52  ;;  %10135 = vrcp.f32 %v5322_v59  ;;  %v5476_v59 = vadd.f32 %v16316_v54, %v16314_v36  ;;  %v8548_v52 = vpop.f32.mrb[186].mxu1 }
 0x3ad   : > { %v10124_v35 = vpop.eup %10123  ;;  %v16390_v7 = vpop.xlane.xlu1 %5276 }
 0x3ae   : > { %v4338_v62 = vpop.xlane.xlu0 %4337  ;;  %v10126_v27 = vpop.eup %10125  ;;  %10137 = vpow2.f32 %v5146_v60  ;;  %6536 = vmatprep.mubr.f32.mxu0 %v10124_v35  ;;  %5477 = vadd.xlane.f32.xlu0 %v5476_v59  ;;  %v16402_v60 = vadd.f32 %v8469_v55, %v8468_v37 }
 0x3af   : > { %v4610_v38 = vsub.f32 %v18239_v33, %v4338_v62  ;;  %v4611_v4 = vsub.f32 %v18240_v22, %v4338_v62  ;;  %10139 = vpow2.f32 %v5148_v20  ;;  %6537 = vmatmul.mubr.f32.gmra.mrb[248].mxu0 %v16386_v23  ;;  %v8549_v13 = vpop.f32.mrb[187].mxu1  ;;  %v16400_v30 = vmul.f32 %v10126_v27, %v16244_v6  ;;  %v18242_v22 = vld [vmem:[#allocation176_spill] sm:$0xff]  ;;  %v18243_v27 = vld [vmem:[#allocation191_spill] sm:$0xff] }
 0x3b0   : > { %v10128_v46 = vpop.eup %10127  ;;  %v16404_v54 = vadd.f32 %v8549_v13, %v8548_v52  ;;  %v5521_v20 = vadd.f32 %v16297_v45, %v16295_v31 }
 0x3b1   : > { %18241 = vst [vmem:[#allocation125_spill] sm:$0xff] %v16400_v30  ;;  %v5086_v11 = vmul.f32 1.442695, %v4610_v38  ;;  %v5088_v39 = vmul.f32 1.442695, %v4611_v4  ;;  %v10130_v62 = vpop.eup %10129  ;;  %v5325_v33 = vpop.xlane.xlu1 %5324 }
 0x3b2   : > { %v4386_v36 = vpop.xlane.xlu0 %4385  ;;  %6681 = vmatprep.mubr.f32.mxu1 %v10130_v62  ;;  %v8471_v38 = vpop.f32.mrb[188].mxu0  ;;  %5522 = vadd.xlane.f32.xlu1 %v5521_v20 }
 0x3b3   : > { %10141 = vpow2.f32 %v5086_v11  ;;  %v4642_v6 = vsub.f32 %v18242_v22, %v4386_v36  ;;  %v4643_v30 = vsub.f32 %v18243_v27, %v4386_v36  ;;  %6682 = vmatmul.mubr.f32.gmra.mrb[248].mxu1 %v10128_v46  ;;  %v8551_v4 = vpop.f32.mrb[188].mxu1  ;;  %v8472_v59 = vpop.f32.mrb[189].mxu0  ;;  %5525 = vadd.xlane.f32.xlu0 %v5524_v50 }
 0x3b4   : > { %10143 = vpow2.f32 %v5088_v39  ;;  %v10132_v37 = vpop.eup %10131  ;;  %v16412_v31 = vadd.f32 %v8472_v59, %v8471_v38  ;;  %v8552_v45 = vpop.f32.mrb[189].mxu1  ;;  %v18244_v39 = vld [vmem:[#allocation156_spill] sm:$0xff] }
 0x3b5   : > { %10145 = vrcp.f32 %v5325_v33  ;;  %v5150_v52 = vmul.f32 1.442695, %v4642_v6  ;;  %v5152_v55 = vmul.f32 1.442695, %v4643_v30  ;;  %v10134_v13 = vpop.eup %10133  ;;  %v4341_v11 = vpop.xlane.xlu1 %4340  ;;  %v16414_v22 = vadd.f32 %v8552_v45, %v8551_v4  ;;  %v18245_v33 = vld [vmem:[#allocation192_spill] sm:$0xff] }
 0x3b6   : > { %v5280_v36 = vpop.xlane.xlu0 %5279  ;;  %v10136_v58 = vpop.eup %10135  ;;  %v4612_v27 = vsub.f32 %v18244_v39, %v4341_v11  ;;  %v4613_v6 = vsub.f32 %v18245_v33, %v4341_v11  ;;  %6541 = vmatprep.mubr.f32.mxu0 %v10134_v13  ;;  %v5482_v30 = vadd.f32 %v10124_v35, %v16386_v23  ;;  %5480 = vadd.xlane.f32.xlu1 %v5479_v5  ;;  %v18246_v35 = vld [vmem:[#allocation196_spill] sm:$0xff] }
 0x3b7   : > { %10147 = vpow2.f32 %v5150_v52  ;;  %6542 = vmatmul.mubr.f32.gmra.mrb[250].mxu0 %v10132_v37  ;;  %v8474_v20 = vpop.f32.mrb[190].mxu0  ;;  %v16422_v50 = vmul.f32 %v10136_v58, %v16262_v14  ;;  %v8554_v3 = vpop.f32.mrb[190].mxu1  ;;  %v5527_v23 = vadd.f32 %v16374_v34, %v16372_v16 }
 0x3b8   : > { %10149 = vpow2.f32 %v5152_v55  ;;  %v10138_v38 = vpop.eup %10137  ;;  %v5090_v4 = vmul.f32 1.442695, %v4612_v27  ;;  %v5092_v59 = vmul.f32 1.442695, %v4613_v6  ;;  %5483 = vadd.xlane.f32.xlu0 %v5482_v30  ;;  %v8475_v17 = vpop.f32.mrb[191].mxu0  ;;  %v18247_v55 = vld [vmem:[#allocation195_spill] sm:$0xff] }
 0x3b9   : > { %10151 = vrcp.f32 %v5280_v36  ;;  %v10140_v52 = vpop.eup %10139  ;;  %v4389_v45 = vpop.xlane.xlu1 %4388  ;;  %v16424_v39 = vadd.f32 %v8475_v17, %v8474_v20  ;;  %v5530_v36 = vadd.f32 %v10130_v62, %v10128_v46 }
 0x3ba   : > { %v5328_v11 = vpop.xlane.xlu0 %5327  ;;  %10153 = vpow2.f32 %v5090_v4  ;;  %v4644_v14 = vsub.f32 %v18246_v35, %v4389_v45  ;;  %v4645_v58 = vsub.f32 %v18247_v55, %v4389_v45  ;;  %6686 = vmatprep.mubr.f32.mxu1 %v10140_v52  ;;  %v8555_v27 = vpop.f32.mrb[191].mxu1  ;;  %5528 = vadd.xlane.f32.xlu1 %v5527_v23  ;;  %v5485_v35 = vadd.f32 %v10134_v13, %v10132_v37 }
 0x3bb   : > { %10155 = vpow2.f32 %v5092_v59  ;;  %6687 = vmatmul.mubr.f32.gmra.mrb[250].mxu1 %v10138_v38  ;;  %v16430_v5 = vadd.f32 %v8555_v27, %v8554_v3  ;;  %v8589_v34 = vpop.f32.mrb[192].mxu0  ;;  %v8669_v17 = vpop.f32.mrb[192].mxu1 }
 0x3bc   : > { %v5154_v6 = vmul.f32 1.442695, %v4644_v14  ;;  %v5156_v30 = vmul.f32 1.442695, %v4645_v58  ;;  %10157 = vrcp.f32 %v5328_v11  ;;  %5531 = vadd.xlane.f32.xlu0 %v5530_v36  ;;  %v8590_v62 = vpop.f32.mrb[193].mxu0  ;;  %v8670_v59 = vpop.f32.mrb[193].mxu1 }
 0x3bd   : > { %v10142_v33 = vpop.eup %10141  ;;  %v5283_v16 = vpop.xlane.xlu1 %5282  ;;  %v16435_v23 = vadd.f32 %v8590_v62, %v8589_v34  ;;  %v16437_v14 = vadd.f32 %v8670_v59, %v8669_v17 }
 0x3be   : > { %v10144_v20 = vpop.eup %10143  ;;  %10159 = vpow2.f32 %v5154_v6  ;;  %v5286_v45 = vpop.xlane.xlu0 %5285  ;;  %5486 = vadd.xlane.f32.xlu1 %v5485_v35 }
 0x3bf   : > { %v10146_v4 = vpop.eup %10145  ;;  %6546 = vmatprep.mubr.f32.mxu0 %v10144_v20  ;;  %v5488_v46 = vadd.f32 %v10144_v20, %v10142_v33  ;;  %10161 = vpow2.f32 %v5156_v30  ;;  %v8592_v37 = vpop.f32.mrb[194].mxu0 }
 0x3c0   : > { %6547 = vmatmul.mubr.f32.gmra.mrb[252].mxu0 %v10142_v33  ;;  %v16433_v3 = vmul.f32 %v10146_v4, %v16284_v47  ;;  %10163 = vrcp.f32 %v5283_v16  ;;  %v8672_v27 = vpop.f32.mrb[194].mxu1  ;;  %v5533_v33 = vadd.f32 %v10140_v52, %v10138_v38  ;;  %v8593_v6 = vpop.f32.mrb[195].mxu0 }
 0x3c1   : > { %v10148_v11 = vpop.eup %10147  ;;  %5489 = vadd.xlane.f32.xlu0 %v5488_v46  ;;  %10165 = vrcp.f32 %v5286_v45  ;;  %v5331_v58 = vpop.xlane.xlu1 %5330  ;;  %v16442_v34 = vadd.f32 %v8593_v6, %v8592_v37 }
 0x3c2   : > { %v10150_v55 = vpop.eup %10149  ;;  %10167 = vrcp.f32 %v5331_v58  ;;  %v5334_v36 = vpop.xlane.xlu0 %5333  ;;  %5534 = vadd.xlane.f32.xlu1 %v5533_v33 }
 0x3c3   : > { %v10152_v13 = vpop.eup %10151  ;;  %6691 = vmatprep.mubr.f32.mxu1 %v10150_v55  ;;  %v5536_v47 = vadd.f32 %v10150_v55, %v10148_v11  ;;  %10169 = vrcp.f32 %v5334_v36  ;;  %v8673_v30 = vpop.f32.mrb[195].mxu1 }
 0x3c4   : > { %6692 = vmatmul.mubr.f32.gmra.mrb[252].mxu1 %v10148_v11  ;;  %v16440_v20 = vmul.f32 %v10152_v13, %v16301_v61  ;;  %v10154_v16 = vpop.eup %10153  ;;  %v16444_v4 = vadd.f32 %v8673_v30, %v8672_v27  ;;  %v8595_v35 = vpop.f32.mrb[196].mxu0 }
 0x3c5   : > { %5537 = vadd.xlane.f32.xlu0 %v5536_v47  ;;  %v10156_v17 = vpop.eup %10155  ;;  %v5289_v45 = vpop.xlane.xlu1 %5288 }
 0x3c6   : > { %v10158_v46 = vpop.eup %10157  ;;  %10171 = vrcp.f32 %v5289_v45  ;;  %6551 = vmatprep.mubr.f32.mxu0 %v10156_v17  ;;  %v8675_v38 = vpop.f32.mrb[196].mxu1  ;;  %v5491_v62 = vadd.f32 %v10156_v17, %v10154_v16 }
 0x3c7   : > { %v5292_v52 = vpop.xlane.xlu0 %5291  ;;  %6552 = vmatmul.mubr.f32.gmra.mrb[254].mxu0 %v10154_v16  ;;  %v8596_v61 = vpop.f32.mrb[197].mxu0  ;;  %v16447_v11 = vmul.f32 %v10158_v46, %v16303_v42 }
 0x3c8   : > { %10173 = vrcp.f32 %v5292_v52  ;;  %v8676_v59 = vpop.f32.mrb[197].mxu1  ;;  %v10160_v55 = vpop.eup %10159  ;;  %v16449_v58 = vadd.f32 %v8596_v61, %v8595_v35  ;;  %5492 = vadd.xlane.f32.xlu1 %v5491_v62 }
 0x3c9   : > { %v16451_v37 = vadd.f32 %v8676_v59, %v8675_v38  ;;  %v10162_v13 = vpop.eup %10161  ;;  %v5337_v27 = vpop.xlane.xlu1 %5336 }
 0x3ca   : > { %v8598_v36 = vpop.f32.mrb[198].mxu0  ;;  %v10164_v33 = vpop.eup %10163  ;;  %10175 = vrcp.f32 %v5337_v27  ;;  %6696 = vmatprep.mubr.f32.mxu1 %v10162_v13  ;;  %v5539_v30 = vadd.f32 %v10162_v13, %v10160_v55 }
 0x3cb   : > { %v8678_v47 = vpop.f32.mrb[198].mxu1  ;;  %v5340_v6 = vpop.xlane.xlu0 %5339  ;;  %6697 = vmatmul.mubr.f32.gmra.mrb[254].mxu1 %v10160_v55  ;;  %v16454_v45 = vmul.f32 %v10164_v33, %v16322_v43 }
 0x3cc   : > { %v10166_v16 = vpop.eup %10165  ;;  %10177 = vrcp.f32 %v5340_v6  ;;  %v8599_v42 = vpop.f32.mrb[199].mxu0  ;;  %5540 = vadd.xlane.f32.xlu1 %v5539_v30 }
 0x3cd   : > { %v8679_v17 = vpop.f32.mrb[199].mxu1  ;;  %v10168_v35 = vpop.eup %10167  ;;  %v16456_v46 = vadd.f32 %v8599_v42, %v8598_v36  ;;  %v16461_v52 = vmul.f32 %v10166_v16, %v16341_v48 }
 0x3ce   : > { %v16458_v38 = vadd.f32 %v8679_v17, %v8678_v47  ;;  %v10170_v62 = vpop.eup %10169  ;;  %v5295_v61 = vpop.xlane.xlu1 %5294  ;;  %v16464_v55 = vmul.f32 %v10168_v35, %v16324_v56 }
 0x3cf   : > { %v8601_v59 = vpop.f32.mrb[200].mxu0  ;;  %10179 = vrcp.f32 %v5295_v61  ;;  %v8681_v13 = vpop.f32.mrb[200].mxu1  ;;  %v16467_v43 = vmul.f32 %v10170_v62, %v16343_v53 }
 0x3d0   : > { %18248 = vst [vmem:[#allocation75_spill] sm:$0xff] %v16464_v55  ;;  %v5298_v27 = vpop.xlane.xlu0 %5297  ;;  %v8602_v36 = vpop.f32.mrb[201].mxu0 }
 0x3d1   : > { %18249 = vst [vmem:[#allocation66_spill] sm:$0xff] %v16467_v43  ;;  %10181 = vrcp.f32 %v5298_v27  ;;  %v8682_v33 = vpop.f32.mrb[201].mxu1  ;;  %v10172_v47 = vpop.eup %10171  ;;  %v16469_v6 = vadd.f32 %v8602_v36, %v8601_v59 }
 0x3d2   : > { %v16471_v48 = vadd.f32 %v8682_v33, %v8681_v13  ;;  %v10174_v30 = vpop.eup %10173  ;;  %v5343_v16 = vpop.xlane.xlu1 %5342  ;;  %v16474_v56 = vmul.f32 %v10172_v47, %v16359_v63 }
 0x3d3   : > { %v8604_v42 = vpop.f32.mrb[202].mxu0  ;;  %10183 = vrcp.f32 %v5343_v16  ;;  %v8684_v17 = vpop.f32.mrb[202].mxu1  ;;  %v16477_v53 = vmul.f32 %v10174_v30, %v16384_v41 }
 0x3d4   : > { %v5346_v35 = vpop.xlane.xlu0 %5345  ;;  %v8605_v62 = vpop.f32.mrb[203].mxu0 }
 0x3d5   : > { %18250 = vst [vmem:[#allocation173_spill] sm:$0xff] %v16477_v53  ;;  %10185 = vrcp.f32 %v5346_v35  ;;  %v8685_v61 = vpop.f32.mrb[203].mxu1  ;;  %v10176_v27 = vpop.eup %10175  ;;  %v16479_v59 = vadd.f32 %v8605_v62, %v8604_v42 }
 0x3d6   : > { %v16481_v13 = vadd.f32 %v8685_v61, %v8684_v17  ;;  %v10178_v36 = vpop.eup %10177  ;;  %v5301_v33 = vpop.xlane.xlu1 %5300  ;;  %v16484_v63 = vmul.f32 %v10176_v27, %v16367_v9 }
 0x3d7   : > { %v8607_v43 = vpop.f32.mrb[204].mxu0  ;;  %10187 = vrcp.f32 %v5301_v33  ;;  %v8687_v47 = vpop.f32.mrb[204].mxu1  ;;  %v16487_v41 = vmul.f32 %v10178_v36, %v16388_v57 }
 0x3d8   : > { %18251 = vst [vmem:[#allocation72_spill] sm:$0xff] %v16484_v63  ;;  %v5352_v16 = vpop.xlane.xlu0 %5351  ;;  %v8608_v30 = vpop.f32.mrb[205].mxu0 }
 0x3d9   : > { %18252 = vst [vmem:[#allocation73_spill] sm:$0xff] %v16487_v41  ;;  %10189 = vrcp.f32 %v5352_v16  ;;  %v8688_v35 = vpop.f32.mrb[205].mxu1  ;;  %v10180_v55 = vpop.eup %10179  ;;  %v16489_v42 = vadd.f32 %v8608_v30, %v8607_v43 }
 0x3da   : > { %v16491_v17 = vadd.f32 %v8688_v35, %v8687_v47  ;;  %v5349_v61 = vpop.xlane.xlu1 %5348  ;;  %v8610_v53 = vpop.f32.mrb[206].mxu0  ;;  %v16494_v9 = vmul.f32 %v10180_v55, %v16402_v60 }
 0x3db   : > { %v10182_v62 = vpop.eup %10181  ;;  %10191 = vrcp.f32 %v5349_v61  ;;  %v8690_v27 = vpop.f32.mrb[206].mxu1 }
 0x3dc   : > { %v5400_v33 = vpop.xlane.xlu0 %5399  ;;  %v16497_v57 = vmul.f32 %v10182_v62, %v16412_v31  ;;  %v8611_v36 = vpop.f32.mrb[207].mxu0 }
 0x3dd   : > { %10193 = vrcp.f32 %v5400_v33  ;;  %v8691_v16 = vpop.f32.mrb[207].mxu1  ;;  %v10184_v41 = vpop.eup %10183  ;;  %v16499_v43 = vadd.f32 %v8611_v36, %v8610_v53 }
 0x3de   : > { %18253 = vst [vmem:[#allocation77_spill] sm:$0xff] %v16497_v57  ;;  %v16501_v47 = vadd.f32 %v8691_v16, %v8690_v27  ;;  %v5355_v35 = vpop.xlane.xlu1 %5354  ;;  %v8613_v63 = vpop.f32.mrb[208].mxu0  ;;  %v16504_v60 = vmul.f32 %v10184_v41, %v16404_v54 }
 0x3df   : > { %v10186_v30 = vpop.eup %10185  ;;  %10195 = vrcp.f32 %v5355_v35  ;;  %v8614_v61 = vpop.f32.mrb[209].mxu0 }
 0x3e0   : > { %18254 = vst [vmem:[#allocation14_spill] sm:$0xff] %v16504_v60  ;;  %v5358_v55 = vpop.xlane.xlu0 %5357  ;;  %v16507_v31 = vmul.f32 %v10186_v30, %v16414_v22  ;;  %v16509_v62 = vadd.f32 %v8614_v61, %v8613_v63  ;;  %v8693_v27 = vpop.f32.mrb[208].mxu1 }
 0x3e1   : > { %10197 = vrcp.f32 %v5358_v55  ;;  %v10188_v33 = vpop.eup %10187  ;;  %v8694_v54 = vpop.f32.mrb[209].mxu1 }
 0x3e2   : > { %18255 = vst [vmem:[#allocation15_spill] sm:$0xff] %v16507_v31  ;;  %v5403_v36 = vpop.xlane.xlu1 %5402  ;;  %v16512_v16 = vmul.f32 %v10188_v33, %v16424_v39  ;;  %v16517_v35 = vadd.f32 %v8694_v54, %v8693_v27  ;;  %v8616_v55 = vpop.f32.mrb[210].mxu0 }
 0x3e3   : > { %v10190_v53 = vpop.eup %10189  ;;  %10199 = vrcp.f32 %v5403_v36  ;;  %v8617_v39 = vpop.f32.mrb[211].mxu0 }
 0x3e4   : > { %v5406_v57 = vpop.xlane.xlu0 %5405  ;;  %v16515_v41 = vmul.f32 %v10190_v53, %v16435_v23  ;;  %v16525_v36 = vadd.f32 %v8617_v39, %v8616_v55  ;;  %v8696_v27 = vpop.f32.mrb[210].mxu1 }
 0x3e5   : > { %10201 = vrcp.f32 %v5406_v57  ;;  %v10192_v22 = vpop.eup %10191  ;;  %v8619_v55 = vpop.f32.mrb[212].mxu0 }
 0x3e6   : > { %v5361_v63 = vpop.xlane.xlu1 %5360  ;;  %v16520_v61 = vmul.f32 %v10192_v22, %v16430_v5  ;;  %v8697_v5 = vpop.f32.mrb[211].mxu1 }
 0x3e7   : > { %v10194_v30 = vpop.eup %10193  ;;  %10203 = vrcp.f32 %v5361_v63  ;;  %v16533_v63 = vadd.f32 %v8697_v5, %v8696_v27  ;;  %v18260_v27 = vld [vmem:[#allocation152_spill] sm:$0xff]  ;;  %v8699_v5 = vpop.f32.mrb[212].mxu1 }
 0x3e8   : > { %18256 = vst [vmem:[#allocation76_spill] sm:$0xff] %v16520_v61  ;;  %v5364_v31 = vpop.xlane.xlu0 %5363  ;;  %v16523_v33 = vmul.f32 %v10194_v30, %v16437_v14 }
 0x3e9   : > { %10205 = vrcp.f32 %v5364_v31  ;;  %v10196_v23 = vpop.eup %10195 }
 0x3ea   : > { %18257 = vst [vmem:[#allocation22_spill] sm:$0xff] %v16523_v33  ;;  %v5409_v53 = vpop.xlane.xlu1 %5408  ;;  %v16528_v54 = vmul.f32 %v10196_v23, %v16442_v34  ;;  %v8620_v34 = vpop.f32.mrb[213].mxu0 }
 0x3eb   : > { %v10198_v57 = vpop.eup %10197  ;;  %10207 = vrcp.f32 %v5409_v53  ;;  %v16541_v53 = vadd.f32 %v8620_v34, %v8619_v55  ;;  %v18261_v34 = vld [vmem:[#allocation59_spill] sm:$0xff] }
 0x3ec   : > { %v5412_v60 = vpop.xlane.xlu0 %5411  ;;  %v16531_v22 = vmul.f32 %v10198_v57, %v16449_v58 }
 0x3ed   : > { %10209 = vrcp.f32 %v5412_v60  ;;  %v10200_v14 = vpop.eup %10199 }
 0x3ee   : > { %v5367_v30 = vpop.xlane.xlu1 %5366  ;;  %v16536_v39 = vmul.f32 %v10200_v14, %v16444_v4  ;;  %v8700_v14 = vpop.f32.mrb[213].mxu1 }
 0x3ef   : > { %v10202_v31 = vpop.eup %10201  ;;  %10211 = vrcp.f32 %v5367_v30 }
 0x3f0   : > { %18258 = vst [vmem:[#allocation16_spill] sm:$0xff] %v16536_v39  ;;  %v5370_v33 = vpop.xlane.xlu0 %5369  ;;  %v16539_v23 = vmul.f32 %v10202_v31, %v16451_v37  ;;  %v16550_v37 = vadd.f32 %v8700_v14, %v8699_v5  ;;  %v18263_v14 = vld [vmem:[#allocation57_spill] sm:$0xff]  ;;  %v8702_v39 = vpop.f32.mrb[214].mxu1 }
 0x3f1   : > { %10213 = vrcp.f32 %v5370_v33  ;;  %v10204_v58 = vpop.eup %10203 }
 0x3f2   : > { %18259 = vst [vmem:[#allocation18_spill] sm:$0xff] %v16539_v23  ;;  %v5415_v57 = vpop.xlane.xlu1 %5414  ;;  %6958 = vxpose.xlu0.b32.start [1/16] (narrow) %v18260_v27, 16  ;;  %v16545_v61 = vmul.f32 %v10204_v58, %v16456_v46  ;;  %v8622_v23 = vpop.f32.mrb[214].mxu0 }
 0x3f3   : > { %v10206_v60 = vpop.eup %10205  ;;  %10215 = vrcp.f32 %v5415_v57  ;;  %v8623_v58 = vpop.f32.mrb[215].mxu0 }
 0x3f4   : > { %v5418_v4 = vpop.xlane.xlu0 %5417  ;;  %v16548_v30 = vmul.f32 %v10206_v60, %v16469_v6  ;;  %v16559_v6 = vadd.f32 %v8623_v58, %v8622_v23  ;;  %v8625_v58 = vpop.f32.mrb[216].mxu0 }
 0x3f5   : > { %10217 = vrcp.f32 %v5418_v4  ;;  %v10208_v33 = vpop.eup %10207 }
 0x3f6   : > { %v5373_v55 = vpop.xlane.xlu1 %5372  ;;  %6959 = vxpose.xlu0.b32.cont [2/16] (narrow) %v18261_v34, 16  ;;  %v16554_v27 = vmul.f32 %v10208_v33, %v16458_v38  ;;  %v8703_v33 = vpop.f32.mrb[215].mxu1 }
 0x3f7   : > { %v10210_v31 = vpop.eup %10209  ;;  %10219 = vrcp.f32 %v5373_v55 }
 0x3f8   : > { %v5376_v46 = vpop.xlane.xlu0 %5375  ;;  %v16557_v57 = vmul.f32 %v10210_v31, %v16471_v48  ;;  %v16568_v48 = vadd.f32 %v8703_v33, %v8702_v39 }
 0x3f9   : > { %10221 = vrcp.f32 %v5376_v46  ;;  %v10212_v60 = vpop.eup %10211 }
 0x3fa   : > { %18262 = vst [vmem:[#allocation21_spill] sm:$0xff] %v16557_v57  ;;  %v5421_v4 = vpop.xlane.xlu1 %5420  ;;  %6960 = vxpose.xlu0.b32.cont [3/16] (narrow) %v18263_v14, 16  ;;  %v16563_v34 = vmul.f32 %v10212_v60, %v16479_v59  ;;  %v8626_v60 = vpop.f32.mrb[217].mxu0 }
 0x3fb   : > { %v10214_v5 = vpop.eup %10213  ;;  %10223 = vrcp.f32 %v5421_v4  ;;  %v8627_v39 = vadd.f32 %v8626_v60, %v8625_v58 }
 0x3fc   : > { %v5424_v38 = vpop.xlane.xlu0 %5423  ;;  %v16566_v55 = vmul.f32 %v10214_v5, %v16489_v42  ;;  %v18264_v42 = vld [vmem:[#allocation155_spill] sm:$0xff] }
 0x3fd   : > { %10225 = vrcp.f32 %v5424_v38  ;;  %v10216_v23 = vpop.eup %10215 }
 0x3fe   : > { %v5379_v46 = vpop.xlane.xlu1 %5378  ;;  %6961 = vxpose.xlu0.b32.cont [4/16] (narrow) %v16006_v19, 16  ;;  %v16572_v14 = vmul.f32 %v10216_v23, %v16481_v13  ;;  %v8705_v19 = vpop.f32.mrb[216].mxu1 }
 0x3ff   : > { %v10218_v31 = vpop.eup %10217  ;;  %10227 = vrcp.f32 %v5379_v46  ;;  %6990 = vxpose.xlu1.b32.start [1/16] (narrow) %v18264_v42, 16  ;;  %v8706_v23 = vpop.f32.mrb[217].mxu1 }
 0x400   : > { %v5382_v59 = vpop.xlane.xlu0 %5381  ;;  %v16575_v4 = vmul.f32 %v10218_v31, %v16491_v17  ;;  %v18265_v17 = vld [vmem:[#allocation54_spill] sm:$0xff]  ;;  %v8707_v31 = vadd.f32 %v8706_v23, %v8705_v19 }
 0x401   : > { %10229 = vrcp.f32 %v5382_v59  ;;  %v10220_v5 = vpop.eup %10219 }
 0x402   : > { %v5427_v33 = vpop.xlane.xlu1 %5426  ;;  %6962 = vxpose.xlu0.b32.cont [5/16] (narrow) %v16021_v10, 16  ;;  %v16580_v57 = vmul.f32 %v10220_v5, %v16499_v43  ;;  %v8628_v10 = vpop.f32.mrb[218].mxu0 }
 0x403   : > { %v10222_v38 = vpop.eup %10221  ;;  %10231 = vrcp.f32 %v5427_v33  ;;  %6991 = vxpose.xlu1.b32.cont [2/16] (narrow) %v18265_v17, 16  ;;  %v8629_v5 = vpop.f32.mrb[219].mxu0 }
 0x404   : > { %v5430_v13 = vpop.xlane.xlu0 %5429  ;;  %v16583_v46 = vmul.f32 %v10222_v38, %v16509_v62  ;;  %v18266_v62 = vld [vmem:[#allocation6_spill] sm:$0xff]  ;;  %v8630_v38 = vadd.f32 %v8629_v5, %v8628_v10 }
 0x405   : > { %10233 = vrcp.f32 %v5430_v13  ;;  %v10224_v58 = vpop.eup %10223 }
 0x406   : > { %v5385_v60 = vpop.xlane.xlu1 %5384  ;;  %6963 = vxpose.xlu0.b32.cont [6/16] (narrow) %v16033_v24, 16  ;;  %v16588_v42 = vmul.f32 %v10224_v58, %v16501_v47  ;;  %v8708_v24 = vpop.f32.mrb[218].mxu1 }
 0x407   : > { %v10226_v59 = vpop.eup %10225  ;;  %10235 = vrcp.f32 %v5385_v60  ;;  %6992 = vxpose.xlu1.b32.cont [3/16] (narrow) %v18266_v62, 16  ;;  %v8709_v58 = vpop.f32.mrb[219].mxu1 }
 0x408   : > { %v5388_v43 = vpop.xlane.xlu0 %5387  ;;  %v16591_v33 = vmul.f32 %v10226_v59, %v16517_v35  ;;  %v18267_v35 = vld [vmem:[#allocation7_spill] sm:$0xff]  ;;  %v8710_v59 = vadd.f32 %v8709_v58, %v8708_v24 }
 0x409   : > { %10237 = vrcp.f32 %v5388_v43  ;;  %v10228_v19 = vpop.eup %10227 }
 0x40a   : > { %v5433_v23 = vpop.xlane.xlu1 %5432  ;;  %6964 = vxpose.xlu0.b32.cont [7/16] (narrow) %v16046_v26, 16  ;;  %v16596_v17 = vmul.f32 %v10228_v19, %v16525_v36  ;;  %v8631_v26 = vpop.f32.mrb[220].mxu0 }
 0x40b   : > { %v10230_v13 = vpop.eup %10229  ;;  %10239 = vrcp.f32 %v5433_v23  ;;  %6993 = vxpose.xlu1.b32.cont [4/16] (narrow) %v18267_v35, 16  ;;  %v8632_v19 = vpop.f32.mrb[221].mxu0 }
 0x40c   : > { %v5436_v47 = vpop.xlane.xlu0 %5435  ;;  %v16599_v60 = vmul.f32 %v10230_v13, %v16541_v53  ;;  %v18268_v53 = vld [vmem:[#allocation61_spill] sm:$0xff]  ;;  %v8633_v13 = vadd.f32 %v8632_v19, %v8631_v26  ;;  %v8634_v19 = vpop.f32.mrb[222].mxu0 }
 0x40d   : > { %10241 = vrcp.f32 %v5436_v47  ;;  %v10232_v10 = vpop.eup %10231 }
 0x40e   : > { %v5391_v5 = vpop.xlane.xlu1 %5390  ;;  %6965 = vxpose.xlu0.b32.cont [8/16] (narrow) %v16062_v25, 16  ;;  %v16604_v62 = vmul.f32 %v10232_v10, %v16533_v63  ;;  %v8711_v25 = vpop.f32.mrb[220].mxu1 }
 0x40f   : > { %v10234_v43 = vpop.eup %10233  ;;  %10243 = vrcp.f32 %v5391_v5  ;;  %6994 = vxpose.xlu1.b32.cont [5/16] (narrow) %v18268_v53, 16  ;;  %v8712_v10 = vpop.f32.mrb[221].mxu1 }
 0x410   : > { %v5394_v36 = vpop.xlane.xlu0 %5393  ;;  %v16607_v23 = vmul.f32 %v10234_v43, %v16550_v37  ;;  %v8713_v37 = vadd.f32 %v8712_v10, %v8711_v25  ;;  %v8635_v53 = vpop.f32.mrb[223].mxu0 }
 0x411   : > { %10245 = vrcp.f32 %v5394_v36  ;;  %v10236_v24 = vpop.eup %10235  ;;  %v8714_v25 = vpop.f32.mrb[222].mxu1 }
 0x412   : > { %v5439_v58 = vpop.xlane.xlu1 %5438  ;;  %6966 = vxpose.xlu0.b32.cont [9/16] (narrow) %v16078_v32, 16  ;;  %v16612_v35 = vmul.f32 %v10236_v24, %v16559_v6  ;;  %v8715_v10 = vpop.f32.mrb[223].mxu1 }
 0x413   : > { %v10238_v47 = vpop.eup %10237  ;;  %10247 = vrcp.f32 %v5439_v58  ;;  %6995 = vxpose.xlu1.b32.cont [6/16] (narrow) %v16035_v1, 16 }
 0x414   : > { %v5442_v63 = vpop.xlane.xlu0 %5441  ;;  %v16614_v5 = vmul.f32 %v10238_v47, %v8627_v39  ;;  %v8636_v39 = vadd.f32 %v8635_v53, %v8634_v19 }
 0x415   : > { %10249 = vrcp.f32 %v5442_v63  ;;  %v10240_v43 = vpop.eup %10239 }
 0x416   : > { %v5397_v36 = vpop.xlane.xlu1 %5396  ;;  %6967 = vxpose.xlu0.b32.cont [10/16] (narrow) %v16090_v8, 16  ;;  %v16619_v32 = vmul.f32 %v10240_v43, %v16568_v48 }
 0x417   : > { %v10242_v26 = vpop.eup %10241  ;;  %10251 = vrcp.f32 %v5397_v36  ;;  %6996 = vxpose.xlu1.b32.cont [7/16] (narrow) %v16048_v0, 16  ;;  %v8749_v36 = vpop.f32.mrb[224].mxu0 }
 0x418   : > { %v5448_v6 = vpop.xlane.xlu0 %5447  ;;  %v16621_v24 = vmul.f32 %v10242_v26, %v8707_v31  ;;  %v8716_v31 = vadd.f32 %v8715_v10, %v8714_v25  ;;  %v18271_v25 = vld [vmem:[#allocation10_spill] sm:$0xff] }
 0x419   : > { %10253 = vrcp.f32 %v5448_v6  ;;  %v10244_v1 = vpop.eup %10243 }
 0x41a   : > { %v5445_v58 = vpop.xlane.xlu1 %5444  ;;  %6968 = vxpose.xlu0.b32.cont [11/16] (narrow) %v16104_v44, 16  ;;  %v16625_v8 = vmul.f32 %v10244_v1, %v8630_v38  ;;  %v8750_v38 = vpop.f32.mrb[225].mxu0 }
 0x41b   : > { %v10246_v47 = vpop.eup %10245  ;;  %10255 = vrcp.f32 %v5445_v58  ;;  %6997 = vxpose.xlu1.b32.cont [8/16] (narrow) %v16064_v12, 16  ;;  %v8751_v6 = vadd.f32 %v8750_v38, %v8749_v36  ;;  %v18273_v36 = vld [vmem:[#allocation167_spill] sm:$0xff]  ;;  %v8752_v38 = vpop.f32.mrb[226].mxu0 }
 0x41c   : > { %v16627_v63 = vmul.f32 %v10246_v47, %v8633_v13  ;;  %v5496_v48 = vpop.xlane.xlu0 %5495  ;;  %v18270_v13 = vld [vmem:[#allocation161_spill] sm:$0xff] }
 0x41d   : > { %10257 = vrcp.f32 %v5496_v48  ;;  %v10248_v43 = vpop.eup %10247  ;;  %v8829_v48 = vpop.f32.mrb[224].mxu1 }
 0x41e   : > { %v5451_v26 = vpop.xlane.xlu1 %5450  ;;  %6969 = vxpose.xlu0.b32.cont [12/16] (narrow) %v16116_v28, 16  ;;  %v16631_v19 = vmul.f32 %v10248_v43, %v8710_v59  ;;  %v8830_v59 = vpop.f32.mrb[225].mxu1 }
 0x41f   : > { %v10250_v0 = vpop.eup %10249  ;;  %10259 = vrcp.f32 %v5451_v26  ;;  %6998 = vxpose.xlu1.b32.cont [9/16] (narrow) %v18270_v13, 16  ;;  %v8831_v10 = vadd.f32 %v8830_v59, %v8829_v48  ;;  %v8753_v13 = vpop.f32.mrb[227].mxu0  ;;  %v18276_v48 = vld [vmem:[#allocation12_spill] sm:$0xff] }
 0x420   : > { %v16633_v44 = vmul.f32 %v10250_v0, %v8713_v37  ;;  %v5454_v1 = vpop.xlane.xlu0 %5453  ;;  %v18272_v37 = vld [vmem:[#allocation58_spill] sm:$0xff]  ;;  %v8832_v59 = vpop.f32.mrb[226].mxu1 }
 0x421   : > { %v10252_v53 = vpop.eup %10251 }
 0x422   : > { %18269 = vst [vmem:[#allocation19_spill] sm:$0xff] %v16633_v44  ;;  %v16636_v12 = vmul.f32 %v10252_v53, %v8636_v39  ;;  %v5499_v58 = vpop.xlane.xlu1 %5498  ;;  %6970 = vxpose.xlu0.b32.cont [13/16] (narrow) %v18271_v25, 16  ;;  %v18275_v25 = vld [vmem:[#allocation62_spill] sm:$0xff] }
 0x423   : > { %v10254_v47 = vpop.eup %10253  ;;  %10261 = vrcp.f32 %v5499_v58  ;;  %6999 = vxpose.xlu1.b32.cont [10/16] (narrow) %v18272_v37, 16  ;;  %v18277_v37 = vld [vmem:[#allocation8_spill] sm:$0xff] }
 0x424   : > { %v16639_v28 = vmul.f32 %v10254_v47, %v8751_v6  ;;  %10263 = vrcp.f32 %v5454_v1  ;;  %v5502_v53 = vpop.xlane.xlu0 %5501  ;;  %v8754_v6 = vadd.f32 %v8753_v13, %v8752_v38 }
 0x425   : > { %v10256_v43 = vpop.eup %10255  ;;  %10265 = vrcp.f32 %v5502_v53  ;;  %v18281_v53 = vld [vmem:[#allocation168_spill] sm:$0xff] }
 0x426   : > { %v16642_v26 = vmul.f32 %v10256_v43, %v8716_v31  ;;  %6971 = vxpose.xlu0.b32.cont [14/16] (narrow) %v18273_v36, 16  ;;  %v5457_v58 = vpop.xlane.xlu1 %5456  ;;  %v8833_v31 = vpop.f32.mrb[227].mxu1 }
 0x427   : > { %v10258_v0 = vpop.eup %10257  ;;  %7000 = vxpose.xlu1.b32.cont [11/16] (narrow) %v18275_v25, 16  ;;  %v8834_v43 = vadd.f32 %v8833_v31, %v8832_v59  ;;  %v8755_v36 = vpop.f32.mrb[228].mxu0  ;;  %10267 = vrcp.f32 %v5457_v58  ;;  %v18280_v25 = vld [vmem:[#allocation164_spill] sm:$0xff] }
 0x428   : > { %v16645_v39 = vmul.f32 %v10258_v0, %v8831_v10  ;;  %v18279_v0 = vld [vmem:[#allocation65_spill] sm:$0xff]  ;;  %v8756_v38 = vpop.f32.mrb[229].mxu0  ;;  %10269 = vrcp.f32 %v16278_v18  ;;  %v8835_v59 = vpop.f32.mrb[228].mxu1 }
 0x429   : > { %v10260_v47 = vpop.eup %10259  ;;  %v5460_v31 = vpop.xlane.xlu0 %5459 }
 0x42a   : > { %18274 = vst [vmem:[#allocation81_spill] sm:$0xff] %v16645_v39  ;;  %v16648_v44 = vmul.f32 %v10260_v47, %v8754_v6  ;;  %6972 = vxpose.xlu0.b32.cont [15/16] (narrow) %v18276_v48, 16  ;;  %v5505_v13 = vpop.xlane.xlu1 %5504  ;;  %v8757_v6 = vadd.f32 %v8756_v38, %v8755_v36 }
 0x42b   : > { %7001 = vxpose.xlu1.b32.cont [12/16] (narrow) %v18277_v37, 16  ;;  %10271 = vrcp.f32 %v5505_v13  ;;  %v8836_v37 = vpop.f32.mrb[229].mxu1 }
 0x42c   : > { %10273 = vrcp.f32 %v16318_v49  ;;  %v8758_v38 = vpop.f32.mrb[230].mxu0 }
 0x42d   : > { %v10262_v1 = vpop.eup %10261  ;;  %10275 = vrcp.f32 %v5460_v31  ;;  %v8759_v18 = vpop.f32.mrb[231].mxu0 }
 0x42e   : > { %v16652_v10 = vmul.f32 %v10262_v1, %v8834_v43  ;;  %6973 = vxpose.xlu0.b32.end [16/16] (narrow) %v18279_v0, 16  ;;  %v10264_v47 = vpop.eup %10263  ;;  %v18282_v43 = vld [vmem:[#allocation171_spill] sm:$0xff]  ;;  %v8837_v1 = vadd.f32 %v8836_v37, %v8835_v59  ;;  %v18283_v0 = vld [vmem:[#allocation69_spill] sm:$0xff]  ;;  %v5463_v13 = vpop.xlane.xlu1 %5462  ;;  %10277 = vrcp.f32 %v16355_v2 }
 0x42f   : > { %7002 = vxpose.xlu1.b32.cont [13/16] (narrow) %v18280_v25, 16  ;;  %v16658_v48 = vmul.f32 %v10264_v47, %v8757_v6  ;;  %v10266_v58 = vpop.eup %10265  ;;  %v18285_v25 = vld [vmem:[#allocation13_spill] sm:$0xff]  ;;  %v8760_v6 = vadd.f32 %v8759_v18, %v8758_v38 }
 0x430   : > { %18278 = vst [vmem:[#allocation190_spill] sm:$0xff] %v16652_v10  ;;  %v16663_v36 = vmul.f32 %v10266_v58, %v8837_v1 }
 0x431   : > { %v10268_v47 = vpop.eup %10267  ;;  %v8838_v59 = vpop.f32.mrb[230].mxu1 }
 0x432   : > { %7022 = vxpose.xlu0.b32.start [1/16] (narrow) %v18281_v53, 16  ;;  %18284 = vst [vmem:[#allocation179_spill] sm:$0xff] %v16663_v36  ;;  %v5508_v53 = vpop.xlane.xlu0 %5507  ;;  %v16666_v10 = vmul.f32 %v10268_v47, %v8760_v6  ;;  %v8839_v49 = vpop.f32.mrb[231].mxu1 }
 0x433   : > { %7003 = vxpose.xlu1.b32.cont [14/16] (narrow) %v18282_v43, 16  ;;  %v10270_v37 = vpop.eup %10269  ;;  %10279 = vrcp.f32 %v5508_v53  ;;  %v18286_v43 = vld [vmem:[#allocation165_spill] sm:$0xff]  ;;  %v8840_v31 = vadd.f32 %v8839_v49, %v8838_v59  ;;  %v5511_v38 = vpop.xlane.xlu1 %5510  ;;  %v18290_v49 = vld [vmem:[#allocation67_spill] sm:$0xff] }
 0x434   : > { %10281 = vrcp.f32 %v16390_v7  ;;  %v6866_v2 = vmul.f32 %v10270_v37, %v16229_v29 }
 0x435   : > { %v10272_v1 = vpop.eup %10271  ;;  %10283 = vrcp.f32 %v5463_v13 }
 0x436   : > { %7023 = vxpose.xlu0.b32.cont [2/16] (narrow) %v18283_v0, 16  ;;  %v16672_v58 = vmul.f32 %v10272_v1, %v8840_v31  ;;  %v10274_v18 = vpop.eup %10273  ;;  %v5466_v53 = vpop.xlane.xlu0 %5465  ;;  %10285 = vrcp.f32 %v5511_v38 }
 0x437   : > { %7004 = vxpose.xlu1.b32.cont [15/16] (narrow) %v18285_v25, 16  ;;  %v8761_v0 = vpop.f32.mrb[232].mxu0  ;;  %v18288_v25 = vld [vmem:[#allocation68_spill] sm:$0xff]  ;;  %v10276_v47 = vpop.eup %10275  ;;  %10287 = vrcp.f32 %v5466_v53 }
 0x438   : > { %18287 = vst [vmem:[#allocation178_spill] sm:$0xff] %v16672_v58  ;;  %v10278_v31 = vpop.eup %10277  ;;  %v5469_v1 = vpop.xlane.xlu1 %5468 }
 0x43a   : > { %7024 = vxpose.xlu0.b32.cont [3/16] (narrow) %v16270_v51, 16  ;;  %v8762_v51 = vpop.f32.mrb[233].mxu0 }
 0x43b   : > { %7005 = vxpose.xlu1.b32.end [16/16] (narrow) %v18286_v43, 16  ;;  %v8763_v6 = vadd.f32 %v8762_v51, %v8761_v0  ;;  %v5514_v51 = vpop.xlane.xlu0 %5513 }
 0x43c   : > { %10289 = vrcp.f32 %v5514_v51 }
 0x43d   : > { %v16677_v59 = vmul.f32 %v10276_v47, %v8763_v6  ;;  %v8841_v7 = vpop.f32.mrb[232].mxu1  ;;  %v10280_v36 = vpop.eup %10279  ;;  %10291 = vrcp.f32 %v5469_v1 }
 0x43e   : > { %7025 = vxpose.xlu0.b32.cont [4/16] (narrow) %v16312_v15, 16  ;;  %v18291_v15 = vld [vmem:[#allocation169_spill] sm:$0xff]  ;;  %v8842_v13 = vpop.f32.mrb[233].mxu1  ;;  %v10282_v0 = vpop.eup %10281 }
 0x43f   : > { %7054 = vxpose.xlu1.b32.start [1/16] (narrow) %v18288_v25, 16  ;;  %18289 = vst [vmem:[#allocation124_spill] sm:$0xff] %v16677_v59  ;;  %v6867_v43 = vmul.f32 %v10274_v18, %v18291_v15  ;;  %v8843_v58 = vadd.f32 %v8842_v13, %v8841_v7  ;;  %v8764_v25 = vpop.f32.mrb[234].mxu0  ;;  %v10284_v47 = vpop.eup %10283 }
 0x440   : > { %v8765_v37 = vpop.f32.mrb[235].mxu0  ;;  %v5517_v7 = vpop.xlane.xlu1 %5516 }
 0x441   : > { %v16681_v29 = vmul.f32 %v10280_v36, %v8843_v58  ;;  %v8766_v38 = vadd.f32 %v8765_v37, %v8764_v25  ;;  %v18295_v58 = vld [vmem:[#allocation11_spill] sm:$0xff]  ;;  %v5472_v59 = vpop.xlane.xlu0 %5471  ;;  %10293 = vrcp.f32 %v5517_v7 }
 0x442   : > { %7026 = vxpose.xlu0.b32.cont [5/16] (narrow) %v6866_v2, 16  ;;  %v18293_v2 = vld [vmem:[#allocation9_spill] sm:$0xff]  ;;  %v6869_v13 = vmul.f32 %v10282_v0, %v18295_v58  ;;  %10295 = vrcp.f32 %v5472_v59 }
 0x443   : > { %7055 = vxpose.xlu1.b32.cont [2/16] (narrow) %v18290_v49, 16  ;;  %18292 = vst [vmem:[#allocation23_spill] sm:$0xff] %v16681_v29  ;;  %v6868_v6 = vmul.f32 %v10278_v31, %v18293_v2  ;;  %v16685_v18 = vmul.f32 %v10284_v47, %v8766_v38  ;;  %v10286_v29 = vpop.eup %10285  ;;  %v18296_v2 = vld [vmem:[#allocation125_spill] sm:$0xff] }
 0x444   : > { %v8844_v49 = vpop.f32.mrb[234].mxu1  ;;  %v10288_v37 = vpop.eup %10287  ;;  %v18297_v59 = vld [vmem:[#allocation173_spill] sm:$0xff] }
 0x445   : > { %v8845_v15 = vpop.f32.mrb[235].mxu1  ;;  %v5520_v38 = vpop.xlane.xlu0 %5519 }
 0x446   : > { %7027 = vxpose.xlu0.b32.cont [6/16] (narrow) %v6867_v43, 16  ;;  %v18294_v43 = vld [vmem:[#allocation71_spill] sm:$0xff]  ;;  %v8846_v36 = vadd.f32 %v8845_v15, %v8844_v49  ;;  %v10290_v47 = vpop.eup %10289  ;;  %10297 = vrcp.f32 %v5520_v38 }
 0x447   : > { %7056 = vxpose.xlu1.b32.cont [3/16] (narrow) %v16293_v21, 16  ;;  %v5475_v21 = vpop.xlane.xlu1 %5474 }
 0x448   : > { %v16689_v39 = vmul.f32 %v10286_v29, %v8846_v36  ;;  %v10292_v36 = vpop.eup %10291  ;;  %10299 = vrcp.f32 %v5475_v21  ;;  %v18300_v21 = vld [vmem:[#allocation77_spill] sm:$0xff] }
 0x44a   : > { %7028 = vxpose.xlu0.b32.cont [7/16] (narrow) %v6868_v6, 16 }
 0x44b   : > { %7057 = vxpose.xlu1.b32.cont [4/16] (narrow) %v18294_v43, 16  ;;  %v8767_v53 = vpop.f32.mrb[236].mxu0  ;;  %v5523_v29 = vpop.xlane.xlu1 %5522 }
 0x44c   : > { %v8768_v31 = vpop.f32.mrb[237].mxu0  ;;  %10301 = vrcp.f32 %v5523_v29 }
 0x44d   : > { %v8769_v25 = vadd.f32 %v8768_v31, %v8767_v53  ;;  %v10294_v31 = vpop.eup %10293 }
 0x44e   : > { %7029 = vxpose.xlu0.b32.cont [8/16] (narrow) %v6869_v13, 16 }
 0x44f   : > { %7058 = vxpose.xlu1.b32.cont [5/16] (narrow) %v16370_v40, 16  ;;  %v16694_v0 = vmul.f32 %v10288_v37, %v8769_v25 }
 0x450   : > { %v8847_v6 = vpop.f32.mrb[236].mxu1 }
 0x451   : > { %v8848_v51 = vpop.f32.mrb[237].mxu1 }
 0x452   : > { %7030 = vxpose.xlu0.b32.cont [9/16] (narrow) %v16440_v20, 16  ;;  %v8849_v40 = vadd.f32 %v8848_v51, %v8847_v6  ;;  %v5478_v20 = vpop.xlane.xlu0 %5477  ;;  %v10296_v51 = vpop.eup %10295 }
 0x453   : > { %7059 = vxpose.xlu1.b32.cont [6/16] (narrow) %v18296_v2, 16  ;;  %v18298_v2 = vld [vmem:[#allocation75_spill] sm:$0xff]  ;;  %10303 = vrcp.f32 %v5478_v20 }
 0x454   : > { %v16698_v49 = vmul.f32 %v10290_v47, %v8849_v40  ;;  %v8770_v1 = vpop.f32.mrb[238].mxu0  ;;  %v18299_v47 = vld [vmem:[#allocation66_spill] sm:$0xff] }
 0x455   : > { %v8771_v15 = vpop.f32.mrb[239].mxu0 }
 0x456   : > { %7031 = vxpose.xlu0.b32.cont [10/16] (narrow) %v16454_v45, 16  ;;  %v8772_v43 = vadd.f32 %v8771_v15, %v8770_v1  ;;  %v5481_v45 = vpop.xlane.xlu1 %5480  ;;  %v5526_v13 = vpop.xlane.xlu0 %5525 }
 0x457   : > { %7060 = vxpose.xlu1.b32.cont [7/16] (narrow) %v16422_v50, 16  ;;  %10305 = vrcp.f32 %v5526_v13 }
 0x458   : > { %v16702_v7 = vmul.f32 %v10292_v36, %v8772_v43  ;;  %v10298_v43 = vpop.eup %10297  ;;  %10307 = vrcp.f32 %v5481_v45 }
 0x459   : > { %v8850_v58 = vpop.f32.mrb[238].mxu1 }
 0x45a   : > { %7032 = vxpose.xlu0.b32.cont [11/16] (narrow) %v16461_v52, 16  ;;  %v8851_v50 = vpop.f32.mrb[239].mxu1  ;;  %v5529_v25 = vpop.xlane.xlu1 %5528 }
 0x45b   : > { %7061 = vxpose.xlu1.b32.cont [8/16] (narrow) %v16433_v3, 16  ;;  %v8852_v53 = vadd.f32 %v8851_v50, %v8850_v58  ;;  %10309 = vrcp.f32 %v5529_v25 }
 0x45d   : > { %v16706_v52 = vmul.f32 %v10294_v31, %v8852_v53 }
 0x45e   : > { %7033 = vxpose.xlu0.b32.cont [12/16] (narrow) %v16474_v56, 16  ;;  %v5484_v56 = vpop.xlane.xlu0 %5483  ;;  %v16714_v1 = vpop.xlane.xlu1 %5486 }
 0x45f   : > { %7062 = vxpose.xlu1.b32.cont [9/16] (narrow) %v16447_v11, 16  ;;  %v8773_v3 = vpop.f32.mrb[240].mxu0  ;;  %10311 = vrcp.f32 %v5484_v56 }
 0x460   : > { %v8774_v37 = vpop.f32.mrb[241].mxu0 }
 0x461   : > { %v8775_v6 = vadd.f32 %v8774_v37, %v8773_v3 }
 0x462   : > { %7034 = vxpose.xlu0.b32.cont [13/16] (narrow) %v18297_v59, 16  ;;  %v5532_v50 = vpop.xlane.xlu0 %5531  ;;  %v10300_v59 = vpop.eup %10299 }
 0x463   : > { %7063 = vxpose.xlu1.b32.cont [10/16] (narrow) %v18298_v2, 16  ;;  %v16711_v38 = vmul.f32 %v10296_v51, %v8775_v6  ;;  %v8853_v40 = vpop.f32.mrb[240].mxu1  ;;  %v16721_v29 = vpop.xlane.xlu1 %5534  ;;  %v18302_v6 = vld [vmem:[#allocation73_spill] sm:$0xff]  ;;  %10313 = vrcp.f32 %v5532_v50 }
 0x464   : > { %v8854_v11 = vpop.f32.mrb[241].mxu1  ;;  %10315 = vrcp.f32 %v16714_v1 }
 0x465   : > { %v8855_v15 = vadd.f32 %v8854_v11, %v8853_v40  ;;  %v10302_v40 = vpop.eup %10301  ;;  %10317 = vrcp.f32 %v16721_v29 }
 0x466   : > { %7035 = vxpose.xlu0.b32.cont [14/16] (narrow) %v16494_v9, 16  ;;  %v18301_v9 = vld [vmem:[#allocation72_spill] sm:$0xff]  ;;  %v16726_v20 = vpop.xlane.xlu0 %5489  ;;  %v10304_v13 = vpop.eup %10303 }
 0x467   : > { %7064 = vxpose.xlu1.b32.cont [11/16] (narrow) %v18299_v47, 16  ;;  %v16717_v36 = vmul.f32 %v10298_v43, %v8855_v15  ;;  %v18303_v15 = vld [vmem:[#allocation14_spill] sm:$0xff]  ;;  %v16732_v43 = vpop.xlane.xlu1 %5492  ;;  %v10306_v45 = vpop.eup %10305  ;;  %10319 = vrcp.f32 %v16726_v20 }
 0x468   : > { %v8776_v58 = vpop.f32.mrb[242].mxu0 }
 0x469   : > { %v8777_v53 = vpop.f32.mrb[243].mxu0 }
 0x46a   : > { %7036 = vxpose.xlu0.b32.cont [15/16] (narrow) %v18300_v21, 16  ;;  %v8778_v31 = vadd.f32 %v8777_v53, %v8776_v58 }
 0x46b   : > { %7065 = vxpose.xlu1.b32.cont [12/16] (narrow) %v18301_v9, 16  ;;  %v5538_v9 = vpop.xlane.xlu0 %5537 }
 0x46c   : > { %v16723_v3 = vmul.f32 %v10300_v59, %v8778_v31  ;;  %v8856_v37 = vpop.f32.mrb[242].mxu1  ;;  %v18304_v31 = vld [vmem:[#allocation15_spill] sm:$0xff]  ;;  %10321 = vrcp.f32 %v5538_v9 }
 0x46d   : > { %v8857_v2 = vpop.f32.mrb[243].mxu1  ;;  %10323 = vrcp.f32 %v16732_v43 }
 0x46e   : > { %7037 = vxpose.xlu0.b32.end [16/16] (narrow) %v16512_v16, 16  ;;  %v8858_v51 = vadd.f32 %v8857_v2, %v8856_v37  ;;  %v16739_v37 = vpop.xlane.xlu1 %5540 }
 0x46f   : > { %7066 = vxpose.xlu1.b32.cont [13/16] (narrow) %v18302_v6, 16  ;;  %10325 = vrcp.f32 %v16739_v37 }
 0x470   : > { %v16729_v11 = vmul.f32 %v10302_v40, %v8858_v51  ;;  %v18305_v51 = vld [vmem:[#allocation76_spill] sm:$0xff] }
 0x471   : > { %v8779_v47 = vpop.f32.mrb[244].mxu0 }
 0x472   : > { %7086 = vxpose.xlu0.b32.start [1/16] (narrow) %v16515_v41, 16  ;;  %v8780_v16 = vpop.f32.mrb[245].mxu0  ;;  %v6974_v40 = vpop.trf.xlu0 }
 0x473   : > { %7067 = vxpose.xlu1.b32.cont [14/16] (narrow) %v18303_v15, 16  ;;  %v8781_v21 = vadd.f32 %v8780_v16, %v8779_v47  ;;  %v10308_v47 = vpop.eup %10307  ;;  %7214 = vst [vmem:[%s16746_s12] sm:$0xff] %v6974_v40  ;;  %v18306_v15 = vld [vmem:[#allocation22_spill] sm:$0xff] }
 0x475   : > { %v16735_v58 = vmul.f32 %v10304_v13, %v8781_v21  ;;  %v8859_v53 = vpop.f32.mrb[244].mxu1 }
 0x476   : > { %7087 = vxpose.xlu0.b32.cont [2/16] (narrow) %v16528_v54, 16  ;;  %v8860_v41 = vpop.f32.mrb[245].mxu1 }
 0x477   : > { %7068 = vxpose.xlu1.b32.cont [15/16] (narrow) %v18304_v31, 16  ;;  %v8861_v59 = vadd.f32 %v8860_v41, %v8859_v53  ;;  %v6975_v53 = vpop.trf.xlu0  ;;  %v10310_v41 = vpop.eup %10309 }
 0x478   : > { %7215 = vst [vmem:[%s16746_s12 + $0x8] sm:$0xff] %v6975_v53 }
 0x479   : > { %v16741_v2 = vmul.f32 %v10306_v45, %v8861_v59  ;;  %v8782_v6 = vpop.f32.mrb[246].mxu0  ;;  %v18307_v45 = vld [vmem:[#allocation16_spill] sm:$0xff] }
 0x47a   : > { %7088 = vxpose.xlu0.b32.cont [3/16] (narrow) %v16531_v22, 16  ;;  %v8783_v54 = vpop.f32.mrb[247].mxu0 }
 0x47b   : > { %7069 = vxpose.xlu1.b32.end [16/16] (narrow) %v18305_v51, 16  ;;  %v8784_v25 = vadd.f32 %v8783_v54, %v8782_v6  ;;  %v10312_v54 = vpop.eup %10311 }
 0x47d   : > { %v16749_v22 = vmul.f32 %v10308_v47, %v8784_v25  ;;  %v8862_v16 = vpop.f32.mrb[246].mxu1  ;;  %v18308_v25 = vld [vmem:[#allocation18_spill] sm:$0xff] }
 0x47e   : > { %7089 = vxpose.xlu0.b32.cont [4/16] (narrow) %v16545_v61, 16  ;;  %v8863_v56 = vpop.f32.mrb[247].mxu1 }
 0x47f   : > { %7118 = vxpose.xlu1.b32.start [1/16] (narrow) %v18306_v15, 16  ;;  %v7006_v21 = vpop.trf.xlu1  ;;  %v8864_v13 = vadd.f32 %v8863_v56, %v8862_v16  ;;  %v10314_v16 = vpop.eup %10313 }
 0x480   : > { %7216 = vst [vmem:[%s16746_s12 + $0x10] sm:$0xff] %v7006_v21  ;;  %v10316_v21 = vpop.eup %10315 }
 0x481   : > { %v16755_v61 = vmul.f32 %v10310_v41, %v8864_v13  ;;  %v18309_v41 = vld [vmem:[#allocation21_spill] sm:$0xff] }
 0x482   : > { %7090 = vxpose.xlu0.b32.cont [5/16] (narrow) %v16548_v30, 16  ;;  %v8785_v31 = vpop.f32.mrb[248].mxu0 }
 0x483   : > { %v8786_v59 = vpop.f32.mrb[249].mxu0  ;;  %7119 = vxpose.xlu1.b32.cont [2/16] (narrow) %v18307_v45, 16  ;;  %v7007_v50 = vpop.trf.xlu1 }
 0x484   : > { %v8787_v6 = vadd.f32 %v8786_v59, %v8785_v31  ;;  %7217 = vst [vmem:[%s16746_s12 + $0x18] sm:$0xff] %v7007_v50  ;;  %v10318_v31 = vpop.eup %10317 }
 0x485   : > { %v10320_v45 = vpop.eup %10319 }
 0x486   : > { %7091 = vxpose.xlu0.b32.cont [6/16] (narrow) %v16563_v34, 16  ;;  %v16761_v51 = vmul.f32 %v10312_v54, %v8787_v6  ;;  %v8865_v40 = vpop.f32.mrb[248].mxu1  ;;  %v10322_v54 = vpop.eup %10321 }
 0x487   : > { %v8866_v30 = vpop.f32.mrb[249].mxu1  ;;  %7120 = vxpose.xlu1.b32.cont [3/16] (narrow) %v18308_v25, 16 }
 0x488   : > { %v8867_v47 = vadd.f32 %v8866_v30, %v8865_v40 }
 0x48a   : > { %7092 = vxpose.xlu0.b32.cont [7/16] (narrow) %v16566_v55, 16  ;;  %v16766_v1 = vmul.f32 %v10314_v16, %v8867_v47  ;;  %v8788_v56 = vpop.f32.mrb[250].mxu0 }
 0x48b   : > { %v8789_v15 = vpop.f32.mrb[251].mxu0  ;;  %7121 = vxpose.xlu1.b32.cont [4/16] (narrow) %v16554_v27, 16 }
 0x48c   : > { %v8790_v34 = vadd.f32 %v8789_v15, %v8788_v56 }
 0x48e   : > { %7093 = vxpose.xlu0.b32.cont [8/16] (narrow) %v16580_v57, 16  ;;  %v16771_v29 = vmul.f32 %v10316_v21, %v8790_v34  ;;  %v8868_v13 = vpop.f32.mrb[250].mxu1 }
 0x48f   : > { %v8869_v53 = vpop.f32.mrb[251].mxu1  ;;  %7122 = vxpose.xlu1.b32.cont [5/16] (narrow) %v18309_v41, 16 }
 0x490   : > { %v8870_v55 = vadd.f32 %v8869_v53, %v8868_v13 }
 0x492   : > { %7094 = vxpose.xlu0.b32.cont [9/16] (narrow) %v16583_v46, 16  ;;  %v16775_v59 = vmul.f32 %v10318_v31, %v8870_v55 }
 0x493   : > { %v8791_v20 = vpop.f32.mrb[252].mxu0  ;;  %7123 = vxpose.xlu1.b32.cont [6/16] (narrow) %v16572_v14, 16 }
 0x494   : > { %v8792_v27 = vpop.f32.mrb[253].mxu0 }
 0x495   : > { %v8793_v57 = vadd.f32 %v8792_v27, %v8791_v20 }
 0x496   : > { %7095 = vxpose.xlu0.b32.cont [10/16] (narrow) %v16596_v17, 16  ;;  %v10324_v17 = vpop.eup %10323 }
 0x497   : > { %v16780_v9 = vmul.f32 %v10320_v45, %v8793_v57  ;;  %v8871_v50 = vpop.f32.mrb[252].mxu1  ;;  %7124 = vxpose.xlu1.b32.cont [7/16] (narrow) %v16575_v4, 16  ;;  %v10326_v16 = vpop.eup %10325 }
 0x498   : > { %v8872_v6 = vpop.f32.mrb[253].mxu1 }
 0x499   : > { %v8873_v46 = vadd.f32 %v8872_v6, %v8871_v50 }
 0x49a   : > { %7096 = vxpose.xlu0.b32.cont [11/16] (narrow) %v16599_v60, 16  ;;  %v8794_v40 = vpop.f32.mrb[254].mxu0 }
 0x49b   : > { %v16785_v43 = vmul.f32 %v10322_v54, %v8873_v46  ;;  %v8795_v14 = vpop.f32.mrb[255].mxu0  ;;  %7125 = vxpose.xlu1.b32.cont [8/16] (narrow) %v16588_v42, 16 }
 0x49c   : > { %v8796_v30 = vadd.f32 %v8795_v14, %v8794_v40 }
 0x49e   : > { %7097 = vxpose.xlu0.b32.cont [12/16] (narrow) %v16612_v35, 16  ;;  %v6941_v25 = vmul.f32 %v10324_v17, %v8796_v30  ;;  %v8874_v47 = vpop.f32.mrb[254].mxu1 }
 0x49f   : > { %v8875_v37 = vpop.f32.mrb[255].mxu1  ;;  %7126 = vxpose.xlu1.b32.cont [9/16] (narrow) %v16591_v33, 16 }
 0x4a0   : > { %v8876_v4 = vadd.f32 %v8875_v37, %v8874_v47 }
 0x4a2   : > { %7098 = vxpose.xlu0.b32.cont [13/16] (narrow) %v16614_v5, 16  ;;  %v6957_v60 = vmul.f32 %v10326_v16, %v8876_v4  ;;  %v18312_v5 = vld [vmem:[#allocation124_spill] sm:$0xff] }
 0x4a3   : > { %7127 = vxpose.xlu1.b32.cont [10/16] (narrow) %v16604_v62, 16  ;;  %v18310_v62 = vld [vmem:[#allocation19_spill] sm:$0xff] }
 0x4a6   : > { %7099 = vxpose.xlu0.b32.cont [14/16] (narrow) %v16625_v8, 16  ;;  %v18314_v8 = vld [vmem:[#allocation179_spill] sm:$0xff] }
 0x4a7   : > { %7128 = vxpose.xlu1.b32.cont [11/16] (narrow) %v16607_v23, 16  ;;  %v18311_v23 = vld [vmem:[#allocation81_spill] sm:$0xff] }
 0x4aa   : > { %7100 = vxpose.xlu0.b32.cont [15/16] (narrow) %v16627_v63, 16  ;;  %v18315_v63 = vld [vmem:[#allocation178_spill] sm:$0xff] }
 0x4ab   : > { %7129 = vxpose.xlu1.b32.cont [12/16] (narrow) %v16619_v32, 16  ;;  %v18313_v32 = vld [vmem:[#allocation190_spill] sm:$0xff] }
 0x4ae   : > { %7101 = vxpose.xlu0.b32.end [16/16] (narrow) %v16636_v12, 16 }
 0x4af   : > { %7130 = vxpose.xlu1.b32.cont [13/16] (narrow) %v16621_v24, 16 }
 0x4b2   : > { %7150 = vxpose.xlu0.b32.start [1/16] (narrow) %v16639_v28, 16  ;;  %v7038_v42 = vpop.trf.xlu0 }
 0x4b3   : > { %7218 = vst [vmem:[%s16746_s12 + $0x20] sm:$0xff] %v7038_v42  ;;  %7131 = vxpose.xlu1.b32.cont [14/16] (narrow) %v16631_v19, 16  ;;  %v18316_v19 = vld [vmem:[#allocation23_spill] sm:$0xff] }
 0x4b6   : > { %7151 = vxpose.xlu0.b32.cont [2/16] (narrow) %v16648_v44, 16  ;;  %v7039_v33 = vpop.trf.xlu0 }
 0x4b7   : > { %7219 = vst [vmem:[%s16746_s12 + $0x28] sm:$0xff] %v7039_v33  ;;  %7132 = vxpose.xlu1.b32.cont [15/16] (narrow) %v18310_v62, 16 }
 0x4ba   : > { %7152 = vxpose.xlu0.b32.cont [3/16] (narrow) %v16658_v48, 16 }
 0x4bb   : > { %7133 = vxpose.xlu1.b32.end [16/16] (narrow) %v16642_v26, 16 }
 0x4be   : > { %7153 = vxpose.xlu0.b32.cont [4/16] (narrow) %v16666_v10, 16 }
 0x4bf   : > { %7182 = vxpose.xlu1.b32.start [1/16] (narrow) %v18311_v23, 16  ;;  %v7070_v35 = vpop.trf.xlu1 }
 0x4c0   : > { %7220 = vst [vmem:[%s16746_s12 + $0x30] sm:$0xff] %v7070_v35 }
 0x4c2   : > { %7154 = vxpose.xlu0.b32.cont [5/16] (narrow) %v18312_v5, 16 }
 0x4c3   : > { %7183 = vxpose.xlu1.b32.cont [2/16] (narrow) %v18313_v32, 16  ;;  %v7071_v24 = vpop.trf.xlu1 }
 0x4c4   : > { %7221 = vst [vmem:[%s16746_s12 + $0x38] sm:$0xff] %v7071_v24 }
 0x4c6   : > { %7155 = vxpose.xlu0.b32.cont [6/16] (narrow) %v16685_v18, 16 }
 0x4c7   : > { %7184 = vxpose.xlu1.b32.cont [3/16] (narrow) %v18314_v8, 16 }
 0x4ca   : > { %7156 = vxpose.xlu0.b32.cont [7/16] (narrow) %v16694_v0, 16 }
 0x4cb   : > { %7185 = vxpose.xlu1.b32.cont [4/16] (narrow) %v18315_v63, 16 }
 0x4ce   : > { %7157 = vxpose.xlu0.b32.cont [8/16] (narrow) %v16702_v7, 16 }
 0x4cf   : > { %7186 = vxpose.xlu1.b32.cont [5/16] (narrow) %v18316_v19, 16 }
 0x4d2   : > { %7158 = vxpose.xlu0.b32.cont [9/16] (narrow) %v16711_v38, 16 }
 0x4d3   : > { %7187 = vxpose.xlu1.b32.cont [6/16] (narrow) %v16689_v39, 16 }
 0x4d6   : > { %7159 = vxpose.xlu0.b32.cont [10/16] (narrow) %v16723_v3, 16 }
 0x4d7   : > { %7188 = vxpose.xlu1.b32.cont [7/16] (narrow) %v16698_v49, 16 }
 0x4da   : > { %7160 = vxpose.xlu0.b32.cont [11/16] (narrow) %v16735_v58, 16 }
 0x4db   : > { %7189 = vxpose.xlu1.b32.cont [8/16] (narrow) %v16706_v52, 16 }
 0x4de   : > { %7161 = vxpose.xlu0.b32.cont [12/16] (narrow) %v16749_v22, 16 }
 0x4df   : > { %7190 = vxpose.xlu1.b32.cont [9/16] (narrow) %v16717_v36, 16 }
 0x4e2   : > { %7162 = vxpose.xlu0.b32.cont [13/16] (narrow) %v16761_v51, 16 }
 0x4e3   : > { %7191 = vxpose.xlu1.b32.cont [10/16] (narrow) %v16729_v11, 16 }
 0x4e6   : > { %7163 = vxpose.xlu0.b32.cont [14/16] (narrow) %v16771_v29, 16 }
 0x4e7   : > { %7192 = vxpose.xlu1.b32.cont [11/16] (narrow) %v16741_v2, 16 }
 0x4ea   : > { %7164 = vxpose.xlu0.b32.cont [15/16] (narrow) %v16780_v9, 16 }
 0x4eb   : > { %7193 = vxpose.xlu1.b32.cont [12/16] (narrow) %v16755_v61, 16 }
 0x4ee   : > { %7165 = vxpose.xlu0.b32.end [16/16] (narrow) %v6941_v25, 16 }
 0x4ef   : > { %7194 = vxpose.xlu1.b32.cont [13/16] (narrow) %v16766_v1, 16 }
 0x4f2   : > { %v7102_v44 = vpop.trf.xlu0 }
 0x4f3   : > { %7222 = vst [vmem:[%s16746_s12 + $0x40] sm:$0xff] %v7102_v44  ;;  %7195 = vxpose.xlu1.b32.cont [14/16] (narrow) %v16775_v59, 16 }
 0x4f6   : > { %v7103_v12 = vpop.trf.xlu0 }
 0x4f7   : > { %7223 = vst [vmem:[%s16746_s12 + $0x48] sm:$0xff] %v7103_v12  ;;  %7196 = vxpose.xlu1.b32.cont [15/16] (narrow) %v16785_v43, 16 }
 0x4fb   : > { %7197 = vxpose.xlu1.b32.end [16/16] (narrow) %v6957_v60, 16 }
 0x4ff   : > { %v7134_v28 = vpop.trf.xlu1 }
 0x500   : > { %7224 = vst [vmem:[%s16746_s12 + $0x50] sm:$0xff] %v7134_v28 }
 0x503   : > { %v7135_v26 = vpop.trf.xlu1 }
 0x504   : > { %7225 = vst [vmem:[%s16746_s12 + $0x58] sm:$0xff] %v7135_v26 }
 0x532   : > { %v7166_v39 = vpop.trf.xlu0 }
 0x533   : > { %7226 = vst [vmem:[%s16746_s12 + $0x60] sm:$0xff] %v7166_v39 }
 0x536   : > { %v7167_v10 = vpop.trf.xlu0 }
 0x537   : > { %7227 = vst [vmem:[%s16746_s12 + $0x68] sm:$0xff] %v7167_v10 }
 0x53f   : > { %v7198_v48 = vpop.trf.xlu1 }
 0x540   : > { %7228 = vst [vmem:[%s16746_s12 + $0x70] sm:$0xff] %v7198_v48 }
 0x543   : > { %v7199_v18 = vpop.trf.xlu1 }
 0x544   : > { %7229 = vst [vmem:[%s16746_s12 + $0x78] sm:$0xff] %v7199_v18 }
 0x545   : > { %10404 = shalt.err (!%p10401_p7)
}
 0x546   : > { %s10405_s6 = scalar_lea.hbm %s16847_s5, 2048  ;;  %s10409_s8 = scalar_lea.hbm %s16898_s4, 4096 }
 0x547   : > { %p10406_p10 = scmp.ne.s32.totalorder %s16847_s5, %s10405_s6  ;;  %p10410_p13 = scmp.lt.u32.totalorder %s16847_s5, %s16898_s4 }
 0x548   : > { %p10411_p0 = scmp.lt.u32.totalorder %s10409_s8, %s10405_s6  ;;  %p10413_p2 = scmp.lt.u32.totalorder %s10405_s6, %s16847_s5 }
 0x549   : > { %p10407_p11 = pnand %p10406_p10, %p10523_p6 }
 0x54a   : > { %p10412_p1 = por %p10411_p0, %p10410_p13 }
 0x54b   : > { %p10408_p12 = pneg %p10407_p11 }
 0x54c   : > { %p10414_p3 = por %p10413_p2, %p10412_p1 }
 0x54e   : > { %p10415_p4 = pnand %p10414_p3, %p10408_p12 }
 0x550   : > { %10418 = shalt.err (!%p10415_p4)
}
 0x551   : > { %s10456_s12 = smov 128   ;;  %s10457_s13 = smov 256  }
 0x552   : > { %s10458_s22 = smov 8  }
 0x553   : > { %9517 = dma.vmem_to_hbm [thread:$0]  (%p10523_p6), %s16849_s20, 2048, %s16847_s5, %s7231_s27, %s10456_s12, %s10457_s13, %s10458_s22  }
 0x554 PF: > { %s7258_s23 = sand.u32 1, %s10441_s15   ;;  %p9520_p5 = pnand %p7325_p9, %p10527_p8 }
 0x555   : > { %s7259_s28 = scalar_lea.sflag [#allocation4], %s7258_s23 }
 0x556   : > { %10436 = dma.done.wait (!%p9520_p5), %s7259_s28, 2048  }
 0x557   : > { %10438 = vsyncadd (!%p9520_p5), %s7259_s28, 4294965248  ;;  %p14_p7 = scmp.ge.s32.totalorder %s10509_s21, 4   ;;  %s18317_s15 = smov %s10445_s16 }
 0x558   : > { %s18318_s16 = smov %s10449_s17  ;;  %s18319_s17 = smov %s10521_s24 }
 0x559   : > { %s18320_s18 = smov %s10509_s21  ;;  %16 = sbr.rel (!%p14_p7) target bundleno = 3 (0x3), region = 117 }
 0x560   :  { %7264 = vsyncpa [#allocation4], 1 }
 0x561   :  { %7266 = vsyncpa [#allocation4 + $0x1], 1 }

</bundles_post_ra>
